<compile_context>
chip_gen: v7x
topology: tpu7x:2x2x1
jax: 0.10.0
libtpu: 0.0.40
codegen_flags: <defaults>
</compile_context>

<pallas_src>
import jax
import jax.numpy as jnp
import numpy as np
from jax.experimental import pallas as pl
from jax.experimental.pallas import tpu as pltpu

# ----------------------------- configuration -------------------------------
B = 2            # batch
N = 256          # points per batch
Z_DIM = 32       # latent dim K
HIDDEN = 32      # siren hidden width
N_LAYERS = 3     # number of FiLM SIREN layers
MAP_HIDDEN = 64  # mapping-network hidden width
OUT_DIM = 4      # 3 displacement dims + 1 density correction

_LH = N_LAYERS * HIDDEN

# Single-TC chips (v5e/v6e): fold batch into lanes, single grid step.
# Megacore chips (v7x): keep grid=(B,) "parallel" so batches shard across TCs.
try:
    _KIND = jax.devices()[0].device_kind.lower()
except Exception:  # pragma: no cover
    _KIND = ""
FOLD_BATCH = "v7" not in _KIND

NB = B if FOLD_BATCH else 1       # batch elements handled per grid step
LANES = NB * N                    # lane width of activations inside the kernel
GRID_B = B // NB                  # grid size


def _lrelu(h):
    return jnp.where(h > 0, h, 0.2 * h)


# ----------------------------- fused kernel --------------------------------
def fused_kernel(z_ref, x_ref, mapw_ref, mapw4_ref, mapb_ref,
                 sw_ref, sb_ref, wout_ref, bout_ref, out_ref):
    """Mapping network + FiLM-SIREN for NB batch elements, all lane-dense.

    z_ref    : (1, MAP_HIDDEN, NB)  zero-padded latent columns
    x_ref    : (1, 3, LANES)        points, batch-major on lanes
    mapw_ref : (3, MAP_HIDDEN, MAP_HIDDEN)   [w1 (cols>=Z_DIM zero), w2, w3]
    mapw4_ref: (2*_LH, MAP_HIDDEN)
    mapb_ref : (3*MAP_HIDDEN + 2*_LH, 1)     [b1 | b2 | b3 | b4]
    sw_ref   : (N_LAYERS, HIDDEN, HIDDEN)    [w0 (cols>=3 zero), wh1, wh2]
    sb_ref   : (N_LAYERS, HIDDEN, 1)
    wout_ref : (OUT_DIM, HIDDEN)   bout_ref : (OUT_DIM, 1)
    out_ref  : (1, OUT_DIM, LANES)
    """
    f32 = jnp.float32
    MH = MAP_HIDDEN

    # ---- mapping network, batched over NB lane columns ----
    h = z_ref[0]                                                     # (MH, NB)
    h = _lrelu(jnp.dot(mapw_ref[0], h, preferred_element_type=f32)
               + mapb_ref[0:MH])
    h = _lrelu(jnp.dot(mapw_ref[1], h, preferred_element_type=f32)
               + mapb_ref[MH:2 * MH])
    h = _lrelu(jnp.dot(mapw_ref[2], h, preferred_element_type=f32)
               + mapb_ref[2 * MH:3 * MH])
    fp = (jnp.dot(mapw4_ref[...], h, preferred_element_type=f32)
          + mapb_ref[3 * MH:3 * MH + 2 * _LH])                      # (2*_LH, NB)
    freqs = fp[:_LH] * 15.0 + 30.0                                  # pi-GAN scaling
    phases = fp[_LH:]

    # lane -> batch-column selector (batch-major lanes), only needed if NB > 1
    if NB > 1:
        lane_b = jax.lax.broadcasted_iota(jnp.int32, (HIDDEN, LANES), 1)

    def expand(col):
        """(HIDDEN, NB) column(s) -> broadcastable over (HIDDEN, LANES)."""
        if NB == 1:
            return col
        tile = jnp.broadcast_to(col[:, 0:1], (HIDDEN, LANES))
        for j in range(1, NB):
            tile = jnp.where(lane_b >= j * N, col[:, j:j + 1], tile)
        return tile

    # ---- SIREN body, lane-dense activations (HIDDEN, LANES) ----
    x = x_ref[0]                                                    # (3, LANES)
    w0 = sw_ref[0]                                                  # cols 0:3 valid

    # layer 0 (K=3): exact-f32 VPU broadcast-FMAs, no MXU
    pre = (w0[:, 0:1] * x[0:1, :]
           + w0[:, 1:2] * x[1:2, :]
           + w0[:, 2:3] * x[2:3, :])                                # (HIDDEN, LANES)
    f0 = freqs[0:HIDDEN]
    c0 = f0 * sb_ref[0] + phases[0:HIDDEN]       # FiLM bias+phase folded to one column
    hh = jnp.sin(expand(f0) * pre + expand(c0))

    # hidden FiLM layers: (H,H) @ (H,LANES) on MXU; bias folded into c_l
    for l in range(1, N_LAYERS):
        pre = jnp.dot(sw_ref[l], hh, preferred_element_type=f32)
        fl = freqs[l * HIDDEN:(l + 1) * HIDDEN]
        cl = fl * sb_ref[l] + phases[l * HIDDEN:(l + 1) * HIDDEN]
        hh = jnp.sin(expand(fl) * pre + expand(cl))

    # final linear -> lane-dense (OUT_DIM, LANES) store
    out_ref[0] = (jnp.dot(wout_ref[...], hh, preferred_element_type=f32)
                  + bout_ref[...])


# ------------------------------ wrapper ------------------------------------
@jax.jit
def implicit_deformation_forward(x, z, pp):
    """Equivalent of ImplicitDeformation3D.forward: x (B,N,3), z (B,K) ->
    dx (B,N,3), dsigma (B,N,1). Mapping network + SIREN in one pallas_call."""
    if FOLD_BATCH:
        # (3, B, N) -> (1, 3, B*N): batch-major lanes
        x_in = jnp.transpose(x, (2, 0, 1)).reshape(GRID_B, 3, LANES)
        z_in = (jnp.zeros((GRID_B, MAP_HIDDEN, NB), jnp.float32)
                .at[0, :Z_DIM, :].set(z.T))
    else:
        x_in = jnp.transpose(x, (0, 2, 1))                          # (B, 3, N)
        z_in = (jnp.zeros((GRID_B, MAP_HIDDEN, NB), jnp.float32)
                .at[:, :Z_DIM, 0].set(z))

    out_t = pl.pallas_call(
        fused_kernel,
        out_shape=jax.ShapeDtypeStruct((GRID_B, OUT_DIM, LANES), jnp.float32),
        grid=(GRID_B,),
        in_specs=[
            pl.BlockSpec((1, MAP_HIDDEN, NB), lambda b: (b, 0, 0)),
            pl.BlockSpec((1, 3, LANES), lambda b: (b, 0, 0)),
            pl.BlockSpec((3, MAP_HIDDEN, MAP_HIDDEN), lambda b: (0, 0, 0)),
            pl.BlockSpec((2 * _LH, MAP_HIDDEN), lambda b: (0, 0)),
            pl.BlockSpec((3 * MAP_HIDDEN + 2 * _LH, 1), lambda b: (0, 0)),
            pl.BlockSpec((N_LAYERS, HIDDEN, HIDDEN), lambda b: (0, 0, 0)),
            pl.BlockSpec((N_LAYERS, HIDDEN, 1), lambda b: (0, 0, 0)),
            pl.BlockSpec((OUT_DIM, HIDDEN), lambda b: (0, 0)),
            pl.BlockSpec((OUT_DIM, 1), lambda b: (0, 0)),
        ],
        out_specs=pl.BlockSpec((1, OUT_DIM, LANES), lambda b: (b, 0, 0)),
        compiler_params=pltpu.CompilerParams(
            dimension_semantics=("parallel",)),
    )(z_in, x_in, pp["mapw"], pp["mapw4"], pp["mapb"],
      pp["sw"], pp["sb"], pp["wout"], pp["bout"])

    if FOLD_BATCH:
        out = jnp.transpose(out_t.reshape(OUT_DIM, B, N), (1, 2, 0))  # (B, N, 4)
    else:
        out = jnp.transpose(out_t, (0, 2, 1))                         # (B, N, 4)
    dx = out[..., :3]
    dsigma = out[..., 3:]
    return dx, dsigma


# ----------------------------- params --------------------------------------
def init_params(key):
    """Weights stored PyTorch-style (out_features, in_features); biases as
    (out_features, 1) columns."""
    ks = jax.random.split(key, 20)

    def u(k, shape, bound):
        return jax.random.uniform(k, shape, jnp.float32, -bound, bound)

    p = {}
    # mapping network (LeakyReLU MLP)
    p["m_w1"] = u(ks[0], (MAP_HIDDEN, Z_DIM), (1.0 / Z_DIM) ** 0.5)
    p["m_b1"] = u(ks[1], (MAP_HIDDEN, 1), (1.0 / Z_DIM) ** 0.5)
    p["m_w2"] = u(ks[2], (MAP_HIDDEN, MAP_HIDDEN), (1.0 / MAP_HIDDEN) ** 0.5)
    p["m_b2"] = u(ks[3], (MAP_HIDDEN, 1), (1.0 / MAP_HIDDEN) ** 0.5)
    p["m_w3"] = u(ks[4], (MAP_HIDDEN, MAP_HIDDEN), (1.0 / MAP_HIDDEN) ** 0.5)
    p["m_b3"] = u(ks[5], (MAP_HIDDEN, 1), (1.0 / MAP_HIDDEN) ** 0.5)
    p["m_w4"] = u(ks[6], (2 * _LH, MAP_HIDDEN), (1.0 / MAP_HIDDEN) ** 0.5)
    p["m_b4"] = u(ks[7], (2 * _LH, 1), (1.0 / MAP_HIDDEN) ** 0.5)

    # SIREN body (pi-GAN style init)
    siren_bound = (6.0 / HIDDEN) ** 0.5 / 25.0
    p["w0"] = u(ks[8], (HIDDEN, 3), 1.0 / 3.0)
    p["b0"] = u(ks[9], (HIDDEN, 1), 1.0 / 3.0)
    p["wh"] = u(ks[10], (N_LAYERS - 1, HIDDEN, HIDDEN), siren_bound)
    p["bh"] = u(ks[11], (N_LAYERS - 1, HIDDEN, 1), siren_bound)
    p["wout"] = u(ks[12], (OUT_DIM, HIDDEN), siren_bound)
    p["bout"] = u(ks[13], (OUT_DIM, 1), siren_bound)
    return p


def pack_params(p):
    """Concatenate operands to cut DMA/descriptor count (16 -> 9 inputs).
    Zero-padded columns contribute exactly 0 to the matmuls."""
    mw1_pad = (jnp.zeros((MAP_HIDDEN, MAP_HIDDEN), jnp.float32)
               .at[:, :Z_DIM].set(p["m_w1"]))
    mapw = jnp.stack([mw1_pad, p["m_w2"], p["m_w3"]], axis=0)        # (3, 64, 64)
    mapb = jnp.concatenate([p["m_b1"], p["m_b2"], p["m_b3"], p["m_b4"]],
                           axis=0)                                   # (384, 1)
    w0_pad = (jnp.zeros((HIDDEN, HIDDEN), jnp.float32)
              .at[:, :3].set(p["w0"]))
    sw = jnp.concatenate([w0_pad[None], p["wh"]], axis=0)            # (3, 32, 32)
    sb = jnp.concatenate([p["b0"][None], p["bh"]], axis=0)           # (3, 32, 1)
    return {"mapw": mapw, "mapw4": p["m_w4"], "mapb": mapb,
            "sw": sw, "sb": sb, "wout": p["wout"], "bout": p["bout"]}


# ----------------------------- pure-JAX reference --------------------------
def reference_forward(x, z, p):
    """Row-form reference with default matmul precision (matches kernel)."""
    h = z
    h = _lrelu(jnp.dot(h, p["m_w1"].T) + p["m_b1"][:, 0])
    h = _lrelu(jnp.dot(h, p["m_w2"].T) + p["m_b2"][:, 0])
    h = _lrelu(jnp.dot(h, p["m_w3"].T) + p["m_b3"][:, 0])
    fp = jnp.dot(h, p["m_w4"].T) + p["m_b4"][:, 0]                   # (B, 2*_LH)
    freqs = fp[:, :_LH].reshape(B, N_LAYERS, HIDDEN) * 15.0 + 30.0
    phases = fp[:, _LH:].reshape(B, N_LAYERS, HIDDEN)

    # layer 0 as exact-f32 broadcast FMAs (mirrors the kernel's VPU path)
    w0 = p["w0"]                                                     # (H, 3)
    pre = (x[..., 0:1] * w0[:, 0][None, None, :]
           + x[..., 1:2] * w0[:, 1][None, None, :]
           + x[..., 2:3] * w0[:, 2][None, None, :]
           + p["b0"][:, 0][None, None, :])
    hh = jnp.sin(freqs[:, 0][:, None, :] * pre + phases[:, 0][:, None, :])
    for l in range(1, N_LAYERS):
        pre = (jnp.einsum("bnh,kh->bnk", hh, p["wh"][l - 1])
               + p["bh"][l - 1][:, 0][None, None, :])
        hh = jnp.sin(freqs[:, l][:, None, :] * pre + phases[:, l][:, None, :])
    out = (jnp.einsum("bnh,oh->bno", hh, p["wout"])
           + p["bout"][:, 0][None, None, :])
    return out[..., :3], out[..., 3:]


# --------------------------------- main -------------------------------------
if __name__ == "__main__":
    key = jax.random.PRNGKey(0)
    k_x, k_z, k_p = jax.random.split(key, 3)

    x = jax.random.uniform(k_x, (B, N, 3), jnp.float32, -1.0, 1.0)   # 3D points
    z = jax.random.normal(k_z, (B, Z_DIM), jnp.float32)              # latent codes
    params = init_params(k_p)
    packed = pack_params(params)

    dx, dsigma = implicit_deformation_forward(x, z, packed)
    dx = jax.block_until_ready(dx)
    dsigma = jax.block_until_ready(dsigma)

    assert dx.shape == (B, N, 3) and dsigma.shape == (B, N, 1)

    dx_ref, ds_ref = reference_forward(x, z, params)
    np.testing.assert_allclose(np.asarray(dx), np.asarray(dx_ref),
                               rtol=5e-3, atol=5e-3)
    np.testing.assert_allclose(np.asarray(dsigma), np.asarray(ds_ref),
                               rtol=5e-3, atol=5e-3)

    print("KERNEL_OK")
</pallas_src>

<mosaic_0001>
module attributes {stable_mosaic.version = 11 : i64} {
  func.func @fused_kernel(%arg0: i32, %arg1: memref<1x64x2xf32, #tpu.memory_space<vmem>>, %arg2: memref<1x3x512xf32, #tpu.memory_space<vmem>>, %arg3: memref<3x64x64xf32, #tpu.memory_space<vmem>>, %arg4: memref<192x64xf32, #tpu.memory_space<vmem>>, %arg5: memref<384x1xf32, #tpu.memory_space<vmem>>, %arg6: memref<3x32x32xf32, #tpu.memory_space<vmem>>, %arg7: memref<3x32x1xf32, #tpu.memory_space<vmem>>, %arg8: memref<4x32xf32, #tpu.memory_space<vmem>>, %arg9: memref<4x1xf32, #tpu.memory_space<vmem>>, %arg10: memref<1x4x512xf32, #tpu.memory_space<vmem>>) attributes {dimension_semantics = [#tpu.dimension_semantics<parallel>], iteration_bounds = array<i64: 1>, scalar_prefetch = 0 : i64, scratch_operands = 0 : i64, tpu.core_type = #tpu.core_type<tc>, window_params = [{transform_indices = @transform_0, window_bounds = array<i64: 1, 64, 2>}, {transform_indices = @transform_1, window_bounds = array<i64: 1, 3, 512>}, {pipeline_mode = #tpu.pipeline_mode<synchronous>, transform_indices = @transform_2, window_bounds = array<i64: 3, 64, 64>}, {pipeline_mode = #tpu.pipeline_mode<synchronous>, transform_indices = @transform_3, window_bounds = array<i64: 192, 64>}, {pipeline_mode = #tpu.pipeline_mode<synchronous>, transform_indices = @transform_4, window_bounds = array<i64: 384, 1>}, {pipeline_mode = #tpu.pipeline_mode<synchronous>, transform_indices = @transform_5, window_bounds = array<i64: 3, 32, 32>}, {pipeline_mode = #tpu.pipeline_mode<synchronous>, transform_indices = @transform_6, window_bounds = array<i64: 3, 32, 1>}, {pipeline_mode = #tpu.pipeline_mode<synchronous>, transform_indices = @transform_7, window_bounds = array<i64: 4, 32>}, {pipeline_mode = #tpu.pipeline_mode<synchronous>, transform_indices = @transform_8, window_bounds = array<i64: 4, 1>}, {transform_indices = @transform_9, window_bounds = array<i64: 1, 4, 512>}]} {
    %c0 = arith.constant 0 : index
    %c0_0 = arith.constant 0 : index
    %c0_1 = arith.constant 0 : index
    %0 = vector.load %arg1[%c0, %c0_0, %c0_1] : memref<1x64x2xf32, #tpu.memory_space<vmem>>, vector<1x64x2xf32>
    %1 = vector.shape_cast %0 : vector<1x64x2xf32> to vector<64x2xf32>
    %c0_2 = arith.constant 0 : index
    %c0_3 = arith.constant 0 : index
    %c0_4 = arith.constant 0 : index
    %2 = vector.load %arg3[%c0_2, %c0_3, %c0_4] : memref<3x64x64xf32, #tpu.memory_space<vmem>>, vector<1x64x64xf32>
    %3 = vector.shape_cast %2 : vector<1x64x64xf32> to vector<64x64xf32>
    %cst = arith.constant dense<0.000000e+00> : vector<64x2xf32>
    %4 = tpu.matmul %3, %1, %cst {dimension_numbers = #tpu.dot_dimension_numbers<[1], [0], [0], [1], [0, 0, 1, 1], [], []>} : vector<64x64xf32>, vector<64x2xf32>, vector<64x2xf32> -> vector<64x2xf32>
    %c0_5 = arith.constant 0 : index
    %c0_6 = arith.constant 0 : index
    %5 = vector.load %arg5[%c0_5, %c0_6] : memref<384x1xf32, #tpu.memory_space<vmem>>, vector<64x1xf32>
    %6 = vector.broadcast %5 : vector<64x1xf32> to vector<64x2xf32>
    %7 = arith.addf %4, %6 : vector<64x2xf32>
    %cst_7 = arith.constant 0.000000e+00 : f32
    %8 = vector.broadcast %cst_7 : f32 to vector<64x2xf32>
    %9 = arith.cmpf ogt, %7, %8 : vector<64x2xf32>
    %cst_8 = arith.constant 2.000000e-01 : f32
    %10 = vector.broadcast %cst_8 : f32 to vector<64x2xf32>
    %11 = arith.mulf %10, %7 : vector<64x2xf32>
    %12 = arith.select %9, %7, %11 : vector<64x2xi1>, vector<64x2xf32>
    %c1 = arith.constant 1 : index
    %c0_9 = arith.constant 0 : index
    %c0_10 = arith.constant 0 : index
    %13 = vector.load %arg3[%c1, %c0_9, %c0_10] : memref<3x64x64xf32, #tpu.memory_space<vmem>>, vector<1x64x64xf32>
    %14 = vector.shape_cast %13 : vector<1x64x64xf32> to vector<64x64xf32>
    %cst_11 = arith.constant dense<0.000000e+00> : vector<64x2xf32>
    %15 = tpu.matmul %14, %12, %cst_11 {dimension_numbers = #tpu.dot_dimension_numbers<[1], [0], [0], [1], [0, 0, 1, 1], [], []>} : vector<64x64xf32>, vector<64x2xf32>, vector<64x2xf32> -> vector<64x2xf32>
    %c64 = arith.constant 64 : index
    %c0_12 = arith.constant 0 : index
    %16 = vector.load %arg5[%c64, %c0_12] : memref<384x1xf32, #tpu.memory_space<vmem>>, vector<64x1xf32>
    %17 = vector.broadcast %16 : vector<64x1xf32> to vector<64x2xf32>
    %18 = arith.addf %15, %17 : vector<64x2xf32>
    %cst_13 = arith.constant 0.000000e+00 : f32
    %19 = vector.broadcast %cst_13 : f32 to vector<64x2xf32>
    %20 = arith.cmpf ogt, %18, %19 : vector<64x2xf32>
    %cst_14 = arith.constant 2.000000e-01 : f32
    %21 = vector.broadcast %cst_14 : f32 to vector<64x2xf32>
    %22 = arith.mulf %21, %18 : vector<64x2xf32>
    %23 = arith.select %20, %18, %22 : vector<64x2xi1>, vector<64x2xf32>
    %c2 = arith.constant 2 : index
    %c0_15 = arith.constant 0 : index
    %c0_16 = arith.constant 0 : index
    %24 = vector.load %arg3[%c2, %c0_15, %c0_16] : memref<3x64x64xf32, #tpu.memory_space<vmem>>, vector<1x64x64xf32>
    %25 = vector.shape_cast %24 : vector<1x64x64xf32> to vector<64x64xf32>
    %cst_17 = arith.constant dense<0.000000e+00> : vector<64x2xf32>
    %26 = tpu.matmul %25, %23, %cst_17 {dimension_numbers = #tpu.dot_dimension_numbers<[1], [0], [0], [1], [0, 0, 1, 1], [], []>} : vector<64x64xf32>, vector<64x2xf32>, vector<64x2xf32> -> vector<64x2xf32>
    %c128 = arith.constant 128 : index
    %c0_18 = arith.constant 0 : index
    %27 = vector.load %arg5[%c128, %c0_18] : memref<384x1xf32, #tpu.memory_space<vmem>>, vector<64x1xf32>
    %28 = vector.broadcast %27 : vector<64x1xf32> to vector<64x2xf32>
    %29 = arith.addf %26, %28 : vector<64x2xf32>
    %cst_19 = arith.constant 0.000000e+00 : f32
    %30 = vector.broadcast %cst_19 : f32 to vector<64x2xf32>
    %31 = arith.cmpf ogt, %29, %30 : vector<64x2xf32>
    %cst_20 = arith.constant 2.000000e-01 : f32
    %32 = vector.broadcast %cst_20 : f32 to vector<64x2xf32>
    %33 = arith.mulf %32, %29 : vector<64x2xf32>
    %34 = arith.select %31, %29, %33 : vector<64x2xi1>, vector<64x2xf32>
    %c0_21 = arith.constant 0 : index
    %c0_22 = arith.constant 0 : index
    %35 = vector.load %arg4[%c0_21, %c0_22] : memref<192x64xf32, #tpu.memory_space<vmem>>, vector<192x64xf32>
    %cst_23 = arith.constant dense<0.000000e+00> : vector<192x2xf32>
    %36 = tpu.matmul %35, %34, %cst_23 {dimension_numbers = #tpu.dot_dimension_numbers<[1], [0], [0], [1], [0, 0, 1, 1], [], []>} : vector<192x64xf32>, vector<64x2xf32>, vector<192x2xf32> -> vector<192x2xf32>
    %c192 = arith.constant 192 : index
    %c0_24 = arith.constant 0 : index
    %37 = vector.load %arg5[%c192, %c0_24] : memref<384x1xf32, #tpu.memory_space<vmem>>, vector<192x1xf32>
    %38 = vector.broadcast %37 : vector<192x1xf32> to vector<192x2xf32>
    %39 = arith.addf %36, %38 : vector<192x2xf32>
    %40 = vector.extract_strided_slice %39 {offsets = [0, 0], sizes = [96, 2], strides = [1, 1]} : vector<192x2xf32> to vector<96x2xf32>
    %cst_25 = arith.constant 1.500000e+01 : f32
    %41 = vector.broadcast %cst_25 : f32 to vector<96x2xf32>
    %42 = arith.mulf %40, %41 : vector<96x2xf32>
    %cst_26 = arith.constant 3.000000e+01 : f32
    %43 = vector.broadcast %cst_26 : f32 to vector<96x2xf32>
    %44 = arith.addf %42, %43 : vector<96x2xf32>
    %45 = vector.extract_strided_slice %39 {offsets = [96, 0], sizes = [96, 2], strides = [1, 1]} : vector<192x2xf32> to vector<96x2xf32>
    %46 = tpu.iota {dimensions = array<i32: 1>} : vector<32x512xi32>
    %c0_27 = arith.constant 0 : index
    %c0_28 = arith.constant 0 : index
    %c0_29 = arith.constant 0 : index
    %47 = vector.load %arg2[%c0_27, %c0_28, %c0_29] : memref<1x3x512xf32, #tpu.memory_space<vmem>>, vector<1x3x512xf32>
    %48 = vector.shape_cast %47 : vector<1x3x512xf32> to vector<3x512xf32>
    %c0_30 = arith.constant 0 : index
    %c0_31 = arith.constant 0 : index
    %c0_32 = arith.constant 0 : index
    %49 = vector.load %arg6[%c0_30, %c0_31, %c0_32] : memref<3x32x32xf32, #tpu.memory_space<vmem>>, vector<1x32x32xf32>
    %50 = vector.shape_cast %49 : vector<1x32x32xf32> to vector<32x32xf32>
    %51 = vector.extract_strided_slice %50 {offsets = [0, 0], sizes = [32, 1], strides = [1, 1]} : vector<32x32xf32> to vector<32x1xf32>
    %52 = vector.extract_strided_slice %48 {offsets = [0, 0], sizes = [1, 512], strides = [1, 1]} : vector<3x512xf32> to vector<1x512xf32>
    %53 = vector.broadcast %51 : vector<32x1xf32> to vector<32x512xf32>
    %54 = vector.broadcast %52 : vector<1x512xf32> to vector<32x512xf32>
    %55 = arith.mulf %53, %54 : vector<32x512xf32>
    %56 = vector.extract_strided_slice %50 {offsets = [0, 1], sizes = [32, 1], strides = [1, 1]} : vector<32x32xf32> to vector<32x1xf32>
    %57 = vector.extract_strided_slice %48 {offsets = [1, 0], sizes = [1, 512], strides = [1, 1]} : vector<3x512xf32> to vector<1x512xf32>
    %58 = vector.broadcast %56 : vector<32x1xf32> to vector<32x512xf32>
    %59 = vector.broadcast %57 : vector<1x512xf32> to vector<32x512xf32>
    %60 = arith.mulf %58, %59 : vector<32x512xf32>
    %61 = arith.addf %55, %60 : vector<32x512xf32>
    %62 = vector.extract_strided_slice %50 {offsets = [0, 2], sizes = [32, 1], strides = [1, 1]} : vector<32x32xf32> to vector<32x1xf32>
    %63 = vector.extract_strided_slice %48 {offsets = [2, 0], sizes = [1, 512], strides = [1, 1]} : vector<3x512xf32> to vector<1x512xf32>
    %64 = vector.broadcast %62 : vector<32x1xf32> to vector<32x512xf32>
    %65 = vector.broadcast %63 : vector<1x512xf32> to vector<32x512xf32>
    %66 = arith.mulf %64, %65 : vector<32x512xf32>
    %67 = arith.addf %61, %66 : vector<32x512xf32>
    %68 = vector.extract_strided_slice %44 {offsets = [0, 0], sizes = [32, 2], strides = [1, 1]} : vector<96x2xf32> to vector<32x2xf32>
    %c0_33 = arith.constant 0 : index
    %c0_34 = arith.constant 0 : index
    %c0_35 = arith.constant 0 : index
    %69 = vector.load %arg7[%c0_33, %c0_34, %c0_35] : memref<3x32x1xf32, #tpu.memory_space<vmem>>, vector<1x32x1xf32>
    %70 = vector.shape_cast %69 : vector<1x32x1xf32> to vector<32x1xf32>
    %71 = vector.broadcast %70 : vector<32x1xf32> to vector<32x2xf32>
    %72 = arith.mulf %68, %71 : vector<32x2xf32>
    %73 = vector.extract_strided_slice %45 {offsets = [0, 0], sizes = [32, 2], strides = [1, 1]} : vector<96x2xf32> to vector<32x2xf32>
    %74 = arith.addf %72, %73 : vector<32x2xf32>
    %75 = vector.extract_strided_slice %68 {offsets = [0, 0], sizes = [32, 1], strides = [1, 1]} : vector<32x2xf32> to vector<32x1xf32>
    %76 = vector.shape_cast %75 : vector<32x1xf32> to vector<32x1xf32>
    %77 = vector.broadcast %76 : vector<32x1xf32> to vector<32x512xf32>
    %c256_i32 = arith.constant 256 : i32
    %78 = vector.broadcast %c256_i32 : i32 to vector<32x512xi32>
    %79 = arith.cmpi sge, %46, %78 : vector<32x512xi32>
    %80 = vector.extract_strided_slice %68 {offsets = [0, 1], sizes = [32, 1], strides = [1, 1]} : vector<32x2xf32> to vector<32x1xf32>
    %81 = vector.shape_cast %80 : vector<32x1xf32> to vector<32x1xf32>
    %82 = vector.broadcast %81 : vector<32x1xf32> to vector<32x512xf32>
    %83 = arith.select %79, %82, %77 : vector<32x512xi1>, vector<32x512xf32>
    %84 = arith.mulf %83, %67 : vector<32x512xf32>
    %85 = vector.extract_strided_slice %74 {offsets = [0, 0], sizes = [32, 1], strides = [1, 1]} : vector<32x2xf32> to vector<32x1xf32>
    %86 = vector.shape_cast %85 : vector<32x1xf32> to vector<32x1xf32>
    %87 = vector.broadcast %86 : vector<32x1xf32> to vector<32x512xf32>
    %c256_i32_36 = arith.constant 256 : i32
    %88 = vector.broadcast %c256_i32_36 : i32 to vector<32x512xi32>
    %89 = arith.cmpi sge, %46, %88 : vector<32x512xi32>
    %90 = vector.extract_strided_slice %74 {offsets = [0, 1], sizes = [32, 1], strides = [1, 1]} : vector<32x2xf32> to vector<32x1xf32>
    %91 = vector.shape_cast %90 : vector<32x1xf32> to vector<32x1xf32>
    %92 = vector.broadcast %91 : vector<32x1xf32> to vector<32x512xf32>
    %93 = arith.select %89, %92, %87 : vector<32x512xi1>, vector<32x512xf32>
    %94 = arith.addf %84, %93 : vector<32x512xf32>
    %95 = math.sin %94 : vector<32x512xf32>
    %c1_37 = arith.constant 1 : index
    %c0_38 = arith.constant 0 : index
    %c0_39 = arith.constant 0 : index
    %96 = vector.load %arg6[%c1_37, %c0_38, %c0_39] : memref<3x32x32xf32, #tpu.memory_space<vmem>>, vector<1x32x32xf32>
    %97 = vector.shape_cast %96 : vector<1x32x32xf32> to vector<32x32xf32>
    %cst_40 = arith.constant dense<0.000000e+00> : vector<32x512xf32>
    %98 = tpu.matmul %97, %95, %cst_40 {dimension_numbers = #tpu.dot_dimension_numbers<[1], [0], [0], [1], [0, 0, 1, 1], [], []>} : vector<32x32xf32>, vector<32x512xf32>, vector<32x512xf32> -> vector<32x512xf32>
    %99 = vector.extract_strided_slice %44 {offsets = [32, 0], sizes = [32, 2], strides = [1, 1]} : vector<96x2xf32> to vector<32x2xf32>
    %c1_41 = arith.constant 1 : index
    %c0_42 = arith.constant 0 : index
    %c0_43 = arith.constant 0 : index
    %100 = vector.load %arg7[%c1_41, %c0_42, %c0_43] : memref<3x32x1xf32, #tpu.memory_space<vmem>>, vector<1x32x1xf32>
    %101 = vector.shape_cast %100 : vector<1x32x1xf32> to vector<32x1xf32>
    %102 = vector.broadcast %101 : vector<32x1xf32> to vector<32x2xf32>
    %103 = arith.mulf %99, %102 : vector<32x2xf32>
    %104 = vector.extract_strided_slice %45 {offsets = [32, 0], sizes = [32, 2], strides = [1, 1]} : vector<96x2xf32> to vector<32x2xf32>
    %105 = arith.addf %103, %104 : vector<32x2xf32>
    %106 = vector.extract_strided_slice %99 {offsets = [0, 0], sizes = [32, 1], strides = [1, 1]} : vector<32x2xf32> to vector<32x1xf32>
    %107 = vector.shape_cast %106 : vector<32x1xf32> to vector<32x1xf32>
    %108 = vector.broadcast %107 : vector<32x1xf32> to vector<32x512xf32>
    %c256_i32_44 = arith.constant 256 : i32
    %109 = vector.broadcast %c256_i32_44 : i32 to vector<32x512xi32>
    %110 = arith.cmpi sge, %46, %109 : vector<32x512xi32>
    %111 = vector.extract_strided_slice %99 {offsets = [0, 1], sizes = [32, 1], strides = [1, 1]} : vector<32x2xf32> to vector<32x1xf32>
    %112 = vector.shape_cast %111 : vector<32x1xf32> to vector<32x1xf32>
    %113 = vector.broadcast %112 : vector<32x1xf32> to vector<32x512xf32>
    %114 = arith.select %110, %113, %108 : vector<32x512xi1>, vector<32x512xf32>
    %115 = arith.mulf %114, %98 : vector<32x512xf32>
    %116 = vector.extract_strided_slice %105 {offsets = [0, 0], sizes = [32, 1], strides = [1, 1]} : vector<32x2xf32> to vector<32x1xf32>
    %117 = vector.shape_cast %116 : vector<32x1xf32> to vector<32x1xf32>
    %118 = vector.broadcast %117 : vector<32x1xf32> to vector<32x512xf32>
    %c256_i32_45 = arith.constant 256 : i32
    %119 = vector.broadcast %c256_i32_45 : i32 to vector<32x512xi32>
    %120 = arith.cmpi sge, %46, %119 : vector<32x512xi32>
    %121 = vector.extract_strided_slice %105 {offsets = [0, 1], sizes = [32, 1], strides = [1, 1]} : vector<32x2xf32> to vector<32x1xf32>
    %122 = vector.shape_cast %121 : vector<32x1xf32> to vector<32x1xf32>
    %123 = vector.broadcast %122 : vector<32x1xf32> to vector<32x512xf32>
    %124 = arith.select %120, %123, %118 : vector<32x512xi1>, vector<32x512xf32>
    %125 = arith.addf %115, %124 : vector<32x512xf32>
    %126 = math.sin %125 : vector<32x512xf32>
    %c2_46 = arith.constant 2 : index
    %c0_47 = arith.constant 0 : index
    %c0_48 = arith.constant 0 : index
    %127 = vector.load %arg6[%c2_46, %c0_47, %c0_48] : memref<3x32x32xf32, #tpu.memory_space<vmem>>, vector<1x32x32xf32>
    %128 = vector.shape_cast %127 : vector<1x32x32xf32> to vector<32x32xf32>
    %cst_49 = arith.constant dense<0.000000e+00> : vector<32x512xf32>
    %129 = tpu.matmul %128, %126, %cst_49 {dimension_numbers = #tpu.dot_dimension_numbers<[1], [0], [0], [1], [0, 0, 1, 1], [], []>} : vector<32x32xf32>, vector<32x512xf32>, vector<32x512xf32> -> vector<32x512xf32>
    %130 = vector.extract_strided_slice %44 {offsets = [64, 0], sizes = [32, 2], strides = [1, 1]} : vector<96x2xf32> to vector<32x2xf32>
    %c2_50 = arith.constant 2 : index
    %c0_51 = arith.constant 0 : index
    %c0_52 = arith.constant 0 : index
    %131 = vector.load %arg7[%c2_50, %c0_51, %c0_52] : memref<3x32x1xf32, #tpu.memory_space<vmem>>, vector<1x32x1xf32>
    %132 = vector.shape_cast %131 : vector<1x32x1xf32> to vector<32x1xf32>
    %133 = vector.broadcast %132 : vector<32x1xf32> to vector<32x2xf32>
    %134 = arith.mulf %130, %133 : vector<32x2xf32>
    %135 = vector.extract_strided_slice %45 {offsets = [64, 0], sizes = [32, 2], strides = [1, 1]} : vector<96x2xf32> to vector<32x2xf32>
    %136 = arith.addf %134, %135 : vector<32x2xf32>
    %137 = vector.extract_strided_slice %130 {offsets = [0, 0], sizes = [32, 1], strides = [1, 1]} : vector<32x2xf32> to vector<32x1xf32>
    %138 = vector.shape_cast %137 : vector<32x1xf32> to vector<32x1xf32>
    %139 = vector.broadcast %138 : vector<32x1xf32> to vector<32x512xf32>
    %c256_i32_53 = arith.constant 256 : i32
    %140 = vector.broadcast %c256_i32_53 : i32 to vector<32x512xi32>
    %141 = arith.cmpi sge, %46, %140 : vector<32x512xi32>
    %142 = vector.extract_strided_slice %130 {offsets = [0, 1], sizes = [32, 1], strides = [1, 1]} : vector<32x2xf32> to vector<32x1xf32>
    %143 = vector.shape_cast %142 : vector<32x1xf32> to vector<32x1xf32>
    %144 = vector.broadcast %143 : vector<32x1xf32> to vector<32x512xf32>
    %145 = arith.select %141, %144, %139 : vector<32x512xi1>, vector<32x512xf32>
    %146 = arith.mulf %145, %129 : vector<32x512xf32>
    %147 = vector.extract_strided_slice %136 {offsets = [0, 0], sizes = [32, 1], strides = [1, 1]} : vector<32x2xf32> to vector<32x1xf32>
    %148 = vector.shape_cast %147 : vector<32x1xf32> to vector<32x1xf32>
    %149 = vector.broadcast %148 : vector<32x1xf32> to vector<32x512xf32>
    %c256_i32_54 = arith.constant 256 : i32
    %150 = vector.broadcast %c256_i32_54 : i32 to vector<32x512xi32>
    %151 = arith.cmpi sge, %46, %150 : vector<32x512xi32>
    %152 = vector.extract_strided_slice %136 {offsets = [0, 1], sizes = [32, 1], strides = [1, 1]} : vector<32x2xf32> to vector<32x1xf32>
    %153 = vector.shape_cast %152 : vector<32x1xf32> to vector<32x1xf32>
    %154 = vector.broadcast %153 : vector<32x1xf32> to vector<32x512xf32>
    %155 = arith.select %151, %154, %149 : vector<32x512xi1>, vector<32x512xf32>
    %156 = arith.addf %146, %155 : vector<32x512xf32>
    %157 = math.sin %156 : vector<32x512xf32>
    %c0_55 = arith.constant 0 : index
    %c0_56 = arith.constant 0 : index
    %158 = vector.load %arg8[%c0_55, %c0_56] : memref<4x32xf32, #tpu.memory_space<vmem>>, vector<4x32xf32>
    %cst_57 = arith.constant dense<0.000000e+00> : vector<4x512xf32>
    %159 = tpu.matmul %158, %157, %cst_57 {dimension_numbers = #tpu.dot_dimension_numbers<[1], [0], [0], [1], [0, 0, 1, 1], [], []>} : vector<4x32xf32>, vector<32x512xf32>, vector<4x512xf32> -> vector<4x512xf32>
    %c0_58 = arith.constant 0 : index
    %c0_59 = arith.constant 0 : index
    %160 = vector.load %arg9[%c0_58, %c0_59] : memref<4x1xf32, #tpu.memory_space<vmem>>, vector<4x1xf32>
    %161 = vector.broadcast %160 : vector<4x1xf32> to vector<4x512xf32>
    %162 = arith.addf %159, %161 : vector<4x512xf32>
    %c0_60 = arith.constant 0 : index
    %c0_61 = arith.constant 0 : index
    %c0_62 = arith.constant 0 : index
    %163 = vector.load %arg10[%c0_60, %c0_61, %c0_62] : memref<1x4x512xf32, #tpu.memory_space<vmem>>, vector<1x4x512xf32>
    %164 = vector.shape_cast %163 : vector<1x4x512xf32> to vector<4x512xf32>
    %165 = vector.shape_cast %162 : vector<4x512xf32> to vector<1x4x512xf32>
    tpu.vector_store %arg10[%c0_60, %c0_61, %c0_62], %165 {strides = array<i32>} : memref<1x4x512xf32, #tpu.memory_space<vmem>>, vector<1x4x512xf32>,
    return
  }
  func.func @transform_0(%arg0: i32) -> (i32, i32, i32) {
    %c0_i32 = arith.constant 0 : i32
    %c0_i32_0 = arith.constant 0 : i32
    %c0_i32_1 = arith.constant 0 : i32
    return %arg0, %c0_i32, %c0_i32_0 : i32, i32, i32
  }
  func.func @transform_1(%arg0: i32) -> (i32, i32, i32) {
    %c0_i32 = arith.constant 0 : i32
    %c0_i32_0 = arith.constant 0 : i32
    %c0_i32_1 = arith.constant 0 : i32
    return %arg0, %c0_i32, %c0_i32_0 : i32, i32, i32
  }
  func.func @transform_2(%arg0: i32) -> (i32, i32, i32) {
    %c0_i32 = arith.constant 0 : i32
    %c0_i32_0 = arith.constant 0 : i32
    %c0_i32_1 = arith.constant 0 : i32
    %c0_i32_2 = arith.constant 0 : i32
    return %c0_i32, %c0_i32_0, %c0_i32_1 : i32, i32, i32
  }
  func.func @transform_3(%arg0: i32) -> (i32, i32) {
    %c0_i32 = arith.constant 0 : i32
    %c0_i32_0 = arith.constant 0 : i32
    %c0_i32_1 = arith.constant 0 : i32
    return %c0_i32, %c0_i32_0 : i32, i32
  }
  func.func @transform_4(%arg0: i32) -> (i32, i32) {
    %c0_i32 = arith.constant 0 : i32
    %c0_i32_0 = arith.constant 0 : i32
    %c0_i32_1 = arith.constant 0 : i32
    return %c0_i32, %c0_i32_0 : i32, i32
  }
  func.func @transform_5(%arg0: i32) -> (i32, i32, i32) {
    %c0_i32 = arith.constant 0 : i32
    %c0_i32_0 = arith.constant 0 : i32
    %c0_i32_1 = arith.constant 0 : i32
    %c0_i32_2 = arith.constant 0 : i32
    return %c0_i32, %c0_i32_0, %c0_i32_1 : i32, i32, i32
  }
  func.func @transform_6(%arg0: i32) -> (i32, i32, i32) {
    %c0_i32 = arith.constant 0 : i32
    %c0_i32_0 = arith.constant 0 : i32
    %c0_i32_1 = arith.constant 0 : i32
    %c0_i32_2 = arith.constant 0 : i32
    return %c0_i32, %c0_i32_0, %c0_i32_1 : i32, i32, i32
  }
  func.func @transform_7(%arg0: i32) -> (i32, i32) {
    %c0_i32 = arith.constant 0 : i32
    %c0_i32_0 = arith.constant 0 : i32
    %c0_i32_1 = arith.constant 0 : i32
    return %c0_i32, %c0_i32_0 : i32, i32
  }
  func.func @transform_8(%arg0: i32) -> (i32, i32) {
    %c0_i32 = arith.constant 0 : i32
    %c0_i32_0 = arith.constant 0 : i32
    %c0_i32_1 = arith.constant 0 : i32
    return %c0_i32, %c0_i32_0 : i32, i32
  }
  func.func @transform_9(%arg0: i32) -> (i32, i32, i32) {
    %c0_i32 = arith.constant 0 : i32
    %c0_i32_0 = arith.constant 0 : i32
    %c0_i32_1 = arith.constant 0 : i32
    return %arg0, %c0_i32, %c0_i32_0 : i32, i32, i32
  }
}

</mosaic_0001>

<bundles_post_ra>
// kernel: implicit_deformation_forward.1
= control target key start
LH: loop header
LB: loop body
LE: loop exit
PB: predicated region body
PF: predicated region fallthrough
CT: control target
= control target key end

     0   :  { %vm96_vm0 = vcmask 523264   ;;  %v13918_v3 = vmov 0   ;;  %v13920_v59 = vmov 1   ;;  %v8481_v61 = vmov 2   ;;  %s13908_s0 = inlined_call_operand.vmem [shape: f32[1,64,2], index: 0, kind: input, shape index: {}]   ;;  %s13909_s2 = inlined_call_operand.vmem [shape: f32[3,64,64], index: 2, kind: input, shape index: {}]   ;;  %s13910_s4 = inlined_call_operand.vmem [shape: f32[384,1], index: 4, kind: input, shape index: {}]   ;;  %s13911_s6 = inlined_call_operand.vmem [shape: f32[3,32,1], index: 6, kind: input, shape index: {}]   ;;  %s13912_s5 = inlined_call_operand.vmem [shape: f32[3,32,32], index: 5, kind: input, shape index: {}]   ;;  %s13913_s3 = inlined_call_operand.vmem [shape: f32[192,64], index: 3, kind: input, shape index: {}]   ;;  %s13914_s1 = inlined_call_operand.vmem [shape: f32[1,3,512], index: 1, kind: input, shape index: {}]   ;;  %s13915_s8 = inlined_call_operand.vmem [shape: f32[4,1], index: 8, kind: input, shape index: {}]   ;;  %s13916_s7 = inlined_call_operand.vmem [shape: f32[4,32], index: 7, kind: input, shape index: {}]   ;;  %s13917_s9 = inlined_call_operand.vmem [shape: f32[1,4,512], index: 9, kind: output, shape index: {}]  }
   0x1   :  { %v32_v0 = vld [vmem:[%s13908_s0] sm:$0xff]  ;;  %v33_v1 = vld [vmem:[%s13908_s0 + $0x8] sm:$0xff]  ;;  %v34_v2 = vld [vmem:[%s13908_s0 + $0x10] sm:$0xff]  ;;  %8251 = vset.pattern.permute.xlu0 %v13918_v3  ;;  %8252 = vset.pattern.permute.xlu1 %v13918_v3 }
   0x2   :  { %v7937_v4 = vpack.c.bf16 %v33_v1, %v32_v0  ;;  %v35_v5 = vld [vmem:[%s13908_s0 + $0x18] sm:$0xff]  ;;  %v36_v7 = vld [vmem:[%s13908_s0 + $0x20] sm:$0xff]  ;;  %v37_v8 = vld [vmem:[%s13908_s0 + $0x28] sm:$0xff] }
   0x3   :  { %v7941_v6 = vpack.c.bf16 %v35_v5, %v34_v2  ;;  %v40_v9 = vld [vmem:[%s13909_s2] sm:$0xff]  ;;  %v50_v11 = vld [vmem:[%s13910_s4 + $0x10] sm:$0xff]  ;;  %v7945_v12 = vpack.c.bf16 %v37_v8, %v36_v7  ;;  %v39_v14 = vld [vmem:[%s13908_s0 + $0x38] sm:$0xff] }
   0x4   :  { %7938 = vmatprep.subr.bf16.mxu0 %v7937_v4  ;;  %7817 = vmatprep.mubr.msk.f32.mxu0 %vm96_vm0, %v40_v9  ;;  %v48_v10 = vld [vmem:[%s13910_s4] sm:$0xff]  ;;  %v38_v13 = vld [vmem:[%s13908_s0 + $0x30] sm:$0xff]  ;;  %v49_v15 = vld [vmem:[%s13910_s4 + $0x8] sm:$0xff] }
   0x5   :  { %7940 = vmatpush3.bf16.msra.mxu0 %v7937_v4  ;;  %58 = vperm.xlu0 %8251, %v48_v10   ;;  %v51_v16 = vld [vmem:[%s13910_s4 + $0x18] sm:$0xff]  ;;  %v7949_v17 = vpack.c.bf16 %v39_v14, %v38_v13  ;;  %v52_v18 = vld [vmem:[%s13910_s4 + $0x20] sm:$0xff]  ;;  %v53_v19 = vld [vmem:[%s13910_s4 + $0x28] sm:$0xff] }
   0x6   :  { %7942 = vmatprep.subr.bf16.mxu0 %v7941_v6  ;;  %68 = vperm.xlu1 %8252, %v50_v11   ;;  %v54_v20 = vld [vmem:[%s13910_s4 + $0x30] sm:$0xff]  ;;  %v55_v21 = vld [vmem:[%s13910_s4 + $0x38] sm:$0xff]  ;;  %v41_v22 = vld [vmem:[%s13909_s2 + $0x8] sm:$0xff] }
   0x7   :  { %v42_v23 = vld [vmem:[%s13909_s2 + $0x10] sm:$0xff]  ;;  %v259_v24 = vld [vmem:[%s13910_s4 + $0x40] sm:$0xff]  ;;  %v260_v25 = vld [vmem:[%s13910_s4 + $0x48] sm:$0xff] }
   0x8   :  { %v43_v26 = vld [vmem:[%s13909_s2 + $0x18] sm:$0xff]  ;;  %v44_v27 = vld [vmem:[%s13909_s2 + $0x20] sm:$0xff]  ;;  %v261_v28 = vld [vmem:[%s13910_s4 + $0x50] sm:$0xff] }
   0x9   :  { %7944 = vmatpush3.bf16.msra.mxu0 %v7941_v6  ;;  %63 = vperm.xlu0 %8251, %v49_v15   ;;  %v262_v29 = vld [vmem:[%s13910_s4 + $0x58] sm:$0xff]  ;;  %v45_v30 = vld [vmem:[%s13909_s2 + $0x28] sm:$0xff]  ;;  %v46_v31 = vld [vmem:[%s13909_s2 + $0x30] sm:$0xff] }
   0xa   :  { %7946 = vmatprep.subr.bf16.mxu0 %v7945_v12  ;;  %73 = vperm.xlu1 %8252, %v51_v16   ;;  %v263_v32 = vld [vmem:[%s13910_s4 + $0x60] sm:$0xff]  ;;  %v264_v33 = vld [vmem:[%s13910_s4 + $0x68] sm:$0xff]  ;;  %v47_v34 = vld [vmem:[%s13909_s2 + $0x38] sm:$0xff] }
   0xb   :  { %v265_v35 = vld [vmem:[%s13910_s4 + $0x70] sm:$0xff]  ;;  %v266_v36 = vld [vmem:[%s13910_s4 + $0x78] sm:$0xff]  ;;  %v469_v37 = vld [vmem:[%s13910_s4 + $0x80] sm:$0xff] }
   0xc   :  { %v470_v38 = vld [vmem:[%s13910_s4 + $0x88] sm:$0xff]  ;;  %v471_v39 = vld [vmem:[%s13910_s4 + $0x90] sm:$0xff]  ;;  %v472_v40 = vld [vmem:[%s13910_s4 + $0x98] sm:$0xff] }
   0xd   :  { %7948 = vmatpush3.bf16.msra.mxu0 %v7945_v12  ;;  %78 = vperm.xlu0 %8251, %v52_v18   ;;  %v473_v41 = vld [vmem:[%s13910_s4 + $0xa0] sm:$0xff]  ;;  %v474_v42 = vld [vmem:[%s13910_s4 + $0xa8] sm:$0xff]  ;;  %v475_v43 = vld [vmem:[%s13910_s4 + $0xb0] sm:$0xff] }
   0xe   :  { %7950 = vmatprep.subr.bf16.mxu0 %v7949_v17  ;;  %83 = vperm.xlu1 %8252, %v53_v19   ;;  %v476_v44 = vld [vmem:[%s13910_s4 + $0xb8] sm:$0xff]  ;;  %v694_v45 = vld [vmem:[%s13910_s4 + $0xc0] sm:$0xff]  ;;  %v695_v46 = vld [vmem:[%s13910_s4 + $0xc8] sm:$0xff] }
   0xf   :  { %v696_v47 = vld [vmem:[%s13910_s4 + $0xd0] sm:$0xff]  ;;  %v697_v48 = vld [vmem:[%s13910_s4 + $0xd8] sm:$0xff]  ;;  %v706_v49 = vld [vmem:[%s13910_s4 + $0x120] sm:$0xff] }
  0x10   :  { %v707_v50 = vld [vmem:[%s13910_s4 + $0x128] sm:$0xff]  ;;  %v1372_v51 = vld [vmem:[%s13911_s6] sm:$0xff]  ;;  %v708_v53 = vld [vmem:[%s13910_s4 + $0x130] sm:$0xff] }
  0x11   :  { %7952 = vmatpush3.bf16.msra.mxu0 %v7949_v17  ;;  %88 = vperm.xlu0 %8251, %v54_v20   ;;  %v1373_v52 = vld [vmem:[%s13911_s6 + $0x8] sm:$0xff]  ;;  %v709_v54 = vld [vmem:[%s13910_s4 + $0x138] sm:$0xff]  ;;  %v1374_v55 = vld [vmem:[%s13911_s6 + $0x10] sm:$0xff] }
  0x12   :  { %93 = vperm.xlu1 %8252, %v55_v21   ;;  %v1375_v56 = vld [vmem:[%s13911_s6 + $0x18] sm:$0xff]  ;;  %v8708_v57 = vld [vmem:[%s13912_s5] sm:$0xff]  ;;  %v1127_v58 = vld [vmem:[%s13912_s5 + $0x8] sm:$0xff] }
  0x13   :  { %v8718_v60 = vld [vmem:[%s13912_s5 + $0x10] sm:$0xff]  ;;  %v7439_v62 = vld [vmem:[%s13909_s2 + $0x40] sm:$0xff] }
  0x14   :  { %7818 = vmatmul.mubr.msk.f32.vlgmr.msra.gmra.mrb[0].mxu0 %vm96_vm0, %v41_v22  ;;  %7845 = vmatprep.mubr.msk.f32.mxu1 %vm96_vm0, %v7439_v62 }
  0x15   :  { %7820 = vmatprep.mubr.msk.f32.mxu0 %vm96_vm0, %v42_v23  ;;  %269 = vperm.xlu0 %8251, %v259_v24  }
  0x16   :  { %274 = vperm.xlu1 %8252, %v260_v25  }
  0x18   :  { %7821 = vmatmul.mubr.msk.f32.gmra.mrb[2].mxu0 %vm96_vm0, %v43_v26 }
  0x19   :  { %7823 = vmatprep.mubr.msk.f32.mxu0 %vm96_vm0, %v44_v27  ;;  %279 = vperm.xlu0 %8251, %v261_v28  }
  0x1a   :  { %284 = vperm.xlu1 %8252, %v262_v29  }
  0x1c   :  { %7824 = vmatmul.mubr.msk.f32.gmra.mrb[4].mxu0 %vm96_vm0, %v45_v30 }
  0x1d   :  { %7826 = vmatprep.mubr.msk.f32.mxu0 %vm96_vm0, %v46_v31  ;;  %289 = vperm.xlu0 %8251, %v263_v32  }
  0x1e   :  { %294 = vperm.xlu1 %8252, %v264_v33  }
  0x20   :  { %7827 = vmatmul.mubr.msk.f32.gmra.mrb[6].mxu0 %vm96_vm0, %v47_v34 }
  0x21   :  { %299 = vperm.xlu0 %8251, %v265_v35  }
  0x22   :  { %304 = vperm.xlu1 %8252, %v266_v36  }
  0x25   :  { %479 = vperm.xlu0 %8251, %v469_v37  }
  0x26   :  { %484 = vperm.xlu1 %8252, %v470_v38  }
  0x29   :  { %489 = vperm.xlu0 %8251, %v471_v39  }
  0x2a   :  { %494 = vperm.xlu1 %8252, %v472_v40  }
  0x2d   :  { %499 = vperm.xlu0 %8251, %v473_v41  }
  0x2e   :  { %504 = vperm.xlu1 %8252, %v474_v42  }
  0x31   :  { %509 = vperm.xlu0 %8251, %v475_v43  }
  0x32   :  { %514 = vperm.xlu1 %8252, %v476_v44   ;;  %v7440_v44 = vld [vmem:[%s13909_s2 + $0x48] sm:$0xff] }
  0x35   :  { %720 = vperm.xlu0 %8251, %v694_v45   ;;  %v7441_v45 = vld [vmem:[%s13909_s2 + $0x50] sm:$0xff] }
  0x36   :  { %725 = vperm.xlu1 %8252, %v695_v46   ;;  %v7442_v46 = vld [vmem:[%s13909_s2 + $0x58] sm:$0xff] }
  0x39   :  { %730 = vperm.xlu0 %8251, %v696_v47   ;;  %v7443_v47 = vld [vmem:[%s13909_s2 + $0x60] sm:$0xff] }
  0x3a   :  { %735 = vperm.xlu1 %8252, %v697_v48   ;;  %v7444_v48 = vld [vmem:[%s13909_s2 + $0x68] sm:$0xff] }
  0x3d   :  { %780 = vperm.xlu0 %8251, %v706_v49   ;;  %v7445_v49 = vld [vmem:[%s13909_s2 + $0x70] sm:$0xff] }
  0x3e   :  { %785 = vperm.xlu1 %8252, %v707_v50   ;;  %v7446_v50 = vld [vmem:[%s13909_s2 + $0x78] sm:$0xff] }
  0x41   :  { %1378 = vperm.xlu0 %8251, %v1372_v51   ;;  %v7455_v51 = vld [vmem:[%s13909_s2 + $0x80] sm:$0xff] }
  0x42   :  { %1383 = vperm.xlu1 %8252, %v1373_v52   ;;  %7873 = vmatprep.mubr.msk.f32.mxu0 %vm96_vm0, %v7455_v51 }
  0x45   :  { %790 = vperm.xlu0 %8251, %v708_v53  }
  0x46   :  { %795 = vperm.xlu1 %8252, %v709_v54  }
  0x49   :  { %1388 = vperm.xlu0 %8251, %v1374_v55  }
  0x4a   :  { %1393 = vperm.xlu1 %8252, %v1375_v56  }
  0x4d   :  { %8253 = vset.pattern.permute.xlu0 %v13920_v59 }
  0x4e   :  { %1205 = vperm.xlu0 %8253, %v8708_v57   ;;  %1137 = vperm.xlu1 %8252, %v1127_v58  }
  0x52   :  { %1213 = vperm.xlu0 %8253, %v8718_v60   ;;  %8254 = vset.pattern.permute.xlu1 %v13920_v59 }
  0x53   :  { %1209 = vperm.xlu1 %8254, %v1127_v58  }
  0x56   :  { %8257 = vset.pattern.permute.xlu0 %v8481_v61 }
  0x57   :  { %1293 = vperm.xlu0 %8257, %v1127_v58   ;;  %8255 = vset.pattern.permute.xlu1 %v8481_v61 }
  0x58   :  { %1289 = vperm.xlu1 %8255, %v8708_v57  }
  0x5c   :  { %8256 = vset.pattern.permute.xlu1 %v13918_v3 }
  0x5d   :  { %1142 = vperm.xlu1 %8256, %v8718_v60  }
  0x84   :  { %v59_v63 = vpop.permute.xlu0 %58 }
  0x85   :  { %v69_v0 = vpop.permute.xlu1 %68 }
  0x88   :  { %v64_v1 = vpop.permute.xlu0 %63 }
  0x89   :  { %v74_v2 = vpop.permute.xlu1 %73 }
  0x8c   :  { %v79_v17 = vpop.permute.xlu0 %78 }
  0x8d   :  { %v84_v14 = vpop.permute.xlu1 %83 }
  0x90   :  { %v89_v32 = vpop.permute.xlu0 %88 }
  0x91   :  { %v94_v29 = vpop.permute.xlu1 %93 }
  0x94   :  { %v270_v53 = vpop.permute.xlu0 %269 }
  0x95   :  { %v275_v52 = vpop.permute.xlu1 %274 }
  0x98   :  { %v280_v56 = vpop.permute.xlu0 %279 }
  0x99   :  { %v285_v54 = vpop.permute.xlu1 %284 }
  0xe7   :  { %v7819_v4 = vpop.f32.mrb[0].mxu0 }
  0xe8   :  { %v193_v5 = vadd.f32 %v7819_v4, %v64_v1  ;;  %v187_v6 = vpop.f32.mrb[1].mxu0 }
  0xe9   :  { %v188_v7 = vadd.f32 %v187_v6, %v59_v63 }
  0xea   :  { %v235_v8 = vmul.f32 0.2, %v193_v5  ;;  %vm227_vm1 = vcmp.gt.f32.partialorder %v193_v5, 0.0 }
  0xeb   :  { %v234_v9 = vmul.f32 0.2, %v188_v7  ;;  %v7822_v10 = vpop.f32.mrb[2].mxu0  ;;  %vm226_vm2 = vcmp.gt.f32.partialorder %v188_v7, 0.0 }
  0xec   :  { %v203_v11 = vadd.f32 %v7822_v10, %v74_v2  ;;  %v197_v12 = vpop.f32.mrb[3].mxu0  ;;  %v243_v13 = vsel %vm227_vm1, %v193_v5, %v235_v8  ;;  %v290_v10 = vpop.permute.xlu0 %289 }
  0xed   :  { %v198_v15 = vadd.f32 %v197_v12, %v69_v0  ;;  %v242_v16 = vsel %vm226_vm2, %v188_v7, %v234_v9  ;;  %v295_v7 = vpop.permute.xlu1 %294 }
  0xee   :  { %vm229_vm3 = vcmp.gt.f32.partialorder %v203_v11, 0.0  ;;  %v237_v18 = vmul.f32 0.2, %v203_v11  ;;  %v7953_v19 = vpack.c.bf16 %v243_v13, %v242_v16 }
  0xef   :  { %vm228_vm4 = vcmp.gt.f32.partialorder %v198_v15, 0.0  ;;  %v236_v20 = vmul.f32 0.2, %v198_v15  ;;  %v7825_v21 = vpop.f32.mrb[4].mxu0 }
  0xf0   :  { %v213_v22 = vadd.f32 %v7825_v21, %v84_v14  ;;  %v207_v23 = vpop.f32.mrb[5].mxu0  ;;  %7954 = vmatprep.subr.bf16.mxu1 %v7953_v19  ;;  %v245_v24 = vsel %vm229_vm3, %v203_v11, %v237_v18 }
  0xf1   :  { %v208_v25 = vadd.f32 %v207_v23, %v79_v17  ;;  %7956 = vmatpush3.bf16.msra.mxu1 %v7953_v19  ;;  %v244_v26 = vsel %vm228_vm4, %v198_v15, %v236_v20 }
  0xf2   :  { %vm231_vm5 = vcmp.gt.f32.partialorder %v213_v22, 0.0  ;;  %v239_v27 = vmul.f32 0.2, %v213_v22  ;;  %v7957_v28 = vpack.c.bf16 %v245_v24, %v244_v26 }
  0xf3   :  { %vm230_vm6 = vcmp.gt.f32.partialorder %v208_v25, 0.0  ;;  %v238_v30 = vmul.f32 0.2, %v208_v25  ;;  %v7828_v31 = vpop.f32.mrb[6].mxu0 }
  0xf4   :  { %v223_v33 = vadd.f32 %v7828_v31, %v94_v29  ;;  %v217_v34 = vpop.f32.mrb[7].mxu0  ;;  %7958 = vmatprep.subr.bf16.mxu1 %v7957_v28  ;;  %v247_v35 = vsel %vm231_vm5, %v213_v22, %v239_v27  ;;  %v305_v22 = vpop.permute.xlu1 %304 }
  0xf5   :  { %v218_v36 = vadd.f32 %v217_v34, %v89_v32  ;;  %7960 = vmatpush3.bf16.msra.mxu1 %v7957_v28  ;;  %v246_v37 = vsel %vm230_vm6, %v208_v25, %v238_v30  ;;  %v300_v25 = vpop.permute.xlu0 %299 }
  0xf6   :  { %vm233_vm7 = vcmp.gt.f32.partialorder %v223_v33, 0.0  ;;  %v241_v38 = vmul.f32 0.2, %v223_v33  ;;  %v7961_v39 = vpack.c.bf16 %v247_v35, %v246_v37  ;;  %v7456_v37 = vld [vmem:[%s13909_s2 + $0x88] sm:$0xff] }
  0xf7   :  { %vm232_vm8 = vcmp.gt.f32.partialorder %v218_v36, 0.0  ;;  %v240_v40 = vmul.f32 0.2, %v218_v36 }
  0xf8   :  { %7962 = vmatprep.subr.bf16.mxu1 %v7961_v39  ;;  %v249_v41 = vsel %vm233_vm7, %v223_v33, %v241_v38  ;;  %v7457_v38 = vld [vmem:[%s13909_s2 + $0x90] sm:$0xff] }
  0xf9   :  { %7964 = vmatpush3.bf16.msra.mxu1 %v7961_v39  ;;  %v248_v42 = vsel %vm232_vm8, %v218_v36, %v240_v40  ;;  %v7458_v39 = vld [vmem:[%s13909_s2 + $0x98] sm:$0xff]  ;;  %v7459_v40 = vld [vmem:[%s13909_s2 + $0xa0] sm:$0xff] }
  0xfa   :  { %v7965_v43 = vpack.c.bf16 %v249_v41, %v248_v42  ;;  %v7460_v41 = vld [vmem:[%s13909_s2 + $0xa8] sm:$0xff]  ;;  %v7461_v42 = vld [vmem:[%s13909_s2 + $0xb0] sm:$0xff] }
  0xfc   :  { %7966 = vmatprep.subr.bf16.mxu1 %v7965_v43 }
  0xfd   :  { %7968 = vmatpush3.bf16.msra.mxu1 %v7965_v43  ;;  %v7462_v43 = vld [vmem:[%s13909_s2 + $0xb8] sm:$0xff] }
 0x100   :  { %7846 = vmatmul.mubr.msk.f32.vlgmr.msra.gmra.mrb[0].mxu1 %vm96_vm0, %v7440_v44  ;;  %v670_v44 = vld [vmem:[%s13913_s3] sm:$0xff] }
 0x101   :  { %7848 = vmatprep.mubr.msk.f32.mxu1 %vm96_vm0, %v7441_v45  ;;  %v1129_v45 = vld [vmem:[%s13912_s5 + $0x18] sm:$0xff] }
 0x102   :  { %1301 = vperm.xlu0 %8257, %v1129_v45   ;;  %1147 = vperm.xlu1 %8256, %v1129_v45  }
 0x104   :  { %7849 = vmatmul.mubr.msk.f32.gmra.mrb[2].mxu1 %vm96_vm0, %v7442_v46  ;;  %v485_v46 = vpop.permute.xlu1 %484 }
 0x105   :  { %7851 = vmatprep.mubr.msk.f32.mxu1 %vm96_vm0, %v7443_v47  ;;  %v480_v47 = vpop.permute.xlu0 %479 }
 0x106   :  { %8260 = vset.pattern.permute.xlu0 %v13918_v3  ;;  %8258 = vset.pattern.permute.xlu1 %v13920_v59 }
 0x107   :  { %1132 = vperm.xlu0 %8260, %v8708_v57   ;;  %1217 = vperm.xlu1 %8258, %v1129_v45   ;;  %v688_v45 = vld [vmem:[%s13913_s3 + $0x90] sm:$0xff] }
 0x108   :  { %7852 = vmatmul.mubr.msk.f32.gmra.mrb[4].mxu1 %vm96_vm0, %v7444_v48  ;;  %v495_v48 = vpop.permute.xlu1 %494 }
 0x109   :  { %7854 = vmatprep.mubr.msk.f32.mxu1 %vm96_vm0, %v7445_v49 }
 0x10b   :  { %8259 = vset.pattern.permute.xlu1 %v8481_v61 }
 0x10c   :  { %7855 = vmatmul.mubr.msk.f32.gmra.mrb[6].mxu1 %vm96_vm0, %v7446_v50  ;;  %1297 = vperm.xlu1 %8259, %v8718_v60   ;;  %v490_v50 = vpop.permute.xlu0 %489 }
 0x10d   :  { %7901 = vmatprep.mubr.msk.f32.mxu1 %vm96_vm0, %v670_v44  ;;  %v687_v44 = vld [vmem:[%s13913_s3 + $0x88] sm:$0xff] }
 0x110   :  { %8261 = vset.pattern.permute.xlu1 %v13918_v3 }
 0x1d3   :  { %v7847_v55 = vpop.f32.mrb[0].mxu1 }
 0x1d4   :  { %v403_v58 = vadd.f32 %v7847_v55, %v275_v52  ;;  %v397_v62 = vpop.f32.mrb[1].mxu1 }
 0x1d5   :  { %v398_v63 = vadd.f32 %v397_v62, %v270_v53  ;;  %v505_v62 = vpop.permute.xlu1 %504 }
 0x1d6   :  { %vm437_vm9 = vcmp.gt.f32.partialorder %v403_v58, 0.0  ;;  %v445_v0 = vmul.f32 0.2, %v403_v58 }
 0x1d7   :  { %vm436_vm10 = vcmp.gt.f32.partialorder %v398_v63, 0.0  ;;  %v444_v1 = vmul.f32 0.2, %v398_v63  ;;  %v7850_v2 = vpop.f32.mrb[2].mxu1 }
 0x1d8   :  { %v413_v4 = vadd.f32 %v7850_v2, %v285_v54  ;;  %v407_v5 = vpop.f32.mrb[3].mxu1  ;;  %v453_v6 = vsel %vm437_vm9, %v403_v58, %v445_v0  ;;  %v500_v0 = vpop.permute.xlu0 %499 }
 0x1d9   :  { %v408_v8 = vadd.f32 %v407_v5, %v280_v56  ;;  %v452_v9 = vsel %vm436_vm10, %v398_v63, %v444_v1 }
 0x1da   :  { %vm439_vm11 = vcmp.gt.f32.partialorder %v413_v4, 0.0  ;;  %v447_v11 = vmul.f32 0.2, %v413_v4  ;;  %v7969_v12 = vpack.c.bf16 %v453_v6, %v452_v9 }
 0x1db   :  { %vm438_vm12 = vcmp.gt.f32.partialorder %v408_v8, 0.0  ;;  %v446_v13 = vmul.f32 0.2, %v408_v8  ;;  %v7853_v14 = vpop.f32.mrb[4].mxu1 }
 0x1dc   :  { %v423_v15 = vadd.f32 %v7853_v14, %v295_v7  ;;  %v417_v16 = vpop.f32.mrb[5].mxu1  ;;  %7970 = vmatprep.subr.bf16.mxu0 %v7969_v12  ;;  %v455_v17 = vsel %vm439_vm11, %v413_v4, %v447_v11 }
 0x1dd   :  { %v418_v18 = vadd.f32 %v417_v16, %v290_v10  ;;  %7972 = vmatpush3.bf16.msra.mxu0 %v7969_v12  ;;  %v454_v19 = vsel %vm438_vm12, %v408_v8, %v446_v13  ;;  %v515_v13 = vpop.permute.xlu1 %514  ;;  %v510_v16 = vpop.permute.xlu0 %509 }
 0x1de   :  { %vm441_vm13 = vcmp.gt.f32.partialorder %v423_v15, 0.0  ;;  %v449_v20 = vmul.f32 0.2, %v423_v15  ;;  %v7973_v21 = vpack.c.bf16 %v455_v17, %v454_v19 }
 0x1df   :  { %vm440_vm14 = vcmp.gt.f32.partialorder %v418_v18, 0.0  ;;  %v448_v23 = vmul.f32 0.2, %v418_v18  ;;  %v7856_v24 = vpop.f32.mrb[6].mxu1 }
 0x1e0   :  { %v433_v26 = vadd.f32 %v7856_v24, %v305_v22  ;;  %v427_v27 = vpop.f32.mrb[7].mxu1  ;;  %7974 = vmatprep.subr.bf16.mxu0 %v7973_v21  ;;  %v457_v28 = vsel %vm441_vm13, %v423_v15, %v449_v20 }
 0x1e1   :  { %v428_v29 = vadd.f32 %v427_v27, %v300_v25  ;;  %7976 = vmatpush3.bf16.msra.mxu0 %v7973_v21  ;;  %v456_v30 = vsel %vm440_vm14, %v418_v18, %v448_v23 }
 0x1e2   :  { %vm443_vm15 = vcmp.gt.f32.partialorder %v433_v26, 0.0  ;;  %v451_v31 = vmul.f32 0.2, %v433_v26  ;;  %v7977_v32 = vpack.c.bf16 %v457_v28, %v456_v30  ;;  %v671_v28 = vld [vmem:[%s13913_s3 + $0x8] sm:$0xff]  ;;  %v673_v30 = vld [vmem:[%s13913_s3 + $0x18] sm:$0xff] }
 0x1e3   :  { %vm442_vm1 = vcmp.gt.f32.partialorder %v428_v29, 0.0  ;;  %v450_v33 = vmul.f32 0.2, %v428_v29 }
 0x1e4   :  { %7978 = vmatprep.subr.bf16.mxu0 %v7977_v32  ;;  %v459_v34 = vsel %vm443_vm15, %v433_v26, %v451_v31  ;;  %v674_v31 = vld [vmem:[%s13913_s3 + $0x20] sm:$0xff] }
 0x1e5   :  { %7980 = vmatpush3.bf16.msra.mxu0 %v7977_v32  ;;  %v458_v35 = vsel %vm442_vm1, %v428_v29, %v450_v33  ;;  %v672_v29 = vld [vmem:[%s13913_s3 + $0x10] sm:$0xff]  ;;  %v675_v32 = vld [vmem:[%s13913_s3 + $0x28] sm:$0xff] }
 0x1e6   :  { %v7981_v36 = vpack.c.bf16 %v459_v34, %v458_v35  ;;  %v676_v33 = vld [vmem:[%s13913_s3 + $0x30] sm:$0xff]  ;;  %v677_v34 = vld [vmem:[%s13913_s3 + $0x38] sm:$0xff]  ;;  %v678_v35 = vld [vmem:[%s13913_s3 + $0x40] sm:$0xff] }
 0x1e8   :  { %7982 = vmatprep.subr.bf16.mxu0 %v7981_v36 }
 0x1e9   :  { %7984 = vmatpush3.bf16.msra.mxu0 %v7981_v36  ;;  %v679_v36 = vld [vmem:[%s13913_s3 + $0x48] sm:$0xff] }
 0x1ec   :  { %7874 = vmatmul.mubr.msk.f32.vlgmr.msra.gmra.mrb[8].mxu0 %vm96_vm0, %v7456_v37  ;;  %v680_v37 = vld [vmem:[%s13913_s3 + $0x50] sm:$0xff] }
 0x1ed   :  { %7876 = vmatprep.mubr.msk.f32.mxu0 %vm96_vm0, %v7457_v38  ;;  %v681_v38 = vld [vmem:[%s13913_s3 + $0x58] sm:$0xff] }
 0x1f0   :  { %7877 = vmatmul.mubr.msk.f32.gmra.mrb[10].mxu0 %vm96_vm0, %v7458_v39  ;;  %v682_v39 = vld [vmem:[%s13913_s3 + $0x60] sm:$0xff] }
 0x1f1   :  { %7879 = vmatprep.mubr.msk.f32.mxu0 %vm96_vm0, %v7459_v40  ;;  %v683_v40 = vld [vmem:[%s13913_s3 + $0x68] sm:$0xff] }
 0x1f4   :  { %7880 = vmatmul.mubr.msk.f32.gmra.mrb[12].mxu0 %vm96_vm0, %v7460_v41  ;;  %v684_v41 = vld [vmem:[%s13913_s3 + $0x70] sm:$0xff] }
 0x1f5   :  { %7882 = vmatprep.mubr.msk.f32.mxu0 %vm96_vm0, %v7461_v42  ;;  %v685_v42 = vld [vmem:[%s13913_s3 + $0x78] sm:$0xff] }
 0x1f8   :  { %7883 = vmatmul.mubr.msk.f32.gmra.mrb[14].mxu0 %vm96_vm0, %v7462_v43  ;;  %v686_v43 = vld [vmem:[%s13913_s3 + $0x80] sm:$0xff] }
 0x2bf   :  { %v7875_v49 = vpop.f32.mrb[8].mxu0 }
 0x2c0   :  { %v613_v51 = vadd.f32 %v7875_v49, %v485_v46  ;;  %v607_v52 = vpop.f32.mrb[9].mxu0  ;;  %v689_v46 = vld [vmem:[%s13913_s3 + $0x98] sm:$0xff] }
 0x2c1   :  { %v608_v53 = vadd.f32 %v607_v52, %v480_v47  ;;  %v726_v47 = vpop.permute.xlu1 %725 }
 0x2c2   :  { %vm647_vm2 = vcmp.gt.f32.partialorder %v613_v51, 0.0  ;;  %v655_v54 = vmul.f32 0.2, %v613_v51 }
 0x2c3   :  { %vm646_vm3 = vcmp.gt.f32.partialorder %v608_v53, 0.0  ;;  %v654_v55 = vmul.f32 0.2, %v608_v53  ;;  %v7878_v57 = vpop.f32.mrb[10].mxu0 }
 0x2c4   :  { %v623_v56 = vadd.f32 %v7878_v57, %v495_v48  ;;  %v617_v58 = vpop.f32.mrb[11].mxu0  ;;  %v663_v61 = vsel %vm647_vm2, %v613_v51, %v655_v54  ;;  %v721_v48 = vpop.permute.xlu0 %720 }
 0x2c5   :  { %v618_v60 = vadd.f32 %v617_v58, %v490_v50  ;;  %v662_v63 = vsel %vm646_vm3, %v608_v53, %v654_v55  ;;  %v736_v54 = vpop.permute.xlu1 %735 }
 0x2c6   :  { %vm649_vm4 = vcmp.gt.f32.partialorder %v623_v56, 0.0  ;;  %v657_v1 = vmul.f32 0.2, %v623_v56  ;;  %v7985_v2 = vpack.c.bf16 %v663_v61, %v662_v63 }
 0x2c7   :  { %vm648_vm5 = vcmp.gt.f32.partialorder %v618_v60, 0.0  ;;  %v656_v4 = vmul.f32 0.2, %v618_v60  ;;  %v7881_v5 = vpop.f32.mrb[12].mxu0 }
 0x2c8   :  { %v633_v6 = vadd.f32 %v7881_v5, %v505_v62  ;;  %v627_v7 = vpop.f32.mrb[13].mxu0  ;;  %7986 = vmatprep.subr.bf16.mxu1 %v7985_v2  ;;  %v665_v8 = vsel %vm649_vm4, %v623_v56, %v657_v1  ;;  %v731_v57 = vpop.permute.xlu0 %730 }
 0x2c9   :  { %v628_v9 = vadd.f32 %v627_v7, %v500_v0  ;;  %7988 = vmatpush3.bf16.msra.mxu1 %v7985_v2  ;;  %v664_v10 = vsel %vm648_vm5, %v618_v60, %v656_v4  ;;  %v786_v4 = vpop.permute.xlu1 %785 }
 0x2ca   :  { %vm651_vm6 = vcmp.gt.f32.partialorder %v633_v6, 0.0  ;;  %v659_v11 = vmul.f32 0.2, %v633_v6  ;;  %v7989_v12 = vpack.c.bf16 %v665_v8, %v664_v10 }
 0x2cb   :  { %vm650_vm7 = vcmp.gt.f32.partialorder %v628_v9, 0.0  ;;  %v658_v14 = vmul.f32 0.2, %v628_v9  ;;  %v7884_v15 = vpop.f32.mrb[14].mxu0 }
 0x2cc   :  { %v643_v17 = vadd.f32 %v7884_v15, %v515_v13  ;;  %v637_v18 = vpop.f32.mrb[15].mxu0  ;;  %7990 = vmatprep.subr.bf16.mxu1 %v7989_v12  ;;  %v667_v19 = vsel %vm651_vm6, %v633_v6, %v659_v11  ;;  %v781_v5 = vpop.permute.xlu0 %780  ;;  %v691_v13 = vld [vmem:[%s13913_s3 + $0xa8] sm:$0xff] }
 0x2cd   :  { %v638_v20 = vadd.f32 %v637_v18, %v510_v16  ;;  %7992 = vmatpush3.bf16.msra.mxu1 %v7989_v12  ;;  %v666_v21 = vsel %vm650_vm7, %v628_v9, %v658_v14  ;;  %v1384_v10 = vpop.permute.xlu1 %1383  ;;  %v690_v12 = vld [vmem:[%s13913_s3 + $0xa0] sm:$0xff] }
 0x2ce   :  { %vm653_vm8 = vcmp.gt.f32.partialorder %v643_v17, 0.0  ;;  %v661_v22 = vmul.f32 0.2, %v643_v17  ;;  %v7993_v23 = vpack.c.bf16 %v667_v19, %v666_v21  ;;  %v692_v19 = vld [vmem:[%s13913_s3 + $0xb0] sm:$0xff] }
 0x2cf   :  { %vm652_vm9 = vcmp.gt.f32.partialorder %v638_v20, 0.0  ;;  %v660_v24 = vmul.f32 0.2, %v638_v20 }
 0x2d0   :  { %7994 = vmatprep.subr.bf16.mxu1 %v7993_v23  ;;  %v669_v25 = vsel %vm653_vm8, %v643_v17, %v661_v22  ;;  %v1379_v14 = vpop.permute.xlu0 %1378 }
 0x2d1   :  { %7996 = vmatpush3.bf16.msra.mxu1 %v7993_v23  ;;  %v668_v26 = vsel %vm652_vm9, %v638_v20, %v660_v24  ;;  %v693_v20 = vld [vmem:[%s13913_s3 + $0xb8] sm:$0xff]  ;;  %v796_v21 = vpop.permute.xlu1 %795 }
 0x2d2   :  { %v7997_v27 = vpack.c.bf16 %v669_v25, %v668_v26 }
 0x2d4   :  { %7998 = vmatprep.subr.bf16.mxu1 %v7997_v27  ;;  %v791_v22 = vpop.permute.xlu0 %790 }
 0x2d5   :  { %8000 = vmatpush3.bf16.msra.mxu1 %v7997_v27 }
 0x2d8   :  { %7902 = vmatmul.mubr.msk.f32.vlgmr.msra.gmra.mrb[8].mxu1 %vm96_vm0, %v671_v28 }
 0x2d9   :  { %7904 = vmatprep.mubr.msk.f32.mxu1 %vm96_vm0, %v672_v29 }
 0x2dc   :  { %7905 = vmatmul.mubr.msk.f32.gmra.mrb[10].mxu1 %vm96_vm0, %v673_v30  ;;  %v1394_v30 = vpop.permute.xlu1 %1393 }
 0x2dd   :  { %7907 = vmatprep.mubr.msk.f32.mxu1 %vm96_vm0, %v674_v31 }
 0x2e0   :  { %7908 = vmatmul.mubr.msk.f32.gmra.mrb[12].mxu1 %vm96_vm0, %v675_v32 }
 0x2e1   :  { %7910 = vmatprep.mubr.msk.f32.mxu1 %vm96_vm0, %v676_v33  ;;  %v1389_v33 = vpop.permute.xlu0 %1388 }
 0x2e4   :  { %7911 = vmatmul.mubr.msk.f32.gmra.mrb[14].mxu1 %vm96_vm0, %v677_v34 }
 0x2e5   :  { %7913 = vmatprep.mubr.msk.f32.mxu1 %vm96_vm0, %v678_v35 }
 0x2e8   :  { %7914 = vmatmul.mubr.msk.f32.gmra.mrb[16].mxu1 %vm96_vm0, %v679_v36 }
 0x2e9   :  { %7916 = vmatprep.mubr.msk.f32.mxu1 %vm96_vm0, %v680_v37 }
 0x2ec   :  { %7917 = vmatmul.mubr.msk.f32.gmra.mrb[18].mxu1 %vm96_vm0, %v681_v38 }
 0x2ed   :  { %7919 = vmatprep.mubr.msk.f32.mxu1 %vm96_vm0, %v682_v39 }
 0x2f0   :  { %7920 = vmatmul.mubr.msk.f32.gmra.mrb[20].mxu1 %vm96_vm0, %v683_v40 }
 0x2f1   :  { %7922 = vmatprep.mubr.msk.f32.mxu1 %vm96_vm0, %v684_v41  ;;  %v698_v41 = vld [vmem:[%s13910_s4 + $0xe0] sm:$0xff] }
 0x2f4   :  { %7923 = vmatmul.mubr.msk.f32.gmra.mrb[22].mxu1 %vm96_vm0, %v685_v42  ;;  %v699_v42 = vld [vmem:[%s13910_s4 + $0xe8] sm:$0xff] }
 0x2f5   :  { %7925 = vmatprep.mubr.msk.f32.mxu1 %vm96_vm0, %v686_v43  ;;  %v701_v43 = vld [vmem:[%s13910_s4 + $0xf8] sm:$0xff] }
 0x2f8   :  { %7926 = vmatmul.mubr.msk.f32.gmra.mrb[24].mxu1 %vm96_vm0, %v687_v44  ;;  %v700_v44 = vld [vmem:[%s13910_s4 + $0xf0] sm:$0xff] }
 0x2f9   :  { %7928 = vmatprep.mubr.msk.f32.mxu1 %vm96_vm0, %v688_v45  ;;  %v711_v45 = vld [vmem:[%s13910_s4 + $0x148] sm:$0xff] }
 0x2fc   :  { %7929 = vmatmul.mubr.msk.f32.gmra.mrb[26].mxu1 %vm96_vm0, %v689_v46  ;;  %v710_v46 = vld [vmem:[%s13910_s4 + $0x140] sm:$0xff] }
 0x2fd   :  { %7931 = vmatprep.mubr.msk.f32.mxu1 %vm96_vm0, %v690_v12 }
 0x300   :  { %7932 = vmatmul.mubr.msk.f32.gmra.mrb[28].mxu1 %vm96_vm0, %v691_v13  ;;  %v1125_v13 = vld [vmem:[%s13914_s1 + $0x8] sm:$0x77] }
 0x301   :  { %7934 = vmatprep.mubr.msk.f32.mxu1 %vm96_vm0, %v692_v19 }
 0x304   :  { %7935 = vmatmul.mubr.msk.f32.gmra.mrb[30].mxu1 %vm96_vm0, %v693_v20 }
 0x3ab   :  { %v7903_v49 = vpop.f32.mrb[8].mxu1 }
 0x3ac   :  { %v982_v50 = vadd.f32 %v7903_v49, %v726_v47  ;;  %v976_v51 = vpop.f32.mrb[9].mxu1  ;;  %v7572_v47 = vld [vmem:[%s13911_s6 + $0x28] sm:$0xff]  ;;  %v713_v49 = vld [vmem:[%s13910_s4 + $0x158] sm:$0xff] }
 0x3ad   :  { %v977_v52 = vadd.f32 %v976_v51, %v721_v48  ;;  %v7571_v48 = vld [vmem:[%s13911_s6 + $0x20] sm:$0xff]  ;;  %v7574_v51 = vld [vmem:[%s13911_s6 + $0x38] sm:$0xff] }
 0x3ae   :  { %v1096_v53 = vmul.f32 15.0, %v982_v50  ;;  %v712_v50 = vld [vmem:[%s13910_s4 + $0x150] sm:$0xff] }
 0x3af   :  { %v7906_v55 = vpop.f32.mrb[10].mxu1  ;;  %v1095_v58 = vmul.f32 15.0, %v977_v52  ;;  %v7573_v52 = vld [vmem:[%s13911_s6 + $0x30] sm:$0xff] }
 0x3b0   :  { %v8880_v56 = vadd.f32 30.0, %v1096_v53  ;;  %v992_v61 = vadd.f32 %v7906_v55, %v736_v54  ;;  %v986_v62 = vpop.f32.mrb[11].mxu1  ;;  %v1138_v53 = vpop.permute.xlu1 %1137 }
 0x3b1   :  { %v1107_v0 = vadd.f32 30.0, %v1095_v58  ;;  %v987_v6 = vadd.f32 %v986_v62, %v731_v57  ;;  %v8965_v58 = vpop.permute.xlu0 %1205 }
 0x3b2   :  { %v1098_v60 = vmul.f32 15.0, %v992_v61  ;;  %1411 = vperm.xlu1 %8261, %v8880_v56   ;;  %v1397_v25 = vmul.f32 %v1384_v10, %v8880_v56  ;;  %v1152_v61 = vlaneseq  ;;  %v1124_v10 = vld [vmem:[%s13914_s1] sm:$0x77] }
 0x3b3   :  { %v8883_v63 = vpop.f32.mrb[12].mxu1  ;;  %v1097_v9 = vmul.f32 15.0, %v987_v6  ;;  %v1396_v28 = vmul.f32 %v1379_v14, %v1107_v0 }
 0x3b4   :  { %14132 = vst [vmem:[#allocation2_spill] sm:$0xff] %v8883_v63  ;;  %v1110_v1 = vadd.f32 30.0, %v1098_v60  ;;  %v8885_v2 = vpop.f32.mrb[13].mxu1  ;;  %v1210_v54 = vpop.permute.xlu1 %1209 }
 0x3b5   :  { %14133 = vst [vmem:[#allocation3_spill] sm:$0xff] %v8885_v2  ;;  %v1109_v16 = vadd.f32 30.0, %v1097_v9  ;;  %v8969_v60 = vpop.permute.xlu0 %1213 }
 0x3b6   :  { %1421 = vperm.xlu0 %8260, %v1110_v1   ;;  %1406 = vperm.xlu1 %8261, %v1107_v0   ;;  %v1399_v35 = vmul.f32 %v1394_v30, %v1110_v1 }
 0x3b7   :  { %v8887_v7 = vpop.f32.mrb[14].mxu1  ;;  %v1398_v38 = vmul.f32 %v1389_v33, %v1109_v16 }
 0x3b8   :  { %14134 = vst [vmem:[#allocation4_spill] sm:$0xff] %v8887_v7  ;;  %v8889_v8 = vpop.f32.mrb[15].mxu1  ;;  %v8959_v55 = vpop.permute.xlu1 %1289 }
 0x3b9   :  { %14135 = vst [vmem:[#allocation5_spill] sm:$0xff] %v8889_v8  ;;  %v1294_v12 = vpop.permute.xlu0 %1293  ;;  %v13935_v8 = vmov 1326507024  }
 0x3ba   :  { %8262 = vset.pattern.permute.xlu1 %v13920_v59 }
 0x3bb   :  { %v8892_v11 = vpop.f32.mrb[16].mxu1  ;;  %1429 = vperm.xlu1 %8262, %v1107_v0   ;;  %v1153_v0 = vshrl.u32 %v1152_v61, 7 }
 0x3bc   :  { %14136 = vst [vmem:[#allocation6_spill] sm:$0xff] %v8892_v11  ;;  %v8900_v15 = vpop.f32.mrb[17].mxu1  ;;  %v8961_v57 = vpop.permute.xlu1 %1142 }
 0x3bd   :  { %14137 = vst [vmem:[#allocation7_spill] sm:$0xff] %v8900_v15  ;;  %v1154_v6 = vsub.s32 0, %v1153_v0  ;;  %v1158_v9 = vsub.s32 4, %v1153_v0  ;;  %v1310_v19 = vsub.s32 6, %v1153_v0 }
 0x3bf   :  { %v8904_v17 = vpop.f32.mrb[18].mxu1  ;;  %8263 = vset.pattern.permute.xlu1 %v13918_v3  ;;  %v1311_v30 = vrot.slane %v1124_v10, %v1310_v19 }
 0x3c0   :  { %14138 = vst [vmem:[#allocation8_spill] sm:$0xff] %v8904_v17  ;;  %v8907_v18 = vpop.f32.mrb[19].mxu1  ;;  %1416 = vperm.xlu1 %8263, %v1109_v16   ;;  %v14151_v17 = vmov 683565275  }
 0x3c1   :  { %14139 = vst [vmem:[#allocation9_spill] sm:$0xff] %v8907_v18 }
 0x3c3   :  { %v7921_v23 = vpop.f32.mrb[20].mxu1 }
 0x3c4   :  { %v1042_v24 = vadd.f32 %v7921_v23, %v786_v4  ;;  %v1036_v26 = vpop.f32.mrb[21].mxu1  ;;  %v1222_v4 = vsub.s32 1, %v1153_v0  ;;  %v1159_v23 = vrot.slane %v1124_v10, %v1158_v9 }
 0x3c5   :  { %v1037_v27 = vadd.f32 %v1036_v26, %v781_v5  ;;  %v1226_v5 = vsub.s32 5, %v1153_v0  ;;  %v1163_v26 = vrot.slane %v1125_v13, %v1154_v6 }
 0x3c6   :  { %v1401_v29 = vadd.f32 %v1397_v25, %v1042_v24  ;;  %v1223_v20 = vrot.slane %v1124_v10, %v1222_v4  ;;  %v1231_v24 = vrot.slane %v1125_v13, %v1222_v4 }
 0x3c7   :  { %v1400_v31 = vadd.f32 %v1396_v28, %v1037_v27  ;;  %v7924_v32 = vpop.f32.mrb[22].mxu1  ;;  %v1235_v25 = vrot.slane %v1125_v13, %v1226_v5  ;;  %v1167_v27 = vrot.slane %v1125_v13, %v1158_v9  ;;  %v8981_v28 = vpop.permute.xlu0 %1301 }
 0x3c8   :  { %v1052_v34 = vadd.f32 %v7924_v32, %v796_v21  ;;  %v1046_v36 = vpop.f32.mrb[23].mxu1  ;;  %1483 = vperm.xlu1 %8263, %v1401_v29   ;;  %v1227_v21 = vrot.slane %v1124_v10, %v1226_v5  ;;  %v8983_v32 = vrot.slane %v1223_v20, %v1222_v4 }
 0x3c9   :  { %v1047_v37 = vadd.f32 %v1046_v36, %v791_v22  ;;  %1478 = vperm.xlu0 %8260, %v1400_v31   ;;  %v1155_v22 = vrot.slane %v1124_v10, %v1154_v6 }
 0x3ca   :  { %v1403_v39 = vadd.f32 %v1399_v35, %v1052_v34  ;;  %v8985_v33 = vrot.slane %v1227_v21, %v1222_v4  ;;  %v8987_v35 = vrot.slane %v1159_v23, %v1154_v6 }
 0x3cb   :  { %v1402_v40 = vadd.f32 %v1398_v38, %v1047_v37  ;;  %v1175_v34 = vrot.slane %v1155_v22, %v1154_v6  ;;  %v8991_v37 = vrot.slane %v1231_v24, %v1222_v4  ;;  %v8993_v38 = vrot.slane %v1235_v25, %v1222_v4 }
 0x3cc   :  { %v1257_v9 = vmul.f32 %v8985_v33, %v8965_v58 }
 0x3cd   :  { %1488 = vperm.xlu1 %8263, %v1402_v40   ;;  %1493 = vperm.xlu0 %8260, %v1403_v39   ;;  %v1263_v61 = vmul.f32 %v8993_v38, %v1210_v54  ;;  %v1258_v25 = vmul.f32 %v8991_v37, %v8965_v58 }
 0x3d1   :  { %8265 = vset.pattern.permute.xlu1 %v13920_v59  ;;  %8264 = vset.pattern.permute.xlu0 %v13920_v59 }
 0x3d2   :  { %1497 = vperm.xlu1 %8265, %v1400_v31   ;;  %1433 = vperm.xlu0 %8264, %v8880_v56   ;;  %v8963_v56 = vpop.permute.xlu1 %1147 }
 0x3d6   :  { %1501 = vperm.xlu1 %8265, %v1401_v29   ;;  %1437 = vperm.xlu0 %8264, %v1109_v16   ;;  %v8967_v62 = vpop.permute.xlu1 %1217  ;;  %v1306_v16 = vsub.s32 2, %v1153_v0  ;;  %v1256_v0 = vmul.f32 %v8983_v32, %v8965_v58 }
 0x3d8   :  { %v1307_v29 = vrot.slane %v1124_v10, %v1306_v16  ;;  %v1315_v31 = vrot.slane %v1125_v13, %v1306_v16 }
 0x3da   :  { %1441 = vperm.xlu1 %8265, %v1110_v1   ;;  %1505 = vperm.xlu0 %8264, %v1402_v40   ;;  %v8971_v1 = vpop.permute.xlu1 %1297  ;;  %v8995_v40 = vrot.slane %v1167_v27, %v1154_v6  ;;  %v9032_v27 = vmul.f32 %v8983_v32, %v8969_v60 }
 0x3de   :  { %1509 = vperm.xlu1 %8265, %v1403_v39   ;;  %8266 = vset.pattern.permute.xlu0 %v13918_v3  ;;  %v1183_v39 = vrot.slane %v1163_v26, %v1154_v6  ;;  %v9028_v26 = vmul.f32 %v8993_v38, %v8965_v58 }
 0x3df   :  { %740 = vperm.xlu0 %8266, %v698_v41   ;;  %v1319_v41 = vrot.slane %v1125_v13, %v1310_v19 }
 0x3e1   :  { %v9011_v5 = vrot.slane %v1319_v41, %v1306_v16 }
 0x3e2   :  { %8267 = vset.pattern.permute.xlu1 %v13918_v3 }
 0x3e3   :  { %745 = vperm.xlu1 %8267, %v699_v42   ;;  %755 = vperm.xlu0 %8266, %v701_v43   ;;  %v1133_v42 = vpop.permute.xlu0 %1132  ;;  %v8997_v43 = vrot.slane %v1307_v29, %v1306_v16  ;;  %v1347_v24 = vmul.f32 %v9011_v5, %v1294_v12  ;;  %v9036_v29 = vmul.f32 %v8985_v33, %v8969_v60 }
 0x3e4   :  { %v1188_v4 = vmul.f32 %v1175_v34, %v1133_v42  ;;  %v1189_v22 = vmul.f32 %v8987_v35, %v1133_v42 }
 0x3e5   :  { %v1344_v19 = vmul.f32 %v8997_v43, %v1294_v12 }
 0x3e6   :  { %v1272_v23 = vadd.f32 %v1256_v0, %v1188_v4  ;;  %v9066_v4 = vmul.f32 %v1183_v39, %v8961_v57 }
 0x3e7   :  { %750 = vperm.xlu1 %8267, %v700_v44   ;;  %805 = vperm.xlu0 %8266, %v711_v45   ;;  %v8999_v44 = vrot.slane %v1311_v30, %v1306_v16  ;;  %v9001_v45 = vrot.slane %v1315_v31, %v1306_v16  ;;  %v1340_v16 = vmul.f32 %v8997_v43, %v8959_v55 }
 0x3e8   :  { %v9040_v30 = vmul.f32 %v8991_v37, %v8969_v60  ;;  %v9046_v31 = vmul.f32 %v8993_v38, %v8969_v60  ;;  %v9061_v60 = vmul.f32 %v8987_v35, %v8961_v57  ;;  %14143 = vst [vmem:[#allocation13_spill] sm:$0xff] %v9066_v4 }
 0x3e9   :  { %14140 = vst [vmem:[#allocation10_spill] sm:$0xff] %v9001_v45 }
 0x3ea   :  { %14141 = vst [vmem:[#allocation11_spill] sm:$0xff] %v9040_v30  ;;  %14142 = vst [vmem:[#allocation12_spill] sm:$0xff] %v9046_v31 }
 0x3eb   :  { %800 = vperm.xlu1 %8267, %v710_v46   ;;  %3416 = vperm.xlu0 %8266, %v7572_v47   ;;  %v1192_v46 = vmul.f32 %v1175_v34, %v1138_v53  ;;  %v1193_v47 = vmul.f32 %v8987_v35, %v1138_v53 }
 0x3ef   :  { %3411 = vperm.xlu1 %8267, %v7571_v48   ;;  %815 = vperm.xlu0 %8266, %v713_v49   ;;  %v1260_v48 = vmul.f32 %v8983_v32, %v1210_v54  ;;  %v1261_v49 = vmul.f32 %v8985_v33, %v1210_v54 }
 0x3f1   :  { %v1276_v10 = vadd.f32 %v1260_v48, %v1192_v46  ;;  %v1277_v13 = vadd.f32 %v1261_v49, %v1193_v47  ;;  %v1273_v48 = vadd.f32 %v1257_v9, %v1189_v22  ;;  %v1341_v49 = vmul.f32 %v8999_v44, %v8959_v55 }
 0x3f2   :  { %v9070_v9 = vmul.f32 %v8995_v40, %v8961_v57  ;;  %v9085_v22 = vmul.f32 %v8987_v35, %v8963_v56  ;;  %v9101_v35 = vmul.f32 %v8983_v32, %v8967_v62 }
 0x3f3   :  { %810 = vperm.xlu1 %8267, %v712_v50   ;;  %3426 = vperm.xlu0 %8266, %v7574_v51   ;;  %v1194_v50 = vmul.f32 %v1183_v39, %v1138_v53  ;;  %v1195_v51 = vmul.f32 %v8995_v40, %v1138_v53  ;;  %v1345_v53 = vmul.f32 %v8999_v44, %v1294_v12 }
 0x3f4   :  { %v1360_v58 = vadd.f32 %v1344_v19, %v1276_v10  ;;  %14144 = vst [vmem:[#allocation14_spill] sm:$0xff] %v9070_v9  ;;  %v1190_v10 = vmul.f32 %v1183_v39, %v1133_v42 }
 0x3f5   :  { %v1279_v21 = vadd.f32 %v1263_v61, %v1195_v51  ;;  %v1361_v41 = vadd.f32 %v1345_v53, %v1277_v13  ;;  %v9074_v53 = vmul.f32 %v8995_v40, %v1133_v42  ;;  %v9094_v42 = vmul.f32 %v8995_v40, %v8963_v56 }
 0x3f7   :  { %3421 = vperm.xlu1 %8267, %v7573_v52   ;;  %v1262_v52 = vmul.f32 %v8991_v37, %v1210_v54  ;;  %v1346_v54 = vmul.f32 %v9001_v45, %v1294_v12  ;;  %v9054_v51 = vadd.f32 %v1347_v24, %v1279_v21  ;;  %14148 = vst [vmem:[#allocation18_spill] sm:$0xff] %v9094_v42 }
 0x3f9   :  { %v1278_v20 = vadd.f32 %v1262_v52, %v1194_v50  ;;  %v1356_v50 = vadd.f32 %v1340_v16, %v1272_v23  ;;  %v9057_v52 = vmul.f32 %v1175_v34, %v8961_v57  ;;  %v9088_v57 = vmul.f32 %v1183_v39, %v8963_v56 }
 0x3fa   :  { %v1357_v23 = vadd.f32 %v1341_v49, %v1273_v48  ;;  %v9105_v39 = vmul.f32 %v8985_v33, %v8967_v62 }
 0x3fb   :  { %v9050_v47 = vadd.f32 %v1346_v54, %v1278_v20  ;;  %v9077_v20 = vmul.f32 %v1175_v34, %v8963_v56  ;;  %14146 = vst [vmem:[#allocation16_spill] sm:$0xff] %v9088_v57  ;;  %v9111_v56 = vmul.f32 %v8991_v37, %v8967_v62  ;;  %v9125_v37 = vadd.f32 %v1258_v25, %v1190_v10 }
 0x3fd   :  { %14149 = vst [vmem:[#allocation19_spill] sm:$0xff] %v9111_v56 }
 0x431   :  { %v8979_v14 = vpop.permute.xlu1 %1411 }
 0x432   :  { %v1464_v61 = vmul.f32 %v8979_v14, %v1360_v58  ;;  %v1465_v0 = vmul.f32 %v8979_v14, %v1361_v41 }
 0x435   :  { %v8989_v36 = vpop.permute.xlu1 %1406  ;;  %v9048_v46 = vpop.permute.xlu0 %1421 }
 0x436   :  { %v1460_v13 = vmul.f32 %v8989_v36, %v1356_v50  ;;  %v1461_v41 = vmul.f32 %v8989_v36, %v1357_v23 }
 0x43a   :  { %v9013_v6 = vpop.permute.xlu1 %1429 }
 0x43f   :  { %v9042_v12 = vpop.permute.xlu1 %1416 }
 0x447   :  { %v1484_v19 = vpop.permute.xlu1 %1483 }
 0x448   :  { %v9079_v21 = vadd.f32 %v1484_v19, %v1464_v61  ;;  %v9081_v14 = vadd.f32 %v1484_v19, %v1465_v0  ;;  %v1479_v54 = vpop.permute.xlu0 %1478  ;;  %v9123_v0 = vmul.f32 %v8993_v38, %v8967_v62 }
 0x449   :  { %v9090_v16 = vadd.f32 %v1479_v54, %v1460_v13  ;;  %v9118_v33 = vadd.f32 %v1479_v54, %v1461_v41 }
 0x44a   :  { %14145 = vst [vmem:[#allocation15_spill] sm:$0xff] %v9079_v21  ;;  %v13922_v34 = vand.u32 2147483647, %v9079_v21  ;;  %v1963_v24 = vand.u32 2139095040, %v9079_v21  ;;  %v13923_v58 = vand.u32 2147483647, %v9081_v14 }
 0x44b   :  { %14147 = vst [vmem:[#allocation17_spill] sm:$0xff] %v9090_v16  ;;  %v2067_v48 = vand.u32 2139095040, %v9081_v14  ;;  %v1547_v50 = vand.u32 2139095040, %v9090_v16  ;;  %v13924_v36 = vand.u32 2147483647, %v9090_v16  ;;  %14150 = vst [vmem:[#allocation20_spill] sm:$0xff] %v9123_v0 }
 0x44c   :  { %v1964_v40 = vshrl.u32 %v1963_v24, 23  ;;  %v1967_v49 = vand.u32 8388607, %v13922_v34  ;;  %v2071_v61 = vand.u32 8388607, %v13923_v58  ;;  %v1651_v41 = vand.u32 2139095040, %v9118_v33 }
 0x44d   :  { %v2068_v32 = vshrl.u32 %v2067_v48, 23  ;;  %v1548_v19 = vshrl.u32 %v1547_v50, 23  ;;  %v9129_v54 = vand.u32 8388607, %v13924_v36  ;;  %v13927_v36 = vmov 2131351028  }
 0x44e   :  { %v7511_v13 = vadd.s32 4294967169, %v1964_v40  ;;  %v1968_v23 = vor.u32 8388608, %v1967_v49  ;;  %v2072_v3 = vor.u32 8388608, %v2071_v61 }
 0x44f   :  { %v7515_v24 = vadd.s32 4294967169, %v2068_v32  ;;  %v7495_v48 = vadd.s32 4294967169, %v1548_v19 }
 0x450   :  { %v1970_v59 = vadd.s32 1, %v7511_v13  ;;  %v9132_v38 = vshll.u32 %v1968_v23, 8  ;;  %v9134_v25 = vshll.u32 %v2072_v3, 8  ;;  %v9139_v13 = vshrl.u32 %v1651_v41, 23 }
 0x451   :  { %v2074_v34 = vadd.s32 1, %v7515_v24  ;;  %v1554_v58 = vadd.s32 1, %v7495_v48  ;;  %v13925_v24 = vmov 683565275   ;;  %v13931_v23 = vmov 2475754826  }
 0x452   :  { %vm1971_vm0 = vcmp.gt.s32.totalorder %v1970_v59, 0 }
 0x453   :  { %v1972_v62 = vsel %vm1971_vm0, %v1970_v59, 0  ;;  %vm2075_vm10 = vcmp.gt.s32.totalorder %v2074_v34, 0  ;;  %vm1555_vm11 = vcmp.gt.s32.totalorder %v1554_v58, 0 }
 0x454   :  { %v1973_v10 = vshrl.u32 %v1972_v62, 5  ;;  %v1974_v40 = vand.u32 31, %v1972_v62  ;;  %v2076_v49 = vsel %vm2075_vm10, %v2074_v34, 0  ;;  %v9143_v3 = vsel %vm1555_vm11, %v1554_v58, 0 }
 0x455   :  { %v9136_v50 = vshrl.u32 %v2076_v49, 5  ;;  %v2078_v32 = vand.u32 31, %v2076_v49  ;;  %v13929_v62 = vmov 2102212464   ;;  %v13933_v49 = vmov 920167782  }
 0x456   :  { %v1975_v19 = vsub.s32 32, %v1974_v40  ;;  %v1977_v59 = vshll.u32 %v13925_v24, %v1974_v40  ;;  %v1980_v48 = vshll.u32 %v13931_v23, %v1974_v40  ;;  %v1983_v34 = vshll.u32 %v13927_v36, %v1974_v40 }
 0x457   :  { %v1986_v18 = vshll.u32 %v13929_v62, %v1974_v40  ;;  %v1989_v61 = vshll.u32 %v13933_v49, %v1974_v40  ;;  %vm1992_vm12 = vcmp.lt.s32.totalorder %v1973_v10, 1  ;;  %vm1993_vm13 = vcmp.lt.s32.totalorder %v1973_v10, 2 }
 0x458   :  { %v1978_v41 = vshrl.u32 %v13931_v23, %v1975_v19  ;;  %v1981_v11 = vshrl.u32 %v13927_v36, %v1975_v19  ;;  %v1984_v24 = vshrl.u32 %v13929_v62, %v1975_v19  ;;  %v1976_v58 = vshrl.u32 %v14151_v17, %v1975_v19 }
 0x459   :  { %v1987_v15 = vshrl.u32 %v13933_v49, %v1975_v19  ;;  %v1990_v7 = vshrl.u32 %v13935_v8, %v1975_v19  ;;  %vm1994_vm14 = vcmp.lt.s32.totalorder %v1973_v10, 3  ;;  %v2079_v40 = vsub.s32 32, %v2078_v32 }
 0x45a   :  { %v1979_v63 = vor.u32 %v1978_v41, %v1977_v59  ;;  %v1982_v2 = vor.u32 %v1981_v11, %v1980_v48  ;;  %v1985_v0 = vor.u32 %v1984_v24, %v1983_v34  ;;  %vm1995_vm15 = vcmp.lt.s32.totalorder %v1973_v10, 4 }
 0x45b   :  { %v1988_v42 = vor.u32 %v1987_v15, %v1986_v18  ;;  %v1991_v56 = vor.u32 %v1990_v7, %v1989_v61  ;;  %v2081_v36 = vshll.u32 %v14151_v17, %v2078_v32  ;;  %v14152_v59 = vmov 2475754826  }
 0x45c   :  { %v1996_v62 = vsel %vm1992_vm12, %v1976_v58, %v1979_v63  ;;  %v1997_v23 = vsel %vm1995_vm15, %v1985_v0, 2102212464  ;;  %v2000_v57 = vsel %vm1992_vm12, %v1979_v63, %v1982_v2  ;;  %v2004_v49 = vsel %vm1992_vm12, %v1982_v2, %v1985_v0 }
 0x45d   :  { %v1998_v31 = vsel %vm1994_vm14, %v1982_v2, %v1997_v23  ;;  %v2001_v19 = vsel %vm1995_vm15, %v1988_v42, 920167782  ;;  %v2005_v8 = vsel %vm1995_vm15, %v1991_v56, 1326507024  ;;  %v2084_v11 = vshll.u32 %v14152_v59, %v2078_v32 }
 0x45e   :  { %v2002_v24 = vsel %vm1994_vm14, %v1985_v0, %v2001_v19  ;;  %v2006_v7 = vsel %vm1994_vm14, %v1988_v42, %v2005_v8  ;;  %v2080_v15 = vshrl.u32 %v14151_v17, %v2079_v40  ;;  %v2082_v18 = vshrl.u32 %v14152_v59, %v2079_v40 }
 0x45f   :  { %v1999_v61 = vsel %vm1993_vm13, %v1996_v62, %v1998_v31  ;;  %v2003_v63 = vsel %vm1993_vm13, %v2000_v57, %v2002_v24  ;;  %v2007_v48 = vsel %vm1993_vm13, %v2004_v49, %v2006_v7  ;;  %v14153_v34 = vmov 2131351028  }
 0x460   :  { %v2085_v2 = vshrl.u32 %v14153_v34, %v2079_v40  ;;  %v9169_v56 = vmul.u32.u64.low %v9132_v38, %v2007_v48  ;;  %v9170_v23 = vmul.u32.u64.high %v9132_v38, %v2007_v48, %v9169_v56  ;;  %v2083_v8 = vor.u32 %v2082_v18, %v2081_v36 }
 0x461   :  { %v9173_v0 = vmul.u32.u64.low %v9132_v38, %v2003_v63  ;;  %v9174_v41 = vmul.u32.u64.high %v9132_v38, %v2003_v63, %v9173_v0  ;;  %v2087_v58 = vshll.u32 %v14153_v34, %v2078_v32  ;;  %v14154_v31 = vmov 2102212464  }
 0x462   :  { %v2086_v42 = vor.u32 %v2085_v2, %v2084_v11  ;;  %v2088_v62 = vshrl.u32 %v14154_v31, %v2079_v40  ;;  %v2015_v57 = vmul.u32 %v9132_v38, %v1999_v61  ;;  %v2090_v10 = vshll.u32 %v14154_v31, %v2078_v32 }
 0x463   :  { %v14155_v49 = vmov 920167782   ;;  %v14156_v24 = vmov 1326507024   ;;  %vm2096_vm1 = vcmp.lt.s32.totalorder %v9136_v50, 1  ;;  %vm2097_vm2 = vcmp.lt.s32.totalorder %v9136_v50, 2 }
 0x464   :  { %v2091_v19 = vshrl.u32 %v14155_v49, %v2079_v40  ;;  %v2094_v7 = vshrl.u32 %v14156_v24, %v2079_v40  ;;  %v2089_v48 = vor.u32 %v2088_v62, %v2087_v58  ;;  %v2093_v56 = vshll.u32 %v14155_v49, %v2078_v32 }
 0x465   :  { %vm2017_vm3 = vc.u32 %v9170_v23, %v9173_v0  ;;  %v2018_v36 = vadd.s32 1, %v9174_v41  ;;  %vm2098_vm4 = vcmp.lt.s32.totalorder %v9136_v50, 3  ;;  %vm2099_vm5 = vcmp.lt.s32.totalorder %v9136_v50, 4 }
 0x466   :  { %v2092_v11 = vor.u32 %v2091_v19, %v2090_v10  ;;  %v2095_v38 = vor.u32 %v2094_v7, %v2093_v56  ;;  %v2100_v18 = vsel %vm2096_vm1, %v2080_v15, %v2083_v8  ;;  %v2104_v40 = vsel %vm2096_vm1, %v2083_v8, %v2086_v42 }
 0x467   :  { %v2019_v61 = vsel %vm2017_vm3, %v2018_v36, %v9174_v41  ;;  %v2101_v32 = vsel %vm2099_vm5, %v2089_v48, 2102212464  ;;  %v2108_v2 = vsel %vm2096_vm1, %v2086_v42, %v2089_v48  ;;  %v9197_v7 = vshrl.u32 %v9143_v3, 5 }
 0x468   :  { %v2105_v63 = vsel %vm2099_vm5, %v2092_v11, 920167782  ;;  %v2020_v58 = vadd.s32 %v2019_v61, %v2015_v57  ;;  %v2102_v62 = vsel %vm2098_vm4, %v2086_v42, %v2101_v32  ;;  %v2109_v30 = vsel %vm2099_vm5, %v2095_v38, 1326507024 }
 0x469   :  { %v2106_v9 = vsel %vm2098_vm4, %v2089_v48, %v2105_v63  ;;  %v2103_v4 = vsel %vm2097_vm2, %v2100_v18, %v2102_v62  ;;  %v2110_v19 = vsel %vm2098_vm4, %v2092_v11, %v2109_v30  ;;  %v9208_v42 = vadd.f32 %v9028_v26, %v9074_v53 }
 0x46a   :  { %v2107_v10 = vsel %vm2097_vm2, %v2104_v40, %v2106_v9  ;;  %v2021_v15 = vadd.s32 536870912, %v2020_v58  ;;  %v2111_v41 = vsel %vm2097_vm2, %v2108_v2, %v2110_v19  ;;  %v1558_v30 = vand.u32 31, %v9143_v3 }
 0x46b   :  { %v9202_v8 = vmul.u32.u64.low %v9134_v25, %v2107_v10  ;;  %v9203_v57 = vmul.u32.u64.high %v9134_v25, %v2107_v10, %v9202_v8  ;;  %v9211_v48 = vmul.u32.u64.low %v9134_v25, %v2111_v41  ;;  %v9212_v9 = vmul.u32.u64.high %v9134_v25, %v2111_v41, %v9211_v48 }
 0x46c   :  { %v9217_v56 = vmul.f32 %v9001_v45, %v8959_v55  ;;  %v9219_v50 = vshrl.u32 %v2021_v15, 30  ;;  %v14157_v36 = vor.u32 8388608, %v9129_v54  ;;  %v7499_v38 = vadd.s32 4294967169, %v9139_v13 }
 0x46d   :  { %v2119_v26 = vmul.u32 %v9134_v25, %v2103_v4  ;;  %v1559_v53 = vsub.s32 32, %v1558_v30  ;;  %vm1576_vm6 = vcmp.lt.s32.totalorder %v9197_v7, 1  ;;  %vm1578_vm7 = vcmp.lt.s32.totalorder %v9197_v7, 3 }
 0x46e   :  { %v9223_v11 = vshll.u32 %v14157_v36, 8  ;;  %v2023_v3 = vshll.u32 %v9219_v50, 30  ;;  %v2122_v18 = vadd.s32 1, %v9203_v57  ;;  %v1561_v40 = vshll.u32 %v14151_v17, %v1558_v30 }
 0x46f   :  { %v1564_v61 = vshll.u32 %v14152_v59, %v1558_v30  ;;  %vm1577_vm8 = vcmp.lt.s32.totalorder %v9197_v7, 2  ;;  %vm2121_vm9 = vc.u32 %v9212_v9, %v9202_v8  ;;  %v1562_v4 = vshrl.u32 %v14152_v59, %v1559_v53 }
 0x470   :  { %v1567_v54 = vshll.u32 %v14153_v34, %v1558_v30  ;;  %v1570_v25 = vshll.u32 %v14154_v31, %v1558_v30  ;;  %v9239_v13 = vsub.s32 %v2020_v58, %v2023_v3  ;;  %v2123_v32 = vsel %vm2121_vm9, %v2122_v18, %v9203_v57 }
 0x471   :  { %v1560_v63 = vshrl.u32 %v14151_v17, %v1559_v53  ;;  %v1565_v2 = vshrl.u32 %v14153_v34, %v1559_v53  ;;  %v2124_v62 = vadd.s32 %v2123_v32, %v2119_v26  ;;  %v1563_v10 = vor.u32 %v1562_v4, %v1561_v40 }
 0x472   :  { %v1568_v19 = vshrl.u32 %v14154_v31, %v1559_v53  ;;  %v1571_v15 = vshrl.u32 %v14155_v49, %v1559_v53  ;;  %v2026_v41 = vsub.s32 0, %v9239_v13  ;;  %v1573_v36 = vshll.u32 %v14155_v49, %v1558_v30 }
 0x473   :  { %v1566_v48 = vor.u32 %v1565_v2, %v1564_v61  ;;  %v1574_v58 = vshrl.u32 %v14156_v24, %v1559_v53  ;;  %v2125_v3 = vadd.s32 536870912, %v2124_v62  ;;  %vm1579_vm0 = vcmp.lt.s32.totalorder %v9197_v7, 4 }
 0x474   :  { %v1569_v45 = vor.u32 %v1568_v19, %v1567_v54  ;;  %v1572_v57 = vor.u32 %v1571_v15, %v1570_v25  ;;  %v7512_v18 = vmin.u32 %v2026_v41, %v9239_v13  ;;  %v1580_v40 = vsel %vm1576_vm6, %v1560_v63, %v1563_v10 }
 0x475   :  { %v1575_v26 = vor.u32 %v1574_v58, %v1573_v36  ;;  %v1584_v4 = vsel %vm1576_vm6, %v1563_v10, %v1566_v48  ;;  %v9255_v32 = vshrl.u32 %v2125_v3, 30  ;;  %v1343_v63 = vmul.f32 %v9011_v5, %v8959_v55 }
 0x476   :  { %v1581_v61 = vsel %vm1579_vm0, %v1569_v45, 2102212464  ;;  %v1585_v30 = vsel %vm1579_vm0, %v1572_v57, 920167782  ;;  %v1588_v53 = vsel %vm1576_vm6, %v1566_v48, %v1569_v45  ;;  %v2028_v54 = vclz %v7512_v18 }
 0x477   :  { %v1582_v25 = vsel %vm1578_vm7, %v1566_v48, %v1581_v61  ;;  %v1586_v2 = vsel %vm1578_vm7, %v1569_v45, %v1585_v30  ;;  %v1589_v19 = vsel %vm1579_vm0, %v1575_v26, 1326507024  ;;  %v2127_v10 = vshll.u32 %v9255_v32, 30 }
 0x478   :  { %v1587_v15 = vsel %vm1577_vm8, %v1584_v4, %v1586_v2  ;;  %v1590_v41 = vsel %vm1578_vm7, %v1572_v57, %v1589_v19  ;;  %v7513_v36 = vadd.s32 4294967294, %v2028_v54  ;;  %v1583_v55 = vsel %vm1577_vm8, %v1580_v40, %v1582_v25 }
 0x479   :  { %v1591_v58 = vsel %vm1577_vm8, %v1588_v53, %v1590_v41  ;;  %v9273_v48 = vmul.u32.u64.low %v9223_v11, %v1587_v15  ;;  %v9274_v3 = vmul.u32.u64.high %v9223_v11, %v1587_v15, %v9273_v48  ;;  %v9277_v45 = vsub.s32 %v2124_v62, %v2127_v10 }
 0x47a   :  { %v9282_v18 = vmul.u32.u64.low %v9223_v11, %v1591_v58  ;;  %v9283_v26 = vmul.u32.u64.high %v9223_v11, %v1591_v58, %v9282_v18  ;;  %v1284_v57 = vadd.f32 %v9101_v35, %v9077_v20  ;;  %v1285_v4 = vadd.f32 %v9105_v39, %v9085_v22 }
 0x47b   :  { %vm7514_vm10 = vcmp.lt.s32.totalorder %v7513_v36, 0  ;;  %v1658_v61 = vadd.s32 1, %v7499_v38  ;;  %v1280_v30 = vadd.f32 %v9032_v27, %v9057_v52  ;;  %v1281_v62 = vadd.f32 %v9036_v29, %v9061_v60 }
 0x47c   :  { %v9293_v7 = vsel %vm7514_vm10, 0, %v7513_v36  ;;  %v2130_v40 = vsub.s32 0, %v9277_v45  ;;  %v1348_v53 = vmul.f32 %v8997_v43, %v8971_v1  ;;  %v1349_v20 = vmul.f32 %v8999_v44, %v8971_v1 }
 0x47d   :  { %v1599_v22 = vmul.u32 %v9223_v11, %v1583_v55  ;;  %v1602_v35 = vadd.s32 1, %v9274_v3  ;;  %v2036_v39 = vsub.s32 4294967266, %v9293_v7  ;;  %vm1601_vm11 = vc.u32 %v9283_v26, %v9273_v48  ;;  %v9319_v55 = vpop.permute.xlu1 %1488 }
 0x47e   :  { %v7516_v27 = vmin.u32 %v2130_v40, %v9277_v45  ;;  %vm1659_vm12 = vcmp.gt.s32.totalorder %v1658_v61, 0  ;;  %v1352_v29 = vmul.f32 %v8997_v43, %v8981_v28  ;;  %v13939_v60 = vand.u32 2147483647, %v9118_v33 }
 0x47f   :  { %v1603_v52 = vsel %vm1601_vm11, %v1602_v35, %v9274_v3  ;;  %v1660_v38 = vsel %vm1659_vm12, %v1658_v61, 0  ;;  %v1353_v11 = vmul.f32 %v8999_v44, %v8981_v28  ;;  %v9314_v19 = vadd.f32 %v9217_v56, %v9125_v37 }
 0x480   :  { %v2132_v54 = vclz %v7516_v27  ;;  %v1604_v25 = vadd.s32 %v1603_v52, %v1599_v22  ;;  %v1662_v2 = vand.u32 31, %v1660_v38  ;;  %v9317_v10 = vadd.f32 %v1343_v63, %v9208_v42 }
 0x481   :  { %v1364_v15 = vadd.f32 %v1348_v53, %v1280_v30  ;;  %v1365_v43 = vadd.f32 %v1349_v20, %v1281_v62  ;;  %v2037_v41 = vadd.s32 127, %v2036_v39  ;;  %v9321_v18 = vadd.f32 %v1352_v29, %v1284_v57 }
 0x482   :  { %v7517_v36 = vadd.s32 4294967294, %v2132_v54  ;;  %v1605_v58 = vadd.s32 536870912, %v1604_v25  ;;  %v1663_v3 = vsub.s32 32, %v1662_v2  ;;  %v2032_v61 = vsub.s32 32, %v9293_v7 }
 0x483   :  { %v1468_v44 = vmul.f32 %v9042_v12, %v1364_v15  ;;  %v1655_v37 = vand.u32 8388607, %v13939_v60  ;;  %v9327_v56 = vadd.f32 %v1353_v11, %v1285_v4  ;;  %v9330_v42 = vmul.f32 %v9042_v12, %v1365_v43 }
 0x484   :  { %vm7518_vm13 = vcmp.lt.s32.totalorder %v7517_v36, 0  ;;  %v9332_v63 = vshrl.u32 %v1605_v58, 30  ;;  %v2016_v30 = vadd.s32 %v9173_v0, %v9170_v23  ;;  %v2120_v57 = vadd.s32 %v9202_v8, %v9212_v9 }
 0x485   :  { %v9338_v62 = vsel %vm7518_vm13, 0, %v7517_v36  ;;  %v9341_v40 = vadd.f32 %v9319_v55, %v1468_v44  ;;  %v2038_v53 = vshll.u32 %v2037_v41, 23  ;;  %v1666_v12 = vshrl.u32 %v14152_v59, %v1663_v3 }
 0x486   :  { %v1607_v4 = vshll.u32 %v9332_v63, 30  ;;  %v1669_v20 = vshrl.u32 %v14153_v34, %v1663_v3  ;;  %v2033_v22 = vshll.u32 %v9239_v13, %v9293_v7  ;;  %v2034_v35 = vshrl.u32 %v2016_v30, %v2032_v61 }
 0x487   :  { %14158 = vst [vmem:[#allocation21_spill] sm:$0xff] %v9341_v40  ;;  %v1656_v23 = vor.u32 8388608, %v1655_v37  ;;  %v1672_v0 = vshrl.u32 %v14154_v31, %v1663_v3  ;;  %v2140_v8 = vsub.s32 4294967266, %v9338_v62  ;;  %v1665_v39 = vshll.u32 %v14151_v17, %v1662_v2 }
 0x488   :  { %v9350_v9 = vsub.s32 %v1604_v25, %v1607_v4  ;;  %v1668_v27 = vshll.u32 %v14152_v59, %v1662_v2  ;;  %v1661_v29 = vshrl.u32 %v1660_v38, 5  ;;  %v1671_v52 = vshll.u32 %v14153_v34, %v1662_v2 }
 0x489   :  { %v1674_v11 = vshll.u32 %v14154_v31, %v1662_v2  ;;  %v1675_v54 = vshrl.u32 %v14155_v49, %v1663_v3  ;;  %v2039_v13 = vor.u32 4788187, %v2038_v53  ;;  %v1667_v15 = vor.u32 %v1666_v12, %v1665_v39 }
 0x48a   :  { %v1610_v7 = vsub.s32 0, %v9350_v9  ;;  %v1670_v43 = vor.u32 %v1669_v20, %v1668_v27  ;;  %v1673_v41 = vor.u32 %v1672_v0, %v1671_v52  ;;  %v1677_v25 = vshll.u32 %v14155_v49, %v1662_v2 }
 0x48b   :  { %v1676_v36 = vor.u32 %v1675_v54, %v1674_v11  ;;  %v1678_v58 = vshrl.u32 %v14156_v24, %v1663_v3  ;;  %v2035_v44 = vor.u32 %v2034_v35, %v2033_v22  ;;  %v2141_v61 = vadd.s32 127, %v2140_v8 }
 0x48c   :  { %v7496_v38 = vmin.u32 %v1610_v7, %v9350_v9  ;;  %v13941_v37 = vand.u32 2147483647, %v9341_v40  ;;  %v2136_v30 = vsub.s32 32, %v9338_v62  ;;  %v1664_v53 = vshrl.u32 %v14151_v17, %v1663_v3 }
 0x48d   :  { %v1679_v4 = vor.u32 %v1678_v58, %v1677_v25  ;;  %v1696_v60 = vshll.u32 %v1656_v23, 8  ;;  %v2040_v12 = vand.u32 2147483647, %v2039_v13  ;;  %vm1680_vm14 = vcmp.lt.s32.totalorder %v1661_v29, 1 }
 0x48e   :  { %v1612_v20 = vclz %v7496_v38  ;;  %vm1683_vm15 = vcmp.lt.s32.totalorder %v1661_v29, 4  ;;  %vm1682_vm1 = vcmp.lt.s32.totalorder %v1661_v29, 3  ;;  %v1688_v0 = vsel %vm1680_vm14, %v1667_v15, %v1670_v43 }
 0x48f   :  { %v1685_v2 = vsel %vm1683_vm15, %v1673_v41, 2102212464  ;;  %v1689_v39 = vsel %vm1683_vm15, %v1676_v36, 920167782  ;;  %v2142_v22 = vshll.u32 %v2141_v61, 23  ;;  %vm1681_vm2 = vcmp.lt.s32.totalorder %v1661_v29, 2 }
 0x490   :  { %v7497_v35 = vadd.s32 4294967294, %v1612_v20  ;;  %v1690_v8 = vsel %vm1682_vm1, %v1673_v41, %v1689_v39  ;;  %v2138_v27 = vshrl.u32 %v2120_v57, %v2136_v30  ;;  %v1692_v11 = vsel %vm1680_vm14, %v1670_v43, %v1673_v41 }
 0x491   :  { %v1691_v52 = vsel %vm1681_vm2, %v1688_v0, %v1690_v8  ;;  %v1693_v54 = vsel %vm1683_vm15, %v1679_v4, 1326507024  ;;  %v1684_v3 = vsel %vm1680_vm14, %v1664_v53, %v1667_v15  ;;  %v1686_v23 = vsel %vm1682_vm1, %v1670_v43, %v1685_v2 }
 0x492   :  { %vm7498_vm3 = vcmp.lt.s32.totalorder %v7497_v35, 0  ;;  %v1694_v13 = vsel %vm1682_vm1, %v1676_v36, %v1693_v54  ;;  %v9366_v58 = vmul.u32.u64.low %v1696_v60, %v1691_v52  ;;  %v9367_v38 = vmul.u32.u64.high %v1696_v60, %v1691_v52, %v9366_v58 }
 0x493   :  { %v1615_v7 = vsel %vm7498_vm3, 0, %v7497_v35  ;;  %v1695_v25 = vsel %vm1681_vm2, %v1692_v11, %v1694_v13  ;;  %v2137_v61 = vshll.u32 %v9277_v45, %v9338_v62  ;;  %v2143_v20 = vor.u32 4788187, %v2142_v22 }
 0x494   :  { %v1616_v57 = vsub.s32 32, %v1615_v7  ;;  %v1620_v30 = vsub.s32 4294967266, %v1615_v7  ;;  %v1600_v41 = vadd.s32 %v9273_v48, %v9283_v26  ;;  %v2379_v43 = vand.u32 2139095040, %v9341_v40 }
 0x495   :  { %v9374_v4 = vmul.u32.u64.low %v1696_v60, %v1695_v25  ;;  %v9375_v15 = vmul.u32.u64.high %v1696_v60, %v1695_v25, %v9374_v4  ;;  %v2042_v36 = vcvt.s32.f32 %v2035_v44  ;;  %v2139_v53 = vor.u32 %v2138_v27, %v2137_v61 }
 0x496   :  { %v1621_v2 = vadd.s32 127, %v1620_v30  ;;  %v1687_v0 = vsel %vm1681_vm2, %v1684_v3, %v1686_v23  ;;  %v9381_v39 = vmul.f32 %v9048_v46, %v9321_v18  ;;  %v1706_v45 = vadd.s32 1, %v9367_v38 }
 0x497   :  { %v9386_v62 = vadd.f32 %v9319_v55, %v9330_v42  ;;  %v2380_v48 = vshrl.u32 %v2379_v43, 23  ;;  %v2043_v26 = vmul.f32 %v2042_v36, %v2040_v12  ;;  %v2144_v22 = vand.u32 2147483647, %v2143_v20 }
 0x498   :  { %v1618_v35 = vshrl.u32 %v1600_v41, %v1616_v57  ;;  %v1622_v8 = vshll.u32 %v1621_v2, 23  ;;  %v1703_v44 = vmul.u32 %v1696_v60, %v1687_v0  ;;  %vm1705_vm4 = vc.u32 %v9375_v15, %v9366_v58 }
 0x499   :  { %14159 = vst [vmem:[#allocation22_spill] sm:$0xff] %v9386_v62  ;;  %v7527_v29 = vadd.s32 4294967169, %v2380_v48  ;;  %v2383_v18 = vand.u32 8388607, %v13941_v37  ;;  %v2146_v27 = vcvt.s32.f32 %v2139_v53  ;;  %v1617_v52 = vshll.u32 %v9350_v9, %v1615_v7 }
 0x49a   :  { %v1623_v11 = vor.u32 4788187, %v1622_v8  ;;  %v1707_v55 = vsel %vm1705_vm4, %v1706_v45, %v9367_v38  ;;  %v9396_v42 = vmul.f32 %v9048_v46, %v9327_v56  ;;  %v2483_v60 = vand.u32 2139095040, %v9386_v62 }
 0x49b   :  { %v1708_v12 = vadd.s32 %v1707_v55, %v1703_v44  ;;  %v2386_v54 = vadd.s32 1, %v7527_v29  ;;  %v2044_v3 = vxor.u32 2147483648, %v2043_v26  ;;  %v2046_v23 = vsub.s32 4, %v9219_v50 }
 0x49c   :  { %v9400_v13 = vmul.f32 %v2146_v27, %v2144_v22  ;;  %v1619_v25 = vor.u32 %v1618_v35, %v1617_v52  ;;  %v2384_v20 = vor.u32 8388608, %v2383_v18  ;;  %v13940_v9 = vand.u32 2147483647, %v9386_v62 }
 0x49d   :  { %v1709_v61 = vadd.s32 536870912, %v1708_v12  ;;  %vm2387_vm5 = vcmp.gt.s32.totalorder %v2386_v54, 0  ;;  %v9405_v7 = vmul.f32 %v9013_v6, %v9314_v19  ;;  %v1624_v46 = vand.u32 2147483647, %v1623_v11 }
 0x49e   :  { %v2388_v56 = vsel %vm2387_vm5, %v2386_v54, 0  ;;  %v2484_v38 = vshrl.u32 %v2483_v60, 23  ;;  %v9409_v57 = vmul.f32 %v9013_v6, %v9317_v10  ;;  %vm1962_vm6 = vcmp.lt.s32.totalorder %v9079_v21, 0 }
 0x49f   :  { %v9412_v30 = vshrl.u32 %v1709_v61, 30  ;;  %v2390_v41 = vand.u32 31, %v2388_v56  ;;  %v9414_v4 = vsel %vm1962_vm6, %v2044_v3, %v2043_v26  ;;  %v9417_v43 = vsel %vm1962_vm6, %v2046_v23, %v9219_v50 }
 0x4a0   :  { %14160 = vst [vmem:[#allocation23_spill] sm:$0xff] %v9417_v43  ;;  %v2148_v19 = vxor.u32 2147483648, %v9400_v13  ;;  %v1626_v36 = vcvt.s32.f32 %v1619_v25  ;;  %v9421_v0 = vshll.u32 %v2384_v20, 8  ;;  %v9425_v6 = vand.u32 8388607, %v13940_v9 }
 0x4a1   :  { %v1711_v53 = vshll.u32 %v9412_v30, 30  ;;  %v2391_v2 = vsub.s32 32, %v2390_v41  ;;  %v2389_v45 = vshrl.u32 %v2388_v56, 5  ;;  %v2393_v48 = vshll.u32 %v14151_v17, %v2390_v41 }
 0x4a2   :  { %v9427_v10 = vmul.f32 %v1626_v36, %v1624_v46  ;;  %v7531_v26 = vadd.s32 4294967169, %v2484_v38  ;;  %v2396_v35 = vshll.u32 %v14152_v59, %v2390_v41  ;;  %v2399_v8 = vshll.u32 %v14153_v34, %v2390_v41 }
 0x4a3   :  { %v9430_v50 = vsub.s32 %v1708_v12, %v1711_v53  ;;  %v2394_v22 = vshrl.u32 %v14152_v59, %v2391_v2  ;;  %v2397_v44 = vshrl.u32 %v14153_v34, %v2391_v2  ;;  %v2400_v29 = vshrl.u32 %v14154_v31, %v2391_v2 }
 0x4a4   :  { %v2402_v18 = vshll.u32 %v14154_v31, %v2390_v41  ;;  %v2403_v27 = vshrl.u32 %v14155_v49, %v2391_v2  ;;  %v2405_v55 = vshll.u32 %v14155_v49, %v2390_v41  ;;  %v2406_v12 = vshrl.u32 %v14156_v24, %v2391_v2 }
 0x4a5   :  { %v1714_v52 = vsub.s32 0, %v9430_v50  ;;  %v2395_v11 = vor.u32 %v2394_v22, %v2393_v48  ;;  %v14161_v54 = vand.u32 2147483647, %v9079_v21  ;;  %v14162_v60 = vmov 0 }
 0x4a6   :  { %vm13980_vm8 = vcmp.lt.s32.totalorder %v9081_v14, 0  ;;  %v2392_v3 = vshrl.u32 %v14151_v17, %v2391_v2  ;;  %v2398_v23 = vor.u32 %v2397_v44, %v2396_v35  ;;  %v2401_v25 = vor.u32 %v2400_v29, %v2399_v8 }
 0x4a7   :  { %vm9444_vm7 = vcmp.le.f32.partialorder %v14161_v54, 0.7853982  ;;  %v2404_v61 = vor.u32 %v2403_v27, %v2402_v18  ;;  %v7500_v20 = vmin.u32 %v1714_v52, %v9430_v50  ;;  %v2407_v46 = vor.u32 %v2406_v12, %v2405_v55  ;;  %v9453_v18 = vpop.permute.xlu0 %1493 }
 0x4a8   :  { %v14163_v60 = vsel %vm9444_vm7, 4294967295, %v14162_v60  ;;  %vm2408_vm9 = vcmp.lt.s32.totalorder %v2389_v45, 1  ;;  %vm2409_vm0 = vcmp.lt.s32.totalorder %v2389_v45, 2  ;;  %vm2410_vm10 = vcmp.lt.s32.totalorder %v2389_v45, 3 }
 0x4a9   :  { %14164 = vst [vmem:[#allocation24_spill] sm:$0xff] %v14163_v60  ;;  %vm2411_vm11 = vcmp.lt.s32.totalorder %v2389_v45, 4  ;;  %v2416_v56 = vsel %vm2408_vm9, %v2395_v11, %v2398_v23  ;;  %v2420_v38 = vsel %vm2408_vm9, %v2398_v23, %v2401_v25  ;;  %v1716_v41 = vclz %v7500_v20 }
 0x4aa   :  { %v2413_v36 = vsel %vm2411_vm11, %v2401_v25, 2102212464  ;;  %v2417_v53 = vsel %vm2411_vm11, %v2404_v61, 920167782  ;;  %v2421_v48 = vsel %vm2411_vm11, %v2407_v46, 1326507024  ;;  %v2412_v22 = vsel %vm2408_vm9, %v2392_v3, %v2395_v11 }
 0x4ab   :  { %v2418_v54 = vsel %vm2410_vm10, %v2401_v25, %v2417_v53  ;;  %v2422_v9 = vsel %vm2410_vm10, %v2404_v61, %v2421_v48  ;;  %v2490_v2 = vadd.s32 1, %v7531_v26  ;;  %v7501_v35 = vadd.s32 4294967294, %v1716_v41 }
 0x4ac   :  { %v2414_v8 = vsel %vm2410_vm10, %v2398_v23, %v2413_v36  ;;  %v2419_v44 = vsel %vm2409_vm0, %v2416_v56, %v2418_v54  ;;  %v2423_v29 = vsel %vm2409_vm0, %v2420_v38, %v2422_v9  ;;  %v2488_v26 = vor.u32 8388608, %v9425_v6 }
 0x4ad   :  { %v9456_v27 = vmul.u32.u64.low %v9421_v0, %v2423_v29  ;;  %v9457_v52 = vmul.u32.u64.high %v9421_v0, %v2423_v29, %v9456_v27  ;;  %v9460_v55 = vmul.u32.u64.low %v9421_v0, %v2419_v44  ;;  %v9461_v12 = vmul.u32.u64.high %v9421_v0, %v2419_v44, %v9460_v55 }
 0x4ae   :  { %vm7502_vm12 = vcmp.lt.s32.totalorder %v7501_v35, 0  ;;  %vm2491_vm13 = vcmp.gt.s32.totalorder %v2490_v2, 0  ;;  %v2415_v9 = vsel %vm2409_vm0, %v2412_v22, %v2414_v8  ;;  %v9469_v25 = vadd.f32 %v9453_v18, %v9381_v39 }
 0x4af   :  { %v1719_v3 = vsel %vm7502_vm12, 0, %v7501_v35  ;;  %v2492_v23 = vsel %vm2491_vm13, %v2490_v2, 0  ;;  %v9475_v61 = vsel %vm9444_vm7, %v9079_v21, %v9414_v4  ;;  %v9482_v6 = vsel %vm13980_vm8, %v2148_v19, %v9400_v13 }
 0x4b0   :  { %14165 = vst [vmem:[#allocation25_spill] sm:$0xff] %v9469_v25  ;;  %v1704_v45 = vadd.s32 %v9366_v58, %v9375_v15  ;;  %v1724_v20 = vsub.s32 4294967266, %v1719_v3  ;;  %vm2433_vm14 = vc.u32 %v9457_v52, %v9460_v55  ;;  %v2434_v46 = vadd.s32 1, %v9461_v12 }
 0x4b1   :  { %v2494_v4 = vand.u32 31, %v2492_v23  ;;  %v1720_v56 = vsub.s32 32, %v1719_v3  ;;  %v2431_v41 = vmul.u32 %v9421_v0, %v2415_v9  ;;  %v9491_v36 = vshll.u32 %v2488_v26, 8 }
 0x4b2   :  { %v1725_v38 = vadd.s32 127, %v1724_v20  ;;  %v2435_v13 = vsel %vm2433_vm14, %v2434_v46, %v9461_v12  ;;  %v2493_v19 = vshrl.u32 %v2492_v23, 5  ;;  %v2795_v58 = vand.u32 2139095040, %v9469_v25 }
 0x4b3   :  { %v2495_v53 = vsub.s32 32, %v2494_v4  ;;  %v2436_v48 = vadd.s32 %v2435_v13, %v2431_v41  ;;  %v2497_v22 = vshll.u32 %v14151_v17, %v2494_v4  ;;  %v2500_v54 = vshll.u32 %v14152_v59, %v2494_v4 }
 0x4b4   :  { %v1726_v15 = vshll.u32 %v1725_v38, 23  ;;  %v2503_v0 = vshll.u32 %v14153_v34, %v2494_v4  ;;  %v1721_v44 = vshll.u32 %v9430_v50, %v1719_v3  ;;  %v1722_v29 = vshrl.u32 %v1704_v45, %v1720_v56 }
 0x4b5   :  { %v2498_v2 = vshrl.u32 %v14152_v59, %v2495_v53  ;;  %v2501_v35 = vshrl.u32 %v14153_v34, %v2495_v53  ;;  %v2504_v8 = vshrl.u32 %v14154_v31, %v2495_v53  ;;  %v2437_v27 = vadd.s32 536870912, %v2436_v48 }
 0x4b6   :  { %v2506_v12 = vshll.u32 %v14154_v31, %v2494_v4  ;;  %v2507_v20 = vshrl.u32 %v14155_v49, %v2495_v53  ;;  %v1727_v46 = vor.u32 4788187, %v1726_v15  ;;  %v2509_v41 = vshll.u32 %v14155_v49, %v2494_v4 }
 0x4b7   :  { %v2499_v26 = vor.u32 %v2498_v2, %v2497_v22  ;;  %v2502_v9 = vor.u32 %v2501_v35, %v2500_v54  ;;  %v2505_v23 = vor.u32 %v2504_v8, %v2503_v0  ;;  %v9504_v38 = vshrl.u32 %v2437_v27, 30 }
 0x4b8   :  { %v2510_v13 = vshrl.u32 %v14156_v24, %v2495_v53  ;;  %vm1546_vm15 = vcmp.lt.s32.totalorder %v9090_v16, 0  ;;  %v2508_v37 = vor.u32 %v2507_v20, %v2506_v12  ;;  %vm2512_vm1 = vcmp.lt.s32.totalorder %v2493_v19, 1 }
 0x4b9   :  { %vm2513_vm2 = vcmp.lt.s32.totalorder %v2493_v19, 2  ;;  %v2796_v50 = vshrl.u32 %v2795_v58, 23  ;;  %v14166_v3 = vand.u32 2147483647, %v9081_v14  ;;  %v14167_v45 = vmov 0 }
 0x4ba   :  { %v1723_v56 = vor.u32 %v1722_v29, %v1721_v44  ;;  %v2439_v15 = vshll.u32 %v9504_v38, 30  ;;  %v2511_v22 = vor.u32 %v2510_v13, %v2509_v41  ;;  %vm2515_vm4 = vcmp.lt.s32.totalorder %v2493_v19, 4 }
 0x4bb   :  { %vm9511_vm3 = vcmp.le.f32.partialorder %v14166_v3, 0.7853982  ;;  %v2496_v4 = vshrl.u32 %v14151_v17, %v2495_v53  ;;  %v2517_v54 = vsel %vm2515_vm4, %v2505_v23, 2102212464  ;;  %v2520_v2 = vsel %vm2512_vm1, %v2499_v26, %v2502_v9 }
 0x4bc   :  { %v14168_v45 = vsel %vm9511_vm3, 4294967295, %v14167_v45  ;;  %v2521_v35 = vsel %vm2515_vm4, %v2508_v37, 920167782  ;;  %v14170_v0 = vand.u32 2147483647, %v9090_v16  ;;  %v14171_v58 = vmov 0 }
 0x4bd   :  { %14169 = vst [vmem:[#allocation26_spill] sm:$0xff] %v14168_v45  ;;  %v1728_v8 = vand.u32 2147483647, %v1727_v46  ;;  %v9524_v27 = vsub.s32 %v2436_v48, %v2439_v15  ;;  %vm2514_vm6 = vcmp.lt.s32.totalorder %v2493_v19, 3  ;;  %v2524_v44 = vsel %vm2512_vm1, %v2502_v9, %v2505_v23 }
 0x4be   :  { %vm9520_vm5 = vcmp.le.f32.partialorder %v14170_v0, 0.7853982  ;;  %v2516_v29 = vsel %vm2512_vm1, %v2496_v4, %v2499_v26  ;;  %v2522_v12 = vsel %vm2514_vm6, %v2505_v23, %v2521_v35  ;;  %v2525_v53 = vsel %vm2515_vm4, %v2511_v22, 1326507024 }
 0x4bf   :  { %v14172_v58 = vsel %vm9520_vm5, 4294967295, %v14171_v58  ;;  %v7543_v20 = vadd.s32 4294967169, %v2796_v50  ;;  %v2442_v41 = vsub.s32 0, %v9524_v27  ;;  %v2518_v13 = vsel %vm2514_vm6, %v2502_v9, %v2517_v54 }
 0x4c0   :  { %14173 = vst [vmem:[#allocation27_spill] sm:$0xff] %v14172_v58  ;;  %v2523_v3 = vsel %vm2513_vm2, %v2520_v2, %v2522_v12  ;;  %v2526_v0 = vsel %vm2514_vm6, %v2508_v37, %v2525_v53  ;;  %v13942_v15 = vand.u32 2147483647, %v9469_v25  ;;  %v1730_v39 = vcvt.s32.f32 %v1723_v56 }
 0x4c1   :  { %v2527_v11 = vsel %vm2513_vm2, %v2524_v44, %v2526_v0  ;;  %v9532_v46 = vmul.u32.u64.low %v9491_v36, %v2523_v3  ;;  %v9533_v48 = vmul.u32.u64.high %v9491_v36, %v2523_v3, %v9532_v46  ;;  %v7528_v26 = vmin.u32 %v2442_v41, %v9524_v27 }
 0x4c2   :  { %v9539_v23 = vmul.u32.u64.low %v9491_v36, %v2527_v11  ;;  %v9540_v50 = vmul.u32.u64.high %v9491_v36, %v2527_v11, %v9539_v23  ;;  %8287 = vcosq.f32 %v9475_v61  ;;  %v2519_v37 = vsel %vm2513_vm2, %v2516_v29, %v2518_v13 }
 0x4c3   :  { %v9546_v9 = vadd.f32 %v9453_v18, %v9396_v42  ;;  %v2802_v22 = vadd.s32 1, %v7543_v20  ;;  %8289 = vsinq.f32 %v9475_v61  ;;  %v14175_v56 = vxor.u32 2147483648, %v9427_v10 }
 0x4c4   :  { %v9554_v54 = vmul.f32 %v1730_v39, %v1728_v8  ;;  %v2444_v11 = vclz %v7528_v26  ;;  %v9560_v19 = vsel %vm9511_vm3, %v9081_v14, %v9482_v6  ;;  %v2538_v42 = vadd.s32 1, %v9533_v48 }
 0x4c5   :  { %14174 = vst [vmem:[#allocation28_spill] sm:$0xff] %v9546_v9  ;;  %v1629_v4 = vsel %vm1546_vm15, %v14175_v56, %v9427_v10  ;;  %v2799_v18 = vand.u32 8388607, %v13942_v15  ;;  %vm2803_vm9 = vcmp.gt.s32.totalorder %v2802_v22, 0  ;;  %v2535_v2 = vmul.u32 %v9491_v36, %v2519_v37 }
 0x4c6   :  { %v7529_v61 = vadd.s32 4294967294, %v2444_v11  ;;  %vm2537_vm0 = vc.u32 %v9540_v50, %v9532_v46  ;;  %v2804_v10 = vsel %vm2803_vm9, %v2802_v22, 0  ;;  %v9571_v39 = vsel %vm9520_vm5, %v9090_v16, %v1629_v4 }
 0x4c7   :  { %v2539_v6 = vsel %vm2537_vm0, %v2538_v42, %v9533_v48  ;;  %v2806_v35 = vand.u32 31, %v2804_v10  ;;  %v2432_v29 = vadd.s32 %v9460_v55, %v9457_v52  ;;  %v2800_v53 = vor.u32 8388608, %v2799_v18 }
 0x4c8   :  { %vm7530_vm10 = vcmp.lt.s32.totalorder %v7529_v61, 0  ;;  %v2540_v36 = vadd.s32 %v2539_v6, %v2535_v2  ;;  %v2899_v41 = vand.u32 2139095040, %v9546_v9  ;;  %v9579_v26 = vshrl.u32 %v2804_v10, 5 }
 0x4c9   :  { %v2447_v12 = vsel %vm7530_vm10, 0, %v7529_v61  ;;  %v2807_v20 = vsub.s32 32, %v2806_v35  ;;  %v2809_v48 = vshll.u32 %v14151_v17, %v2806_v35  ;;  %v2812_v37 = vshll.u32 %v14152_v59, %v2806_v35 }
 0x4ca   :  { %v2448_v13 = vsub.s32 32, %v2447_v12  ;;  %v2452_v3 = vsub.s32 4294967266, %v2447_v12  ;;  %v2541_v0 = vadd.s32 536870912, %v2540_v36  ;;  %v2449_v55 = vshll.u32 %v9524_v27, %v2447_v12 }
 0x4cb   :  { %v2810_v23 = vshrl.u32 %v14152_v59, %v2807_v20  ;;  %v2813_v52 = vshrl.u32 %v14153_v34, %v2807_v20  ;;  %v2816_v4 = vshrl.u32 %v14154_v31, %v2807_v20  ;;  %v2815_v18 = vshll.u32 %v14153_v34, %v2806_v35 }
 0x4cc   :  { %v2453_v22 = vadd.s32 127, %v2452_v3  ;;  %v9586_v56 = vshrl.u32 %v2541_v0, 30  ;;  %v9589_v11 = vpop.eup %8287  ;;  %v2450_v42 = vshrl.u32 %v2432_v29, %v2448_v13  ;;  %v2818_v61 = vshll.u32 %v14154_v31, %v2806_v35 }
 0x4cd   :  { %14177 = vst [vmem:[#allocation30_spill] sm:$0xff] %v9589_v11  ;;  %v2819_v2 = vshrl.u32 %v14155_v49, %v2807_v20  ;;  %v9594_v10 = vpop.eup %8289  ;;  %v2811_v27 = vor.u32 %v2810_v23, %v2809_v48  ;;  %v2814_v12 = vor.u32 %v2813_v52, %v2812_v37  ;;  %v2817_v3 = vor.u32 %v2816_v4, %v2815_v18 }
 0x4ce   :  { %14176 = vst [vmem:[#allocation29_spill] sm:$0xff] %v9586_v56  ;;  %14178 = vst [vmem:[#allocation31_spill] sm:$0xff] %v9594_v10  ;;  %v2454_v6 = vshll.u32 %v2453_v22, 23  ;;  %v2543_v15 = vshll.u32 %v9586_v56, 30  ;;  %v2821_v44 = vshll.u32 %v14155_v49, %v2806_v35  ;;  %v2822_v8 = vshrl.u32 %v14156_v24, %v2807_v20 }
 0x4cf   :  { %v2820_v0 = vor.u32 %v2819_v2, %v2818_v61  ;;  %v9601_v21 = vshll.u32 %v2800_v53, 8  ;;  %v2900_v11 = vshrl.u32 %v2899_v41, 23  ;;  %v2451_v60 = vor.u32 %v2450_v42, %v2449_v55 }
 0x4d0   :  { %v2455_v29 = vor.u32 4788187, %v2454_v6  ;;  %v9599_v13 = vsub.s32 %v2540_v36, %v2543_v15  ;;  %v2808_v10 = vshrl.u32 %v14151_v17, %v2807_v20  ;;  %v2823_v22 = vor.u32 %v2822_v8, %v2821_v44  ;;  %v9633_v6 = vpop.permute.xlu1 %1497 }
 0x4d1   :  { %vm2824_vm11 = vcmp.lt.s32.totalorder %v9579_v26, 1  ;;  %vm13981_vm12 = vcmp.lt.s32.totalorder %v9118_v33, 0  ;;  %vm2826_vm13 = vcmp.lt.s32.totalorder %v9579_v26, 3  ;;  %vm2827_vm14 = vcmp.lt.s32.totalorder %v9579_v26, 4 }
 0x4d2   :  { %v2546_v48 = vsub.s32 0, %v9599_v13  ;;  %v2832_v15 = vsel %vm2824_vm11, %v2811_v27, %v2814_v12  ;;  %v2829_v35 = vsel %vm2827_vm14, %v2817_v3, 2102212464  ;;  %v2833_v36 = vsel %vm2827_vm14, %v2820_v0, 920167782 }
 0x4d3   :  { %v2836_v53 = vsel %vm2824_vm11, %v2814_v12, %v2817_v3  ;;  %v2837_v20 = vsel %vm2827_vm14, %v2823_v22, 1326507024  ;;  %v2456_v8 = vand.u32 2147483647, %v2455_v29  ;;  %vm2825_vm1 = vcmp.lt.s32.totalorder %v9579_v26, 2 }
 0x4d4   :  { %v7532_v44 = vmin.u32 %v2546_v48, %v9599_v13  ;;  %v2834_v41 = vsel %vm2826_vm13, %v2817_v3, %v2833_v36  ;;  %v2458_v23 = vcvt.s32.f32 %v2451_v60  ;;  %v2838_v52 = vsel %vm2826_vm13, %v2820_v0, %v2837_v20 }
 0x4d5   :  { %v2835_v37 = vsel %vm2825_vm1, %v2832_v15, %v2834_v41  ;;  %v7547_v55 = vadd.s32 4294967169, %v2900_v11  ;;  %v14179_v4 = vand.u32 2147483647, %v9118_v33  ;;  %v2828_v61 = vsel %vm2824_vm11, %v2808_v10, %v2811_v27 }
 0x4d6   :  { %v2548_v18 = vclz %v7532_v44  ;;  %v2830_v60 = vsel %vm2826_vm13, %v2814_v12, %v2829_v35  ;;  %v2839_v2 = vsel %vm2825_vm1, %v2836_v53, %v2838_v52  ;;  %v2459_v22 = vmul.f32 %v2458_v23, %v2456_v8 }
 0x4d7   :  { %vm9623_vm2 = vcmp.le.f32.partialorder %v14179_v4, 0.7853982  ;;  %v9636_v11 = vmul.u32.u64.low %v9601_v21, %v2839_v2  ;;  %v9637_v3 = vmul.u32.u64.high %v9601_v21, %v2839_v2, %v9636_v11  ;;  %v14182_v10 = vand.u32 2147483647, %v9546_v9 }
 0x4d8   :  { %v9640_v0 = vmul.u32.u64.low %v9601_v21, %v2835_v37  ;;  %v9641_v29 = vmul.u32.u64.high %v9601_v21, %v2835_v37, %v9640_v0  ;;  %v7533_v48 = vadd.s32 4294967294, %v2548_v18  ;;  %v2906_v12 = vadd.s32 1, %v7547_v55 }
 0x4d9   :  { %v2903_v27 = vand.u32 8388607, %v14182_v10  ;;  %8291 = vcosq.f32 %v9560_v19  ;;  %v14183_v15 = vsub.s32 4, %v9332_v63  ;;  %vm2378_vm4 = vcmp.lt.s32.totalorder %v9341_v40, 0 }
 0x4da   :  { %v9657_v36 = vadd.f32 %v9633_v6, %v9405_v7  ;;  %8293 = vsinq.f32 %v9560_v19  ;;  %vm7534_vm6 = vcmp.lt.s32.totalorder %v7533_v48, 0  ;;  %v2831_v53 = vsel %vm2825_vm1, %v2828_v61, %v2830_v60 }
 0x4db   :  { %v9652_v35 = vsel %vm1546_vm15, %v14183_v15, %v9332_v63  ;;  %vm2907_vm9 = vcmp.gt.s32.totalorder %v2906_v12, 0  ;;  %8295 = vcosq.f32 %v9571_v39  ;;  %v14186_v20 = vxor.u32 2147483648, %v9554_v54 }
 0x4dc   :  { %14184 = vst [vmem:[#allocation32_spill] sm:$0xff] %v9652_v35  ;;  %14185 = vst [vmem:[#allocation33_spill] sm:$0xff] %v9657_v36  ;;  %v2551_v8 = vsel %vm7534_vm6, 0, %v7533_v48  ;;  %vm2849_vm15 = vc.u32 %v9637_v3, %v9640_v0  ;;  %v2460_v7 = vxor.u32 2147483648, %v2459_v22  ;;  %v2850_v19 = vadd.s32 1, %v9641_v29 }
 0x4dd   :  { %v1733_v63 = vsel %vm13981_vm12, %v14186_v20, %v9554_v54  ;;  %v2556_v44 = vsub.s32 4294967266, %v2551_v8  ;;  %v2904_v41 = vor.u32 8388608, %v2903_v27  ;;  %8297 = vsinq.f32 %v9571_v39 }
 0x4de   :  { %v2847_v26 = vmul.u32 %v9601_v21, %v2831_v53  ;;  %v2908_v23 = vsel %vm2907_vm9, %v2906_v12, 0  ;;  %v1755_v37 = vand.u32 2139095040, %v9657_v36  ;;  %v2552_v52 = vsub.s32 32, %v2551_v8 }
 0x4df   :  { %v2557_v55 = vadd.s32 127, %v2556_v44  ;;  %v2851_v54 = vsel %vm2849_vm15, %v2850_v19, %v9641_v29  ;;  %v13948_v4 = vand.u32 2147483647, %v9657_v36  ;;  %v9679_v18 = vsel %vm9623_vm2, %v9118_v33, %v1733_v63 }
 0x4e0   :  { %v2852_v60 = vadd.s32 %v2851_v54, %v2847_v26  ;;  %v2910_v39 = vand.u32 31, %v2908_v23  ;;  %v9684_v21 = vsel %vm2378_vm4, %v2460_v7, %v2459_v22  ;;  %v2536_v2 = vadd.s32 %v9532_v46, %v9540_v50 }
 0x4e1   :  { %v2553_v11 = vshll.u32 %v9599_v13, %v2551_v8  ;;  %v9689_v29 = vshll.u32 %v2904_v41, 8  ;;  %v2558_v48 = vshll.u32 %v2557_v55, 23  ;;  %v1756_v12 = vshrl.u32 %v1755_v37, 23 }
 0x4e2   :  { %v2853_v10 = vadd.s32 536870912, %v2852_v60  ;;  %v2911_v27 = vsub.s32 32, %v2910_v39  ;;  %v2554_v15 = vshrl.u32 %v2536_v2, %v2552_v52  ;;  %v2909_v53 = vshrl.u32 %v2908_v23, 5 }
 0x4e3   :  { %v2913_v20 = vshll.u32 %v14151_v17, %v2910_v39  ;;  %v9694_v63 = vand.u32 8388607, %v13948_v4  ;;  %v9696_v22 = vpop.eup %8291  ;;  %v2916_v50 = vshll.u32 %v14152_v59, %v2910_v39  ;;  %v2919_v44 = vshll.u32 %v14153_v34, %v2910_v39 }
 0x4e4   :  { %14187 = vst [vmem:[#allocation34_spill] sm:$0xff] %v9696_v22  ;;  %v9698_v7 = vshrl.u32 %v2853_v10, 30  ;;  %v2914_v46 = vshrl.u32 %v14152_v59, %v2911_v27  ;;  %v2917_v13 = vshrl.u32 %v14153_v34, %v2911_v27  ;;  %v9703_v8 = vpop.eup %8293  ;;  %v2920_v19 = vshrl.u32 %v14154_v31, %v2911_v27 }
 0x4e5   :  { %v2922_v41 = vshll.u32 %v14154_v31, %v2910_v39  ;;  %v2923_v26 = vshrl.u32 %v14155_v49, %v2911_v27  ;;  %v9709_v23 = vpop.eup %8295  ;;  %v2559_v37 = vor.u32 4788187, %v2558_v48  ;;  %v14189_v2 = vand.u32 2147483647, %v9341_v40 }
 0x4e6   :  { %14188 = vst [vmem:[#allocation35_spill] sm:$0xff] %v9709_v23  ;;  %v2855_v52 = vshll.u32 %v9698_v7, 30  ;;  %v2915_v55 = vor.u32 %v2914_v46, %v2913_v20  ;;  %v2918_v54 = vor.u32 %v2917_v13, %v2916_v50  ;;  %v14190_v10 = vmov 0 }
 0x4e7   :  { %vm9714_vm0 = vcmp.le.f32.partialorder %v14189_v2, 0.7853982  ;;  %v2921_v4 = vor.u32 %v2920_v19, %v2919_v44  ;;  %v2924_v61 = vor.u32 %v2923_v26, %v2922_v41  ;;  %v2925_v56 = vshll.u32 %v14155_v49, %v2910_v39  ;;  %v9720_v43 = vpop.eup %8297 }
 0x4e8   :  { %v14191_v10 = vsel %vm9714_vm0, 4294967295, %v14190_v10  ;;  %v2926_v16 = vshrl.u32 %v14156_v24, %v2911_v27  ;;  %14193 = vst [vmem:[#allocation37_spill] sm:$0xff] %v9720_v43  ;;  %v2555_v23 = vor.u32 %v2554_v15, %v2553_v11  ;;  %v9722_v48 = vsub.s32 %v2852_v60, %v2855_v52 }
 0x4e9   :  { %14192 = vst [vmem:[#allocation36_spill] sm:$0xff] %v14191_v10  ;;  %vm2928_vm10 = vcmp.lt.s32.totalorder %v2909_v53, 1  ;;  %v7503_v20 = vadd.s32 4294967169, %v1756_v12  ;;  %v2912_v46 = vshrl.u32 %v14151_v17, %v2911_v27  ;;  %vm2930_vm11 = vcmp.lt.s32.totalorder %v2909_v53, 3 }
 0x4ea   :  { %v2927_v50 = vor.u32 %v2926_v16, %v2925_v56  ;;  %vm2931_vm13 = vcmp.lt.s32.totalorder %v2909_v53, 4  ;;  %v2858_v13 = vsub.s32 0, %v9722_v48  ;;  %v2936_v19 = vsel %vm2928_vm10, %v2915_v55, %v2918_v54 }
 0x4eb   :  { %v2933_v44 = vsel %vm2931_vm13, %v2921_v4, 2102212464  ;;  %v2937_v41 = vsel %vm2931_vm13, %v2924_v61, 920167782  ;;  %v2560_v39 = vand.u32 2147483647, %v2559_v37  ;;  %v2940_v2 = vsel %vm2928_vm10, %v2918_v54, %v2921_v4 }
 0x4ec   :  { %vm2929_vm14 = vcmp.lt.s32.totalorder %v2909_v53, 2  ;;  %v2938_v26 = vsel %vm2930_vm11, %v2921_v4, %v2937_v41  ;;  %v7544_v11 = vmin.u32 %v2858_v13, %v9722_v48  ;;  %v2932_v60 = vsel %vm2928_vm10, %v2912_v46, %v2915_v55 }
 0x4ed   :  { %v2939_v15 = vsel %vm2929_vm14, %v2936_v19, %v2938_v26  ;;  %v2941_v12 = vsel %vm2931_vm13, %v2927_v50, 1326507024  ;;  %v2934_v52 = vsel %vm2930_vm11, %v2918_v54, %v2933_v44  ;;  %8299 = vcosq.f32 %v9679_v18 }
 0x4ee   :  { %v2942_v27 = vsel %vm2930_vm11, %v2924_v61, %v2941_v12  ;;  %v9729_v16 = vmul.u32.u64.low %v9689_v29, %v2939_v15  ;;  %v9730_v56 = vmul.u32.u64.high %v9689_v29, %v2939_v15, %v9729_v16  ;;  %v2860_v43 = vclz %v7544_v11 }
 0x4ef   :  { %v2943_v37 = vsel %vm2929_vm14, %v2940_v2, %v2942_v27  ;;  %v9737_v4 = vadd.f32 %v9633_v6, %v9409_v57  ;;  %v2562_v55 = vcvt.s32.f32 %v2555_v23  ;;  %v1762_v61 = vadd.s32 1, %v7503_v20 }
 0x4f0   :  { %v9740_v46 = vmul.u32.u64.low %v9689_v29, %v2943_v37  ;;  %v9741_v50 = vmul.u32.u64.high %v9689_v29, %v2943_v37, %v9740_v46  ;;  %8301 = vsinq.f32 %v9679_v18  ;;  %v9748_v54 = vsel %vm9714_vm0, %v9341_v40, %v9684_v21 }
 0x4f1   :  { %v7545_v13 = vadd.s32 4294967294, %v2860_v43  ;;  %v2935_v44 = vsel %vm2929_vm14, %v2932_v60, %v2934_v52  ;;  %v9751_v19 = vmul.f32 %v2562_v55, %v2560_v39  ;;  %v2954_v57 = vadd.s32 1, %v9730_v56 }
 0x4f2   :  { %v1760_v6 = vor.u32 8388608, %v9694_v63  ;;  %vm1763_vm1 = vcmp.gt.s32.totalorder %v1762_v61, 0  ;;  %v1859_v20 = vand.u32 2139095040, %v9737_v4  ;;  %v2951_v21 = vmul.u32 %v9689_v29, %v2935_v44 }
 0x4f3   :  { %vm7546_vm6 = vcmp.lt.s32.totalorder %v7545_v13, 0  ;;  %v1764_v23 = vsel %vm1763_vm1, %v1762_v61, 0  ;;  %vm2953_vm9 = vc.u32 %v9741_v50, %v9729_v16  ;;  %v2848_v53 = vadd.s32 %v9640_v0, %v9637_v3 }
 0x4f4   :  { %v2863_v41 = vsel %vm7546_vm6, 0, %v7545_v13  ;;  %v9760_v43 = vshrl.u32 %v1764_v23, 5  ;;  %v2955_v26 = vsel %vm2953_vm9, %v2954_v57, %v9730_v56  ;;  %v2564_v2 = vxor.u32 2147483648, %v9751_v19 }
 0x4f5   :  { %v2864_v39 = vsub.s32 32, %v2863_v41  ;;  %v2868_v63 = vsub.s32 4294967266, %v2863_v41  ;;  %v2956_v11 = vadd.s32 %v2955_v26, %v2951_v21  ;;  %v1766_v60 = vand.u32 31, %v1764_v23 }
 0x4f6   :  { %v9766_v15 = vshll.u32 %v1760_v6, 8  ;;  %v2865_v29 = vshll.u32 %v9722_v48, %v2863_v41  ;;  %vm1784_vm15 = vcmp.lt.s32.totalorder %v9760_v43, 1  ;;  %v1860_v52 = vshrl.u32 %v1859_v20, 23 }
 0x4f7   :  { %v2869_v12 = vadd.s32 127, %v2868_v63  ;;  %v2866_v27 = vshrl.u32 %v2848_v53, %v2864_v39  ;;  %v2957_v37 = vadd.s32 536870912, %v2956_v11  ;;  %v1767_v55 = vsub.s32 32, %v1766_v60  ;;  %v9771_v3 = vpop.eup %8299 }
 0x4f8   :  { %vm1785_vm10 = vcmp.lt.s32.totalorder %v9760_v43, 2  ;;  %v1769_v56 = vshll.u32 %v14151_v17, %v1766_v60  ;;  %vm1786_vm11 = vcmp.lt.s32.totalorder %v9760_v43, 3  ;;  %vm1787_vm13 = vcmp.lt.s32.totalorder %v9760_v43, 4 }
 0x4f9   :  { %v2870_v0 = vshll.u32 %v2869_v12, 23  ;;  %vm13977_vm14 = vcmp.lt.s32.totalorder %v9386_v62, 0  ;;  %v9777_v48 = vshrl.u32 %v2957_v37, 30  ;;  %v1770_v46 = vshrl.u32 %v14152_v59, %v1767_v55 }
 0x4fa   :  { %v1772_v61 = vshll.u32 %v14152_v59, %v1766_v60  ;;  %v1773_v13 = vshrl.u32 %v14153_v34, %v1767_v55  ;;  %v9782_v44 = vpop.eup %8301  ;;  %v1775_v57 = vshll.u32 %v14153_v34, %v1766_v60  ;;  %v1776_v6 = vshrl.u32 %v14154_v31, %v1767_v55 }
 0x4fb   :  { %14194 = vst [vmem:[#allocation38_spill] sm:$0xff] %v9777_v48  ;;  %v1778_v23 = vshll.u32 %v14154_v31, %v1766_v60  ;;  %v1779_v20 = vshrl.u32 %v14155_v49, %v1767_v55  ;;  %v2871_v41 = vor.u32 4788187, %v2870_v0  ;;  %v2959_v21 = vshll.u32 %v9777_v48, 30 }
 0x4fc   :  { %v1771_v53 = vor.u32 %v1770_v46, %v1769_v56  ;;  %v1774_v39 = vor.u32 %v1773_v13, %v1772_v61  ;;  %v1777_v63 = vor.u32 %v1776_v6, %v1775_v57  ;;  %v1781_v12 = vshll.u32 %v14155_v49, %v1766_v60 }
 0x4fd   :  { %v1780_v26 = vor.u32 %v1779_v20, %v1778_v23  ;;  %v1782_v37 = vshrl.u32 %v14156_v24, %v1767_v55  ;;  %v14195_v18 = vand.u32 2147483647, %v9386_v62  ;;  %v14196_v10 = vmov 0 }
 0x4fe   :  { %v2867_v58 = vor.u32 %v2866_v27, %v2865_v29  ;;  %v9797_v35 = vsub.s32 %v2956_v11, %v2959_v21  ;;  %v1768_v0 = vshrl.u32 %v14151_v17, %v1767_v55  ;;  %v1792_v56 = vsel %vm1784_vm15, %v1771_v53, %v1774_v39 }
 0x4ff   :  { %vm9793_vm1 = vcmp.le.f32.partialorder %v14195_v18, 0.7853982  ;;  %v1783_v46 = vor.u32 %v1782_v37, %v1781_v12  ;;  %v1789_v60 = vsel %vm1787_vm13, %v1777_v63, 2102212464  ;;  %v1793_v61 = vsel %vm1787_vm13, %v1780_v26, 920167782 }
 0x500   :  { %v14197_v10 = vsel %vm9793_vm1, 4294967295, %v14196_v10  ;;  %v7507_v13 = vadd.s32 4294967169, %v1860_v52  ;;  %v2872_v18 = vand.u32 2147483647, %v2871_v41  ;;  %v2962_v57 = vsub.s32 0, %v9797_v35 }
 0x501   :  { %14198 = vst [vmem:[#allocation39_spill] sm:$0xff] %v14197_v10  ;;  %v1794_v11 = vsel %vm1786_vm11, %v1777_v63, %v1793_v61  ;;  %v1796_v29 = vsel %vm1784_vm15, %v1774_v39, %v1777_v63  ;;  %v1788_v27 = vsel %vm1784_vm15, %v1768_v0, %v1771_v53  ;;  %v1790_v55 = vsel %vm1786_vm11, %v1774_v39, %v1789_v60  ;;  %v1434_v60 = vpop.permute.xlu0 %1433 }
 0x502   :  { %v1795_v6 = vsel %vm1785_vm10, %v1792_v56, %v1794_v11  ;;  %v1797_v52 = vsel %vm1787_vm13, %v1783_v46, 1326507024  ;;  %v7548_v23 = vmin.u32 %v2962_v57, %v9797_v35  ;;  %v2565_v53 = vsel %vm13977_vm14, %v2564_v2, %v9751_v19 }
 0x503   :  { %v1798_v20 = vsel %vm1786_vm11, %v1780_v26, %v1797_v52  ;;  %v9823_v41 = vmul.u32.u64.low %v9766_v15, %v1795_v6  ;;  %v9824_v21 = vmul.u32.u64.high %v9766_v15, %v1795_v6, %v9823_v41  ;;  %v14199_v63 = vand.u32 2147483647, %v9737_v4 }
 0x504   :  { %v1799_v39 = vsel %vm1785_vm10, %v1796_v29, %v1798_v20  ;;  %v1866_v37 = vadd.s32 1, %v7507_v13  ;;  %v2874_v0 = vcvt.s32.f32 %v2867_v58  ;;  %v2964_v56 = vclz %v7548_v23 }
 0x505   :  { %v1863_v12 = vand.u32 8388607, %v14199_v63  ;;  %v9835_v26 = vmul.u32.u64.low %v9766_v15, %v1799_v39  ;;  %v9836_v46 = vmul.u32.u64.high %v9766_v15, %v1799_v39, %v9835_v26  ;;  %v14200_v61 = vsub.s32 4, %v9504_v38 }
 0x506   :  { %8303 = vcosq.f32 %v9748_v54  ;;  %v1791_v2 = vsel %vm1785_vm10, %v1788_v27, %v1790_v55  ;;  %vm1867_vm6 = vcmp.gt.s32.totalorder %v1866_v37, 0  ;;  %v2875_v58 = vmul.f32 %v2874_v0, %v2872_v18 }
 0x507   :  { %v9843_v19 = vsel %vm2378_vm4, %v14200_v61, %v9504_v38  ;;  %v7549_v13 = vadd.s32 4294967294, %v2964_v56  ;;  %v1810_v57 = vadd.s32 1, %v9824_v21  ;;  %v1868_v11 = vsel %vm1867_vm6, %v1866_v37, 0 }
 0x508   :  { %14201 = vst [vmem:[#allocation40_spill] sm:$0xff] %v9843_v19  ;;  %v9852_v29 = vsel %vm9793_vm1, %v9386_v62, %v2565_v53  ;;  %vm2794_vm9 = vcmp.lt.s32.totalorder %v9469_v25, 0  ;;  %v1870_v38 = vand.u32 31, %v1868_v11  ;;  %v1466_v6 = vmul.f32 %v1434_v60, %v9050_v47 }
 0x509   :  { %v9857_v52 = vmul.f32 %v1434_v60, %v9054_v51  ;;  %vm7550_vm4 = vcmp.lt.s32.totalorder %v7549_v13, 0  ;;  %v1807_v43 = vmul.u32 %v9766_v15, %v1791_v2  ;;  %vm1809_vm15 = vc.u32 %v9836_v46, %v9823_v41 }
 0x50a   :  { %v1864_v18 = vor.u32 8388608, %v1863_v12  ;;  %v2952_v27 = vadd.s32 %v9729_v16, %v9741_v50  ;;  %v2967_v55 = vsel %vm7550_vm4, 0, %v7549_v13  ;;  %v1811_v23 = vsel %vm1809_vm15, %v1810_v57, %v9824_v21 }
 0x50b   :  { %v1871_v20 = vsub.s32 32, %v1870_v38  ;;  %v2876_v53 = vxor.u32 2147483648, %v2875_v58  ;;  %v2968_v39 = vsub.s32 32, %v2967_v55  ;;  %v2972_v47 = vsub.s32 4294967266, %v2967_v55 }
 0x50c   :  { %v1812_v63 = vadd.s32 %v1811_v23, %v1807_v43  ;;  %v1869_v51 = vshrl.u32 %v1868_v11, 5  ;;  %v1873_v37 = vshll.u32 %v14151_v17, %v1870_v38  ;;  %v2969_v12 = vshll.u32 %v9797_v35, %v2967_v55  ;;  %v1502_v43 = vpop.permute.xlu1 %1501 }
 0x50d   :  { %v1874_v15 = vshrl.u32 %v14152_v59, %v1871_v20  ;;  %v1877_v0 = vshrl.u32 %v14153_v34, %v1871_v20  ;;  %v2973_v56 = vadd.s32 127, %v2972_v47  ;;  %v1876_v16 = vshll.u32 %v14152_v59, %v1870_v38 }
 0x50e   :  { %v1813_v26 = vadd.s32 536870912, %v1812_v63  ;;  %v2970_v50 = vshrl.u32 %v2952_v27, %v2968_v39  ;;  %v1879_v60 = vshll.u32 %v14153_v34, %v1870_v38  ;;  %v1880_v61 = vshrl.u32 %v14154_v31, %v1871_v20 }
 0x50f   :  { %v1875_v21 = vor.u32 %v1874_v15, %v1873_v37  ;;  %v2974_v2 = vshll.u32 %v2973_v56, 23  ;;  %v1878_v57 = vor.u32 %v1877_v0, %v1876_v16  ;;  %v1883_v11 = vshrl.u32 %v14155_v49, %v1871_v20 }
 0x510   :  { %v9872_v13 = vshrl.u32 %v1813_v26, 30  ;;  %v9875_v23 = vpop.eup %8303  ;;  %v1881_v35 = vor.u32 %v1880_v61, %v1879_v60  ;;  %v1882_v55 = vshll.u32 %v14154_v31, %v1870_v38  ;;  %v1885_v47 = vshll.u32 %v14155_v49, %v1870_v38 }
 0x511   :  { %14202 = vst [vmem:[#allocation41_spill] sm:$0xff] %v9875_v23  ;;  %v1886_v27 = vshrl.u32 %v14156_v24, %v1871_v20  ;;  %v2877_v39 = vsel %vm2794_vm9, %v2876_v53, %v2875_v58  ;;  %v2975_v37 = vor.u32 4788187, %v2974_v2  ;;  %v1904_v56 = vshll.u32 %v1864_v18, 8 }
 0x512   :  { %v1815_v15 = vshll.u32 %v9872_v13, 30  ;;  %v2971_v0 = vor.u32 %v2970_v50, %v2969_v12  ;;  %v1884_v26 = vor.u32 %v1883_v11, %v1882_v55  ;;  %v9883_v40 = vadd.f32 %v1502_v43, %v1466_v6 }
 0x513   :  { %v1887_v16 = vor.u32 %v1886_v27, %v1885_v47  ;;  %v14204_v60 = vand.u32 2147483647, %v9469_v25  ;;  %v14205_v61 = vmov 0  ;;  %vm1888_vm11 = vcmp.lt.s32.totalorder %v1869_v51, 1 }
 0x514   :  { %14203 = vst [vmem:[#allocation42_spill] sm:$0xff] %v9883_v40  ;;  %v9891_v38 = vsub.s32 %v1812_v63, %v1815_v15  ;;  %vm1890_vm13 = vcmp.lt.s32.totalorder %v1869_v51, 3  ;;  %vm1891_vm6 = vcmp.lt.s32.totalorder %v1869_v51, 4  ;;  %v2976_v58 = vand.u32 2147483647, %v2975_v37 }
 0x515   :  { %vm9887_vm10 = vcmp.le.f32.partialorder %v14204_v60, 0.7853982  ;;  %v1893_v53 = vsel %vm1891_vm6, %v1881_v35, 2102212464  ;;  %v1896_v18 = vsel %vm1888_vm11, %v1875_v21, %v1878_v57  ;;  %v1897_v12 = vsel %vm1891_vm6, %v1884_v26, 920167782 }
 0x516   :  { %v14206_v61 = vsel %vm9887_vm10, 4294967295, %v14205_v61  ;;  %v1818_v50 = vsub.s32 0, %v9891_v38  ;;  %v1872_v6 = vshrl.u32 %v14151_v17, %v1871_v20  ;;  %vm1889_vm4 = vcmp.lt.s32.totalorder %v1869_v51, 2 }
 0x517   :  { %14207 = vst [vmem:[#allocation43_spill] sm:$0xff] %v14206_v61  ;;  %v1898_v2 = vsel %vm1890_vm13, %v1881_v35, %v1897_v12  ;;  %v2978_v11 = vcvt.s32.f32 %v2971_v0  ;;  %v1900_v63 = vsel %vm1888_vm11, %v1878_v57, %v1881_v35  ;;  %v1901_v47 = vsel %vm1891_vm6, %v1887_v16, 1326507024 }
 0x518   :  { %v1899_v55 = vsel %vm1889_vm4, %v1896_v18, %v1898_v2  ;;  %v7504_v27 = vmin.u32 %v1818_v50, %v9891_v38  ;;  %v1892_v37 = vsel %vm1888_vm11, %v1872_v6, %v1875_v21  ;;  %v1894_v15 = vsel %vm1890_vm13, %v1878_v57, %v1893_v53 }
 0x519   :  { %v1902_v60 = vsel %vm1890_vm13, %v1884_v26, %v1901_v47  ;;  %v2979_v23 = vmul.f32 %v2978_v11, %v2976_v58  ;;  %v9904_v19 = vmul.u32.u64.low %v1904_v56, %v1899_v55  ;;  %v9905_v10 = vmul.u32.u64.high %v1904_v56, %v1899_v55, %v9904_v19 }
 0x51a   :  { %v1903_v20 = vsel %vm1889_vm4, %v1900_v63, %v1902_v60  ;;  %v1820_v0 = vclz %v7504_v27  ;;  %v13959_v35 = vand.u32 2147483647, %v9883_v40  ;;  %8305 = vsinq.f32 %v9748_v54  ;;  %v14213_v60 = vld [vmem:[#allocation13_spill] sm:$0xff] }
 0x51b   :  { %v9907_v12 = vmul.u32.u64.low %v1904_v56, %v1903_v20  ;;  %v9908_v18 = vmul.u32.u64.high %v1904_v56, %v1903_v20, %v9907_v12  ;;  %v1895_v21 = vsel %vm1889_vm4, %v1892_v37, %v1894_v15  ;;  %v9914_v57 = vadd.f32 %v1502_v43, %v9857_v52 }
 0x51c   :  { %v2171_v26 = vand.u32 2139095040, %v9883_v40  ;;  %8307 = vcosq.f32 %v9852_v29  ;;  %v2878_v16 = vsub.s32 4, %v9698_v7  ;;  %v14208_v58 = vand.u32 2147483647, %v9546_v9 }
 0x51d   :  { %v14209_v53 = vmov 0  ;;  %vm13976_vm11 = vcmp.lt.s32.totalorder %v9546_v9, 0  ;;  %v7505_v54 = vadd.s32 4294967294, %v1820_v0  ;;  %v2880_v52 = vsel %vm9887_vm10, %v9469_v25, %v2877_v39  ;;  %v9950_v0 = vpop.f32.mrb[24].mxu1 }
 0x51e   :  { %vm9921_vm15 = vcmp.le.f32.partialorder %v14208_v58, 0.7853982  ;;  %v2980_v51 = vxor.u32 2147483648, %v2979_v23  ;;  %v1914_v43 = vadd.s32 1, %v9905_v10  ;;  %v2172_v50 = vshrl.u32 %v2171_v26, 23  ;;  %v14216_v26 = vld [vmem:[#allocation12_spill] sm:$0xff] }
 0x51f   :  { %v14210_v53 = vsel %vm9921_vm15, 4294967295, %v14209_v53  ;;  %vm7506_vm13 = vcmp.lt.s32.totalorder %v7505_v54, 0  ;;  %v1911_v6 = vmul.u32 %v1904_v56, %v1895_v21  ;;  %vm1913_vm6 = vc.u32 %v9908_v18, %v9904_v19 }
 0x520   :  { %14211 = vst [vmem:[#allocation44_spill] sm:$0xff] %v14210_v53  ;;  %v2175_v2 = vand.u32 8388607, %v13959_v35  ;;  %v9933_v11 = vsel %vm7506_vm13, 0, %v7505_v54  ;;  %v1915_v55 = vsel %vm1913_vm6, %v1914_v43, %v9905_v10  ;;  %v7519_v63 = vadd.s32 4294967169, %v2172_v50  ;;  %v14214_v10 = vld [vmem:[#allocation11_spill] sm:$0xff] }
 0x521   :  { %v2275_v47 = vand.u32 2139095040, %v9914_v57  ;;  %8309 = vsinq.f32 %v9852_v29  ;;  %v9941_v39 = vsel %vm2794_vm9, %v2878_v16, %v9698_v7  ;;  %v1828_v56 = vsub.s32 4294967266, %v9933_v11  ;;  %v14215_v7 = vld [vmem:[#allocation14_spill] sm:$0xff] }
 0x522   :  { %14212 = vst [vmem:[#allocation45_spill] sm:$0xff] %v9941_v39  ;;  %v1916_v27 = vadd.s32 %v1915_v55, %v1911_v6  ;;  %8311 = vcosq.f32 %v2880_v52  ;;  %v2981_v37 = vsel %vm13976_vm11, %v2980_v51, %v2979_v23  ;;  %v2178_v15 = vadd.s32 1, %v7519_v63 }
 0x523   :  { %v9948_v20 = vadd.f32 %v14214_v10, %v14213_v60  ;;  %v2176_v12 = vor.u32 8388608, %v2175_v2  ;;  %v13960_v21 = vand.u32 2147483647, %v9914_v57  ;;  %v9955_v16 = vadd.f32 %v14216_v26, %v14215_v7 }
 0x524   :  { %v1917_v29 = vadd.s32 536870912, %v1916_v27  ;;  %v1824_v58 = vsub.s32 32, %v9933_v11  ;;  %v1829_v54 = vadd.s32 127, %v1828_v56  ;;  %vm2179_vm9 = vcmp.gt.s32.totalorder %v2178_v15, 0  ;;  %v9962_v6 = vpop.eup %8305 }
 0x525   :  { %v2276_v23 = vshrl.u32 %v2275_v47, 23  ;;  %8313 = vsinq.f32 %v2880_v52  ;;  %v1808_v51 = vadd.s32 %v9823_v41, %v9836_v46  ;;  %v2180_v50 = vsel %vm2179_vm9, %v2178_v15, 0  ;;  %14218 = vst [vmem:[#allocation11_spill] sm:$0xff] %v9962_v6  ;;  %v9973_v52 = vpop.f32.mrb[25].mxu1 }
 0x526   :  { %v9960_v43 = vshrl.u32 %v1917_v29, 30  ;;  %v9967_v2 = vsel %vm9921_vm15, %v9546_v9, %v2981_v37  ;;  %v9971_v63 = vadd.s32 %v9904_v19, %v9908_v18  ;;  %v2182_v47 = vand.u32 31, %v2180_v50  ;;  %v9975_v56 = vpop.eup %8307  ;;  %v9994_v55 = vpop.f32.mrb[26].mxu1 }
 0x527   :  { %14219 = vst [vmem:[#allocation14_spill] sm:$0xff] %v9975_v56  ;;  %v1825_v41 = vshll.u32 %v9891_v38, %v9933_v11  ;;  %v9980_v15 = vshll.u32 %v2176_v12, 8  ;;  %v9984_v37 = vand.u32 8388607, %v13960_v21  ;;  %v1826_v60 = vshrl.u32 %v1808_v51, %v1824_v58  ;;  %v14222_v56 = vld [vmem:[#allocation10_spill] sm:$0xff]  ;;  %v10011_v48 = vpop.f32.mrb[27].mxu1 }
 0x528   :  { %14217 = vst [vmem:[#allocation13_spill] sm:$0xff] %v9960_v43  ;;  %v1919_v46 = vshll.u32 %v9960_v43, 30  ;;  %v1830_v10 = vshll.u32 %v1829_v54, 23  ;;  %v2183_v19 = vsub.s32 32, %v2182_v47  ;;  %v7523_v18 = vadd.s32 4294967169, %v2276_v23 }
 0x529   :  { %v2181_v7 = vshrl.u32 %v2180_v50, 5  ;;  %v2185_v26 = vshll.u32 %v14151_v17, %v2182_v47  ;;  %v2188_v35 = vshll.u32 %v14152_v59, %v2182_v47  ;;  %v2191_v12 = vshll.u32 %v14153_v34, %v2182_v47 }
 0x52a   :  { %v9986_v29 = vsub.s32 %v1916_v27, %v1919_v46  ;;  %v2186_v38 = vshrl.u32 %v14152_v59, %v2183_v19  ;;  %v2189_v11 = vshrl.u32 %v14153_v34, %v2183_v19  ;;  %v2192_v21 = vshrl.u32 %v14154_v31, %v2183_v19 }
 0x52b   :  { %v9996_v58 = vpop.eup %8309  ;;  %v2194_v54 = vshll.u32 %v14154_v31, %v2182_v47  ;;  %v2195_v23 = vshrl.u32 %v14155_v49, %v2183_v19  ;;  %v2198_v51 = vshrl.u32 %v14156_v24, %v2183_v19  ;;  %v2197_v61 = vshll.u32 %v14155_v49, %v2182_v47 }
 0x52c   :  { %14220 = vst [vmem:[#allocation12_spill] sm:$0xff] %v9996_v58  ;;  %v1922_v27 = vsub.s32 0, %v9986_v29  ;;  %v10002_v50 = vpop.eup %8311  ;;  %v2187_v46 = vor.u32 %v2186_v38, %v2185_v26  ;;  %v2190_v25 = vor.u32 %v2189_v11, %v2188_v35  ;;  %v2193_v43 = vor.u32 %v2192_v21, %v2191_v12 }
 0x52d   :  { %14221 = vst [vmem:[#allocation46_spill] sm:$0xff] %v10002_v50  ;;  %v2196_v6 = vor.u32 %v2195_v23, %v2194_v54  ;;  %v2280_v53 = vor.u32 8388608, %v9984_v37  ;;  %v10009_v9 = vmul.f32 %v14222_v56, %v8971_v1  ;;  %v1827_v62 = vor.u32 %v1826_v60, %v1825_v41 }
 0x52e   :  { %v7508_v39 = vmin.u32 %v1922_v27, %v9986_v29  ;;  %v2199_v58 = vor.u32 %v2198_v51, %v2197_v61  ;;  %vm2200_vm4 = vcmp.lt.s32.totalorder %v2181_v7, 1  ;;  %vm2203_vm13 = vcmp.lt.s32.totalorder %v2181_v7, 4 }
 0x52f   :  { %v10013_v26 = vpop.eup %8313  ;;  %v2205_v21 = vsel %vm2203_vm13, %v2193_v43, 2102212464  ;;  %v2208_v47 = vsel %vm2200_vm4, %v2187_v46, %v2190_v25  ;;  %v2282_v38 = vadd.s32 1, %v7523_v18  ;;  %v1831_v11 = vor.u32 4788187, %v1830_v10 }
 0x530   :  { %14223 = vst [vmem:[#allocation10_spill] sm:$0xff] %v10013_v26  ;;  %v1924_v35 = vclz %v7508_v39  ;;  %v2184_v37 = vshrl.u32 %v14151_v17, %v2183_v19  ;;  %vm2202_vm6 = vcmp.lt.s32.totalorder %v2181_v7, 3  ;;  %v2209_v12 = vsel %vm2203_vm13, %v2196_v6, 920167782 }
 0x531   :  { %vm2201_vm9 = vcmp.lt.s32.totalorder %v2181_v7, 2  ;;  %v2210_v61 = vsel %vm2202_vm6, %v2193_v43, %v2209_v12  ;;  %v2212_v60 = vsel %vm2200_vm4, %v2190_v25, %v2193_v43  ;;  %v2206_v54 = vsel %vm2202_vm6, %v2190_v25, %v2205_v21 }
 0x532   :  { %v7509_v41 = vadd.s32 4294967294, %v1924_v35  ;;  %v2204_v27 = vsel %vm2200_vm4, %v2184_v37, %v2187_v46  ;;  %v2211_v39 = vsel %vm2201_vm9, %v2208_v47, %v2210_v61  ;;  %v2213_v23 = vsel %vm2203_vm13, %v2199_v58, 1326507024 }
 0x533   :  { %v2214_v18 = vsel %vm2202_vm6, %v2196_v6, %v2213_v23  ;;  %v10024_v10 = vmul.u32.u64.low %v9980_v15, %v2211_v39  ;;  %v10025_v19 = vmul.u32.u64.high %v9980_v15, %v2211_v39, %v10024_v10  ;;  %v1832_v51 = vand.u32 2147483647, %v1831_v11 }
 0x534   :  { %vm7510_vm11 = vcmp.lt.s32.totalorder %v7509_v41, 0  ;;  %v2215_v12 = vsel %vm2201_vm9, %v2212_v60, %v2214_v18  ;;  %vm2283_vm14 = vcmp.gt.s32.totalorder %v2282_v38, 0  ;;  %v2207_v25 = vsel %vm2201_vm9, %v2204_v27, %v2206_v54 }
 0x535   :  { %v1927_v35 = vsel %vm7510_vm11, 0, %v7509_v41  ;;  %v2284_v46 = vsel %vm2283_vm14, %v2282_v38, 0  ;;  %v1834_v21 = vcvt.s32.f32 %v1827_v62  ;;  %v2226_v11 = vadd.s32 1, %v10025_v19 }
 0x536   :  { %v1928_v43 = vsub.s32 32, %v1927_v35  ;;  %v1932_v50 = vsub.s32 4294967266, %v1927_v35  ;;  %v10031_v58 = vmul.u32.u64.low %v9980_v15, %v2215_v12  ;;  %v10032_v47 = vmul.u32.u64.high %v9980_v15, %v2215_v12, %v10031_v58 }
 0x537   :  { %v2286_v6 = vand.u32 31, %v2284_v46  ;;  %v10036_v41 = vshll.u32 %v2280_v53, 8  ;;  %v1835_v60 = vmul.f32 %v1834_v21, %v1832_v51  ;;  %v1929_v39 = vshll.u32 %v9986_v29, %v1927_v35 }
 0x538   :  { %v1930_v37 = vshrl.u32 %v9971_v63, %v1928_v43  ;;  %v1933_v61 = vadd.s32 127, %v1932_v50  ;;  %v2223_v7 = vmul.u32 %v9980_v15, %v2207_v25  ;;  %v2285_v62 = vshrl.u32 %v2284_v46, 5 }
 0x539   :  { %v2287_v27 = vsub.s32 32, %v2286_v6  ;;  %v2289_v54 = vshll.u32 %v14151_v17, %v2286_v6  ;;  %v2292_v23 = vshll.u32 %v14152_v59, %v2286_v6  ;;  %vm1754_vm14 = vcmp.lt.s32.totalorder %v9657_v36, 0 }
 0x53a   :  { %v1934_v38 = vshll.u32 %v1933_v61, 23  ;;  %v1931_v63 = vor.u32 %v1930_v37, %v1929_v39  ;;  %vm2225_vm11 = vc.u32 %v10032_v47, %v10024_v10  ;;  %v2295_v50 = vshll.u32 %v14153_v34, %v2286_v6 }
 0x53b   :  { %v2290_v53 = vshrl.u32 %v14152_v59, %v2287_v27  ;;  %v2227_v15 = vsel %vm2225_vm11, %v2226_v11, %v10025_v19  ;;  %v2293_v18 = vshrl.u32 %v14153_v34, %v2287_v27  ;;  %v2298_v51 = vshll.u32 %v14154_v31, %v2286_v6 }
 0x53c   :  { %v1935_v29 = vor.u32 4788187, %v1934_v38  ;;  %v2228_v35 = vadd.s32 %v2227_v15, %v2223_v7  ;;  %v2296_v43 = vshrl.u32 %v14154_v31, %v2287_v27  ;;  %v2299_v25 = vshrl.u32 %v14155_v49, %v2287_v27 }
 0x53d   :  { %v2291_v12 = vor.u32 %v2290_v53, %v2289_v54  ;;  %v2294_v21 = vor.u32 %v2293_v18, %v2292_v23  ;;  %v2301_v58 = vshll.u32 %v14155_v49, %v2286_v6  ;;  %v2302_v37 = vshrl.u32 %v14156_v24, %v2287_v27 }
 0x53e   :  { %v1936_v46 = vand.u32 2147483647, %v1935_v29  ;;  %v1938_v61 = vcvt.s32.f32 %v1931_v63  ;;  %v2229_v39 = vadd.s32 536870912, %v2228_v35  ;;  %v2297_v38 = vor.u32 %v2296_v43, %v2295_v50  ;;  %v1438_v50 = vpop.permute.xlu0 %1437 }
 0x53f   :  { %v2300_v19 = vor.u32 %v2299_v25, %v2298_v51  ;;  %v14224_v11 = vand.u32 2147483647, %v9657_v36  ;;  %v14225_v26 = vmov 0  ;;  %v1836_v7 = vxor.u32 2147483648, %v1835_v60 }
 0x540   :  { %v2303_v54 = vor.u32 %v2302_v37, %v2301_v58  ;;  %vm2304_vm6 = vcmp.lt.s32.totalorder %v2285_v62, 1  ;;  %v1351_v6 = vmul.f32 %v9011_v5, %v8971_v1  ;;  %v1939_v23 = vmul.f32 %v1938_v61, %v1936_v46 }
 0x541   :  { %vm10056_vm4 = vcmp.le.f32.partialorder %v14224_v11, 0.7853982  ;;  %v2230_v53 = vshrl.u32 %v2229_v39, 30  ;;  %vm2307_vm9 = vcmp.lt.s32.totalorder %v2285_v62, 4  ;;  %v2312_v63 = vsel %vm2304_vm6, %v2291_v12, %v2294_v21 }
 0x542   :  { %v14226_v26 = vsel %vm10056_vm4, 4294967295, %v14225_v26  ;;  %v2288_v29 = vshrl.u32 %v14151_v17, %v2287_v27  ;;  %vm2306_vm11 = vcmp.lt.s32.totalorder %v2285_v62, 3  ;;  %v2309_v15 = vsel %vm2307_vm9, %v2297_v38, 2102212464 }
 0x543   :  { %14227 = vst [vmem:[#allocation47_spill] sm:$0xff] %v14226_v26  ;;  %v2313_v18 = vsel %vm2307_vm9, %v2300_v19, 920167782  ;;  %v14228_v51 = vand.u32 2147483647, %v9737_v4  ;;  %v14229_v43 = vmov 0  ;;  %v2316_v46 = vsel %vm2304_vm6, %v2294_v21, %v2297_v38 }
 0x544   :  { %v2231_v25 = vshll.u32 %v2230_v53, 30  ;;  %vm2305_vm12 = vcmp.lt.s32.totalorder %v2285_v62, 2  ;;  %v2314_v1 = vsel %vm2306_vm11, %v2297_v38, %v2313_v18  ;;  %v1837_v58 = vsel %vm1754_vm14, %v1836_v7, %v1835_v60 }
 0x545   :  { %vm10067_vm8 = vcmp.le.f32.partialorder %v14228_v51, 0.7853982  ;;  %v2308_v27 = vsel %vm2304_vm6, %v2288_v29, %v2291_v12  ;;  %v2315_v37 = vsel %vm2305_vm12, %v2312_v63, %v2314_v1  ;;  %v2317_v61 = vsel %vm2307_vm9, %v2303_v54, 1326507024  ;;  %v1506_v54 = vpop.permute.xlu0 %1505  ;;  %v14232_v63 = vld [vmem:[#allocation16_spill] sm:$0xff]  ;;  %v14233_v29 = vld [vmem:[#allocation19_spill] sm:$0xff] }
 0x546   :  { %v14230_v43 = vsel %vm10067_vm8, 4294967295, %v14229_v43  ;;  %v1940_v39 = vxor.u32 2147483648, %v1939_v23  ;;  %vm13991_vm13 = vcmp.lt.s32.totalorder %v9883_v40, 0  ;;  %v10078_v11 = vsub.s32 %v2228_v35, %v2231_v25  ;;  %v14234_v25 = vld [vmem:[#allocation18_spill] sm:$0xff]  ;;  %v14235_v1 = vld [vmem:[#allocation20_spill] sm:$0xff] }
 0x547   :  { %14231 = vst [vmem:[#allocation48_spill] sm:$0xff] %v14230_v43  ;;  %v2310_v51 = vsel %vm2306_vm11, %v2294_v21, %v2309_v15  ;;  %v2318_v22 = vsel %vm2306_vm11, %v2300_v19, %v2317_v61  ;;  %v10084_v38 = vmul.u32.u64.low %v10036_v41, %v2315_v37  ;;  %v10085_v45 = vmul.u32.u64.high %v10036_v41, %v2315_v37, %v10084_v38 }
 0x548   :  { %v2319_v18 = vsel %vm2305_vm12, %v2316_v46, %v2318_v22  ;;  %v1366_v60 = vadd.f32 %v10009_v9, %v9948_v20  ;;  %v2234_v12 = vsub.s32 0, %v10078_v11  ;;  %v1367_v21 = vadd.f32 %v1351_v6, %v9955_v16 }
 0x549   :  { %v10092_v7 = vmul.u32.u64.low %v10036_v41, %v2319_v18  ;;  %v10093_v35 = vmul.u32.u64.high %v10036_v41, %v2319_v18, %v10092_v7  ;;  %v2311_v19 = vsel %vm2305_vm12, %v2308_v27, %v2310_v51  ;;  %v1286_v15 = vadd.f32 %v14233_v29, %v14232_v63  ;;  %v10140_v63 = vpop.permute.xlu1 %1441 }
 0x54a   :  { %v1470_v22 = vmul.f32 %v1438_v50, %v1366_v60  ;;  %v10101_v46 = vadd.f32 %v14235_v1, %v14234_v25  ;;  %8315 = vcosq.f32 %v9967_v2  ;;  %v1840_v9 = vsel %vm10056_vm4, %v9657_v36, %v1837_v58 }
 0x54b   :  { %vm14236_vm6 = vcmp.lt.s32.totalorder %v9737_v4, 0  ;;  %v7520_v16 = vmin.u32 %v2234_v12, %v10078_v11  ;;  %v2254_v62 = vsub.s32 4, %v2230_v53  ;;  %v2330_v6 = vadd.s32 1, %v10085_v45 }
 0x54c   :  { %v1941_v20 = vsel %vm14236_vm6, %v1940_v39, %v1939_v23  ;;  %v1471_v27 = vmul.f32 %v1438_v50, %v1367_v21  ;;  %v10111_v37 = vadd.f32 %v1506_v54, %v1470_v22  ;;  %8317 = vsinq.f32 %v9967_v2 }
 0x54d   :  { %v2236_v61 = vclz %v7520_v16  ;;  %v2327_v51 = vmul.u32 %v10036_v41, %v2311_v19  ;;  %vm2329_vm12 = vc.u32 %v10093_v35, %v10084_v38  ;;  %v1944_v23 = vsel %vm10067_vm8, %v9737_v4, %v1941_v20 }
 0x54e   :  { %v2331_v58 = vsel %vm2329_vm12, %v2330_v6, %v10085_v45  ;;  %v10121_v39 = vadd.f32 %v1506_v54, %v1471_v27  ;;  %v13985_v50 = vand.u32 2147483647, %v10111_v37  ;;  %8319 = vcosq.f32 %v1840_v9 }
 0x54f   :  { %v7521_v18 = vadd.s32 4294967294, %v2236_v61  ;;  %v2332_v60 = vadd.s32 %v2331_v58, %v2327_v51  ;;  %v2587_v2 = vand.u32 2139095040, %v10111_v37  ;;  %v14237_v41 = vsub.s32 4, %v9872_v13  ;;  %v14241_v61 = vld [vmem:[#allocation3_spill] sm:$0xff] }
 0x550   :  { %8321 = vsinq.f32 %v1840_v9  ;;  %v2224_v45 = vadd.s32 %v10024_v10, %v10032_v47  ;;  %v10136_v7 = vsel %vm13991_vm13, %v2254_v62, %v2230_v53  ;;  %v1354_v22 = vmul.f32 %v14222_v56, %v8981_v28  ;;  %v741_v10 = vpop.permute.xlu0 %740 }
 0x551   :  { %v10130_v12 = vsel %vm1754_vm14, %v14237_v41, %v9872_v13  ;;  %14239 = vst [vmem:[#allocation19_spill] sm:$0xff] %v10136_v7  ;;  %8323 = vcosq.f32 %v1944_v23  ;;  %vm7522_vm9 = vcmp.lt.s32.totalorder %v7521_v18, 0  ;;  %v2333_v21 = vadd.s32 536870912, %v2332_v60 }
 0x552   :  { %14238 = vst [vmem:[#allocation16_spill] sm:$0xff] %v10130_v12  ;;  %v2588_v54 = vshrl.u32 %v2587_v2, 23  ;;  %v2239_v19 = vsel %vm7522_vm9, 0, %v7521_v18  ;;  %v2591_v13 = vand.u32 8388607, %v13985_v50  ;;  %v2691_v29 = vand.u32 2139095040, %v10121_v39 }
 0x553   :  { %v2240_v47 = vsub.s32 32, %v2239_v19  ;;  %v2244_v25 = vsub.s32 4294967266, %v2239_v19  ;;  %v10145_v53 = vshrl.u32 %v2333_v21, 30  ;;  %v13984_v1 = vand.u32 2147483647, %v10121_v39 }
 0x554   :  { %8325 = vsinq.f32 %v1944_v23  ;;  %v1355_v9 = vmul.f32 %v9011_v5, %v8981_v28  ;;  %v7535_v20 = vadd.s32 4294967169, %v2588_v54  ;;  %v2692_v56 = vshrl.u32 %v2691_v29, 23  ;;  %v10150_v16 = vpop.eup %8315 }
 0x555   :  { %14240 = vst [vmem:[#allocation18_spill] sm:$0xff] %v10145_v53  ;;  %v2242_v62 = vshrl.u32 %v2224_v45, %v2240_v47  ;;  %v2245_v6 = vadd.s32 127, %v2244_v25  ;;  %v2335_v27 = vshll.u32 %v10145_v53, 30  ;;  %v10154_v51 = vadd.f32 %v14241_v61, %v741_v10 }
 0x556   :  { %v2241_v58 = vshll.u32 %v10078_v11, %v2239_v19  ;;  %v2592_v18 = vor.u32 8388608, %v2591_v13  ;;  %v2594_v2 = vadd.s32 1, %v7535_v20  ;;  %v7539_v41 = vadd.s32 4294967169, %v2692_v56  ;;  %v10157_v23 = vpop.eup %8317  ;;  %v10167_v11 = vpop.permute.xlu1 %1509 }
 0x557   :  { %v2246_v21 = vshll.u32 %v2245_v6, 23  ;;  %v10159_v28 = vsub.s32 %v2332_v60, %v2335_v27  ;;  %v1370_v5 = vadd.f32 %v1354_v22, %v1286_v15  ;;  %v10163_v45 = vand.u32 8388607, %v13984_v1 }
 0x558   :  { %v2243_v54 = vor.u32 %v2242_v62, %v2241_v58  ;;  %v2328_v29 = vadd.s32 %v10084_v38, %v10093_v35  ;;  %vm2595_vm14 = vcmp.gt.s32.totalorder %v2594_v2, 0  ;;  %v2698_v10 = vadd.s32 1, %v7539_v41  ;;  %v10169_v19 = vpop.eup %8319 }
 0x559   :  { %14242 = vst [vmem:[#allocation20_spill] sm:$0xff] %v10169_v19  ;;  %v2247_v13 = vor.u32 4788187, %v2246_v21  ;;  %v2338_v47 = vsub.s32 0, %v10159_v28  ;;  %v1474_v60 = vmul.f32 %v10140_v63, %v1370_v5  ;;  %v2596_v15 = vsel %vm2595_vm14, %v2594_v2, 0 }
 0x55a   :  { %v10173_v22 = vpop.eup %8321  ;;  %v10176_v25 = vadd.f32 %v1355_v9, %v10101_v46  ;;  %v2598_v20 = vand.u32 31, %v2596_v15  ;;  %v10178_v56 = vshll.u32 %v2592_v18, 8  ;;  %vm2699_vm11 = vcmp.gt.s32.totalorder %v2698_v10, 0 }
 0x55b   :  { %14243 = vst [vmem:[#allocation3_spill] sm:$0xff] %v10173_v22  ;;  %v10180_v38 = vpop.eup %8323  ;;  %v2248_v35 = vand.u32 2147483647, %v2247_v13  ;;  %v7524_v62 = vmin.u32 %v2338_v47, %v10159_v28  ;;  %v10185_v27 = vadd.f32 %v10167_v11, %v1474_v60  ;;  %v2250_v61 = vcvt.s32.f32 %v2243_v54 }
 0x55c   :  { %14244 = vst [vmem:[#allocation49_spill] sm:$0xff] %v10180_v38  ;;  %v2597_v58 = vshrl.u32 %v2596_v15, 5  ;;  %v2599_v2 = vsub.s32 32, %v2598_v20  ;;  %v2700_v41 = vsel %vm2699_vm11, %v2698_v10, 0  ;;  %v2601_v9 = vshll.u32 %v14151_v17, %v2598_v20 }
 0x55d   :  { %v2340_v46 = vclz %v7524_v62  ;;  %v2604_v18 = vshll.u32 %v14152_v59, %v2598_v20  ;;  %v2607_v21 = vshll.u32 %v14153_v34, %v2598_v20  ;;  %v2251_v13 = vmul.f32 %v2250_v61, %v2248_v35 }
 0x55e   :  { %v10190_v5 = vpop.eup %8325  ;;  %v2602_v47 = vshrl.u32 %v14152_v59, %v2599_v2  ;;  %v2605_v1 = vshrl.u32 %v14153_v34, %v2599_v2  ;;  %v2608_v60 = vshrl.u32 %v14154_v31, %v2599_v2  ;;  %v2610_v15 = vshll.u32 %v14154_v31, %v2598_v20 }
 0x55f   :  { %14245 = vst [vmem:[#allocation50_spill] sm:$0xff] %v10190_v5  ;;  %v7525_v54 = vadd.s32 4294967294, %v2340_v46  ;;  %v2611_v10 = vshrl.u32 %v14155_v49, %v2599_v2  ;;  %v2614_v62 = vshrl.u32 %v14156_v24, %v2599_v2  ;;  %v2613_v36 = vshll.u32 %v14155_v49, %v2598_v20 }
 0x560   :  { %v2603_v50 = vor.u32 %v2602_v47, %v2601_v9  ;;  %v2606_v6 = vor.u32 %v2605_v1, %v2604_v18  ;;  %v3003_v19 = vand.u32 2139095040, %v10185_v27  ;;  %v2600_v35 = vshrl.u32 %v14151_v17, %v2599_v2 }
 0x561   :  { %vm7526_vm6 = vcmp.lt.s32.totalorder %v7525_v54, 0  ;;  %v2609_v61 = vor.u32 %v2608_v60, %v2607_v21  ;;  %v2612_v7 = vor.u32 %v2611_v10, %v2610_v15  ;;  %v14246_v22 = vand.u32 2147483647, %v9883_v40 }
 0x562   :  { %v14247_v46 = vmov 0  ;;  %v2252_v26 = vxor.u32 2147483648, %v2251_v13  ;;  %v2343_v12 = vsel %vm7526_vm6, 0, %v7525_v54  ;;  %v2615_v38 = vor.u32 %v2614_v62, %v2613_v36  ;;  %v746_v62 = vpop.permute.xlu1 %745 }
 0x563   :  { %vm10203_vm12 = vcmp.le.f32.partialorder %v14246_v22, 0.7853982  ;;  %vm2616_vm9 = vcmp.lt.s32.totalorder %v2597_v58, 1  ;;  %v2344_v1 = vsub.s32 32, %v2343_v12  ;;  %v2348_v9 = vsub.s32 4294967266, %v2343_v12 }
 0x564   :  { %v14248_v46 = vsel %vm10203_vm12, 4294967295, %v14247_v46  ;;  %vm2617_vm14 = vcmp.lt.s32.totalorder %v2597_v58, 2  ;;  %vm2618_vm11 = vcmp.lt.s32.totalorder %v2597_v58, 3  ;;  %v2345_v20 = vshll.u32 %v10159_v28, %v2343_v12 }
 0x565   :  { %14249 = vst [vmem:[#allocation51_spill] sm:$0xff] %v14248_v46  ;;  %vm2619_vm13 = vcmp.lt.s32.totalorder %v2597_v58, 4  ;;  %v2620_v2 = vsel %vm2616_vm9, %v2600_v35, %v2603_v50  ;;  %v2624_v18 = vsel %vm2616_vm9, %v2603_v50, %v2606_v6  ;;  %v2346_v21 = vshrl.u32 %v2328_v29, %v2344_v1 }
 0x566   :  { %v2349_v47 = vadd.s32 127, %v2348_v9  ;;  %v2621_v60 = vsel %vm2619_vm13, %v2609_v61, 2102212464  ;;  %v2625_v22 = vsel %vm2619_vm13, %v2612_v7, 920167782  ;;  %v2628_v54 = vsel %vm2616_vm9, %v2606_v6, %v2609_v61 }
 0x567   :  { %v2622_v15 = vsel %vm2618_vm11, %v2606_v6, %v2621_v60  ;;  %v2626_v10 = vsel %vm2618_vm11, %v2609_v61, %v2625_v22  ;;  %v2629_v36 = vsel %vm2619_vm13, %v2615_v38, 1326507024  ;;  %vm14250_vm6 = vcmp.lt.s32.totalorder %v9883_v40, 0  ;;  %v14251_v61 = vld [vmem:[#allocation2_spill] sm:$0xff] }
 0x568   :  { %v2253_v5 = vsel %vm14250_vm6, %v2252_v26, %v2251_v13  ;;  %v2347_v53 = vor.u32 %v2346_v21, %v2345_v20  ;;  %v2350_v43 = vshll.u32 %v2349_v47, 23  ;;  %v2627_v12 = vsel %vm2617_vm14, %v2624_v18, %v2626_v10 }
 0x569   :  { %v2623_v50 = vsel %vm2617_vm14, %v2620_v2, %v2622_v15  ;;  %v2630_v28 = vsel %vm2618_vm11, %v2612_v7, %v2629_v36  ;;  %v10216_v29 = vmul.u32.u64.low %v10178_v56, %v2627_v12  ;;  %v10217_v35 = vmul.u32.u64.high %v10178_v56, %v2627_v12, %v10216_v29 }
 0x56a   :  { %v2351_v1 = vor.u32 4788187, %v2350_v43  ;;  %v2631_v38 = vsel %vm2617_vm14, %v2628_v54, %v2630_v28  ;;  %v2701_v6 = vshrl.u32 %v2700_v41, 5  ;;  %v10222_v9 = vadd.f32 %v14251_v61, %v746_v62 }
 0x56b   :  { %v1475_v26 = vmul.f32 %v10140_v63, %v10176_v25  ;;  %v10227_v13 = vmul.u32.u64.low %v10178_v56, %v2631_v38  ;;  %v10228_v20 = vmul.u32.u64.high %v10178_v56, %v2631_v38, %v10227_v13  ;;  %v2702_v7 = vand.u32 31, %v2700_v41 }
 0x56c   :  { %v2256_v2 = vsel %vm10203_vm12, %v9883_v40, %v2253_v5  ;;  %v2639_v43 = vmul.u32 %v10178_v56, %v2623_v50  ;;  %v14252_v58 = vor.u32 8388608, %v10163_v45  ;;  %v13997_v21 = vand.u32 2147483647, %v10185_v27 }
 0x56d   :  { %v2354_v47 = vcvt.s32.f32 %v2347_v53  ;;  %v2642_v63 = vadd.s32 1, %v10217_v35  ;;  %v2703_v25 = vsub.s32 32, %v2702_v7  ;;  %v3004_v60 = vshrl.u32 %v3003_v19, 23 }
 0x56e   :  { %v10236_v18 = vshll.u32 %v14252_v58, 8  ;;  %v2352_v22 = vand.u32 2147483647, %v2351_v1  ;;  %v2705_v41 = vshll.u32 %v14151_v17, %v2702_v7  ;;  %v2708_v15 = vshll.u32 %v14152_v59, %v2702_v7 }
 0x56f   :  { %vm2720_vm13 = vcmp.lt.s32.totalorder %v2701_v6, 1  ;;  %vm2641_vm9 = vc.u32 %v10228_v20, %v10216_v29  ;;  %v2706_v45 = vshrl.u32 %v14152_v59, %v2703_v25  ;;  %v2711_v56 = vshll.u32 %v14153_v34, %v2702_v7 }
 0x570   :  { %v2714_v5 = vshll.u32 %v14154_v31, %v2702_v7  ;;  %v2643_v53 = vsel %vm2641_vm9, %v2642_v63, %v10217_v35  ;;  %v2709_v10 = vshrl.u32 %v14153_v34, %v2703_v25  ;;  %v2712_v19 = vshrl.u32 %v14154_v31, %v2703_v25 }
 0x571   :  { %v2717_v54 = vshll.u32 %v14155_v49, %v2702_v7  ;;  %v2644_v36 = vadd.s32 %v2643_v53, %v2639_v43  ;;  %v2707_v62 = vor.u32 %v2706_v45, %v2705_v41  ;;  %v2715_v12 = vshrl.u32 %v14155_v49, %v2703_v25  ;;  %v716_v41 = vld [vmem:[%s13910_s4 + $0x170] sm:$0xff] }
 0x572   :  { %v2718_v50 = vshrl.u32 %v14156_v24, %v2703_v25  ;;  %v2355_v28 = vmul.f32 %v2354_v47, %v2352_v22  ;;  %v2704_v1 = vshrl.u32 %v14151_v17, %v2703_v25  ;;  %v2710_v38 = vor.u32 %v2709_v10, %v2708_v15 }
 0x573   :  { %v2713_v61 = vor.u32 %v2712_v19, %v2711_v56  ;;  %v2645_v35 = vadd.s32 536870912, %v2644_v36  ;;  %v2716_v13 = vor.u32 %v2715_v12, %v2714_v5  ;;  %vm2723_vm11 = vcmp.lt.s32.totalorder %v2701_v6, 4 }
 0x574   :  { %v2719_v58 = vor.u32 %v2718_v50, %v2717_v54  ;;  %vm2721_vm6 = vcmp.lt.s32.totalorder %v2701_v6, 2  ;;  %vm2722_vm9 = vcmp.lt.s32.totalorder %v2701_v6, 3  ;;  %v2728_v63 = vsel %vm2720_vm13, %v2707_v62, %v2710_v38 }
 0x575   :  { %v2725_v7 = vsel %vm2723_vm11, %v2713_v61, 2102212464  ;;  %v14253_v43 = vand.u32 2147483647, %v9914_v57  ;;  %v10262_v47 = vshrl.u32 %v2645_v35, 30  ;;  %v2724_v25 = vsel %vm2720_vm13, %v2704_v1, %v2707_v62 }
 0x576   :  { %v2726_v22 = vsel %vm2722_vm9, %v2710_v38, %v2725_v7  ;;  %v2729_v15 = vsel %vm2723_vm11, %v2716_v13, 920167782  ;;  %v2356_v45 = vxor.u32 2147483648, %v2355_v28  ;;  %v2732_v5 = vsel %vm2720_vm13, %v2710_v38, %v2713_v61 }
 0x577   :  { %vm10258_vm14 = vcmp.le.f32.partialorder %v14253_v43, 0.7853982  ;;  %v2730_v56 = vsel %vm2722_vm9, %v2713_v61, %v2729_v15  ;;  %v2733_v53 = vsel %vm2723_vm11, %v2719_v58, 1326507024  ;;  %v2647_v10 = vshll.u32 %v10262_v47, 30 }
 0x578   :  { %v2731_v19 = vsel %vm2721_vm6, %v2728_v63, %v2730_v56  ;;  %v2734_v54 = vsel %vm2722_vm9, %v2716_v13, %v2733_v53  ;;  %v10269_v12 = vadd.f32 %v10167_v11, %v1475_v26  ;;  %v2727_v50 = vsel %vm2721_vm6, %v2724_v25, %v2726_v22 }
 0x579   :  { %v2735_v35 = vsel %vm2721_vm6, %v2732_v5, %v2734_v54  ;;  %v10274_v62 = vmul.u32.u64.low %v10236_v18, %v2731_v19  ;;  %v10275_v1 = vmul.u32.u64.high %v10236_v18, %v2731_v19, %v10274_v62  ;;  %8327 = vcosq.f32 %v2256_v2 }
 0x57a   :  { %v10278_v38 = vsub.s32 %v2644_v36, %v2647_v10  ;;  %v10281_v61 = vmul.u32.u64.low %v10236_v18, %v2735_v35  ;;  %v10282_v58 = vmul.u32.u64.high %v10236_v18, %v2735_v35, %v10281_v61  ;;  %8329 = vsinq.f32 %v2256_v2 }
 0x57b   :  { %vm14256_vm13 = vcmp.lt.s32.totalorder %v9914_v57, 0  ;;  %v7551_v26 = vadd.s32 4294967169, %v3004_v60  ;;  %v3007_v6 = vand.u32 8388607, %v13997_v21  ;;  %v2743_v7 = vmul.u32 %v10236_v18, %v2727_v50 }
 0x57c   :  { %v2357_v11 = vsel %vm14256_vm13, %v2356_v45, %v2355_v28  ;;  %v2650_v13 = vsub.s32 0, %v10278_v38  ;;  %v13996_v63 = vand.u32 2147483647, %v10269_v12  ;;  %v3107_v36 = vand.u32 2139095040, %v10269_v12 }
 0x57d   :  { %v2746_v43 = vadd.s32 1, %v10275_v1  ;;  %v3008_v25 = vor.u32 8388608, %v3007_v6  ;;  %v3010_v22 = vadd.s32 1, %v7551_v26  ;;  %v1099_v2 = vmul.f32 15.0, %v10154_v51 }
 0x57e   :  { %v7536_v28 = vmin.u32 %v2650_v13, %v10278_v38  ;;  %vm2745_vm11 = vc.u32 %v10282_v58, %v10274_v62  ;;  %v3108_v60 = vshrl.u32 %v3107_v36, 23  ;;  %v1100_v15 = vmul.f32 15.0, %v10222_v9 }
 0x57f   :  { %v10301_v18 = vsel %vm10258_vm14, %v9914_v57, %v2357_v11  ;;  %v2640_v45 = vadd.s32 %v10216_v29, %v10228_v20  ;;  %v2747_v56 = vsel %vm2745_vm11, %v2746_v43, %v10275_v1  ;;  %vm3011_vm6 = vcmp.gt.s32.totalorder %v3010_v22, 0 }
 0x580   :  { %v2652_v51 = vclz %v7536_v28  ;;  %v2748_v53 = vadd.s32 %v2747_v56, %v2743_v7  ;;  %v3012_v10 = vsel %vm3011_vm6, %v3010_v22, 0  ;;  %v10307_v54 = vshll.u32 %v3008_v25, 8 }
 0x581   :  { %v3014_v19 = vand.u32 31, %v3012_v10  ;;  %v10311_v9 = vand.u32 8388607, %v13996_v63  ;;  %v10313_v50 = vadd.f32 30.0, %v1099_v2  ;;  %v7555_v29 = vadd.s32 4294967169, %v3108_v60 }
 0x582   :  { %v7537_v35 = vadd.s32 4294967294, %v2652_v51  ;;  %v2749_v61 = vadd.s32 536870912, %v2748_v53  ;;  %v10315_v20 = vadd.f32 30.0, %v1100_v15  ;;  %v10317_v1 = vshrl.u32 %v3012_v10, 5 }
 0x583   :  { %v3015_v11 = vsub.s32 32, %v3014_v19  ;;  %v3017_v26 = vshll.u32 %v14151_v17, %v3014_v19  ;;  %v3020_v6 = vshll.u32 %v14152_v59, %v3014_v19  ;;  %3439 = vperm.xlu1 %8267, %v10313_v50   ;;  %v10322_v13 = vpop.eup %8327  ;;  %v3023_v36 = vshll.u32 %v14153_v34, %v3014_v19 }
 0x584   :  { %14257 = vst [vmem:[#allocation2_spill] sm:$0xff] %v10322_v13  ;;  %vm7538_vm9 = vcmp.lt.s32.totalorder %v7537_v35, 0  ;;  %v10324_v7 = vshrl.u32 %v2749_v61, 30  ;;  %v3026_v43 = vshll.u32 %v14154_v31, %v3014_v19  ;;  %3444 = vperm.xlu0 %8266, %v10315_v20   ;;  %v10329_v25 = vpop.eup %8329  ;;  %v3029_v60 = vshll.u32 %v14155_v49, %v3014_v19 }
 0x585   :  { %14259 = vst [vmem:[#allocation53_spill] sm:$0xff] %v10329_v25  ;;  %v2655_v22 = vsel %vm7538_vm9, 0, %v7537_v35  ;;  %v3018_v2 = vshrl.u32 %v14152_v59, %v3015_v11  ;;  %v3021_v28 = vshrl.u32 %v14153_v34, %v3015_v11  ;;  %v3024_v21 = vshrl.u32 %v14154_v31, %v3015_v11 }
 0x586   :  { %14258 = vst [vmem:[#allocation52_spill] sm:$0xff] %v10324_v7  ;;  %v2656_v15 = vsub.s32 32, %v2655_v22  ;;  %v2657_v56 = vshll.u32 %v10278_v38, %v2655_v22  ;;  %v2660_v51 = vsub.s32 4294967266, %v2655_v22  ;;  %v2751_v10 = vshll.u32 %v10324_v7, 30 }
 0x587   :  { %v3019_v61 = vor.u32 %v3018_v2, %v3017_v26  ;;  %v3022_v63 = vor.u32 %v3021_v28, %v3020_v6  ;;  %v3027_v5 = vshrl.u32 %v14155_v49, %v3015_v11  ;;  %v14260_v40 = vmov 1  }
 0x588   :  { %8268 = vset.pattern.permute.xlu1 %v14260_v40  ;;  %v2658_v35 = vshrl.u32 %v2640_v45, %v2656_v15  ;;  %v2661_v13 = vadd.s32 127, %v2660_v51  ;;  %v10339_v25 = vsub.s32 %v2748_v53, %v2751_v10  ;;  %v3030_v19 = vshrl.u32 %v14156_v24, %v3015_v11 }
 0x589   :  { %3458 = vperm.xlu1 %8268, %v10313_v50   ;;  %v3016_v38 = vshrl.u32 %v14151_v17, %v3015_v11  ;;  %v3025_v22 = vor.u32 %v3024_v21, %v3023_v36  ;;  %v3028_v7 = vor.u32 %v3027_v5, %v3026_v43  ;;  %v3114_v26 = vadd.s32 1, %v7555_v29 }
 0x58a   :  { %v2659_v6 = vor.u32 %v2658_v35, %v2657_v56  ;;  %v2662_v2 = vshll.u32 %v2661_v13, 23  ;;  %v2754_v28 = vsub.s32 0, %v10339_v25  ;;  %v3031_v46 = vor.u32 %v3030_v19, %v3029_v60  ;;  %v10352_v60 = vpop.permute.xlu0 %755 }
 0x58b   :  { %vm3032_vm11 = vcmp.lt.s32.totalorder %v10317_v1, 1  ;;  %vm3033_vm6 = vcmp.lt.s32.totalorder %v10317_v1, 2  ;;  %vm3034_vm9 = vcmp.lt.s32.totalorder %v10317_v1, 3  ;;  %vm3035_vm12 = vcmp.lt.s32.totalorder %v10317_v1, 4 }
 0x58c   :  { %v2663_v45 = vor.u32 4788187, %v2662_v2  ;;  %v7540_v21 = vmin.u32 %v2754_v28, %v10339_v25  ;;  %v3037_v5 = vsel %vm3035_vm12, %v3025_v22, 2102212464  ;;  %v3040_v53 = vsel %vm3032_vm11, %v3019_v61, %v3022_v63 }
 0x58d   :  { %v14261_v29 = vmov 0   ;;  %v3036_v11 = vsel %vm3032_vm11, %v3016_v38, %v3019_v61  ;;  %v3041_v13 = vsel %vm3035_vm12, %v3028_v7, 920167782  ;;  %v3044_v36 = vsel %vm3032_vm11, %v3022_v63, %v3025_v22  ;;  %v10362_v38 = vpop.permute.xlu1 %750 }
 0x58e   :  { %8270 = vset.pattern.permute.xlu1 %v14261_v29  ;;  %v3045_v43 = vsel %vm3035_vm12, %v3031_v46, 1326507024  ;;  %v2664_v15 = vand.u32 2147483647, %v2663_v45  ;;  %v2666_v56 = vcvt.s32.f32 %v2659_v6  ;;  %v2756_v51 = vclz %v7540_v21 }
 0x58f   :  { %v3042_v10 = vsel %vm3034_vm9, %v3025_v22, %v3041_v13  ;;  %v3038_v35 = vsel %vm3034_vm9, %v3022_v63, %v3037_v5  ;;  %v3046_v61 = vsel %vm3034_vm9, %v3028_v7, %v3045_v43  ;;  %vm3115_vm13 = vcmp.gt.s32.totalorder %v3114_v26, 0 }
 0x590   :  { %v3043_v19 = vsel %vm3033_vm6, %v3040_v53, %v3042_v10  ;;  %v2667_v46 = vmul.f32 %v2666_v56, %v2664_v15  ;;  %v7541_v2 = vadd.s32 4294967294, %v2756_v51  ;;  %v3047_v6 = vsel %vm3033_vm6, %v3044_v36, %v3046_v61  ;;  %v10380_v36 = vpop.permute.xlu0 %805 }
 0x591   :  { %v3116_v28 = vsel %vm3115_vm13, %v3114_v26, 0  ;;  %v10367_v22 = vmul.u32.u64.low %v10307_v54, %v3047_v6  ;;  %v10368_v45 = vmul.u32.u64.high %v10307_v54, %v3047_v6, %v10367_v22  ;;  %8331 = vcosq.f32 %v10301_v18 }
 0x592   :  { %v10371_v63 = vmul.u32.u64.low %v10307_v54, %v3043_v19  ;;  %v10372_v21 = vmul.u32.u64.high %v10307_v54, %v3043_v19, %v10371_v63  ;;  %vm7542_vm12 = vcmp.lt.s32.totalorder %v7541_v2, 0  ;;  %v3039_v7 = vsel %vm3033_vm6, %v3036_v11, %v3038_v35  ;;  %v10403_v19 = vpop.permute.xlu1 %800 }
 0x593   :  { %v3118_v5 = vand.u32 31, %v3116_v28  ;;  %8333 = vsinq.f32 %v10301_v18  ;;  %v2668_v53 = vxor.u32 2147483648, %v2667_v46  ;;  %v2759_v26 = vsel %vm7542_vm12, 0, %v7541_v2 }
 0x594   :  { %v3112_v13 = vor.u32 8388608, %v10311_v9  ;;  %v14262_v43 = vand.u32 2147483647, %v10111_v37  ;;  %v14263_v15 = vmov 0  ;;  %v14265_v56 = vsub.s32 4, %v10262_v47 }
 0x595   :  { %vm14266_vm11 = vcmp.lt.s32.totalorder %v10111_v37, 0  ;;  %v2744_v18 = vadd.s32 %v10274_v62, %v10282_v58  ;;  %v2760_v11 = vsub.s32 32, %v2759_v26  ;;  %v2764_v9 = vsub.s32 4294967266, %v2759_v26 }
 0x596   :  { %vm10384_vm13 = vcmp.le.f32.partialorder %v14262_v43, 0.7853982  ;;  %v10393_v1 = vsel %vm14266_vm11, %v14265_v56, %v10262_v47  ;;  %v3055_v51 = vmul.u32 %v10307_v54, %v3039_v7  ;;  %vm3057_vm6 = vc.u32 %v10368_v45, %v10371_v63  ;;  %vm14268_vm9 = vmmov %vm14266_vm11 }
 0x597   :  { %v14264_v15 = vsel %vm10384_vm13, 4294967295, %v14263_v15  ;;  %14267 = vst [vmem:[#allocation54_spill] sm:$0xff] %v10393_v1  ;;  %v3058_v10 = vadd.s32 1, %v10372_v21  ;;  %v10401_v35 = vshrl.u32 %v3116_v28, 5  ;;  %v2761_v61 = vshll.u32 %v10339_v25, %v2759_v26 }
 0x598   :  { %v2762_v47 = vshrl.u32 %v2744_v18, %v2760_v11  ;;  %v2765_v2 = vadd.s32 127, %v2764_v9  ;;  %v3119_v6 = vsub.s32 32, %v3118_v5  ;;  %v2669_v62 = vsel %vm14268_vm9, %v2668_v53, %v2667_v46  ;;  %v3417_v46 = vpop.permute.xlu0 %3416 }
 0x599   :  { %v3059_v58 = vsel %vm3057_vm6, %v3058_v10, %v10372_v21  ;;  %v3121_v54 = vshll.u32 %v14151_v17, %v3118_v5  ;;  %v10410_v22 = vshll.u32 %v3112_v13, 8  ;;  %v3124_v56 = vshll.u32 %v14152_v59, %v3118_v5 }
 0x59a   :  { %v2763_v7 = vor.u32 %v2762_v47, %v2761_v61  ;;  %v2766_v43 = vshll.u32 %v2765_v2, 23  ;;  %v3060_v28 = vadd.s32 %v3059_v58, %v3055_v51  ;;  %v3122_v1 = vshrl.u32 %v14152_v59, %v3119_v6  ;;  %v3412_v47 = vpop.permute.xlu1 %3411 }
 0x59b   :  { %v3125_v25 = vshrl.u32 %v14153_v34, %v3119_v6  ;;  %v3127_v26 = vshll.u32 %v14153_v34, %v3118_v5  ;;  %v3128_v18 = vshrl.u32 %v14154_v31, %v3119_v6  ;;  %v3130_v13 = vshll.u32 %v14154_v31, %v3118_v5  ;;  %v10420_v2 = vpop.eup %8331  ;;  %v10794_v31 = vld [vmem:[%s13912_s5 + $0x38] sm:$0xff] }
 0x59c   :  { %v2767_v53 = vor.u32 4788187, %v2766_v43  ;;  %v2770_v21 = vcvt.s32.f32 %v2763_v7  ;;  %v3061_v11 = vadd.s32 536870912, %v3060_v28  ;;  %v3123_v9 = vor.u32 %v3122_v1, %v3121_v54 }
 0x59d   :  { %v3126_v51 = vor.u32 %v3125_v25, %v3124_v56  ;;  %v3129_v10 = vor.u32 %v3128_v18, %v3127_v26  ;;  %v3131_v61 = vshrl.u32 %v14155_v49, %v3119_v6  ;;  %v3133_v59 = vshll.u32 %v14155_v49, %v3118_v5  ;;  %v10426_v43 = vpop.eup %8333  ;;  %v14269_v56 = vld [vmem:[#allocation4_spill] sm:$0xff]  ;;  %v14270_v26 = vld [vmem:[#allocation5_spill] sm:$0xff] }
 0x59e   :  { %v2768_v58 = vand.u32 2147483647, %v2767_v53  ;;  %v10422_v34 = vshrl.u32 %v3061_v11, 30  ;;  %v3134_v7 = vshrl.u32 %v14156_v24, %v3119_v6  ;;  %v10431_v1 = vsel %vm10384_vm13, %v10111_v37, %v2669_v62 }
 0x59f   :  { %v3132_v54 = vor.u32 %v3131_v61, %v3130_v13  ;;  %v1012_v25 = vadd.f32 %v14269_v56, %v10352_v60  ;;  %v1007_v18 = vadd.f32 %v14270_v26, %v10362_v38  ;;  %v3120_v5 = vshrl.u32 %v14151_v17, %v3119_v6  ;;  %v816_v60 = vpop.permute.xlu0 %815 }
 0x5a0   :  { %v2771_v53 = vmul.f32 %v2770_v21, %v2768_v58  ;;  %v3063_v11 = vshll.u32 %v10422_v34, 30  ;;  %v3135_v24 = vor.u32 %v3134_v7, %v3133_v59  ;;  %v14271_v49 = vand.u32 2147483647, %v10121_v39  ;;  %v811_v58 = vpop.permute.xlu1 %810 }
 0x5a1   :  { %vm3136_vm6 = vcmp.lt.s32.totalorder %v10401_v35, 1  ;;  %vm3137_vm9 = vcmp.lt.s32.totalorder %v10401_v35, 2  ;;  %vm3138_vm12 = vcmp.lt.s32.totalorder %v10401_v35, 3  ;;  %vm3139_vm13 = vcmp.lt.s32.totalorder %v10401_v35, 4 }
 0x5a2   :  { %vm10441_vm11 = vcmp.le.f32.partialorder %v14271_v49, 0.7853982  ;;  %v2772_v38 = vxor.u32 2147483648, %v2771_v53  ;;  %v10449_v62 = vsub.s32 %v3060_v28, %v3063_v11  ;;  %v3141_v6 = vsel %vm3139_vm13, %v3129_v10, 2102212464 }
 0x5a3   :  { %v3144_v59 = vsel %vm3136_vm6, %v3123_v9, %v3126_v51  ;;  %v3145_v21 = vsel %vm3139_vm13, %v3132_v54, 920167782  ;;  %v3148_v13 = vsel %vm3136_vm6, %v3126_v51, %v3129_v10  ;;  %v3149_v49 = vsel %vm3139_vm13, %v3135_v24, 1326507024 }
 0x5a4   :  { %v1102_v61 = vmul.f32 15.0, %v1012_v25  ;;  %v3066_v7 = vsub.s32 0, %v10449_v62  ;;  %v3140_v56 = vsel %vm3136_vm6, %v3120_v5, %v3123_v9  ;;  %v3142_v26 = vsel %vm3138_vm12, %v3126_v51, %v3141_v6  ;;  %v3427_v6 = vpop.permute.xlu0 %3426 }
 0x5a5   :  { %v3146_v17 = vsel %vm3138_vm12, %v3129_v10, %v3145_v21  ;;  %8335 = vcosq.f32 %v10431_v1  ;;  %v3056_v28 = vadd.s32 %v10371_v63, %v10368_v45  ;;  %v3150_v24 = vsel %vm3138_vm12, %v3132_v54, %v3149_v49  ;;  %v3422_v49 = vpop.permute.xlu1 %3421 }
 0x5a6   :  { %v3147_v11 = vsel %vm3137_vm9, %v3144_v59, %v3146_v17  ;;  %vm14274_vm13 = vcmp.lt.s32.totalorder %v10121_v39, 0  ;;  %v7552_v25 = vmin.u32 %v3066_v7, %v10449_v62  ;;  %v3151_v51 = vsel %vm3137_vm9, %v3148_v13, %v3150_v24 }
 0x5a7   :  { %v2773_v9 = vsel %vm14274_vm13, %v2772_v38, %v2771_v53  ;;  %v10468_v10 = vadd.f32 30.0, %v1102_v61  ;;  %v3143_v5 = vsel %vm3137_vm9, %v3140_v56, %v3142_v26  ;;  %v1101_v17 = vmul.f32 15.0, %v1007_v18 }
 0x5a8   :  { %v10473_v45 = vmul.u32.u64.low %v10410_v22, %v3151_v51  ;;  %v10474_v63 = vmul.u32.u64.high %v10410_v22, %v3151_v51, %v10473_v45  ;;  %v3068_v54 = vclz %v7552_v25  ;;  %v1062_v38 = vadd.f32 %v9950_v0, %v10380_v36 }
 0x5a9   :  { %v10477_v59 = vmul.u32.u64.low %v10410_v22, %v3147_v11  ;;  %v10478_v53 = vmul.u32.u64.high %v10410_v22, %v3147_v11, %v10477_v59  ;;  %3454 = vperm.xlu1 %8270, %v10468_v10   ;;  %v1113_v21 = vadd.f32 30.0, %v1101_v17  ;;  %v3430_v35 = vmul.f32 %v3417_v46, %v10315_v20 }
 0x5aa   :  { %v1057_v13 = vadd.f32 %v9973_v52, %v10403_v19  ;;  %v3429_v18 = vmul.f32 %v3412_v47, %v10313_v50  ;;  %v10491_v61 = vsel %vm10441_vm11, %v10121_v39, %v2773_v9  ;;  %v7553_v7 = vadd.s32 4294967294, %v3068_v54 }
 0x5ab   :  { %v1072_v56 = vadd.f32 %v9994_v55, %v816_v60  ;;  %v3432_v0 = vmul.f32 %v3427_v6, %v10468_v10  ;;  %vm3161_vm12 = vc.u32 %v10474_v63, %v10477_v59  ;;  %v3434_v36 = vadd.f32 %v3430_v35, %v1062_v38  ;;  %3449 = vperm.xlu0 %8266, %v1113_v21  }
 0x5ac   :  { %v10497_v46 = vadd.f32 %v3429_v18, %v1057_v13  ;;  %v1067_v52 = vadd.f32 %v10011_v48, %v811_v58  ;;  %vm7554_vm6 = vcmp.lt.s32.totalorder %v7553_v7, 0  ;;  %v3162_v50 = vadd.s32 1, %v10478_v53  ;;  %v14278_v18 = vld [vmem:[#allocation34_spill] sm:$0xff] }
 0x5ad   :  { %v10501_v19 = vadd.f32 %v3432_v0, %v1072_v56  ;;  %8271 = vset.pattern.permute.xlu1 %v14260_v40  ;;  %v3431_v47 = vmul.f32 %v3422_v49, %v1113_v21  ;;  %8337 = vsinq.f32 %v10431_v1  ;;  %v3071_v55 = vsel %vm7554_vm6, 0, %v7553_v7 }
 0x5ae   :  { %v3159_v60 = vmul.u32 %v10410_v22, %v3143_v5  ;;  %3466 = vperm.xlu1 %8271, %v1113_v21   ;;  %v1734_v26 = vsub.s32 4, %v9412_v30  ;;  %8339 = vcosq.f32 %v10491_v61  ;;  %v3072_v11 = vsub.s32 32, %v3071_v55 }
 0x5af   :  { %v3076_v48 = vsub.s32 4294967266, %v3071_v55  ;;  %v3163_v58 = vsel %vm3161_vm12, %v3162_v50, %v10478_v53  ;;  %v10512_v24 = vpop.eup %8335  ;;  %v3073_v9 = vshll.u32 %v10449_v62, %v3071_v55  ;;  %8269 = vset.pattern.permute.xlu0 %v14260_v40  ;;  %v10516_v22 = vadd.f32 %v3431_v47, %v1067_v52  ;;  %v14279_v52 = vld [vmem:[#allocation32_spill] sm:$0xff] }
 0x5b0   :  { %v3164_v1 = vadd.s32 %v3163_v58, %v3159_v60  ;;  %vm14275_vm9 = vcmp.lt.s32.totalorder %v9118_v33, 0  ;;  %vm1740_vm13 = vweird.f32 %v9118_v33  ;;  %v3074_v51 = vshrl.u32 %v3056_v28, %v3072_v11  ;;  %3462 = vperm.xlu0 %8269, %v10315_v20  }
 0x5b1   :  { %v1735_v25 = vsel %vm14275_vm9, %v1734_v26, %v9412_v30  ;;  %v3077_v5 = vadd.s32 127, %v3076_v48  ;;  %v2150_v62 = vsub.s32 4, %v9255_v32  ;;  %v1745_v54 = vxor.u32 2147483648, %v9782_v44 }
 0x5b2   :  { %v1737_v45 = vsel %vm9623_vm2, 0, %v1735_v25  ;;  %v3165_v17 = vadd.s32 536870912, %v3164_v1  ;;  %8272 = vset.pattern.permute.xlu1 %v14261_v29  ;;  %v1748_v53 = vxor.u32 2147483648, %v9771_v3  ;;  %v3075_v30 = vor.u32 %v3074_v51, %v3073_v9 }
 0x5b3   :  { %v1741_v6 = vadd.s32 3, %v1737_v45  ;;  %v3078_v38 = vshll.u32 %v3077_v5, 23  ;;  %3512 = vperm.xlu1 %8272, %v3434_v36   ;;  %vm14276_vm12 = vcmp.lt.s32.totalorder %v9081_v14, 0  ;;  %v2161_v42 = vxor.u32 2147483648, %v9703_v8  ;;  %v14284_v45 = vld [vmem:[#allocation37_spill] sm:$0xff] }
 0x5b4   :  { %v2151_v20 = vsel %vm14276_vm12, %v2150_v62, %v9255_v32  ;;  %v10533_v28 = vshrl.u32 %v3165_v17, 30  ;;  %v2164_v49 = vxor.u32 2147483648, %v14278_v18  ;;  %vm14012_vm2 = vcmp.lt.s32.totalorder %v10185_v27, 0  ;;  %3470 = vperm.xlu0 %8269, %v10468_v10  }
 0x5b5   :  { %v1742_v21 = vand.u32 3, %v1741_v6  ;;  %v2153_v13 = vsel %vm9511_vm3, 0, %v2151_v20  ;;  %v3079_v7 = vor.u32 4788187, %v3078_v38  ;;  %v3082_v56 = vcvt.s32.f32 %v3075_v30  ;;  %v14286_v20 = vld [vmem:[#allocation23_spill] sm:$0xff] }
 0x5b6   :  { %v2157_v0 = vadd.s32 3, %v2153_v13  ;;  %v1633_v32 = vsel %vm9520_vm5, 0, %v14279_v52  ;;  %v3167_v47 = vshll.u32 %v10533_v28, 30  ;;  %v14281_v10 = vand.u32 2147483647, %v10185_v27 }
 0x5b7   :  { %vm1743_vm6 = vcmp.lt.s32.totalorder %v1742_v21, 2  ;;  %vm1744_vm9 = vcmp.eq.s32.totalorder %v1742_v21, 0  ;;  %vm1747_vm12 = vcmp.eq.s32.totalorder %v1742_v21, 2  ;;  %v3080_v55 = vand.u32 2147483647, %v3079_v7  ;;  %8273 = vset.pattern.permute.xlu1 %v14260_v40  ;;  %v10547_v48 = vpop.eup %8337 }
 0x5b8   :  { %v1746_v60 = vsel %vm1744_vm9, %v9771_v3, %v1745_v54  ;;  %v1749_v26 = vsel %vm1747_vm12, %v1748_v53, %v9782_v44  ;;  %v2158_v11 = vand.u32 3, %v2157_v0  ;;  %vm10551_vm3 = vcmp.le.f32.partialorder %v14281_v10, 0.7853982  ;;  %3530 = vperm.xlu1 %8273, %v3434_v36   ;;  %v10558_v5 = vpop.eup %8339  ;;  %3526 = vperm.xlu0 %8269, %v10497_v46   ;;  %v14285_v53 = vld [vmem:[#allocation35_spill] sm:$0xff]  ;;  %v14291_v10 = vld [vmem:[#allocation29_spill] sm:$0xff] }
 0x5b9   :  { %v10555_v9 = vsub.s32 %v3164_v1, %v3167_v47  ;;  %v1750_v25 = vsel %vm1743_vm6, %v1746_v60, %v1749_v26  ;;  %vm2156_vm5 = vweird.f32 %v9081_v14  ;;  %v1637_v51 = vadd.s32 3, %v1633_v32  ;;  %v702_v14 = vld [vmem:[%s13910_s4 + $0x100] sm:$0xff]  ;;  %v14288_v32 = vld [vmem:[#allocation17_spill] sm:$0xff]  ;;  %v14289_v47 = vld [vmem:[#allocation31_spill] sm:$0xff] }
 0x5ba   :  { %v3083_v3 = vmul.f32 %v3082_v56, %v3080_v55  ;;  %v1751_v44 = vsel %vm1740_vm13, nan, %v1750_v25  ;;  %vm2160_vm9 = vcmp.eq.s32.totalorder %v2158_v11, 0  ;;  %v1641_v62 = vxor.u32 2147483648, %v14284_v45  ;;  %v14290_v26 = vld [vmem:[#allocation30_spill] sm:$0xff]  ;;  %v14292_v25 = vld [vmem:[#allocation15_spill] sm:$0xff] }
 0x5bb   :  { %v3170_v17 = vsub.s32 0, %v10555_v9  ;;  %v2162_v1 = vsel %vm2160_vm9, %v14278_v18, %v2161_v42  ;;  %vm2163_vm12 = vcmp.eq.s32.totalorder %v2158_v11, 2  ;;  %v1638_v36 = vand.u32 3, %v1637_v51  ;;  %v14293_v51 = vld [vmem:[#allocation38_spill] sm:$0xff] }
 0x5bc   :  { %v3084_v6 = vxor.u32 2147483648, %v3083_v3  ;;  %vm2159_vm6 = vcmp.lt.s32.totalorder %v2158_v11, 2  ;;  %v2165_v54 = vsel %vm2163_vm12, %v2164_v49, %v9703_v8  ;;  %v1644_v30 = vxor.u32 2147483648, %v14285_v53  ;;  %8274 = vset.pattern.permute.xlu1 %v14261_v29  ;;  %3534 = vperm.xlu0 %8269, %v10516_v22  }
 0x5bd   :  { %v7556_v38 = vmin.u32 %v3170_v17, %v10555_v9  ;;  %v2166_v33 = vsel %vm2159_vm6, %v2162_v1, %v2165_v54  ;;  %vm1640_vm13 = vcmp.eq.s32.totalorder %v1638_v36, 0  ;;  %v2049_v35 = vsel %vm9444_vm7, 0, %v14286_v20  ;;  %3507 = vperm.xlu1 %8274, %v10497_v46  }
 0x5be   :  { %v2167_v42 = vsel %vm2156_vm5, nan, %v2166_v33  ;;  %vm1639_vm9 = vcmp.lt.s32.totalorder %v1638_v36, 2  ;;  %v1642_v8 = vsel %vm1640_vm13, %v14285_v53, %v1641_v62  ;;  %vm1643_vm12 = vcmp.eq.s32.totalorder %v1638_v36, 2  ;;  %v14294_v62 = vld [vmem:[#allocation12_spill] sm:$0xff] }
 0x5bf   :  { %v3085_v13 = vsel %vm14012_vm2, %v3084_v6, %v3083_v3  ;;  %v3172_v18 = vclz %v7556_v38  ;;  %v8001_v49 = vpack.c.bf16 %v2167_v42, %v1751_v44  ;;  %v1645_v7 = vsel %vm1643_vm12, %v1644_v30, %v14284_v45  ;;  %v705_v45 = vld [vmem:[%s13910_s4 + $0x118] sm:$0xff]  ;;  %v14295_v30 = vld [vmem:[#allocation22_spill] sm:$0xff]  ;;  %v14297_v33 = vld [vmem:[#allocation28_spill] sm:$0xff] }
 0x5c0   :  { %8341 = vsinq.f32 %v10491_v61  ;;  %v3086_v56 = vsub.s32 4, %v10422_v34  ;;  %v1646_v46 = vsel %vm1639_vm9, %v1642_v8, %v1645_v7  ;;  %v2053_v0 = vadd.s32 3, %v2049_v35  ;;  %8276 = vset.pattern.permute.xlu0 %v14261_v29  ;;  %v715_v8 = vld [vmem:[%s13910_s4 + $0x168] sm:$0xff] }
 0x5c1   :  { %v3160_v52 = vadd.s32 %v10477_v59, %v10474_v63  ;;  %v7557_v50 = vadd.s32 4294967294, %v3172_v18  ;;  %8002 = vmatprep.subr.bf16.mxu0 %v8001_v49  ;;  %vm1636_vm7 = vweird.f32 %v14288_v32  ;;  %v2057_v55 = vxor.u32 2147483648, %v14289_v47  ;;  %3522 = vperm.xlu1 %8274, %v10501_v19   ;;  %v14300_v49 = vld [vmem:[#allocation14_spill] sm:$0xff] }
 0x5c2   :  { %v10593_v61 = vsel %vm10551_vm3, %v10185_v27, %v3085_v13  ;;  %v2054_v60 = vand.u32 3, %v2053_v0  ;;  %v2060_v11 = vxor.u32 2147483648, %v14290_v26  ;;  %v2566_v63 = vsub.s32 4, %v14291_v10  ;;  %760 = vperm.xlu0 %8276, %v702_v14  }
 0x5c3   :  { %vm7558_vm5 = vcmp.lt.s32.totalorder %v7557_v50, 0  ;;  %v1647_v59 = vsel %vm1636_vm7, nan, %v1646_v46  ;;  %vm2052_vm6 = vweird.f32 %v14292_v25  ;;  %v2982_v3 = vsub.s32 4, %v14293_v51 }
 0x5c4   :  { %v3175_v44 = vsel %vm7558_vm5, 0, %v7557_v50  ;;  %vm2055_vm13 = vcmp.lt.s32.totalorder %v2054_v60, 2  ;;  %vm2056_vm9 = vcmp.eq.s32.totalorder %v2054_v60, 0  ;;  %v2577_v17 = vxor.u32 2147483648, %v14294_v62 }
 0x5c5   :  { %v3176_v1 = vsub.s32 32, %v3175_v44  ;;  %v3180_v36 = vsub.s32 4294967266, %v3175_v44  ;;  %v2058_v6 = vsel %vm2056_vm9, %v14290_v26, %v2057_v55  ;;  %vm2059_vm12 = vcmp.eq.s32.totalorder %v2054_v60, 2  ;;  %3517 = vperm.xlu1 %8274, %v10516_v22  }
 0x5c6   :  { %v3177_v54 = vshll.u32 %v10555_v9, %v3175_v44  ;;  %v2061_v53 = vsel %vm2059_vm12, %v2060_v11, %v14289_v47  ;;  %vm14296_vm7 = vcmp.lt.s32.totalorder %v14295_v30, 0  ;;  %vm2572_vm5 = vweird.f32 %v14295_v30  ;;  %775 = vperm.xlu0 %8276, %v705_v45   ;;  %v14302_v11 = vld [vmem:[#allocation40_spill] sm:$0xff] }
 0x5c7   :  { %v2567_v38 = vsel %vm14296_vm7, %v2566_v63, %v14291_v10  ;;  %vm14298_vm2 = vcmp.lt.s32.totalorder %v14297_v33, 0  ;;  %v3178_v21 = vshrl.u32 %v3160_v52, %v3176_v1  ;;  %v3181_v35 = vadd.s32 127, %v3180_v36  ;;  %v7652_v1 = vld [vmem:[%s13911_s6 + $0x48] sm:$0xff]  ;;  %v704_v30 = vld [vmem:[%s13910_s4 + $0x110] sm:$0xff]  ;;  %v14312_v10 = vld [vmem:[#allocation46_spill] sm:$0xff] }
 0x5c8   :  { %v2983_v20 = vsel %vm14298_vm2, %v2982_v3, %v14293_v51  ;;  %v2062_v42 = vsel %vm2055_vm13, %v2058_v6, %v2061_v53  ;;  %v2569_v22 = vsel %vm9793_vm1, 0, %v2567_v38  ;;  %v2580_v7 = vxor.u32 2147483648, %v14300_v49  ;;  %v14307_v36 = vld [vmem:[#allocation11_spill] sm:$0xff] }
 0x5c9   :  { %v2063_v13 = vsel %vm2052_vm6, nan, %v2062_v42  ;;  %v2573_v18 = vadd.s32 3, %v2569_v22  ;;  %v2985_v46 = vsel %vm9921_vm15, 0, %v2983_v20  ;;  %v3179_v0 = vor.u32 %v3178_v21, %v3177_v54  ;;  %8275 = vset.pattern.permute.xlu1 %v14260_v40  ;;  %v703_v53 = vld [vmem:[%s13910_s4 + $0x108] sm:$0xff] }
 0x5ca   :  { %v3182_v52 = vshll.u32 %v3181_v35, 23  ;;  %v8003_v50 = vpack.c.bf16 %v2063_v13, %v1647_v59  ;;  %v2989_v32 = vadd.s32 3, %v2985_v46  ;;  %v10627_v47 = vpop.eup %8341  ;;  %vm3106_vm1 = vcmp.lt.s32.totalorder %v10269_v12, 0  ;;  %825 = vperm.xlu0 %8276, %v715_v8   ;;  %3538 = vperm.xlu1 %8275, %v10501_v19  }
 0x5cb   :  { %v2574_v55 = vand.u32 3, %v2573_v18  ;;  %v2993_v60 = vxor.u32 2147483648, %v10157_v23  ;;  %v2996_v26 = vxor.u32 2147483648, %v10150_v16  ;;  %v2465_v63 = vsel %vm9714_vm0, 0, %v14302_v11 }
 0x5cc   :  { %v14304_v25 = vand.u32 2147483647, %v10269_v12  ;;  %v3183_v51 = vor.u32 4788187, %v3182_v52  ;;  %v3186_v3 = vcvt.s32.f32 %v3179_v0  ;;  %v2990_v44 = vand.u32 3, %v2989_v32  ;;  %8004 = vmatpush1.bf16.msra.mxu0 %v8003_v50  ;;  %v14311_v50 = vld [vmem:[#allocation10_spill] sm:$0xff] }
 0x5cd   :  { %v2469_v45 = vadd.s32 3, %v2465_v63  ;;  %vm2575_vm2 = vcmp.lt.s32.totalorder %v2574_v55, 2  ;;  %vm2576_vm0 = vcmp.eq.s32.totalorder %v2574_v55, 0  ;;  %vm2579_vm6 = vcmp.eq.s32.totalorder %v2574_v55, 2  ;;  %v10674_v55 = vpop.f32.mrb[28].mxu1 }
 0x5ce   :  { %vm10638_vm15 = vcmp.le.f32.partialorder %v14304_v25, 0.7853982  ;;  %v2473_v6 = vxor.u32 2147483648, %v14307_v36  ;;  %v3184_v54 = vand.u32 2147483647, %v3183_v51  ;;  %v2578_v38 = vsel %vm2576_vm0, %v14300_v49, %v2577_v17  ;;  %5444 = vperm.xlu0 %8276, %v7652_v1   ;;  %8277 = vset.pattern.permute.xlu1 %v14261_v29  ;;  %v714_v25 = vld [vmem:[%s13910_s4 + $0x160] sm:$0xff] }
 0x5cf   :  { %v2581_v19 = vsel %vm2579_vm6, %v2580_v7, %v14294_v62  ;;  %vm2991_vm13 = vcmp.lt.s32.totalorder %v2990_v44, 2  ;;  %vm2992_vm9 = vcmp.eq.s32.totalorder %v2990_v44, 0  ;;  %vm2995_vm12 = vcmp.eq.s32.totalorder %v2990_v44, 2  ;;  %v717_v62 = vld [vmem:[%s13910_s4 + $0x178] sm:$0xff]  ;;  %765 = vperm.xlu1 %8277, %v703_v53  }
 0x5d0   :  { %v2582_v20 = vsel %vm2575_vm2, %v2578_v38, %v2581_v19  ;;  %v2470_v21 = vand.u32 3, %v2469_v45  ;;  %v3187_v35 = vmul.f32 %v3186_v3, %v3184_v54  ;;  %v2994_v9 = vsel %vm2992_vm9, %v10150_v16, %v2993_v60  ;;  %v14308_v16 = vld [vmem:[#allocation41_spill] sm:$0xff]  ;;  %v10691_v54 = vpop.f32.mrb[29].mxu1 }
 0x5d1   :  { %v2583_v42 = vsel %vm2572_vm5, nan, %v2582_v20  ;;  %v2997_v22 = vsel %vm2995_vm12, %v2996_v26, %v10157_v23  ;;  %8343 = vcosq.f32 %v10593_v61  ;;  %vm2988_vm7 = vweird.f32 %v14297_v33  ;;  %v14309_v7 = vld [vmem:[#allocation45_spill] sm:$0xff]  ;;  %v10696_v38 = vpop.f32.mrb[30].mxu1 }
 0x5d2   :  { %v2998_v17 = vsel %vm2991_vm13, %v2994_v9, %v2997_v22  ;;  %vm2472_vm2 = vcmp.eq.s32.totalorder %v2470_v21, 0  ;;  %v3188_v8 = vxor.u32 2147483648, %v3187_v35  ;;  %v2476_v23 = vxor.u32 2147483648, %v14308_v16  ;;  %835 = vperm.xlu0 %8276, %v717_v62   ;;  %v7654_v26 = vld [vmem:[%s13911_s6 + $0x58] sm:$0xff]  ;;  %v7651_v22 = vld [vmem:[%s13911_s6 + $0x40] sm:$0xff] }
 0x5d3   :  { %v2999_v13 = vsel %vm2988_vm7, nan, %v2998_v17  ;;  %v2474_v18 = vsel %vm2472_vm2, %v14308_v16, %v2473_v6  ;;  %vm2471_vm5 = vcmp.lt.s32.totalorder %v2470_v21, 2  ;;  %vm2475_vm0 = vcmp.eq.s32.totalorder %v2470_v21, 2  ;;  %770 = vperm.xlu1 %8277, %v704_v30   ;;  %v14313_v51 = vld [vmem:[#allocation21_spill] sm:$0xff] }
 0x5d4   :  { %v8005_v49 = vpack.c.bf16 %v2999_v13, %v2583_v42  ;;  %v2881_v46 = vsel %vm9887_vm10, 0, %v14309_v7  ;;  %v3189_v33 = vsel %vm3106_vm1, %v3188_v8, %v3187_v35  ;;  %v2477_v0 = vsel %vm2475_vm0, %v2476_v23, %v14307_v36  ;;  %v14314_v45 = vld [vmem:[#allocation13_spill] sm:$0xff]  ;;  %v14318_v42 = vld [vmem:[#allocation18_spill] sm:$0xff]  ;;  %v14322_v7 = vld [vmem:[#allocation16_spill] sm:$0xff] }
 0x5d5   :  { %v2885_v52 = vadd.s32 3, %v2881_v46  ;;  %v2889_v32 = vxor.u32 2147483648, %v14311_v50  ;;  %v3192_v60 = vsel %vm10638_vm15, %v10269_v12, %v3189_v33  ;;  %v2478_v11 = vsel %vm2471_vm5, %v2474_v18, %v2477_v0  ;;  %v14315_v6 = vld [vmem:[#allocation25_spill] sm:$0xff]  ;;  %v14319_v8 = vld [vmem:[#allocation50_spill] sm:$0xff] }
 0x5d6   :  { %8006 = vmatprep.subr.bf16.mxu0 %v8005_v49  ;;  %v2892_v63 = vxor.u32 2147483648, %v14312_v10  ;;  %8345 = vcosq.f32 %v3192_v60  ;;  %vm2468_vm10 = vweird.f32 %v14313_v51  ;;  %v14013_v44 = vmov 0.0   ;;  %5454 = vperm.xlu0 %8276, %v7654_v26   ;;  %v14320_v18 = vld [vmem:[#allocation49_spill] sm:$0xff]  ;;  %v14326_v51 = vld [vmem:[#allocation51_spill] sm:$0xff] }
 0x5d7   :  { %v2886_v3 = vand.u32 3, %v2885_v52  ;;  %3290 = vmatprep.mubr.f32.mxu0 %v14013_v44  ;;  %v1942_v1 = vsub.s32 4, %v14314_v45  ;;  %5407 = vmatprep.mubr.f32.mxu1 %v14013_v44  ;;  %8347 = vsinq.f32 %v3192_v60  ;;  %v2479_v36 = vsel %vm2468_vm10, nan, %v2478_v11  ;;  %v14324_v11 = vld [vmem:[#allocation3_spill] sm:$0xff] }
 0x5d8   :  { %vm2884_vm6 = vweird.f32 %v14315_v6  ;;  %vm14064_vm13 = vcmask 261120   ;;  %vm14316_vm2 = vcmp.lt.s32.totalorder %v9737_v4, 0  ;;  %820 = vperm.xlu1 %8277, %v714_v25   ;;  %v2358_v9 = vsub.s32 4, %v14318_v42  ;;  %v14325_v25 = vld [vmem:[#allocation19_spill] sm:$0xff] }
 0x5d9   :  { %vm2887_vm9 = vcmp.lt.s32.totalorder %v2886_v3, 2  ;;  %vm2888_vm12 = vcmp.eq.s32.totalorder %v2886_v3, 0  ;;  %vm2891_vm7 = vcmp.eq.s32.totalorder %v2886_v3, 2  ;;  %v1943_v53 = vsel %vm14316_vm2, %v1942_v1, %v14314_v45 }
 0x5da   :  { %v2890_v19 = vsel %vm2888_vm12, %v14312_v10, %v2889_v32  ;;  %v2893_v20 = vsel %vm2891_vm7, %v2892_v63, %v14311_v50  ;;  %v1945_v35 = vsel %vm10067_vm8, 0, %v1943_v53  ;;  %vm1948_vm5 = vweird.f32 %v9737_v4  ;;  %v10727_v63 = vld [vmem:[%s13912_s5 + $0x20] sm:$0xff] }
 0x5db   :  { %v2894_v62 = vsel %vm2887_vm9, %v2890_v19, %v2893_v20  ;;  %v1949_v17 = vadd.s32 3, %v1945_v35  ;;  %v1953_v30 = vxor.u32 2147483648, %v14319_v8  ;;  %v10708_v13 = vpop.eup %8343  ;;  %v1956_v23 = vxor.u32 2147483648, %v14320_v18  ;;  %v14328_v20 = vld [vmem:[#allocation20_spill] sm:$0xff] }
 0x5dc   :  { %v2895_v16 = vsel %vm2884_vm6, nan, %v2894_v62  ;;  %vm14321_vm8 = vcmp.lt.s32.totalorder %v9914_v57, 0  ;;  %v1841_v46 = vsel %vm10056_vm4, 0, %v14322_v7  ;;  %v2369_v50 = vxor.u32 2147483648, %v10426_v43  ;;  %5439 = vperm.xlu1 %8277, %v7651_v22   ;;  %v14329_v62 = vld [vmem:[#allocation53_spill] sm:$0xff] }
 0x5dd   :  { %v2359_v49 = vsel %vm14321_vm8, %v2358_v9, %v14318_v42  ;;  %v8007_v33 = vpack.c.bf16 %v2895_v16, %v2479_v36  ;;  %v1950_v0 = vand.u32 3, %v1949_v17  ;;  %v2372_v60 = vxor.u32 2147483648, %v10420_v2  ;;  %v10741_v42 = vpop.f32.mrb[31].mxu1 }
 0x5de   :  { %v2361_v52 = vsel %vm10258_vm14, 0, %v2359_v49  ;;  %v1845_v26 = vadd.s32 3, %v1841_v46  ;;  %v1849_v10 = vxor.u32 2147483648, %v14324_v11  ;;  %vm14327_vm10 = vnez %v14326_v51  ;;  %v14330_v46 = vld [vmem:[#allocation2_spill] sm:$0xff] }
 0x5df   :  { %v2365_v32 = vadd.s32 3, %v2361_v52  ;;  %8008 = vmatpush1.bf16.msra.mxu0 %v8007_v33  ;;  %vm1951_vm4 = vcmp.lt.s32.totalorder %v1950_v0, 2  ;;  %vm1952_vm14 = vcmp.eq.s32.totalorder %v1950_v0, 0  ;;  %vm1955_vm0 = vcmp.eq.s32.totalorder %v1950_v0, 2  ;;  %v14331_v0 = vld [vmem:[#allocation52_spill] sm:$0xff] }
 0x5e0   :  { %v2257_v3 = vsel %vm14327_vm10, 0, %v14325_v25  ;;  %v1954_v45 = vsel %vm1952_vm14, %v14320_v18, %v1953_v30  ;;  %v1957_v1 = vsel %vm1955_vm0, %v1956_v23, %v14319_v8  ;;  %v1846_v6 = vand.u32 3, %v1845_v26  ;;  %v10737_v53 = vpop.eup %8345  ;;  %830 = vperm.xlu1 %8277, %v716_v41   ;;  %v10754_v8 = vld [vmem:[%s13912_s5 + $0x28] sm:$0xff]  ;;  %v7653_v30 = vld [vmem:[%s13911_s6 + $0x50] sm:$0xff] }
 0x5e1   :  { %v2366_v36 = vand.u32 3, %v2365_v32  ;;  %v1958_v19 = vsel %vm1951_vm4, %v1954_v45, %v1957_v1  ;;  %vm2364_vm6 = vweird.f32 %v9914_v57  ;;  %v1852_v21 = vxor.u32 2147483648, %v14328_v20  ;;  %v10743_v9 = vpop.eup %8347  ;;  %v10775_v57 = vld [vmem:[%s13912_s5 + $0x30] sm:$0xff]  ;;  %v14333_v32 = vld [vmem:[#allocation33_spill] sm:$0xff] }
 0x5e2   :  { %v2261_v35 = vadd.s32 3, %v2257_v3  ;;  %7563 = vmatmul.mubr.msk.f32.vlgmr.msra.gmra.mrb[16].mxu0 %vm14064_vm13, %v10727_v63  ;;  %v1959_v22 = vsel %vm1948_vm5, nan, %v1958_v19  ;;  %v2265_v17 = vxor.u32 2147483648, %v14329_v62  ;;  %vm1848_vm2 = vcmp.eq.s32.totalorder %v1846_v6, 0 }
 0x5e3   :  { %vm2368_vm9 = vcmp.eq.s32.totalorder %v2366_v36, 0  ;;  %vm2371_vm12 = vcmp.eq.s32.totalorder %v2366_v36, 2  ;;  %3296 = vmatprep.mubr.f32.mxu0 %v14013_v44  ;;  %vm2367_vm7 = vcmp.lt.s32.totalorder %v2366_v36, 2  ;;  %v1850_v23 = vsel %vm1848_vm2, %v14328_v20, %v1849_v10  ;;  %v14335_v20 = vld [vmem:[#allocation54_spill] sm:$0xff] }
 0x5e4   :  { %v2370_v16 = vsel %vm2368_vm9, %v10420_v2, %v2369_v50  ;;  %v2373_v4 = vsel %vm2371_vm12, %v2372_v60, %v10426_v43  ;;  %vm1851_vm5 = vcmp.eq.s32.totalorder %v1846_v6, 2  ;;  %v2262_v49 = vand.u32 3, %v2261_v35  ;;  %5449 = vperm.xlu1 %8277, %v7653_v30  }
 0x5e5   :  { %v2374_v18 = vsel %vm2367_vm7, %v2370_v16, %v2373_v4  ;;  %v1853_v14 = vsel %vm1851_vm5, %v1852_v21, %v14324_v11  ;;  %v2268_v33 = vxor.u32 2147483648, %v14330_v46  ;;  %v2774_v52 = vsub.s32 4, %v14331_v0  ;;  %v14334_v11 = vld [vmem:[#allocation42_spill] sm:$0xff] }
 0x5e6   :  { %v2375_v7 = vsel %vm2364_vm6, nan, %v2374_v18  ;;  %8349 = vsinq.f32 %v10593_v61  ;;  %7564 = vmatmul.mubr.msk.f32.gmra.mrb[18].mxu0 %vm14064_vm13, %v10754_v8  ;;  %vm1847_vm8 = vcmp.lt.s32.totalorder %v1846_v6, 2  ;;  %vm2264_vm4 = vcmp.eq.s32.totalorder %v2262_v49, 0 }
 0x5e7   :  { %v8009_v2 = vpack.c.bf16 %v2375_v7, %v1959_v22  ;;  %v1854_v43 = vsel %vm1847_vm8, %v1850_v23, %v1853_v14  ;;  %v2266_v50 = vsel %vm2264_vm4, %v14330_v46, %v2265_v17  ;;  %vm2267_vm14 = vcmp.eq.s32.totalorder %v2262_v49, 2  ;;  %3302 = vmatprep.mubr.f32.mxu0 %v14013_v44 }
 0x5e8   :  { %vm14332_vm0 = vcmp.lt.s32.totalorder %v10121_v39, 0  ;;  %vm1844_vm10 = vweird.f32 %v14333_v32  ;;  %vm2263_vm6 = vcmp.lt.s32.totalorder %v2262_v49, 2  ;;  %v2269_v60 = vsel %vm2267_vm14, %v2268_v33, %v14329_v62 }
 0x5e9   :  { %v2775_v61 = vsel %vm14332_vm0, %v2774_v52, %v14331_v0  ;;  %8010 = vmatprep.subr.bf16.mxu0 %v8009_v2  ;;  %vm2260_vm9 = vweird.f32 %v14334_v11  ;;  %v2270_v10 = vsel %vm2263_vm6, %v2266_v50, %v2269_v60  ;;  %v3190_v25 = vsub.s32 4, %v10533_v28 }
 0x5ea   :  { %v2777_v26 = vsel %vm10441_vm11, 0, %v2775_v61  ;;  %v1855_v51 = vsel %vm1844_vm10, nan, %v1854_v43  ;;  %v2271_v3 = vsel %vm2260_vm9, nan, %v2270_v10  ;;  %7565 = vmatmul.mubr.msk.f32.gmra.mrb[20].mxu0 %vm14064_vm13, %v10775_v57  ;;  %v2785_v45 = vxor.u32 2147483648, %v10627_v47 }
 0x5eb   :  { %v2781_v41 = vadd.s32 3, %v2777_v26  ;;  %v2788_v1 = vxor.u32 2147483648, %v10558_v5  ;;  %v8011_v36 = vpack.c.bf16 %v2271_v3, %v1855_v51  ;;  %3308 = vmatprep.mubr.f32.mxu0 %v14013_v44  ;;  %v3191_v19 = vsel %vm3106_vm1, %v3190_v25, %v10533_v28 }
 0x5ec   :  { %vm14336_vm11 = vnez %v14264_v15  ;;  %vm14337_vm12 = vcmp.lt.s32.totalorder %v10185_v27, 0  ;;  %v3193_v22 = vsel %vm10638_vm15, 0, %v3191_v19  ;;  %v3201_v62 = vxor.u32 2147483648, %v10743_v9 }
 0x5ed   :  { %v2782_v6 = vand.u32 3, %v2781_v41  ;;  %v2673_v21 = vsel %vm14336_vm11, 0, %v14335_v20  ;;  %v3087_v35 = vsel %vm14337_vm12, %v3086_v56, %v10422_v34  ;;  %8012 = vmatpush1.bf16.msra.mxu0 %v8011_v36  ;;  %v3197_v28 = vadd.s32 3, %v3193_v22  ;;  %v14341_v20 = vld [vmem:[#allocation8_spill] sm:$0xff] }
 0x5ee   :  { %v2677_v17 = vadd.s32 3, %v2673_v21  ;;  %v3204_v30 = vxor.u32 2147483648, %v10737_v53  ;;  %7566 = vmatmul.mubr.msk.f32.gmra.mrb[22].mxu0 %vm14064_vm13, %v10794_v31  ;;  %v2681_v56 = vxor.u32 2147483648, %v10547_v48  ;;  %v2684_v4 = vxor.u32 2147483648, %v10512_v24 }
 0x5ef   :  { %vm2784_vm7 = vcmp.eq.s32.totalorder %v2782_v6, 0  ;;  %vm2787_vm2 = vcmp.eq.s32.totalorder %v2782_v6, 2  ;;  %vm2783_vm1 = vcmp.lt.s32.totalorder %v2782_v6, 2  ;;  %v3198_v59 = vand.u32 3, %v3197_v28  ;;  %3379 = vmatprep.mubr.f32.mxu0 %v14013_v44 }
 0x5f0   :  { %v2786_v15 = vsel %vm2784_vm7, %v10558_v5, %v2785_v45  ;;  %v2789_v16 = vsel %vm2787_vm2, %v2788_v1, %v10627_v47  ;;  %v2678_v34 = vand.u32 3, %v2677_v17  ;;  %v3089_v18 = vsel %vm10551_vm3, 0, %v3087_v35  ;;  %v8350_v23 = vpop.eup %8349  ;;  %v14340_v45 = vld [vmem:[#allocation7_spill] sm:$0xff] }
 0x5f1   :  { %vm2780_vm15 = vweird.f32 %v10121_v39  ;;  %v2790_v49 = vsel %vm2783_vm1, %v2786_v15, %v2789_v16  ;;  %vm3196_vm5 = vweird.f32 %v10269_v12  ;;  %vm3199_vm4 = vcmp.lt.s32.totalorder %v3198_v59, 2 }
 0x5f2   :  { %vm2680_vm8 = vcmp.eq.s32.totalorder %v2678_v34, 0  ;;  %vm3200_vm14 = vcmp.eq.s32.totalorder %v3198_v59, 0  ;;  %vm3203_vm0 = vcmp.eq.s32.totalorder %v3198_v59, 2  ;;  %vm2683_vm10 = vcmp.eq.s32.totalorder %v2678_v34, 2 }
 0x5f3   :  { %v3202_v5 = vsel %vm3200_vm14, %v10737_v53, %v3201_v62  ;;  %v3205_v47 = vsel %vm3203_vm0, %v3204_v30, %v10743_v9  ;;  %v2682_v58 = vsel %vm2680_vm8, %v10512_v24, %v2681_v56  ;;  %v3093_v7 = vadd.s32 3, %v3089_v18  ;;  %v14343_v30 = vld [vmem:[#allocation6_spill] sm:$0xff] }
 0x5f4   :  { %v3206_v14 = vsel %vm3199_vm4, %v3202_v5, %v3205_v47  ;;  %v2685_v46 = vsel %vm2683_vm10, %v2684_v4, %v10547_v48  ;;  %v3097_v33 = vxor.u32 2147483648, %v8350_v23  ;;  %v3100_v0 = vxor.u32 2147483648, %v10708_v13 }
 0x5f5   :  { %v2791_v12 = vsel %vm2780_vm15, nan, %v2790_v49  ;;  %v3207_v52 = vsel %vm3196_vm5, nan, %v3206_v14  ;;  %v3094_v2 = vand.u32 3, %v3093_v7  ;;  %vm2679_vm3 = vcmp.lt.s32.totalorder %v2678_v34, 2 }
 0x5f6   :  { %v8013_v43 = vpack.c.bf16 %v3207_v52, %v2791_v12  ;;  %v2686_v50 = vsel %vm2679_vm3, %v2682_v58, %v2685_v46  ;;  %vm2676_vm12 = vweird.f32 %v10111_v37  ;;  %vm3092_vm7 = vweird.f32 %v10185_v27 }
 0x5f7   :  { %vm3096_vm6 = vcmp.eq.s32.totalorder %v3094_v2, 0  ;;  %vm3099_vm9 = vcmp.eq.s32.totalorder %v3094_v2, 2  ;;  %vm3095_vm11 = vcmp.lt.s32.totalorder %v3094_v2, 2  ;;  %v2687_v9 = vsel %vm2676_vm12, nan, %v2686_v50 }
 0x5f8   :  { %8014 = vmatprep.subr.bf16.mxu0 %v8013_v43  ;;  %v3098_v24 = vsel %vm3096_vm6, %v10708_v13, %v3097_v33  ;;  %v3101_v53 = vsel %vm3099_vm9, %v3100_v0, %v8350_v23  ;;  %v14344_v23 = vld [vmem:[#allocation9_spill] sm:$0xff] }
 0x5f9   :  { %v3102_v48 = vsel %vm3095_vm11, %v3098_v24, %v3101_v53 }
 0x5fa   :  { %v3103_v39 = vsel %vm3092_vm7, nan, %v3102_v48 }
 0x5fb   :  { %v8015_v61 = vpack.c.bf16 %v3103_v39, %v2687_v9 }
 0x5fd   :  { %8016 = vmatpush1.bf16.msra.mxu0 %v8015_v61 }
 0x600   :  { %7567 = vmatmul.mubr.msk.f32.vlgmr.msra.gmra.mrb[24].mxu0 %vm14064_vm13, %v10727_v63 }
 0x601   :  { %3385 = vmatprep.mubr.f32.mxu0 %v14013_v44 }
 0x602   :  { %v10844_v37 = vpop.permute.xlu1 %3439 }
 0x603   :  { %v10848_v13 = vpop.permute.xlu0 %3444 }
 0x604   :  { %7568 = vmatmul.mubr.msk.f32.gmra.mrb[26].mxu0 %vm14064_vm13, %v10754_v8 }
 0x605   :  { %3391 = vmatprep.mubr.f32.mxu0 %v14013_v44 }
 0x608   :  { %7569 = vmatmul.mubr.msk.f32.gmra.mrb[28].mxu0 %vm14064_vm13, %v10775_v57  ;;  %v10846_v27 = vpop.permute.xlu1 %3458 }
 0x609   :  { %3397 = vmatprep.mubr.f32.mxu0 %v14013_v44 }
 0x60c   :  { %7570 = vmatmul.mubr.msk.f32.gmra.mrb[30].mxu0 %vm14064_vm13, %v10794_v31 }
 0x60d   :  { %5318 = vmatprep.mubr.f32.mxu0 %v14013_v44 }
 0x628   :  { %v10850_v63 = vpop.permute.xlu1 %3454 }
 0x62a   :  { %v10852_v8 = vpop.permute.xlu0 %3449 }
 0x62d   :  { %v10854_v32 = vpop.permute.xlu1 %3466 }
 0x62f   :  { %v10856_v57 = vpop.permute.xlu0 %3462 }
 0x632   :  { %v10858_v60 = vpop.permute.xlu1 %3512 }
 0x633   :  { %v10860_v26 = vpop.permute.xlu0 %3470 }
 0x634   :  { %14338 = vst [vmem:[#allocation4_spill] sm:$0xff] %v10860_v26 }
 0x637   :  { %v10862_v11 = vpop.permute.xlu1 %3530  ;;  %v10864_v10 = vpop.permute.xlu0 %3526 }
 0x63b   :  { %v10866_v41 = vpop.permute.xlu0 %3534 }
 0x63c   :  { %14339 = vst [vmem:[#allocation5_spill] sm:$0xff] %v10866_v41  ;;  %v10868_v25 = vpop.permute.xlu1 %3507 }
 0x640   :  { %v10870_v51 = vpop.permute.xlu1 %3522 }
 0x641   :  { %v761_v3 = vpop.permute.xlu0 %760 }
 0x642   :  { %v1017_v1 = vadd.f32 %v14340_v45, %v761_v3 }
 0x644   :  { %v1103_v36 = vmul.f32 15.0, %v1017_v1  ;;  %v10873_v31 = vpop.permute.xlu1 %3517 }
 0x645   :  { %v776_v6 = vpop.permute.xlu0 %775 }
 0x646   :  { %v1115_v19 = vadd.f32 30.0, %v1103_v36  ;;  %v1032_v21 = vadd.f32 %v14341_v20, %v776_v6 }
 0x648   :  { %5467 = vperm.xlu1 %8277, %v1115_v19   ;;  %v1106_v62 = vmul.f32 15.0, %v1032_v21 }
 0x649   :  { %v826_v35 = vpop.permute.xlu0 %825  ;;  %v10876_v22 = vpop.permute.xlu1 %3538 }
 0x64a   :  { %14342 = vst [vmem:[#allocation26_spill] sm:$0xff] %v10876_v22  ;;  %v1118_v16 = vadd.f32 30.0, %v1106_v62  ;;  %v1082_v4 = vadd.f32 %v10674_v55, %v826_v35 }
 0x64c   :  { %8278 = vset.pattern.permute.xlu1 %v14260_v40 }
 0x64d   :  { %5486 = vperm.xlu1 %8278, %v1115_v19   ;;  %v5445_v17 = vpop.permute.xlu0 %5444 }
 0x64e   :  { %v766_v28 = vpop.permute.xlu1 %765 }
 0x64f   :  { %v1022_v15 = vadd.f32 %v14343_v30, %v766_v28 }
 0x651   :  { %8280 = vset.pattern.permute.xlu1 %v14261_v29  ;;  %v836_v34 = vpop.permute.xlu0 %835  ;;  %v1104_v56 = vmul.f32 15.0, %v1022_v15 }
 0x652   :  { %5482 = vperm.xlu1 %8280, %v1118_v16   ;;  %v771_v59 = vpop.permute.xlu1 %770  ;;  %v1092_v5 = vadd.f32 %v10696_v38, %v836_v34 }
 0x653   :  { %v1116_v18 = vadd.f32 30.0, %v1104_v56  ;;  %v1027_v49 = vadd.f32 %v14344_v23, %v771_v59 }
 0x655   :  { %v5458_v47 = vmul.f32 %v5445_v17, %v1116_v18  ;;  %v5455_v58 = vpop.permute.xlu0 %5454  ;;  %v1105_v7 = vmul.f32 15.0, %v1027_v49  ;;  %5472 = vperm.xlu0 %8276, %v1116_v18  }
 0x656   :  { %v5460_v14 = vmul.f32 %v5455_v58, %v1118_v16  ;;  %8281 = vset.pattern.permute.xlu1 %v14260_v40 }
 0x657   :  { %v821_v46 = vpop.permute.xlu1 %820  ;;  %v1117_v33 = vadd.f32 30.0, %v1105_v7  ;;  %v5462_v0 = vadd.f32 %v5458_v47, %v1082_v4 }
 0x658   :  { %v5464_v12 = vadd.f32 %v5460_v14, %v1092_v5  ;;  %v1077_v52 = vadd.f32 %v10691_v54, %v821_v46 }
 0x659   :  { %5477 = vperm.xlu0 %8276, %v1117_v33   ;;  %5494 = vperm.xlu1 %8281, %v1117_v33  }
 0x65b   :  { %v5440_v55 = vpop.permute.xlu1 %5439 }
 0x65c   :  { %v5457_v2 = vmul.f32 %v5440_v55, %v1115_v19 }
 0x65d   :  { %8279 = vset.pattern.permute.xlu0 %v14260_v40  ;;  %8282 = vset.pattern.permute.xlu1 %v14261_v29 }
 0x65e   :  { %v5461_v43 = vadd.f32 %v5457_v2, %v1077_v52  ;;  %5490 = vperm.xlu0 %8279, %v1116_v18   ;;  %5540 = vperm.xlu1 %8282, %v5462_v0   ;;  %v14348_v2 = vmov 683565275  }
 0x65f   :  { %v831_v38 = vpop.permute.xlu1 %830 }
 0x660   :  { %v1087_v50 = vadd.f32 %v10741_v42, %v831_v38 }
 0x662   :  { %5498 = vperm.xlu0 %8279, %v1118_v16   ;;  %8283 = vset.pattern.permute.xlu1 %v14260_v40 }
 0x663   :  { %v5450_v24 = vpop.permute.xlu1 %5449  ;;  %5558 = vperm.xlu1 %8283, %v5462_v0  }
 0x664   :  { %v5459_v53 = vmul.f32 %v5450_v24, %v1117_v33  ;;  %v14349_v24 = vmov 2475754826  }
 0x666   :  { %v5463_v54 = vadd.f32 %v5459_v53, %v1087_v50  ;;  %5554 = vperm.xlu0 %8279, %v5461_v43  }
 0x667   :  { %8284 = vset.pattern.permute.xlu1 %v14261_v29 }
 0x668   :  { %5535 = vperm.xlu1 %8284, %v5461_v43  }
 0x66a   :  { %5562 = vperm.xlu0 %8279, %v5463_v54  }
 0x66c   :  { %5550 = vperm.xlu1 %8284, %v5464_v12  }
 0x66e   :  { %8286 = vset.pattern.permute.xlu0 %v14261_v29 }
 0x670   :  { %5545 = vperm.xlu1 %8284, %v5463_v54  }
 0x674   :  { %8285 = vset.pattern.permute.xlu1 %v14260_v40 }
 0x675   :  { %5566 = vperm.xlu1 %8285, %v5464_v12  }
 0x6b5   :  { %v3292_v42 = vpop.f32.mrb[16].mxu0 }
 0x6b6   :  { %v3489_v48 = vmul.f32 %v10844_v37, %v3292_v42  ;;  %v3294_v9 = vpop.f32.mrb[17].mxu0  ;;  %v14351_v42 = vmov 2102212464  }
 0x6b7   :  { %v3490_v39 = vmul.f32 %v10844_v37, %v3294_v9  ;;  %v14352_v9 = vmov 920167782  }
 0x6b8   :  { %v10896_v61 = vadd.f32 %v10868_v25, %v3489_v48 }
 0x6b9   :  { %v10899_v3 = vadd.f32 %v10868_v25, %v3490_v39  ;;  %v3298_v45 = vpop.f32.mrb[18].mxu0 }
 0x6ba   :  { %14345 = vst [vmem:[#allocation34_spill] sm:$0xff] %v10896_v61  ;;  %v14018_v1 = vand.u32 2147483647, %v10896_v61  ;;  %v3576_v29 = vand.u32 2139095040, %v10896_v61  ;;  %v3493_v40 = vmul.f32 %v10848_v13, %v3298_v45  ;;  %v3300_v36 = vpop.f32.mrb[19].mxu0 }
 0x6bb   :  { %14346 = vst [vmem:[#allocation32_spill] sm:$0xff] %v10899_v3  ;;  %v14015_v6 = vand.u32 2147483647, %v10899_v3  ;;  %v3680_v19 = vand.u32 2139095040, %v10899_v3  ;;  %v3494_v56 = vmul.f32 %v10848_v13, %v3300_v36 }
 0x6bc   :  { %v3577_v20 = vshrl.u32 %v3576_v29, 23  ;;  %v3580_v37 = vand.u32 8388607, %v14018_v1  ;;  %v10909_v21 = vadd.f32 %v10858_v60, %v3493_v40 }
 0x6bd   :  { %v3681_v25 = vshrl.u32 %v3680_v19, 23  ;;  %v3684_v35 = vand.u32 8388607, %v14015_v6  ;;  %v10913_v62 = vpop.f32.mrb[20].mxu0  ;;  %v10925_v33 = vadd.f32 %v10858_v60, %v3494_v56  ;;  %v14350_v60 = vmov 2131351028  }
 0x6be   :  { %14347 = vst [vmem:[#allocation27_spill] sm:$0xff] %v10909_v21  ;;  %v7575_v17 = vadd.s32 4294967169, %v3577_v20  ;;  %v10915_v28 = vpop.f32.mrb[21].mxu0  ;;  %v3992_v15 = vand.u32 2139095040, %v10909_v21  ;;  %v3581_v16 = vor.u32 8388608, %v3580_v37 }
 0x6bf   :  { %v7579_v30 = vadd.s32 4294967169, %v3681_v25  ;;  %v3685_v59 = vor.u32 8388608, %v3684_v35  ;;  %v14016_v18 = vand.u32 2147483647, %v10909_v21  ;;  %v14353_v20 = vmov 1326507024  }
 0x6c0   :  { %v3583_v34 = vadd.s32 1, %v7575_v17  ;;  %v3993_v23 = vshrl.u32 %v3992_v15, 23  ;;  %v10927_v13 = vshll.u32 %v3581_v16, 8 }
 0x6c1   :  { %v3687_v4 = vadd.s32 1, %v7579_v30  ;;  %v10920_v49 = vpop.f32.mrb[22].mxu0  ;;  %v10931_v12 = vshll.u32 %v3685_v59, 8  ;;  %v10935_v52 = vand.u32 8388607, %v14016_v18 }
 0x6c2   :  { %vm3584_vm2 = vcmp.gt.s32.totalorder %v3583_v34, 0  ;;  %v10922_v5 = vpop.f32.mrb[23].mxu0  ;;  %v7591_v58 = vadd.s32 4294967169, %v3993_v23 }
 0x6c3   :  { %v3585_v47 = vsel %vm3584_vm2, %v3583_v34, 0  ;;  %vm3688_vm1 = vcmp.gt.s32.totalorder %v3687_v4, 0 }
 0x6c4   :  { %v3586_v7 = vshrl.u32 %v3585_v47, 5  ;;  %v3587_v14 = vand.u32 31, %v3585_v47  ;;  %v3689_v46 = vsel %vm3688_vm1, %v3687_v4, 0  ;;  %v10938_v50 = vadd.s32 1, %v7591_v58 }
 0x6c5   :  { %v10929_v0 = vshrl.u32 %v3689_v46, 5  ;;  %v3691_v38 = vand.u32 31, %v3689_v46 }
 0x6c6   :  { %v3588_v55 = vsub.s32 32, %v3587_v14  ;;  %v3590_v43 = vshll.u32 %v14348_v2, %v3587_v14  ;;  %v3593_v53 = vshll.u32 %v14349_v24, %v3587_v14  ;;  %v3596_v54 = vshll.u32 %v14350_v60, %v3587_v14 }
 0x6c7   :  { %v3599_v48 = vshll.u32 %v14351_v42, %v3587_v14  ;;  %v3602_v39 = vshll.u32 %v14352_v9, %v3587_v14  ;;  %vm3605_vm15 = vcmp.lt.s32.totalorder %v3586_v7, 1  ;;  %vm3606_vm5 = vcmp.lt.s32.totalorder %v3586_v7, 2 }
 0x6c8   :  { %v3591_v45 = vshrl.u32 %v14349_v24, %v3588_v55  ;;  %v3594_v29 = vshrl.u32 %v14350_v60, %v3588_v55  ;;  %v3597_v40 = vshrl.u32 %v14351_v42, %v3588_v55  ;;  %v3589_v36 = vshrl.u32 %v14348_v2, %v3588_v55 }
 0x6c9   :  { %v3600_v19 = vshrl.u32 %v14352_v9, %v3588_v55  ;;  %v3603_v37 = vshrl.u32 %v14353_v20, %v3588_v55  ;;  %v3692_v30 = vsub.s32 32, %v3691_v38  ;;  %vm3607_vm8 = vcmp.lt.s32.totalorder %v3586_v7, 3 }
 0x6ca   :  { %v3592_v25 = vor.u32 %v3591_v45, %v3590_v43  ;;  %v3595_v35 = vor.u32 %v3594_v29, %v3593_v53  ;;  %v3598_v17 = vor.u32 %v3597_v40, %v3596_v54  ;;  %vm3608_vm4 = vcmp.lt.s32.totalorder %v3586_v7, 4 }
 0x6cb   :  { %v3601_v15 = vor.u32 %v3600_v19, %v3599_v48  ;;  %v3604_v16 = vor.u32 %v3603_v37, %v3602_v39  ;;  %v3694_v14 = vshll.u32 %v14348_v2, %v3691_v38  ;;  %v3695_v43 = vshrl.u32 %v14349_v24, %v3692_v30 }
 0x6cc   :  { %v3609_v34 = vsel %vm3605_vm15, %v3589_v36, %v3592_v25  ;;  %v3610_v56 = vsel %vm3608_vm4, %v3598_v17, 2102212464  ;;  %v3613_v59 = vsel %vm3605_vm15, %v3592_v25, %v3595_v35  ;;  %v3617_v4 = vsel %vm3605_vm15, %v3595_v35, %v3598_v17 }
 0x6cd   :  { %v3611_v23 = vsel %vm3607_vm8, %v3595_v35, %v3610_v56  ;;  %v3614_v47 = vsel %vm3608_vm4, %v3601_v15, 920167782  ;;  %v3618_v58 = vsel %vm3608_vm4, %v3604_v16, 1326507024  ;;  %v3697_v53 = vshll.u32 %v14349_v24, %v3691_v38 }
 0x6ce   :  { %v3615_v46 = vsel %vm3607_vm8, %v3598_v17, %v3614_v47  ;;  %v3619_v55 = vsel %vm3607_vm8, %v3601_v15, %v3618_v58  ;;  %v3612_v54 = vsel %vm3606_vm5, %v3609_v34, %v3611_v23  ;;  %v3698_v45 = vshrl.u32 %v14350_v60, %v3692_v30 }
 0x6cf   :  { %v3616_v48 = vsel %vm3606_vm5, %v3613_v59, %v3615_v46  ;;  %v3620_v39 = vsel %vm3606_vm5, %v3617_v4, %v3619_v55  ;;  %v3696_v37 = vor.u32 %v3695_v43, %v3694_v14  ;;  %v3700_v35 = vshll.u32 %v14350_v60, %v3691_v38 }
 0x6d0   :  { %v10961_v29 = vmul.u32.u64.low %v10927_v13, %v3620_v39  ;;  %v10962_v40 = vmul.u32.u64.high %v10927_v13, %v3620_v39, %v10961_v29  ;;  %v10965_v36 = vmul.u32.u64.low %v10927_v13, %v3616_v48  ;;  %v10966_v19 = vmul.u32.u64.high %v10927_v13, %v3616_v48, %v10965_v36 }
 0x6d1   :  { %v3699_v25 = vor.u32 %v3698_v45, %v3697_v53  ;;  %v3701_v17 = vshrl.u32 %v14351_v42, %v3692_v30  ;;  %v3693_v7 = vshrl.u32 %v14348_v2, %v3692_v30  ;;  %v3703_v15 = vshll.u32 %v14351_v42, %v3691_v38 }
 0x6d2   :  { %v3704_v16 = vshrl.u32 %v14352_v9, %v3692_v30  ;;  %v3707_v34 = vshrl.u32 %v14353_v20, %v3692_v30  ;;  %v3628_v59 = vmul.u32 %v10927_v13, %v3612_v54  ;;  %v3706_v23 = vshll.u32 %v14352_v9, %v3691_v38 }
 0x6d3   :  { %v10975_v56 = vpop.f32.mrb[24].mxu0  ;;  %v3702_v4 = vor.u32 %v3701_v17, %v3700_v35  ;;  %vm3709_vm14 = vcmp.lt.s32.totalorder %v10929_v0, 1  ;;  %vm3630_vm0 = vc.u32 %v10962_v40, %v10965_v36  ;;  %v3631_v47 = vadd.s32 1, %v10966_v19 }
 0x6d4   :  { %v3705_v58 = vor.u32 %v3704_v16, %v3703_v15  ;;  %vm3710_vm10 = vcmp.lt.s32.totalorder %v10929_v0, 2  ;;  %v10984_v14 = vpop.f32.mrb[25].mxu0  ;;  %v3708_v30 = vor.u32 %v3707_v34, %v3706_v23  ;;  %vm3711_vm3 = vcmp.lt.s32.totalorder %v10929_v0, 3 }
 0x6d5   :  { %vm3712_vm6 = vcmp.lt.s32.totalorder %v10929_v0, 4  ;;  %v3717_v13 = vsel %vm3709_vm14, %v3696_v37, %v3699_v25  ;;  %v3632_v38 = vsel %vm3630_vm0, %v3631_v47, %v10966_v19  ;;  %v3721_v43 = vsel %vm3709_vm14, %v3699_v25, %v3702_v4 }
 0x6d6   :  { %v3714_v46 = vsel %vm3712_vm6, %v3702_v4, 2102212464  ;;  %v3718_v55 = vsel %vm3712_vm6, %v3705_v58, 920167782  ;;  %v3633_v53 = vadd.s32 %v3632_v38, %v3628_v59  ;;  %v3713_v54 = vsel %vm3709_vm14, %v3693_v7, %v3696_v37 }
 0x6d7   :  { %v3719_v48 = vsel %vm3711_vm3, %v3702_v4, %v3718_v55  ;;  %v3722_v39 = vsel %vm3712_vm6, %v3708_v30, 1326507024  ;;  %v3715_v45 = vsel %vm3711_vm3, %v3699_v25, %v3714_v46  ;;  %vm4000_vm9 = vcmp.gt.s32.totalorder %v10938_v50, 0 }
 0x6d8   :  { %v3720_v29 = vsel %vm3710_vm10, %v3717_v13, %v3719_v48  ;;  %v3723_v35 = vsel %vm3711_vm3, %v3705_v58, %v3722_v39  ;;  %v3634_v17 = vadd.s32 536870912, %v3633_v53  ;;  %v4001_v25 = vsel %vm4000_vm9, %v10938_v50, 0 }
 0x6d9   :  { %v3724_v15 = vsel %vm3710_vm10, %v3721_v43, %v3723_v35  ;;  %v10995_v19 = vmul.u32.u64.low %v10931_v12, %v3720_v29  ;;  %v10996_v16 = vmul.u32.u64.high %v10931_v12, %v3720_v29, %v10995_v19  ;;  %v4096_v34 = vand.u32 2139095040, %v10925_v33 }
 0x6da   :  { %v11000_v37 = vmul.u32.u64.low %v10931_v12, %v3724_v15  ;;  %v11001_v7 = vmul.u32.u64.high %v10931_v12, %v3724_v15, %v11000_v37  ;;  %v11005_v59 = vshrl.u32 %v3634_v17, 30  ;;  %v3716_v4 = vsel %vm3710_vm10, %v3713_v54, %v3715_v45 }
 0x6db   :  { %v4003_v23 = vand.u32 31, %v4001_v25  ;;  %v3735_v58 = vadd.s32 1, %v10996_v16  ;;  %v3997_v30 = vor.u32 8388608, %v10935_v52  ;;  %v3732_v38 = vmul.u32 %v10931_v12, %v3716_v4 }
 0x6dc   :  { %v3636_v47 = vshll.u32 %v11005_v59, 30  ;;  %vm3734_vm11 = vc.u32 %v11001_v7, %v10995_v19  ;;  %v4002_v50 = vshrl.u32 %v4001_v25, 5  ;;  %v4097_v46 = vshrl.u32 %v4096_v34, 23 }
 0x6dd   :  { %v4004_v13 = vsub.s32 32, %v4003_v23  ;;  %v3736_v0 = vsel %vm3734_vm11, %v3735_v58, %v10996_v16  ;;  %v4006_v43 = vshll.u32 %v14348_v2, %v4003_v23  ;;  %v4009_v54 = vshll.u32 %v14349_v24, %v4003_v23 }
 0x6de   :  { %v11015_v55 = vsub.s32 %v3633_v53, %v3636_v47  ;;  %v3737_v48 = vadd.s32 %v3736_v0, %v3732_v38  ;;  %v4012_v12 = vshll.u32 %v14350_v60, %v4003_v23  ;;  %v4015_v53 = vshll.u32 %v14351_v42, %v4003_v23 }
 0x6df   :  { %v4007_v39 = vshrl.u32 %v14349_v24, %v4004_v13  ;;  %v4010_v52 = vshrl.u32 %v14350_v60, %v4004_v13  ;;  %v4013_v29 = vshrl.u32 %v14351_v42, %v4004_v13  ;;  %v4016_v35 = vshrl.u32 %v14352_v9, %v4004_v13 }
 0x6e0   :  { %v3639_v45 = vsub.s32 0, %v11015_v55  ;;  %v3738_v17 = vadd.s32 536870912, %v3737_v48  ;;  %v4018_v37 = vshll.u32 %v14352_v9, %v4003_v23  ;;  %v4019_v47 = vshrl.u32 %v14353_v20, %v4004_v13 }
 0x6e1   :  { %v4008_v15 = vor.u32 %v4007_v39, %v4006_v43  ;;  %v4011_v16 = vor.u32 %v4010_v52, %v4009_v54  ;;  %v4014_v34 = vor.u32 %v4013_v29, %v4012_v12  ;;  %v4017_v4 = vor.u32 %v4016_v35, %v4015_v53 }
 0x6e2   :  { %v7576_v25 = vmin.u32 %v3639_v45, %v11015_v55  ;;  %v11030_v58 = vshrl.u32 %v3738_v17, 30  ;;  %vm4021_vm12 = vcmp.lt.s32.totalorder %v4002_v50, 1  ;;  %v4037_v38 = vshll.u32 %v3997_v30, 8 }
 0x6e3   :  { %v7595_v0 = vadd.s32 4294967169, %v4097_v46  ;;  %v4020_v6 = vor.u32 %v4019_v47, %v4018_v37  ;;  %vm4022_vm7 = vcmp.lt.s32.totalorder %v4002_v50, 2  ;;  %vm4024_vm2 = vcmp.lt.s32.totalorder %v4002_v50, 4 }
 0x6e4   :  { %14354 = vst [vmem:[#allocation37_spill] sm:$0xff] %v11030_v58  ;;  %v3641_v44 = vclz %v7576_v25  ;;  %v3740_v43 = vshll.u32 %v11030_v58, 30  ;;  %vm4023_vm1 = vcmp.lt.s32.totalorder %v4002_v50, 3  ;;  %v4029_v23 = vsel %vm4021_vm12, %v4008_v15, %v4011_v16 }
 0x6e5   :  { %v4030_v54 = vsel %vm4024_vm2, %v4017_v4, 920167782  ;;  %v4026_v52 = vsel %vm4024_vm2, %v4014_v34, 2102212464  ;;  %v4033_v45 = vsel %vm4021_vm12, %v4011_v16, %v4014_v34  ;;  %v4005_v30 = vshrl.u32 %v14348_v2, %v4004_v13 }
 0x6e6   :  { %v7577_v39 = vadd.s32 4294967294, %v3641_v44  ;;  %v4031_v12 = vsel %vm4023_vm1, %v4014_v34, %v4030_v54  ;;  %v11036_v29 = vsub.s32 %v3737_v48, %v3740_v43  ;;  %v4034_v53 = vsel %vm4024_vm2, %v4020_v6, 1326507024 }
 0x6e7   :  { %v4032_v46 = vsel %vm4022_vm7, %v4029_v23, %v4031_v12  ;;  %v4035_v35 = vsel %vm4023_vm1, %v4017_v4, %v4034_v53  ;;  %v4025_v25 = vsel %vm4021_vm12, %v4005_v30, %v4008_v15  ;;  %v4027_v47 = vsel %vm4023_vm1, %v4011_v16, %v4026_v52 }
 0x6e8   :  { %vm7578_vm15 = vcmp.lt.s32.totalorder %v7577_v39, 0  ;;  %v11041_v17 = vmul.u32.u64.low %v4037_v38, %v4032_v46  ;;  %v11042_v37 = vmul.u32.u64.high %v4037_v38, %v4032_v46, %v11041_v17  ;;  %v4036_v48 = vsel %vm4022_vm7, %v4033_v45, %v4035_v35 }
 0x6e9   :  { %v3644_v44 = vsel %vm7578_vm15, 0, %v7577_v39  ;;  %v3743_v34 = vsub.s32 0, %v11036_v29  ;;  %v4103_v13 = vadd.s32 1, %v7595_v0  ;;  %v14017_v6 = vand.u32 2147483647, %v10925_v33  ;;  %v11058_v0 = vpop.f32.mrb[26].mxu0 }
 0x6ea   :  { %v11049_v43 = vmul.u32.u64.low %v4037_v38, %v4036_v48  ;;  %v11050_v23 = vmul.u32.u64.high %v4037_v38, %v4036_v48, %v11049_v43  ;;  %v3649_v4 = vsub.s32 4294967266, %v3644_v44  ;;  %v4028_v54 = vsel %vm4022_vm7, %v4025_v25, %v4027_v47 }
 0x6eb   :  { %v4047_v12 = vadd.s32 1, %v11042_v37  ;;  %vm4104_vm5 = vcmp.gt.s32.totalorder %v4103_v13, 0  ;;  %v3645_v15 = vsub.s32 32, %v3644_v44  ;;  %v7580_v16 = vmin.u32 %v3743_v34, %v11036_v29 }
 0x6ec   :  { %v4105_v39 = vsel %vm4104_vm5, %v4103_v13, 0  ;;  %v4044_v45 = vmul.u32 %v4037_v38, %v4028_v54  ;;  %vm4046_vm8 = vc.u32 %v11050_v23, %v11041_v17  ;;  %v3629_v30 = vadd.s32 %v10965_v36, %v10962_v40 }
 0x6ed   :  { %v4107_v52 = vand.u32 31, %v4105_v39  ;;  %v3650_v46 = vadd.s32 127, %v3649_v4  ;;  %v4048_v50 = vsel %vm4046_vm8, %v4047_v12, %v11042_v37  ;;  %v4100_v53 = vand.u32 8388607, %v14017_v6 }
 0x6ee   :  { %v4049_v35 = vadd.s32 %v4048_v50, %v4044_v45  ;;  %v3647_v47 = vshrl.u32 %v3629_v30, %v3645_v15  ;;  %v3745_v48 = vclz %v7580_v16  ;;  %v3497_v38 = vmul.f32 %v10852_v8, %v10913_v62 }
 0x6ef   :  { %v4108_v25 = vsub.s32 32, %v4107_v52  ;;  %v3646_v13 = vshll.u32 %v11015_v55, %v3644_v44  ;;  %v3651_v43 = vshll.u32 %v3650_v46, 23  ;;  %v4101_v54 = vor.u32 8388608, %v4100_v53 }
 0x6f0   :  { %v4050_v34 = vadd.s32 536870912, %v4049_v35  ;;  %v7581_v12 = vadd.s32 4294967294, %v3745_v48  ;;  %v11075_v16 = vadd.f32 %v10873_v31, %v3497_v38  ;;  %v4110_v55 = vshll.u32 %v14348_v2, %v4107_v52 }
 0x6f1   :  { %v4111_v40 = vshrl.u32 %v14349_v24, %v4108_v25  ;;  %v4114_v36 = vshrl.u32 %v14350_v60, %v4108_v25  ;;  %v4117_v37 = vshrl.u32 %v14351_v42, %v4108_v25  ;;  %v3648_v4 = vor.u32 %v3647_v47, %v3646_v13 }
 0x6f2   :  { %v11068_v18 = vshrl.u32 %v4050_v34, 30  ;;  %v4120_v15 = vshrl.u32 %v14352_v9, %v4108_v25  ;;  %14355 = vst [vmem:[#allocation35_spill] sm:$0xff] %v11075_v16  ;;  %v4113_v44 = vshll.u32 %v14349_v24, %v4107_v52  ;;  %v4116_v45 = vshll.u32 %v14350_v60, %v4107_v52 }
 0x6f3   :  { %v3652_v30 = vor.u32 4788187, %v3651_v43  ;;  %v4106_v46 = vshrl.u32 %v4105_v39, 5  ;;  %v4119_v50 = vshll.u32 %v14351_v42, %v4107_v52  ;;  %v3498_v53 = vmul.f32 %v10852_v8, %v10915_v28 }
 0x6f4   :  { %v4052_v62 = vshll.u32 %v11068_v18, 30  ;;  %v4112_v48 = vor.u32 %v4111_v40, %v4110_v55  ;;  %v4115_v38 = vor.u32 %v4114_v36, %v4113_v44  ;;  %v4118_v34 = vor.u32 %v4117_v37, %v4116_v45 }
 0x6f5   :  { %vm7582_vm4 = vcmp.lt.s32.totalorder %v7581_v12, 0  ;;  %v4121_v13 = vor.u32 %v4120_v15, %v4119_v50  ;;  %v4122_v6 = vshll.u32 %v14352_v9, %v4107_v52  ;;  %v4123_v1 = vshrl.u32 %v14353_v20, %v4108_v25 }
 0x6f6   :  { %v11084_v47 = vsub.s32 %v4049_v35, %v4052_v62  ;;  %v3655_v58 = vcvt.s32.f32 %v3648_v4  ;;  %v4141_v39 = vshll.u32 %v4101_v54, 8  ;;  %v3653_v26 = vand.u32 2147483647, %v3652_v30  ;;  %v11093_v4 = vpop.f32.mrb[27].mxu0 }
 0x6f7   :  { %v4124_v41 = vor.u32 %v4123_v1, %v4122_v6  ;;  %vm4125_vm14 = vcmp.lt.s32.totalorder %v4106_v46, 1  ;;  %vm4128_vm0 = vcmp.lt.s32.totalorder %v4106_v46, 4  ;;  %v3748_v8 = vsel %vm7582_vm4, 0, %v7581_v12 }
 0x6f8   :  { %v4055_v43 = vsub.s32 0, %v11084_v47  ;;  %v4130_v35 = vsel %vm4128_vm0, %v4118_v34, 2102212464  ;;  %v4133_v40 = vsel %vm4125_vm14, %v4112_v48, %v4115_v38  ;;  %vm4127_vm10 = vcmp.lt.s32.totalorder %v4106_v46, 3 }
 0x6f9   :  { %v4134_v52 = vsel %vm4128_vm0, %v4121_v13, 920167782  ;;  %v4137_v36 = vsel %vm4125_vm14, %v4115_v38, %v4118_v34  ;;  %v4138_v37 = vsel %vm4128_vm0, %v4124_v41, 1326507024  ;;  %v4109_v15 = vshrl.u32 %v14348_v2, %v4108_v25 }
 0x6fa   :  { %v7592_v28 = vmin.u32 %v4055_v43, %v11084_v47  ;;  %vm4126_vm3 = vcmp.lt.s32.totalorder %v4106_v46, 2  ;;  %v4135_v1 = vsel %vm4127_vm10, %v4118_v34, %v4134_v52  ;;  %v3753_v6 = vsub.s32 4294967266, %v3748_v8 }
 0x6fb   :  { %v4136_v12 = vsel %vm4126_vm3, %v4133_v40, %v4135_v1  ;;  %v4139_v62 = vsel %vm4127_vm10, %v4121_v13, %v4138_v37  ;;  %v4408_v55 = vand.u32 2139095040, %v11075_v16  ;;  %v4129_v45 = vsel %vm4125_vm14, %v4109_v15, %v4112_v48 }
 0x6fc   :  { %v4057_v54 = vclz %v7592_v28  ;;  %v4131_v30 = vsel %vm4127_vm10, %v4115_v38, %v4130_v35  ;;  %v4140_v50 = vsel %vm4126_vm3, %v4137_v36, %v4139_v62  ;;  %v3749_v25 = vsub.s32 32, %v3748_v8 }
 0x6fd   :  { %v11100_v41 = vmul.u32.u64.low %v4141_v39, %v4140_v50  ;;  %v11101_v43 = vmul.u32.u64.high %v4141_v39, %v4140_v50, %v11100_v41  ;;  %v11103_v28 = vmul.u32.u64.low %v4141_v39, %v4136_v12  ;;  %v11104_v22 = vmul.u32.u64.high %v4141_v39, %v4136_v12, %v11103_v28 }
 0x6fe   :  { %v7593_v44 = vadd.s32 4294967294, %v4057_v54  ;;  %v4409_v34 = vshrl.u32 %v4408_v55, 23  ;;  %v3656_v40 = vmul.f32 %v3655_v58, %v3653_v26  ;;  %v3754_v13 = vadd.s32 127, %v3753_v6 }
 0x6ff   :  { %v4132_v37 = vsel %vm4126_vm3, %v4129_v45, %v4131_v30  ;;  %vm3575_vm9 = vcmp.lt.s32.totalorder %v10896_v61, 0  ;;  %v3733_v48 = vadd.s32 %v10995_v19, %v11001_v7  ;;  %v14356_v35 = vand.u32 2147483647, %v11075_v16 }
 0x700   :  { %vm7594_vm6 = vcmp.lt.s32.totalorder %v7593_v44, 0  ;;  %v7607_v38 = vadd.s32 4294967169, %v4409_v34  ;;  %vm4150_vm11 = vc.u32 %v11101_v43, %v11103_v28  ;;  %v4151_v26 = vadd.s32 1, %v11104_v22 }
 0x701   :  { %v11107_v52 = vsel %vm7594_vm6, 0, %v7593_v44  ;;  %v4412_v36 = vand.u32 8388607, %v14356_v35  ;;  %v11120_v58 = vadd.f32 %v10873_v31, %v3498_v53  ;;  %v3659_v46 = vsub.s32 4, %v11005_v59 }
 0x702   :  { %v4065_v54 = vsub.s32 4294967266, %v11107_v52  ;;  %v3751_v15 = vshrl.u32 %v3733_v48, %v3749_v25  ;;  %v4148_v1 = vmul.u32 %v4141_v39, %v4132_v37  ;;  %v4415_v6 = vadd.s32 1, %v7607_v38 }
 0x703   :  { %v3657_v19 = vxor.u32 2147483648, %v3656_v40  ;;  %v3750_v7 = vshll.u32 %v11036_v29, %v3748_v8  ;;  %v3755_v12 = vshll.u32 %v3754_v13, 23  ;;  %v4152_v62 = vsel %vm4150_vm11, %v4151_v26, %v11104_v22 }
 0x704   :  { %v4061_v55 = vsub.s32 32, %v11107_v52  ;;  %v4153_v44 = vadd.s32 %v4152_v62, %v4148_v1  ;;  %v4413_v45 = vor.u32 8388608, %v4412_v36  ;;  %vm4416_vm12 = vcmp.gt.s32.totalorder %v4415_v6, 0 }
 0x705   :  { %v4066_v30 = vadd.s32 127, %v4065_v54  ;;  %v4417_v50 = vsel %vm4416_vm12, %v4415_v6, 0  ;;  %v4512_v31 = vand.u32 2139095040, %v11120_v58  ;;  %v11129_v53 = vmul.f32 %v10850_v63, %v10920_v49 }
 0x706   :  { %v11134_v29 = vsel %vm3575_vm9, %v3659_v46, %v11005_v59  ;;  %v11136_v39 = vor.u32 %v3751_v15, %v3750_v7  ;;  %v4045_v22 = vadd.s32 %v11041_v17, %v11050_v23  ;;  %v4154_v8 = vadd.s32 536870912, %v4153_v44 }
 0x707   :  { %14357 = vst [vmem:[#allocation23_spill] sm:$0xff] %v11134_v29  ;;  %v3658_v41 = vsel %vm3575_vm9, %v3657_v19, %v3656_v40  ;;  %v11142_v25 = vor.u32 4788187, %v3755_v12  ;;  %v4062_v49 = vshll.u32 %v11084_v47, %v11107_v52  ;;  %v4419_v34 = vand.u32 31, %v4417_v50 }
 0x708   :  { %v4063_v13 = vshrl.u32 %v4045_v22, %v4061_v55  ;;  %v11146_v37 = vshrl.u32 %v4154_v8, 30  ;;  %v11148_v59 = vshll.u32 %v4413_v45, 8  ;;  %v4067_v38 = vshll.u32 %v4066_v30, 23 }
 0x709   :  { %v4418_v35 = vshrl.u32 %v4417_v50, 5  ;;  %v4420_v17 = vsub.s32 32, %v4419_v34  ;;  %v4513_v23 = vshrl.u32 %v4512_v31, 23  ;;  %v4422_v40 = vshll.u32 %v14348_v2, %v4419_v34 }
 0x70a   :  { %14358 = vst [vmem:[#allocation24_spill] sm:$0xff] %v11146_v37  ;;  %v4156_v36 = vshll.u32 %v11146_v37, 30  ;;  %v4425_v54 = vshll.u32 %v14349_v24, %v4419_v34  ;;  %v4428_v47 = vshll.u32 %v14350_v60, %v4419_v34  ;;  %v14359_v52 = vand.u32 2147483647, %v10896_v61 }
 0x70b   :  { %v14360_v26 = vmov 0  ;;  %v4423_v46 = vshrl.u32 %v14349_v24, %v4420_v17  ;;  %v4426_v15 = vshrl.u32 %v14350_v60, %v4420_v17  ;;  %v4429_v1 = vshrl.u32 %v14351_v42, %v4420_v17 }
 0x70c   :  { %vm11157_vm7 = vcmp.le.f32.partialorder %v14359_v52, 0.7853982  ;;  %v4431_v6 = vshll.u32 %v14351_v42, %v4419_v34  ;;  %v11165_v19 = vsub.s32 %v4153_v44, %v4156_v36  ;;  %v4432_v7 = vshrl.u32 %v14352_v9, %v4420_v17 }
 0x70d   :  { %v14361_v26 = vsel %vm11157_vm7, 4294967295, %v14360_v26  ;;  %v4434_v12 = vshll.u32 %v14352_v9, %v4419_v34  ;;  %v4435_v62 = vshrl.u32 %v14353_v20, %v4420_v17  ;;  %v4068_v55 = vor.u32 4788187, %v4067_v38 }
 0x70e   :  { %14362 = vst [vmem:[#allocation17_spill] sm:$0xff] %v14361_v26  ;;  %v4424_v45 = vor.u32 %v4423_v46, %v4422_v40  ;;  %v4427_v30 = vor.u32 %v4426_v15, %v4425_v54  ;;  %v4430_v50 = vor.u32 %v4429_v1, %v4428_v47  ;;  %v4159_v31 = vsub.s32 0, %v11165_v19  ;;  %v11173_v54 = vpop.f32.mrb[28].mxu0 }
 0x70f   :  { %v4433_v22 = vor.u32 %v4432_v7, %v4431_v6  ;;  %v4436_v8 = vor.u32 %v4435_v62, %v4434_v12  ;;  %vm4437_vm2 = vcmp.lt.s32.totalorder %v4418_v35, 1  ;;  %v4421_v52 = vshrl.u32 %v14348_v2, %v4420_v17 }
 0x710   :  { %vm4440_vm1 = vcmp.lt.s32.totalorder %v4418_v35, 4  ;;  %v4445_v44 = vsel %vm4437_vm2, %v4424_v45, %v4427_v30  ;;  %v7611_v36 = vadd.s32 4294967169, %v4513_v23  ;;  %v7596_v48 = vmin.u32 %v4159_v31, %v11165_v19 }
 0x711   :  { %vm4439_vm15 = vcmp.lt.s32.totalorder %v4418_v35, 3  ;;  %v4442_v34 = vsel %vm4440_vm1, %v4430_v50, 2102212464  ;;  %v4446_v29 = vsel %vm4440_vm1, %v4433_v22, 920167782  ;;  %v4064_v37 = vor.u32 %v4063_v13, %v4062_v49 }
 0x712   :  { %vm4438_vm5 = vcmp.lt.s32.totalorder %v4418_v35, 2  ;;  %v4447_v38 = vsel %vm4439_vm15, %v4430_v50, %v4446_v29  ;;  %v4449_v40 = vsel %vm4437_vm2, %v4427_v30, %v4430_v50  ;;  %v4161_v47 = vclz %v7596_v48 }
 0x713   :  { %v4441_v46 = vsel %vm4437_vm2, %v4421_v52, %v4424_v45  ;;  %v4448_v15 = vsel %vm4438_vm5, %v4445_v44, %v4447_v38  ;;  %v4450_v1 = vsel %vm4440_vm1, %v4436_v8, 1326507024  ;;  %v4443_v17 = vsel %vm4439_vm15, %v4427_v30, %v4442_v34 }
 0x714   :  { %v4451_v6 = vsel %vm4439_vm15, %v4433_v22, %v4450_v1  ;;  %v11177_v23 = vmul.u32.u64.low %v11148_v59, %v4448_v15  ;;  %v11178_v7 = vmul.u32.u64.high %v11148_v59, %v4448_v15, %v11177_v23  ;;  %v3661_v49 = vsel %vm11157_vm7, %v10896_v61, %v3658_v41 }
 0x715   :  { %v4069_v29 = vand.u32 2147483647, %v4068_v55  ;;  %v4452_v13 = vsel %vm4438_vm5, %v4449_v40, %v4451_v6  ;;  %v4519_v12 = vadd.s32 1, %v7611_v36  ;;  %v3757_v48 = vand.u32 2147483647, %v11142_v25 }
 0x716   :  { %v7597_v62 = vadd.s32 4294967294, %v4161_v47  ;;  %v11187_v45 = vmul.u32.u64.low %v11148_v59, %v4452_v13  ;;  %v11188_v30 = vmul.u32.u64.high %v11148_v59, %v4452_v13, %v11187_v45  ;;  %v4071_v50 = vcvt.s32.f32 %v4064_v37 }
 0x717   :  { %v4444_v31 = vsel %vm4438_vm5, %v4441_v46, %v4443_v17  ;;  %vm4520_vm8 = vcmp.gt.s32.totalorder %v4519_v12, 0  ;;  %v11193_v22 = vadd.f32 %v10870_v51, %v11129_v53  ;;  %8351 = vcosq.f32 %v3661_v49 }
 0x718   :  { %v4463_v41 = vadd.s32 1, %v11178_v7  ;;  %v14364_v55 = vand.u32 2147483647, %v11120_v58  ;;  %v4521_v25 = vsel %vm4520_vm8, %v4519_v12, 0  ;;  %8353 = vsinq.f32 %v3661_v49 }
 0x719   :  { %14363 = vst [vmem:[#allocation31_spill] sm:$0xff] %v11193_v22  ;;  %v3759_v52 = vcvt.s32.f32 %v11136_v39  ;;  %vm3991_vm4 = vcmp.lt.s32.totalorder %v10909_v21, 0  ;;  %v4072_v37 = vmul.f32 %v4071_v50, %v4069_v29  ;;  %vm7598_vm14 = vcmp.lt.s32.totalorder %v7597_v62, 0 }
 0x71a   :  { %v4516_v8 = vand.u32 8388607, %v14364_v55  ;;  %v4460_v44 = vmul.u32 %v11148_v59, %v4444_v31  ;;  %vm4462_vm0 = vc.u32 %v11188_v30, %v11177_v23  ;;  %v4523_v53 = vand.u32 31, %v4521_v25 }
 0x71b   :  { %v11204_v36 = vmul.f32 %v3759_v52, %v3757_v48  ;;  %v4464_v34 = vsel %vm4462_vm0, %v4463_v41, %v11178_v7  ;;  %v3502_v39 = vmul.f32 %v10850_v63, %v10922_v5  ;;  %v4824_v15 = vand.u32 2139095040, %v11193_v22 }
 0x71c   :  { %v4465_v40 = vadd.s32 %v4464_v34, %v4460_v44  ;;  %v4517_v47 = vor.u32 8388608, %v4516_v8  ;;  %v4524_v46 = vsub.s32 32, %v4523_v53  ;;  %v4073_v1 = vxor.u32 2147483648, %v4072_v37 }
 0x71d   :  { %v11211_v59 = vsel %vm7598_vm14, 0, %v7597_v62  ;;  %v4522_v17 = vshrl.u32 %v4521_v25, 5  ;;  %v4526_v6 = vshll.u32 %v14348_v2, %v4523_v53  ;;  %v4529_v7 = vshll.u32 %v14349_v24, %v4523_v53 }
 0x71e   :  { %v4466_v49 = vadd.s32 536870912, %v4465_v40  ;;  %v4527_v29 = vshrl.u32 %v14349_v24, %v4524_v46  ;;  %v4530_v13 = vshrl.u32 %v14350_v60, %v4524_v46  ;;  %v4532_v63 = vshll.u32 %v14350_v60, %v4523_v53 }
 0x71f   :  { %v4533_v5 = vshrl.u32 %v14351_v42, %v4524_v46  ;;  %v4535_v12 = vshll.u32 %v14351_v42, %v4523_v53  ;;  %v4536_v48 = vshrl.u32 %v14352_v9, %v4524_v46  ;;  %v4825_v31 = vshrl.u32 %v4824_v15, 23 }
 0x720   :  { %v11221_v62 = vshrl.u32 %v4466_v49, 30  ;;  %v4528_v45 = vor.u32 %v4527_v29, %v4526_v6  ;;  %v4531_v50 = vor.u32 %v4530_v13, %v4529_v7  ;;  %v4538_v8 = vshll.u32 %v14352_v9, %v4523_v53 }
 0x721   :  { %v4534_v41 = vor.u32 %v4533_v5, %v4532_v63  ;;  %v4537_v55 = vor.u32 %v4536_v48, %v4535_v12  ;;  %v4539_v25 = vshrl.u32 %v14353_v20, %v4524_v46  ;;  %v11225_v52 = vpop.eup %8351  ;;  %v14366_v44 = vand.u32 2147483647, %v10909_v21 }
 0x722   :  { %14365 = vst [vmem:[#allocation30_spill] sm:$0xff] %v11225_v52  ;;  %v14367_v34 = vmov 0  ;;  %v4074_v49 = vsel %vm3991_vm4, %v4073_v1, %v4072_v37  ;;  %v4468_v6 = vshll.u32 %v11221_v62, 30  ;;  %v4557_v15 = vshll.u32 %v4517_v47, 8  ;;  %v11239_v53 = vpop.eup %8353 }
 0x723   :  { %vm11229_vm10 = vcmp.le.f32.partialorder %v14366_v44, 0.7853982  ;;  %v11237_v29 = vadd.f32 %v10870_v51, %v3502_v39  ;;  %14370 = vst [vmem:[#allocation15_spill] sm:$0xff] %v11239_v53  ;;  %v4169_v7 = vsub.s32 4294967266, %v11211_v59  ;;  %v4540_v13 = vor.u32 %v4539_v25, %v4538_v8 }
 0x724   :  { %v14368_v34 = vsel %vm11229_vm10, 4294967295, %v14367_v34  ;;  %vm4541_vm3 = vcmp.lt.s32.totalorder %v4522_v17, 1  ;;  %vm4544_vm6 = vcmp.lt.s32.totalorder %v4522_v17, 4  ;;  %v11242_v63 = vsub.s32 %v4465_v40, %v4468_v6  ;;  %v11247_v40 = vpop.f32.mrb[29].mxu0 }
 0x725   :  { %14369 = vst [vmem:[#allocation29_spill] sm:$0xff] %v14368_v34  ;;  %v4546_v5 = vsel %vm4544_vm6, %v4534_v41, 2102212464  ;;  %v4549_v12 = vsel %vm4541_vm3, %v4528_v45, %v4531_v50  ;;  %v7623_v48 = vadd.s32 4294967169, %v4825_v31  ;;  %v4525_v37 = vshrl.u32 %v14348_v2, %v4524_v46  ;;  %14371 = vst [vmem:[#allocation38_spill] sm:$0xff] %v11247_v40 }
 0x726   :  { %vm4543_vm9 = vcmp.lt.s32.totalorder %v4522_v17, 3  ;;  %v4550_v1 = vsel %vm4544_vm6, %v4537_v55, 920167782  ;;  %v4553_v47 = vsel %vm4541_vm3, %v4531_v50, %v4534_v41  ;;  %v4471_v51 = vsub.s32 0, %v11242_v63 }
 0x727   :  { %vm4542_vm11 = vcmp.lt.s32.totalorder %v4522_v17, 2  ;;  %v4551_v39 = vsel %vm4543_vm9, %v4534_v41, %v4550_v1  ;;  %v4554_v44 = vsel %vm4544_vm6, %v4540_v13, 1326507024  ;;  %v4545_v35 = vsel %vm4541_vm3, %v4525_v37, %v4528_v45 }
 0x728   :  { %v4547_v38 = vsel %vm4543_vm9, %v4531_v50, %v4546_v5  ;;  %v4552_v8 = vsel %vm4542_vm11, %v4549_v12, %v4551_v39  ;;  %v4555_v25 = vsel %vm4543_vm9, %v4537_v55, %v4554_v44  ;;  %v7608_v6 = vmin.u32 %v4471_v51, %v11242_v63 }
 0x729   :  { %v4556_v31 = vsel %vm4542_vm11, %v4553_v47, %v4555_v25  ;;  %v11251_v46 = vmul.u32.u64.low %v4557_v15, %v4552_v8  ;;  %v11252_v52 = vmul.u32.u64.high %v4557_v15, %v4552_v8, %v11251_v46  ;;  %v4831_v41 = vadd.s32 1, %v7623_v48 }
 0x72a   :  { %v11255_v61 = vmul.u32.u64.low %v4557_v15, %v4556_v31  ;;  %v11256_v53 = vmul.u32.u64.high %v4557_v15, %v4556_v31, %v11255_v61  ;;  %v3491_v45 = vmul.f32 %v10846_v27, %v10975_v56  ;;  %v4149_v50 = vadd.s32 %v11103_v28, %v11101_v43 }
 0x72b   :  { %v4165_v55 = vsub.s32 32, %v11211_v59  ;;  %v4473_v13 = vclz %v7608_v6  ;;  %v4548_v5 = vsel %vm4542_vm11, %v4545_v35, %v4547_v38  ;;  %v11267_v12 = vsel %vm11229_vm10, %v10909_v21, %v4074_v49 }
 0x72c   :  { %v11269_v37 = vadd.s32 127, %v4169_v7  ;;  %v14372_v61 = vand.u32 2147483647, %v11193_v22  ;;  %vm4832_vm12 = vcmp.gt.s32.totalorder %v4831_v41, 0  ;;  %v4567_v1 = vadd.s32 1, %v11252_v52 }
 0x72d   :  { %v7609_v56 = vadd.s32 4294967294, %v4473_v13  ;;  %v4833_v43 = vsel %vm4832_vm12, %v4831_v41, 0  ;;  %v4928_v28 = vand.u32 2139095040, %v11237_v29  ;;  %v4564_v47 = vmul.u32 %v4557_v15, %v4548_v5 }
 0x72e   :  { %v4828_v48 = vand.u32 8388607, %v14372_v61  ;;  %vm4566_vm2 = vc.u32 %v11256_v53, %v11251_v46  ;;  %v4835_v35 = vand.u32 31, %v4833_v43  ;;  %v11278_v38 = vadd.f32 %v10864_v10, %v3491_v45 }
 0x72f   :  { %v11280_v17 = vshrl.u32 %v4149_v50, %v4165_v55  ;;  %v4461_v49 = vadd.s32 %v11177_v23, %v11188_v30  ;;  %vm7610_vm1 = vcmp.lt.s32.totalorder %v7609_v56, 0  ;;  %v4568_v7 = vsel %vm4566_vm2, %v4567_v1, %v11252_v52 }
 0x730   :  { %14373 = vst [vmem:[#allocation12_spill] sm:$0xff] %v11278_v38  ;;  %v4476_v39 = vsel %vm7610_vm1, 0, %v7609_v56  ;;  %v4569_v44 = vadd.s32 %v4568_v7, %v4564_v47  ;;  %v4836_v15 = vsub.s32 32, %v4835_v35  ;;  %v4829_v25 = vor.u32 8388608, %v4828_v48 }
 0x731   :  { %v4481_v8 = vsub.s32 4294967266, %v4476_v39  ;;  %v4838_v6 = vshll.u32 %v14348_v2, %v4835_v35  ;;  %v4929_v31 = vshrl.u32 %v4928_v28, 23  ;;  %v4841_v50 = vshll.u32 %v14349_v24, %v4835_v35 }
 0x732   :  { %v4570_v41 = vadd.s32 536870912, %v4569_v44  ;;  %v4839_v45 = vshrl.u32 %v14349_v24, %v4836_v15  ;;  %v4842_v23 = vshrl.u32 %v14350_v60, %v4836_v15  ;;  %v4834_v55 = vshrl.u32 %v4833_v43, 5 }
 0x733   :  { %v4482_v30 = vadd.s32 127, %v4481_v8  ;;  %v4844_v52 = vshll.u32 %v14350_v60, %v4835_v35  ;;  %v4845_v13 = vshrl.u32 %v14351_v42, %v4836_v15  ;;  %v4477_v5 = vsub.s32 32, %v4476_v39 }
 0x734   :  { %v11292_v61 = vshrl.u32 %v4570_v41, 30  ;;  %v4840_v48 = vor.u32 %v4839_v45, %v4838_v6  ;;  %v4843_v56 = vor.u32 %v4842_v23, %v4841_v50  ;;  %v4847_v47 = vshll.u32 %v14351_v42, %v4835_v35 }
 0x735   :  { %v4483_v1 = vshll.u32 %v4482_v30, 23  ;;  %v4846_v28 = vor.u32 %v4845_v13, %v4844_v52  ;;  %v4848_v7 = vshrl.u32 %v14352_v9, %v4836_v15  ;;  %v4850_v8 = vshll.u32 %v14352_v9, %v4835_v35 }
 0x736   :  { %14374 = vst [vmem:[#allocation22_spill] sm:$0xff] %v11292_v61  ;;  %v4572_v51 = vshll.u32 %v11292_v61, 30  ;;  %v4851_v43 = vshrl.u32 %v14353_v20, %v4836_v15  ;;  %v4869_v34 = vshll.u32 %v4829_v25, 8  ;;  %v4478_v26 = vshll.u32 %v11242_v63, %v4476_v39 }
 0x737   :  { %v4837_v41 = vshrl.u32 %v14348_v2, %v4836_v15  ;;  %v4849_v40 = vor.u32 %v4848_v7, %v4847_v47  ;;  %v7627_v6 = vadd.s32 4294967169, %v4929_v31  ;;  %vm4853_vm15 = vcmp.lt.s32.totalorder %v4834_v55, 1 }
 0x738   :  { %v11301_v45 = vsub.s32 %v4569_v44, %v4572_v51  ;;  %v4852_v50 = vor.u32 %v4851_v43, %v4850_v8  ;;  %vm4856_vm5 = vcmp.lt.s32.totalorder %v4834_v55, 4  ;;  %v4479_v23 = vshrl.u32 %v4461_v49, %v4477_v5  ;;  %v11307_v5 = vpop.f32.mrb[30].mxu0 }
 0x739   :  { %v4484_v30 = vor.u32 4788187, %v4483_v1  ;;  %v4858_v52 = vsel %vm4856_vm5, %v4846_v28, 2102212464  ;;  %v4861_v13 = vsel %vm4853_vm15, %v4840_v48, %v4843_v56  ;;  %vm4855_vm8 = vcmp.lt.s32.totalorder %v4834_v55, 3  ;;  %14375 = vst [vmem:[#allocation28_spill] sm:$0xff] %v11307_v5 }
 0x73a   :  { %v4575_v35 = vsub.s32 0, %v11301_v45  ;;  %v4862_v61 = vsel %vm4856_vm5, %v4849_v40, 920167782  ;;  %v4865_v25 = vsel %vm4853_vm15, %v4843_v56, %v4846_v28  ;;  %vm3679_vm14 = vcmp.lt.s32.totalorder %v10899_v3, 0 }
 0x73b   :  { %vm4854_vm0 = vcmp.lt.s32.totalorder %v4834_v55, 2  ;;  %v4857_v63 = vsel %vm4853_vm15, %v4837_v41, %v4840_v48  ;;  %v4863_v39 = vsel %vm4855_vm8, %v4846_v28, %v4862_v61  ;;  %v4866_v15 = vsel %vm4856_vm5, %v4852_v50, 1326507024 }
 0x73c   :  { %v7612_v51 = vmin.u32 %v4575_v35, %v11301_v45  ;;  %v4859_v44 = vsel %vm4855_vm8, %v4843_v56, %v4858_v52  ;;  %v4864_v31 = vsel %vm4854_vm0, %v4861_v13, %v4863_v39  ;;  %v4867_v49 = vsel %vm4855_vm8, %v4849_v40, %v4866_v15 }
 0x73d   :  { %v4480_v1 = vor.u32 %v4479_v23, %v4478_v26  ;;  %v4868_v47 = vsel %vm4854_vm0, %v4865_v25, %v4867_v49  ;;  %v11310_v7 = vmul.u32.u64.low %v4869_v34, %v4864_v31  ;;  %v11311_v8 = vmul.u32.u64.high %v4869_v34, %v4864_v31, %v11310_v7 }
 0x73e   :  { %v4166_v48 = vshll.u32 %v11165_v19, %v11211_v59  ;;  %v4577_v61 = vclz %v7612_v51  ;;  %v11316_v28 = vmul.u32.u64.low %v4869_v34, %v4868_v47  ;;  %v11317_v43 = vmul.u32.u64.high %v4869_v34, %v4868_v47, %v11316_v28 }
 0x73f   :  { %v4485_v56 = vand.u32 2147483647, %v4484_v30  ;;  %v4860_v41 = vsel %vm4854_vm0, %v4857_v63, %v4859_v44  ;;  %v14034_v40 = vand.u32 2147483647, %v11237_v29  ;;  %v4935_v50 = vadd.s32 1, %v7627_v6 }
 0x740   :  { %v3761_v26 = vxor.u32 2147483648, %v11204_v36  ;;  %8355 = vcosq.f32 %v11267_v12  ;;  %v11324_v23 = vor.u32 %v11280_v17, %v4166_v48  ;;  %v14376_v52 = vshll.u32 %v11269_v37, 23 }
 0x741   :  { %v4487_v59 = vcvt.s32.f32 %v4480_v1  ;;  %v7613_v13 = vadd.s32 4294967294, %v4577_v61  ;;  %v4879_v30 = vadd.s32 1, %v11311_v8  ;;  %vm4936_vm3 = vcmp.gt.s32.totalorder %v4935_v50, 0 }
 0x742   :  { %v11328_v19 = vor.u32 4788187, %v14376_v52  ;;  %v4876_v55 = vmul.u32 %v4869_v34, %v4860_v41  ;;  %vm4878_vm6 = vc.u32 %v11317_v43, %v11310_v7  ;;  %v14035_v6 = vand.u32 2147483647, %v11278_v38 }
 0x743   :  { %v3784_v35 = vand.u32 2139095040, %v11278_v38  ;;  %v11335_v25 = vmul.f32 %v4487_v59, %v4485_v56  ;;  %v4880_v17 = vsel %vm4878_vm6, %v4879_v30, %v11311_v8  ;;  %v4932_v37 = vand.u32 8388607, %v14034_v40 }
 0x744   :  { %v4937_v63 = vsel %vm4936_vm3, %v4935_v50, 0  ;;  %v11343_v39 = vsel %vm3679_vm14, %v3761_v26, %v11204_v36  ;;  %v14378_v34 = vsub.s32 4, %v11068_v18  ;;  %8357 = vsinq.f32 %v11267_v12 }
 0x745   :  { %14377 = vst [vmem:[#allocation39_spill] sm:$0xff] %v11343_v39  ;;  %v4881_v51 = vadd.s32 %v4880_v17, %v4876_v55  ;;  %vm7614_vm9 = vcmp.lt.s32.totalorder %v7613_v13, 0  ;;  %v4939_v49 = vand.u32 31, %v4937_v63  ;;  %v11358_v36 = vadd.s32 %v11251_v46, %v11256_v53 }
 0x746   :  { %v11350_v15 = vsel %vm3991_vm4, %v14378_v34, %v11068_v18  ;;  %v3785_v8 = vshrl.u32 %v3784_v35, 23  ;;  %v4489_v18 = vxor.u32 2147483648, %v11335_v25  ;;  %v4933_v48 = vor.u32 8388608, %v4932_v37 }
 0x747   :  { %14379 = vst [vmem:[#allocation14_spill] sm:$0xff] %v11350_v15  ;;  %v4882_v47 = vadd.s32 536870912, %v4881_v51  ;;  %v4940_v61 = vsub.s32 32, %v4939_v49  ;;  %v11363_v12 = vand.u32 8388607, %v14035_v6  ;;  %v11365_v28 = vsel %vm7614_vm9, 0, %v7613_v13 }
 0x748   :  { %v4942_v41 = vshll.u32 %v14348_v2, %v4939_v49  ;;  %v4945_v50 = vshll.u32 %v14349_v24, %v4939_v49  ;;  %v4948_v26 = vshll.u32 %v14350_v60, %v4939_v49  ;;  %v4938_v13 = vshrl.u32 %v4937_v63, 5 }
 0x749   :  { %v11367_v56 = vshrl.u32 %v4882_v47, 30  ;;  %v4943_v53 = vshrl.u32 %v14349_v24, %v4940_v61  ;;  %v4946_v46 = vshrl.u32 %v14350_v60, %v4940_v61  ;;  %v4949_v52 = vshrl.u32 %v14351_v42, %v4940_v61 }
 0x74a   :  { %v11375_v59 = vpop.eup %8355  ;;  %v4951_v55 = vshll.u32 %v14351_v42, %v4939_v49  ;;  %v7583_v35 = vadd.s32 4294967169, %v3785_v8  ;;  %v4952_v47 = vshrl.u32 %v14352_v9, %v4940_v61  ;;  %vm4407_vm4 = vcmp.lt.s32.totalorder %v11075_v16, 0 }
 0x74b   :  { %14380 = vst [vmem:[#allocation44_spill] sm:$0xff] %v11375_v59  ;;  %v4884_v30 = vshll.u32 %v11367_v56, 30  ;;  %v4944_v17 = vor.u32 %v4943_v53, %v4942_v41  ;;  %v4947_v37 = vor.u32 %v4946_v46, %v4945_v50  ;;  %v4950_v34 = vor.u32 %v4949_v52, %v4948_v26 }
 0x74c   :  { %v4581_v40 = vsub.s32 32, %v11365_v28  ;;  %v4585_v6 = vsub.s32 4294967266, %v11365_v28  ;;  %v4973_v31 = vshll.u32 %v4933_v48, 8  ;;  %v4953_v44 = vor.u32 %v4952_v47, %v4951_v55 }
 0x74d   :  { %v11383_v1 = vsub.s32 %v4881_v51, %v4884_v30  ;;  %v4954_v63 = vshll.u32 %v14352_v9, %v4939_v49  ;;  %v4955_v21 = vshrl.u32 %v14353_v20, %v4940_v61  ;;  %v3789_v8 = vor.u32 8388608, %v11363_v12  ;;  %v11393_v30 = vpop.f32.mrb[31].mxu0 }
 0x74e   :  { %v11388_v41 = vpop.eup %8357  ;;  %vm4957_vm11 = vcmp.lt.s32.totalorder %v4938_v13, 1  ;;  %vm4960_vm12 = vcmp.lt.s32.totalorder %v4938_v13, 4  ;;  %v3791_v53 = vadd.s32 1, %v7583_v35  ;;  %v4941_v46 = vshrl.u32 %v14348_v2, %v4940_v61  ;;  %14382 = vst [vmem:[#allocation36_spill] sm:$0xff] %v11393_v30 }
 0x74f   :  { %14381 = vst [vmem:[#allocation40_spill] sm:$0xff] %v11388_v41  ;;  %v4887_v50 = vsub.s32 0, %v11383_v1  ;;  %v4956_v26 = vor.u32 %v4955_v21, %v4954_v63  ;;  %v4962_v51 = vsel %vm4960_vm12, %v4950_v34, 2102212464  ;;  %v4965_v52 = vsel %vm4957_vm11, %v4944_v17, %v4947_v37 }
 0x750   :  { %vm4958_vm2 = vcmp.lt.s32.totalorder %v4938_v13, 2  ;;  %vm4959_vm1 = vcmp.lt.s32.totalorder %v4938_v13, 3  ;;  %v4966_v49 = vsel %vm4960_vm12, %v4953_v44, 920167782  ;;  %v4961_v12 = vsel %vm4957_vm11, %v4941_v46, %v4944_v17 }
 0x751   :  { %v7624_v48 = vmin.u32 %v4887_v50, %v11383_v1  ;;  %v4967_v55 = vsel %vm4959_vm1, %v4950_v34, %v4966_v49  ;;  %v4969_v47 = vsel %vm4957_vm11, %v4947_v37, %v4950_v34  ;;  %v4970_v59 = vsel %vm4960_vm12, %v4956_v26, 1326507024 }
 0x752   :  { %v4963_v15 = vsel %vm4959_vm1, %v4947_v37, %v4962_v51  ;;  %v4968_v35 = vsel %vm4958_vm2, %v4965_v52, %v4967_v55  ;;  %v4971_v39 = vsel %vm4959_vm1, %v4953_v44, %v4970_v59  ;;  %v11396_v61 = vadd.s32 127, %v4585_v6 }
 0x753   :  { %v4889_v41 = vclz %v7624_v48  ;;  %v4972_v21 = vsel %vm4958_vm2, %v4969_v47, %v4971_v39  ;;  %v11399_v63 = vmul.u32.u64.low %v4973_v31, %v4968_v35  ;;  %v11400_v50 = vmul.u32.u64.high %v4973_v31, %v4968_v35, %v11399_v63 }
 0x754   :  { %v11403_v5 = vmul.u32.u64.low %v4973_v31, %v4972_v21  ;;  %v11404_v30 = vmul.u32.u64.high %v4973_v31, %v4972_v21, %v11403_v5  ;;  %vm3792_vm15 = vcmp.gt.s32.totalorder %v3791_v53, 0  ;;  %v14383_v17 = vand.u32 2147483647, %v11328_v19 }
 0x755   :  { %v7625_v3 = vadd.s32 4294967294, %v4889_v41  ;;  %v14384_v37 = vcvt.s32.f32 %v11324_v23  ;;  %v11415_v6 = vsel %vm4407_vm4, %v4489_v18, %v11335_v25  ;;  %v4964_v39 = vsel %vm4958_vm2, %v4961_v12, %v4963_v15 }
 0x756   :  { %v3793_v44 = vsel %vm3792_vm15, %v3791_v53, 0  ;;  %v11419_v59 = vshrl.u32 %v11358_v36, %v4581_v40  ;;  %v4877_v5 = vadd.s32 %v11310_v7, %v11317_v43  ;;  %v4587_v23 = vshll.u32 %v11396_v61, 23 }
 0x757   :  { %v11410_v34 = vmul.f32 %v14384_v37, %v14383_v17  ;;  %vm7626_vm5 = vcmp.lt.s32.totalorder %v7625_v3, 0  ;;  %v3795_v19 = vand.u32 31, %v3793_v44  ;;  %v4983_v46 = vadd.s32 1, %v11400_v50 }
 0x758   :  { %v4892_v41 = vsel %vm7626_vm5, 0, %v7625_v3  ;;  %v3492_v25 = vmul.f32 %v10846_v27, %v10984_v14  ;;  %v4980_v15 = vmul.u32 %v4973_v31, %v4964_v39  ;;  %v11427_v53 = vshll.u32 %v3789_v8, 8 }
 0x759   :  { %v4893_v18 = vsub.s32 32, %v4892_v41  ;;  %v4897_v13 = vsub.s32 4294967266, %v4892_v41  ;;  %v4894_v40 = vshll.u32 %v11383_v1, %v4892_v41  ;;  %vm4982_vm8 = vc.u32 %v11404_v30, %v11399_v63 }
 0x75a   :  { %v11432_v7 = vshrl.u32 %v3793_v44, 5  ;;  %v3796_v43 = vsub.s32 32, %v3795_v19  ;;  %v4984_v26 = vsel %vm4982_vm8, %v4983_v46, %v11400_v50  ;;  %v3798_v51 = vshll.u32 %v14348_v2, %v3795_v19 }
 0x75b   :  { %v4895_v36 = vshrl.u32 %v4877_v5, %v4893_v18  ;;  %v4898_v3 = vadd.s32 127, %v4897_v13  ;;  %v4985_v27 = vadd.s32 %v4984_v26, %v4980_v15  ;;  %v3801_v31 = vshll.u32 %v14349_v24, %v3795_v19 }
 0x75c   :  { %v3799_v14 = vshrl.u32 %v14349_v24, %v3796_v43  ;;  %v3802_v8 = vshrl.u32 %v14350_v60, %v3796_v43  ;;  %v3804_v48 = vshll.u32 %v14350_v60, %v3795_v19  ;;  %v3805_v49 = vshrl.u32 %v14351_v42, %v3796_v43 }
 0x75d   :  { %v4896_v1 = vor.u32 %v4895_v36, %v4894_v40  ;;  %v4899_v52 = vshll.u32 %v4898_v3, 23  ;;  %v4986_v12 = vadd.s32 536870912, %v4985_v27  ;;  %v3807_v55 = vshll.u32 %v14351_v42, %v3795_v19 }
 0x75e   :  { %v3808_v47 = vshrl.u32 %v14352_v9, %v3796_v43  ;;  %v11444_v35 = vadd.f32 %v10864_v10, %v3492_v25  ;;  %v3800_v50 = vor.u32 %v3799_v14, %v3798_v51  ;;  %v3803_v17 = vor.u32 %v3802_v8, %v3801_v31 }
 0x75f   :  { %v4900_v21 = vor.u32 4788187, %v4899_v52  ;;  %v3806_v37 = vor.u32 %v3805_v49, %v3804_v48  ;;  %v14385_v39 = vand.u32 2147483647, %v11075_v16  ;;  %v11452_v5 = vshrl.u32 %v4986_v12, 30 }
 0x760   :  { %v3809_v41 = vor.u32 %v3808_v47, %v3807_v55  ;;  %v3810_v46 = vshll.u32 %v14352_v9, %v3795_v19  ;;  %v3811_v18 = vshrl.u32 %v14353_v20, %v3796_v43  ;;  %v4903_v13 = vcvt.s32.f32 %v4896_v1 }
 0x761   :  { %vm11448_vm0 = vcmp.le.f32.partialorder %v14385_v39, 0.7853982  ;;  %v3797_v10 = vshrl.u32 %v14348_v2, %v3796_v43  ;;  %vm3816_vm3 = vcmp.lt.s32.totalorder %v11432_v7, 4  ;;  %v3495_v25 = vmul.f32 %v10856_v57, %v11058_v0 }
 0x762   :  { %v4988_v15 = vshll.u32 %v11452_v5, 30  ;;  %v3812_v40 = vor.u32 %v3811_v18, %v3810_v46  ;;  %vm3813_vm6 = vcmp.lt.s32.totalorder %v11432_v7, 1  ;;  %v3818_v36 = vsel %vm3816_vm3, %v3806_v37, 2102212464 }
 0x763   :  { %v4901_v3 = vand.u32 2147483647, %v4900_v21  ;;  %vm3815_vm9 = vcmp.lt.s32.totalorder %v11432_v7, 3  ;;  %v3821_v19 = vsel %vm3813_vm6, %v3800_v50, %v3803_v17  ;;  %v3822_v43 = vsel %vm3816_vm3, %v3809_v41, 920167782 }
 0x764   :  { %v11467_v26 = vsub.s32 %v4985_v27, %v4988_v15  ;;  %vm3814_vm11 = vcmp.lt.s32.totalorder %v11432_v7, 2  ;;  %v3823_v0 = vsel %vm3815_vm9, %v3806_v37, %v3822_v43  ;;  %v3825_v51 = vsel %vm3813_vm6, %v3803_v17, %v3806_v37 }
 0x765   :  { %v3817_v14 = vsel %vm3813_vm6, %v3797_v10, %v3800_v50  ;;  %v3819_v31 = vsel %vm3815_vm9, %v3803_v17, %v3818_v36  ;;  %v3824_v8 = vsel %vm3814_vm11, %v3821_v19, %v3823_v0  ;;  %v3826_v1 = vsel %vm3816_vm3, %v3812_v40, 1326507024 }
 0x766   :  { %v4991_v52 = vsub.s32 0, %v11467_v26  ;;  %v3827_v48 = vsel %vm3815_vm9, %v3809_v41, %v3826_v1  ;;  %v11476_v49 = vmul.u32.u64.low %v11427_v53, %v3824_v8  ;;  %v11477_v12 = vmul.u32.u64.high %v11427_v53, %v3824_v8, %v11476_v49 }
 0x767   :  { %vm4823_vm12 = vcmp.lt.s32.totalorder %v11193_v22, 0  ;;  %v4904_v27 = vmul.f32 %v4903_v13, %v4901_v3  ;;  %v3828_v55 = vsel %vm3814_vm11, %v3825_v51, %v3827_v48  ;;  %v14042_v47 = vand.u32 2147483647, %v11444_v35 }
 0x768   :  { %v3888_v21 = vand.u32 2139095040, %v11444_v35  ;;  %vm4095_vm2 = vcmp.lt.s32.totalorder %v10925_v33, 0  ;;  %v4582_v50 = vshll.u32 %v11301_v45, %v11365_v28  ;;  %v7628_v17 = vmin.u32 %v4991_v52, %v11467_v26 }
 0x769   :  { %v11489_v37 = vmul.u32.u64.low %v11427_v53, %v3828_v55  ;;  %v11490_v39 = vmul.u32.u64.high %v11427_v53, %v3828_v55, %v11489_v37  ;;  %v4493_v41 = vsel %vm11448_vm0, %v11075_v16, %v11415_v6  ;;  %v3820_v46 = vsel %vm3814_vm11, %v3817_v14, %v3819_v31 }
 0x76a   :  { %v3889_v18 = vshrl.u32 %v3888_v21, 23  ;;  %v11499_v13 = vadd.f32 %v10862_v11, %v3495_v25  ;;  %v4584_v45 = vor.u32 %v11419_v59, %v4582_v50  ;;  %v4588_v28 = vor.u32 4788187, %v4587_v23 }
 0x76b   :  { %v14388_v10 = vand.u32 2147483647, %v11193_v22  ;;  %v4993_v40 = vclz %v7628_v17  ;;  %v3839_v6 = vadd.s32 1, %v11477_v12  ;;  %v4905_v7 = vxor.u32 2147483648, %v4904_v27 }
 0x76c   :  { %v7587_v36 = vadd.s32 4294967169, %v3889_v18  ;;  %v3892_v25 = vand.u32 8388607, %v14042_v47  ;;  %v3496_v59 = vmul.f32 %v10856_v57, %v11093_v4  ;;  %v3836_v61 = vmul.u32 %v11427_v53, %v3820_v46 }
 0x76d   :  { %vm11506_vm1 = vcmp.le.f32.partialorder %v14388_v10, 0.7853982  ;;  %v7629_v3 = vadd.s32 4294967294, %v4993_v40  ;;  %vm3838_vm15 = vc.u32 %v11490_v39, %v11476_v49  ;;  %v14043_v23 = vand.u32 2147483647, %v11499_v13 }
 0x76e   :  { %v4177_v19 = vxor.u32 2147483648, %v11410_v34  ;;  %v3840_v43 = vsel %vm3838_vm15, %v3839_v6, %v11477_v12  ;;  %v3895_v0 = vadd.s32 1, %v7587_v36  ;;  %v4200_v51 = vand.u32 2139095040, %v11499_v13 }
 0x76f   :  { %v14391_v14 = vsub.s32 4, %v11221_v62  ;;  %8359 = vcosq.f32 %v4493_v41  ;;  %v4589_v4 = vand.u32 2147483647, %v4588_v28  ;;  %v3841_v53 = vadd.s32 %v3840_v43, %v3836_v61 }
 0x770   :  { %v4591_v31 = vcvt.s32.f32 %v4584_v45  ;;  %vm7630_vm5 = vcmp.lt.s32.totalorder %v7629_v3, 0  ;;  %v3893_v8 = vor.u32 8388608, %v3892_v25  ;;  %vm3896_vm8 = vcmp.gt.s32.totalorder %v3895_v0, 0 }
 0x771   :  { %v11526_v57 = vsel %vm4407_vm4, %v14391_v14, %v11221_v62  ;;  %v4906_v1 = vsel %vm4823_vm12, %v4905_v7, %v4904_v27  ;;  %v3842_v52 = vadd.s32 536870912, %v3841_v53  ;;  %v11532_v48 = vand.u32 8388607, %v14043_v23 }
 0x772   :  { %v11535_v12 = vadd.f32 %v10862_v11, %v3496_v59  ;;  %v11540_v62 = vsel %vm4095_vm2, %v4177_v19, %v11410_v34  ;;  %8361 = vsinq.f32 %v4493_v41  ;;  %v3897_v55 = vsel %vm3896_vm8, %v3895_v0, 0 }
 0x773   :  { %v4201_v21 = vshrl.u32 %v4200_v51, 23  ;;  %v11542_v50 = vmul.f32 %v4591_v31, %v4589_v4  ;;  %v11545_v17 = vsel %vm7630_vm5, 0, %v7629_v3  ;;  %v11547_v37 = vshrl.u32 %v3842_v52, 30 }
 0x774   :  { %v11552_v11 = vsel %vm11506_vm1, %v11193_v22, %v4906_v1  ;;  %v11556_v34 = vadd.s32 %v11399_v63, %v11404_v30  ;;  %v3899_v41 = vand.u32 31, %v3897_v55  ;;  %v11558_v46 = vshll.u32 %v3893_v8, 8 }
 0x775   :  { %v11561_v18 = vadd.s32 %v11476_v49, %v11490_v39  ;;  %v3844_v45 = vshll.u32 %v11547_v37, 30  ;;  %v4205_v28 = vor.u32 8388608, %v11532_v48  ;;  %v4997_v40 = vsub.s32 32, %v11545_v17 }
 0x776   :  { %v5001_v6 = vsub.s32 4294967266, %v11545_v17  ;;  %v3900_v7 = vsub.s32 32, %v3899_v41  ;;  %v7599_v36 = vadd.s32 4294967169, %v4201_v21  ;;  %v3898_v63 = vshrl.u32 %v3897_v55, 5 }
 0x777   :  { %v11568_v30 = vsub.s32 %v3841_v53, %v3844_v45  ;;  %v3902_v25 = vshll.u32 %v14348_v2, %v3899_v41  ;;  %v3905_v49 = vshll.u32 %v14349_v24, %v3899_v41  ;;  %v3908_v3 = vshll.u32 %v14350_v60, %v3899_v41 }
 0x778   :  { %v3903_v39 = vshrl.u32 %v14349_v24, %v3900_v7  ;;  %v3906_v59 = vshrl.u32 %v14350_v60, %v3900_v7  ;;  %v3909_v61 = vshrl.u32 %v14351_v42, %v3900_v7  ;;  %v3911_v51 = vshll.u32 %v14351_v42, %v3899_v41 }
 0x779   :  { %v11576_v19 = vpop.eup %8359  ;;  %v3847_v0 = vsub.s32 0, %v11568_v30  ;;  %v3912_v14 = vshrl.u32 %v14352_v9, %v3900_v7  ;;  %v4304_v8 = vand.u32 2139095040, %v11535_v12  ;;  %v3914_v48 = vshll.u32 %v14352_v9, %v3899_v41 }
 0x77a   :  { %v3904_v4 = vor.u32 %v3903_v39, %v3902_v25  ;;  %v3907_v53 = vor.u32 %v3906_v59, %v3905_v49  ;;  %v3910_v31 = vor.u32 %v3909_v61, %v3908_v3  ;;  %v3915_v55 = vshrl.u32 %v14353_v20, %v3900_v7 }
 0x77b   :  { %v7584_v1 = vmin.u32 %v3847_v0, %v11568_v30  ;;  %v3913_v52 = vor.u32 %v3912_v14, %v3911_v51  ;;  %v11589_v45 = vadd.s32 127, %v5001_v6  ;;  %v3901_v47 = vshrl.u32 %v14348_v2, %v3900_v7 }
 0x77c   :  { %v11587_v21 = vpop.eup %8361  ;;  %vm3917_vm4 = vcmp.lt.s32.totalorder %v3898_v63, 1  ;;  %v4207_v23 = vadd.s32 1, %v7599_v36  ;;  %v3916_v49 = vor.u32 %v3915_v55, %v3914_v48  ;;  %vm3918_vm3 = vcmp.lt.s32.totalorder %v3898_v63, 2 }
 0x77d   :  { %v3849_v25 = vclz %v7584_v1  ;;  %vm3920_vm6 = vcmp.lt.s32.totalorder %v3898_v63, 4  ;;  %vm3919_vm9 = vcmp.lt.s32.totalorder %v3898_v63, 3  ;;  %v3925_v59 = vsel %vm3917_vm4, %v3904_v4, %v3907_v53 }
 0x77e   :  { %v3922_v39 = vsel %vm3920_vm6, %v3910_v31, 2102212464  ;;  %v3926_v3 = vsel %vm3920_vm6, %v3913_v52, 920167782  ;;  %v3921_v41 = vsel %vm3917_vm4, %v3901_v47, %v3904_v4  ;;  %v3929_v51 = vsel %vm3917_vm4, %v3907_v53, %v3910_v31 }
 0x77f   :  { %v7585_v61 = vadd.s32 4294967294, %v3849_v25  ;;  %v3927_v0 = vsel %vm3919_vm9, %v3910_v31, %v3926_v3  ;;  %v3923_v14 = vsel %vm3919_vm9, %v3907_v53, %v3922_v39  ;;  %v3930_v10 = vsel %vm3920_vm6, %v3916_v49, 1326507024 }
 0x780   :  { %v3928_v6 = vsel %vm3918_vm3, %v3925_v59, %v3927_v0  ;;  %vm4208_vm11 = vcmp.gt.s32.totalorder %v4207_v23, 0  ;;  %v3931_v7 = vsel %vm3919_vm9, %v3913_v52, %v3930_v10  ;;  %v4305_v25 = vshrl.u32 %v4304_v8, 23 }
 0x781   :  { %vm7586_vm15 = vcmp.lt.s32.totalorder %v7585_v61, 0  ;;  %v11594_v36 = vmul.u32.u64.low %v11558_v46, %v3928_v6  ;;  %v11595_v1 = vmul.u32.u64.high %v11558_v46, %v3928_v6, %v11594_v36  ;;  %v3932_v55 = vsel %vm3918_vm3, %v3929_v51, %v3931_v7 }
 0x782   :  { %v3852_v48 = vsel %vm7586_vm15, 0, %v7585_v61  ;;  %v4209_v43 = vsel %vm4208_vm11, %v4207_v23, 0  ;;  %v3924_v53 = vsel %vm3918_vm3, %v3921_v41, %v3923_v14  ;;  %v11606_v52 = vshll.u32 %v4205_v28, 8 }
 0x783   :  { %v3853_v47 = vsub.s32 32, %v3852_v48  ;;  %v3857_v4 = vsub.s32 4294967266, %v3852_v48  ;;  %v11600_v31 = vshrl.u32 %v4209_v43, 5  ;;  %v4211_v10 = vand.u32 31, %v4209_v43 }
 0x784   :  { %v11603_v49 = vmul.u32.u64.low %v11558_v46, %v3932_v55  ;;  %v11604_v39 = vmul.u32.u64.high %v11558_v46, %v3932_v55, %v11603_v49  ;;  %v11609_v59 = vshrl.u32 %v11556_v34, %v4997_v40  ;;  %v5003_v3 = vshll.u32 %v11589_v45, 23 }
 0x785   :  { %v3858_v23 = vadd.s32 127, %v3857_v4  ;;  %v3943_v8 = vadd.s32 1, %v11595_v1  ;;  %v3854_v63 = vshll.u32 %v11568_v30, %v3852_v48  ;;  %v3940_v61 = vmul.u32 %v11558_v46, %v3924_v53 }
 0x786   :  { %v4212_v41 = vsub.s32 32, %v4211_v10  ;;  %v7603_v0 = vadd.s32 4294967169, %v4305_v25  ;;  %v3855_v51 = vshrl.u32 %v11561_v18, %v3853_v47  ;;  %v4214_v28 = vshll.u32 %v14348_v2, %v4211_v10 }
 0x787   :  { %v3859_v14 = vshll.u32 %v3858_v23, 23  ;;  %vm4229_vm5 = vcmp.lt.s32.totalorder %v11600_v31, 1  ;;  %vm3942_vm8 = vc.u32 %v11604_v39, %v11594_v36  ;;  %v4217_v40 = vshll.u32 %v14349_v24, %v4211_v10 }
 0x788   :  { %v4215_v34 = vshrl.u32 %v14349_v24, %v4212_v41  ;;  %v4220_v30 = vshll.u32 %v14350_v60, %v4211_v10  ;;  %v3944_v46 = vsel %vm3942_vm8, %v3943_v8, %v11595_v1  ;;  %v4218_v45 = vshrl.u32 %v14350_v60, %v4212_v41 }
 0x789   :  { %v3860_v43 = vor.u32 4788187, %v3859_v14  ;;  %v4223_v18 = vshll.u32 %v14351_v42, %v4211_v10  ;;  %v3945_v6 = vadd.s32 %v3944_v46, %v3940_v61  ;;  %v4221_v48 = vshrl.u32 %v14351_v42, %v4212_v41 }
 0x78a   :  { %v4216_v7 = vor.u32 %v4215_v34, %v4214_v28  ;;  %v4224_v55 = vshrl.u32 %v14352_v9, %v4212_v41  ;;  %v3856_v25 = vor.u32 %v3855_v51, %v3854_v63  ;;  %v4219_v47 = vor.u32 %v4218_v45, %v4217_v40 }
 0x78b   :  { %v4226_v4 = vshll.u32 %v14352_v9, %v4211_v10  ;;  %v4227_v53 = vshrl.u32 %v14353_v20, %v4212_v41  ;;  %v3946_v49 = vadd.s32 536870912, %v3945_v6  ;;  %v4213_v23 = vshrl.u32 %v14348_v2, %v4212_v41 }
 0x78c   :  { %v4222_v1 = vor.u32 %v4221_v48, %v4220_v30  ;;  %v4225_v8 = vor.u32 %v4224_v55, %v4223_v18  ;;  %v3861_v14 = vand.u32 2147483647, %v3860_v43  ;;  %vm4231_vm4 = vcmp.lt.s32.totalorder %v11600_v31, 3 }
 0x78d   :  { %v4228_v27 = vor.u32 %v4227_v53, %v4226_v4  ;;  %vm4232_vm3 = vcmp.lt.s32.totalorder %v11600_v31, 4  ;;  %v11633_v61 = vshrl.u32 %v3946_v49, 30  ;;  %v4237_v63 = vsel %vm4229_vm5, %v4216_v7, %v4219_v47 }
 0x78e   :  { %v4234_v28 = vsel %vm4232_vm3, %v4222_v1, 2102212464  ;;  %v4238_v10 = vsel %vm4232_vm3, %v4225_v8, 920167782  ;;  %v3863_v51 = vcvt.s32.f32 %v3856_v25  ;;  %vm4230_vm6 = vcmp.lt.s32.totalorder %v11600_v31, 2 }
 0x78f   :  { %14392 = vst [vmem:[#allocation11_spill] sm:$0xff] %v11633_v61  ;;  %v4239_v41 = vsel %vm4231_vm4, %v4222_v1, %v4238_v10  ;;  %v4241_v34 = vsel %vm4229_vm5, %v4219_v47, %v4222_v1  ;;  %vm14066_vm9 = vcmp.lt.s32.totalorder %v11120_v58, 0  ;;  %vm3783_vm11 = vcmp.lt.s32.totalorder %v11278_v38, 0 }
 0x790   :  { %v3948_v40 = vshll.u32 %v11633_v61, 30  ;;  %v4233_v30 = vsel %vm4229_vm5, %v4213_v23, %v4216_v7  ;;  %v4240_v43 = vsel %vm4230_vm6, %v4237_v63, %v4239_v41  ;;  %v4242_v46 = vsel %vm4232_vm3, %v4228_v27, 1326507024 }
 0x791   :  { %v4235_v45 = vsel %vm4231_vm4, %v4219_v47, %v4234_v28  ;;  %v4243_v18 = vsel %vm4231_vm4, %v4225_v8, %v4242_v46  ;;  %v11654_v48 = vmul.u32.u64.low %v11606_v52, %v4240_v43  ;;  %v11655_v55 = vmul.u32.u64.high %v11606_v52, %v4240_v43, %v11654_v48 }
 0x792   :  { %v5004_v25 = vor.u32 4788187, %v5003_v3  ;;  %v3864_v4 = vmul.f32 %v3863_v51, %v3861_v14  ;;  %v11658_v53 = vsub.s32 %v3945_v6, %v3948_v40  ;;  %v4244_v7 = vsel %vm4230_vm6, %v4241_v34, %v4243_v18 }
 0x793   :  { %v4593_v27 = vxor.u32 2147483648, %v11542_v50  ;;  %v14393_v47 = vsub.s32 4, %v11367_v56  ;;  %v11671_v23 = vmul.u32.u64.low %v11606_v52, %v4244_v7  ;;  %v11672_v1 = vmul.u32.u64.high %v11606_v52, %v4244_v7, %v11671_v23 }
 0x794   :  { %v14394_v3 = vshll.u32 %v11467_v26, %v11545_v17  ;;  %v3951_v8 = vsub.s32 0, %v11658_v53  ;;  %v4236_v14 = vsel %vm4230_vm6, %v4233_v30, %v4235_v45  ;;  %v4311_v28 = vadd.s32 1, %v7603_v0 }
 0x795   :  { %v11668_v49 = vsel %vm4823_vm12, %v14393_v47, %v11367_v56  ;;  %8363 = vcosq.f32 %v11552_v11  ;;  %v14395_v56 = vand.u32 2147483647, %v11278_v38  ;;  %v14396_v63 = vmov 0 }
 0x796   :  { %v5000_v6 = vor.u32 %v11609_v59, %v14394_v3  ;;  %v3867_v10 = vsub.s32 4, %v11547_v37  ;;  %v4255_v26 = vadd.s32 1, %v11655_v55  ;;  %v14399_v17 = vand.u32 2147483647, %v11535_v12  ;;  %v14401_v3 = vld [vmem:[#allocation5_spill] sm:$0xff] }
 0x797   :  { %vm11684_vm12 = vcmp.le.f32.partialorder %v14395_v56, 0.7853982  ;;  %v5005_v51 = vand.u32 2147483647, %v5004_v25  ;;  %v3865_v41 = vxor.u32 2147483648, %v3864_v4  ;;  %v7588_v31 = vmin.u32 %v3951_v8, %v11658_v53 }
 0x798   :  { %v14397_v63 = vsel %vm11684_vm12, 4294967295, %v14396_v63  ;;  %v4308_v59 = vand.u32 8388607, %v14399_v17  ;;  %vm4312_vm15 = vcmp.gt.s32.totalorder %v4311_v28, 0  ;;  %v4252_v0 = vmul.u32 %v11606_v52, %v4236_v14 }
 0x799   :  { %14398 = vst [vmem:[#allocation41_spill] sm:$0xff] %v14397_v63  ;;  %vm4254_vm5 = vc.u32 %v11672_v1, %v11654_v48  ;;  %v4313_v34 = vsel %vm4312_vm15, %v4311_v28, 0  ;;  %v3499_v40 = vmul.f32 %v10854_v32, %v11173_v54  ;;  %v5007_v30 = vcvt.s32.f32 %v5000_v6 }
 0x79a   :  { %v3953_v43 = vclz %v7588_v31  ;;  %v4256_v46 = vsel %vm4254_vm5, %v4255_v26, %v11655_v55  ;;  %v4315_v45 = vand.u32 31, %v4313_v34  ;;  %v11702_v18 = vsel %vm14066_vm9, %v4593_v27, %v11542_v50 }
 0x79b   :  { %8365 = vsinq.f32 %v11552_v11  ;;  %v11708_v52 = vsel %vm3783_vm11, %v3867_v10, %v11547_v37  ;;  %v4257_v25 = vadd.s32 %v4256_v46, %v4252_v0  ;;  %v11710_v7 = vmul.f32 %v5007_v30, %v5005_v51 }
 0x79c   :  { %14400 = vst [vmem:[#allocation45_spill] sm:$0xff] %v11708_v52  ;;  %v3941_v54 = vadd.s32 %v11594_v36, %v11604_v39  ;;  %v7589_v55 = vadd.s32 4294967294, %v3953_v43  ;;  %v4316_v47 = vsub.s32 32, %v4315_v45  ;;  %v3866_v23 = vsel %vm3783_vm11, %v3865_v41, %v3864_v4 }
 0x79d   :  { %v4258_v50 = vadd.s32 536870912, %v4257_v25  ;;  %v4309_v27 = vor.u32 8388608, %v4308_v59  ;;  %v11717_v11 = vadd.f32 %v14401_v3, %v3499_v40  ;;  %v4318_v6 = vshll.u32 %v14348_v2, %v4315_v45 }
 0x79e   :  { %v4319_v37 = vshrl.u32 %v14349_v24, %v4316_v47  ;;  %v4321_v8 = vshll.u32 %v14349_v24, %v4315_v45  ;;  %v4322_v14 = vshrl.u32 %v14350_v60, %v4316_v47  ;;  %vm7590_vm8 = vcmp.lt.s32.totalorder %v7589_v55, 0 }
 0x79f   :  { %14402 = vst [vmem:[#allocation43_spill] sm:$0xff] %v11717_v11  ;;  %v11723_v36 = vshrl.u32 %v4258_v50, 30  ;;  %v4325_v39 = vshrl.u32 %v14351_v42, %v4316_v47  ;;  %v4328_v4 = vshrl.u32 %v14352_v9, %v4316_v47  ;;  %v3869_v28 = vsel %vm11684_vm12, %v11278_v38, %v3866_v23  ;;  %v11732_v17 = vpop.eup %8363  ;;  %v14404_v50 = vld [vmem:[#allocation38_spill] sm:$0xff] }
 0x7a0   :  { %v4314_v56 = vshrl.u32 %v4313_v34, 5  ;;  %v4324_v10 = vshll.u32 %v14350_v60, %v4315_v45  ;;  %v4327_v26 = vshll.u32 %v14351_v42, %v4315_v45  ;;  %14403 = vst [vmem:[#allocation10_spill] sm:$0xff] %v11732_v17  ;;  %v4320_v51 = vor.u32 %v4319_v37, %v4318_v6 }
 0x7a1   :  { %v4260_v59 = vshll.u32 %v11723_v36, 30  ;;  %v4323_v41 = vor.u32 %v4322_v14, %v4321_v8  ;;  %v4330_v31 = vshll.u32 %v14352_v9, %v4315_v45  ;;  %v3956_v0 = vsel %vm7590_vm8, 0, %v7589_v55 }
 0x7a2   :  { %v4326_v40 = vor.u32 %v4325_v39, %v4324_v10  ;;  %v4329_v30 = vor.u32 %v4328_v4, %v4327_v26  ;;  %v4331_v43 = vshrl.u32 %v14353_v20, %v4316_v47  ;;  %v11739_v34 = vshll.u32 %v4309_v27, 8 }
 0x7a3   :  { %v11737_v46 = vsub.s32 %v4257_v25, %v4260_v59  ;;  %v3500_v38 = vmul.f32 %v10854_v32, %v14404_v50  ;;  %v4317_v63 = vshrl.u32 %v14348_v2, %v4316_v47  ;;  %vm4333_vm4 = vcmp.lt.s32.totalorder %v4314_v56, 1 }
 0x7a4   :  { %v4332_v6 = vor.u32 %v4331_v43, %v4330_v31  ;;  %v4616_v45 = vand.u32 2139095040, %v11717_v11  ;;  %vm14065_vm3 = vcmp.lt.s32.totalorder %v11237_v29, 0  ;;  %v3957_v37 = vsub.s32 32, %v3956_v0 }
 0x7a5   :  { %v11746_v55 = vpop.eup %8365  ;;  %v4263_v25 = vsub.s32 0, %v11737_v46  ;;  %vm4336_vm6 = vcmp.lt.s32.totalorder %v4314_v56, 4  ;;  %v4341_v27 = vsel %vm4333_vm4, %v4320_v51, %v4323_v41  ;;  %v3961_v8 = vsub.s32 4294967266, %v3956_v0 }
 0x7a6   :  { %14405 = vst [vmem:[#allocation46_spill] sm:$0xff] %v11746_v55  ;;  %vm4335_vm11 = vcmp.lt.s32.totalorder %v4314_v56, 3  ;;  %v4338_v14 = vsel %vm4336_vm6, %v4326_v40, 2102212464  ;;  %v4342_v32 = vsel %vm4336_vm6, %v4329_v30, 920167782  ;;  %v4345_v4 = vsel %vm4333_vm4, %v4323_v41, %v4326_v40 }
 0x7a7   :  { %v7600_v47 = vmin.u32 %v4263_v25, %v11737_v46  ;;  %vm4334_vm15 = vcmp.lt.s32.totalorder %v4314_v56, 2  ;;  %v4343_v39 = vsel %vm4335_vm11, %v4326_v40, %v4342_v32  ;;  %v4337_v10 = vsel %vm4333_vm4, %v4317_v63, %v4320_v51 }
 0x7a8   :  { %v4339_v26 = vsel %vm4335_vm11, %v4323_v41, %v4338_v14  ;;  %v4344_v59 = vsel %vm4334_vm15, %v4341_v27, %v4343_v39  ;;  %v4346_v31 = vsel %vm4336_vm6, %v4332_v6, 1326507024  ;;  %v5009_v61 = vxor.u32 2147483648, %v11710_v7 }
 0x7a9   :  { %v4265_v43 = vclz %v7600_v47  ;;  %v4347_v50 = vsel %vm4335_vm11, %v4329_v30, %v4346_v31  ;;  %v11756_v23 = vmul.u32.u64.low %v11739_v34, %v4344_v59  ;;  %v11757_v52 = vmul.u32.u64.high %v11739_v34, %v4344_v59, %v11756_v23 }
 0x7aa   :  { %v3959_v25 = vshrl.u32 %v3941_v54, %v3957_v37  ;;  %v4348_v32 = vsel %vm4334_vm15, %v4345_v4, %v4347_v50  ;;  %v11763_v40 = vadd.f32 %v14401_v3, %v3500_v38  ;;  %v4617_v6 = vshrl.u32 %v4616_v45, 23 }
 0x7ab   :  { %v7601_v63 = vadd.s32 4294967294, %v4265_v43  ;;  %v11766_v51 = vmul.u32.u64.low %v11739_v34, %v4348_v32  ;;  %v11767_v41 = vmul.u32.u64.high %v11739_v34, %v4348_v32, %v11766_v51  ;;  %8367 = vcosq.f32 %v3869_v28  ;;  %v14409_v32 = vld [vmem:[#allocation4_spill] sm:$0xff] }
 0x7ac   :  { %14406 = vst [vmem:[#allocation21_spill] sm:$0xff] %v11763_v40  ;;  %v3958_v30 = vshll.u32 %v11658_v53, %v3956_v0  ;;  %v3962_v27 = vadd.s32 127, %v3961_v8  ;;  %v4340_v14 = vsel %vm4334_vm15, %v4337_v10, %v4339_v26  ;;  %v4359_v54 = vadd.s32 1, %v11757_v52 }
 0x7ad   :  { %vm7602_vm5 = vcmp.lt.s32.totalorder %v7601_v63, 0  ;;  %v7615_v37 = vadd.s32 4294967169, %v4617_v6  ;;  %v14407_v47 = vand.u32 2147483647, %v11717_v11  ;;  %v11777_v3 = vsel %vm14065_vm3, %v5009_v61, %v11710_v7 }
 0x7ae   :  { %8369 = vsinq.f32 %v3869_v28  ;;  %v4268_v45 = vsel %vm7602_vm5, 0, %v7601_v63  ;;  %v4720_v39 = vand.u32 2139095040, %v11763_v40  ;;  %v11780_v53 = vor.u32 %v3959_v25, %v3958_v30  ;;  %v14408_v25 = vld [vmem:[#allocation28_spill] sm:$0xff] }
 0x7af   :  { %v4620_v38 = vand.u32 8388607, %v14407_v47  ;;  %v4253_v56 = vadd.s32 %v11654_v48, %v11672_v1  ;;  %v4269_v0 = vsub.s32 32, %v4268_v45  ;;  %v4273_v8 = vsub.s32 4294967266, %v4268_v45 }
 0x7b0   :  { %v3963_v4 = vshll.u32 %v3962_v27, 23  ;;  %v4356_v10 = vmul.u32 %v11739_v34, %v4340_v14  ;;  %vm4358_vm8 = vc.u32 %v11767_v41, %v11756_v23  ;;  %v4623_v26 = vadd.s32 1, %v7615_v37  ;;  %v14410_v34 = vld [vmem:[#allocation36_spill] sm:$0xff] }
 0x7b1   :  { %v4274_v61 = vadd.s32 127, %v4273_v8  ;;  %v4360_v7 = vsel %vm4358_vm8, %v4359_v54, %v11757_v52  ;;  %v4621_v28 = vor.u32 8388608, %v4620_v38  ;;  %v14049_v59 = vand.u32 2147483647, %v11763_v40 }
 0x7b2   :  { %v4271_v31 = vshrl.u32 %v4253_v56, %v4269_v0  ;;  %v4361_v43 = vadd.s32 %v4360_v7, %v4356_v10  ;;  %vm4624_vm4 = vcmp.gt.s32.totalorder %v4623_v26, 0  ;;  %v4721_v50 = vshrl.u32 %v4720_v39, 23 }
 0x7b3   :  { %v4275_v48 = vshll.u32 %v4274_v61, 23  ;;  %v4625_v1 = vsel %vm4624_vm4, %v4623_v26, 0  ;;  %v3503_v63 = vmul.f32 %v14409_v32, %v14408_v25  ;;  %v11793_v51 = vmul.f32 %v14409_v32, %v14410_v34 }
 0x7b4   :  { %v4270_v6 = vshll.u32 %v11737_v46, %v4268_v45  ;;  %v4362_v30 = vadd.s32 536870912, %v4361_v43  ;;  %v4627_v27 = vand.u32 31, %v4625_v1  ;;  %v11797_v14 = vor.u32 4788187, %v3963_v4 }
 0x7b5   :  { %v11800_v37 = vshll.u32 %v4621_v28, 8  ;;  %v11804_v47 = vand.u32 8388607, %v14049_v59  ;;  %v11806_v38 = vpop.eup %8367  ;;  %v7619_v45 = vadd.s32 4294967169, %v4721_v50  ;;  %v4276_v0 = vor.u32 4788187, %v4275_v48 }
 0x7b6   :  { %14411 = vst [vmem:[#allocation13_spill] sm:$0xff] %v11806_v38  ;;  %v4272_v39 = vor.u32 %v4271_v31, %v4270_v6  ;;  %v11808_v56 = vshrl.u32 %v4362_v30, 30  ;;  %v4628_v46 = vsub.s32 32, %v4627_v27  ;;  %v4626_v8 = vshrl.u32 %v4625_v1, 5  ;;  %v14414_v38 = vld [vmem:[#allocation26_spill] sm:$0xff] }
 0x7b7   :  { %v4630_v4 = vshll.u32 %v14348_v2, %v4627_v27  ;;  %v4633_v10 = vshll.u32 %v14349_v24, %v4627_v27  ;;  %v4636_v31 = vshll.u32 %v14350_v60, %v4627_v27  ;;  %v4639_v50 = vshll.u32 %v14351_v42, %v4627_v27 }
 0x7b8   :  { %14412 = vst [vmem:[#allocation25_spill] sm:$0xff] %v11808_v56  ;;  %v11812_v26 = vpop.eup %8369  ;;  %v4364_v61 = vshll.u32 %v11808_v56, 30  ;;  %v4631_v7 = vshrl.u32 %v14349_v24, %v4628_v46  ;;  %v4634_v28 = vshrl.u32 %v14350_v60, %v4628_v46  ;;  %v4637_v25 = vshrl.u32 %v14351_v42, %v4628_v46 }
 0x7b9   :  { %14413 = vst [vmem:[#allocation48_spill] sm:$0xff] %v11812_v26  ;;  %v4640_v48 = vshrl.u32 %v14352_v9, %v4628_v46  ;;  %v4643_v1 = vshrl.u32 %v14353_v20, %v4628_v46  ;;  %v4642_v30 = vshll.u32 %v14352_v9, %v4627_v27  ;;  %v4277_v59 = vand.u32 2147483647, %v4276_v0 }
 0x7ba   :  { %v11822_v32 = vsub.s32 %v4361_v43, %v4364_v61  ;;  %v4632_v34 = vor.u32 %v4631_v7, %v4630_v4  ;;  %v4635_v6 = vor.u32 %v4634_v28, %v4633_v10  ;;  %v4638_v52 = vor.u32 %v4637_v25, %v4636_v31 }
 0x7bb   :  { %v4641_v54 = vor.u32 %v4640_v48, %v4639_v50  ;;  %v11826_v26 = vadd.f32 %v14414_v38, %v3503_v63  ;;  %v4644_v40 = vor.u32 %v4643_v1, %v4642_v30  ;;  %vm4645_vm6 = vcmp.lt.s32.totalorder %v4626_v8, 1 }
 0x7bc   :  { %v4367_v56 = vsub.s32 0, %v11822_v32  ;;  %v4727_v17 = vadd.s32 1, %v7619_v45  ;;  %v4279_v16 = vcvt.s32.f32 %v4272_v39  ;;  %v4629_v55 = vshrl.u32 %v14348_v2, %v4628_v46 }
 0x7bd   :  { %vm4648_vm11 = vcmp.lt.s32.totalorder %v4626_v8, 4  ;;  %v4653_v43 = vsel %vm4645_vm6, %v4632_v34, %v4635_v6  ;;  %vm4199_vm15 = vcmp.lt.s32.totalorder %v11499_v13, 0  ;;  %vm4647_vm5 = vcmp.lt.s32.totalorder %v4626_v8, 3 }
 0x7be   :  { %v7604_v27 = vmin.u32 %v4367_v56, %v11822_v32  ;;  %v4650_v0 = vsel %vm4648_vm11, %v4638_v52, 2102212464  ;;  %v4654_v4 = vsel %vm4648_vm11, %v4641_v54, 920167782  ;;  %v4280_v63 = vmul.f32 %v4279_v16, %v4277_v59 }
 0x7bf   :  { %vm4646_vm8 = vcmp.lt.s32.totalorder %v4626_v8, 2  ;;  %v4655_v10 = vsel %vm4647_vm5, %v4638_v52, %v4654_v4  ;;  %v4657_v61 = vsel %vm4645_vm6, %v4635_v6, %v4638_v52  ;;  %v4649_v39 = vsel %vm4645_vm6, %v4629_v55, %v4632_v34 }
 0x7c0   :  { %v4369_v7 = vclz %v7604_v27  ;;  %v4656_v46 = vsel %vm4646_vm8, %v4653_v43, %v4655_v10  ;;  %v4658_v45 = vsel %vm4648_vm11, %v4644_v40, 1326507024  ;;  %v4651_v28 = vsel %vm4647_vm5, %v4635_v6, %v4650_v0 }
 0x7c1   :  { %v4659_v31 = vsel %vm4647_vm5, %v4641_v54, %v4658_v45  ;;  %v11837_v25 = vmul.u32.u64.low %v11800_v37, %v4656_v46  ;;  %v11838_v50 = vmul.u32.u64.high %v11800_v37, %v4656_v46, %v11837_v25  ;;  %v4725_v59 = vor.u32 8388608, %v11804_v47 }
 0x7c2   :  { %v7605_v56 = vadd.s32 4294967294, %v4369_v7  ;;  %v4660_v16 = vsel %vm4646_vm8, %v4657_v61, %v4659_v31  ;;  %vm4728_vm4 = vcmp.gt.s32.totalorder %v4727_v17, 0  ;;  %v4281_v52 = vxor.u32 2147483648, %v4280_v63 }
 0x7c3   :  { %v11844_v48 = vmul.u32.u64.low %v11800_v37, %v4660_v16  ;;  %v11845_v55 = vmul.u32.u64.high %v11800_v37, %v4660_v16, %v11844_v48  ;;  %v4729_v1 = vsel %vm4728_vm4, %v4727_v17, 0  ;;  %v4652_v40 = vsel %vm4646_vm8, %v4649_v39, %v4651_v28  ;;  %v12310_v16 = vld [vmem:[%s13912_s5 + $0x48] sm:$0xff] }
 0x7c4   :  { %vm7606_vm6 = vcmp.lt.s32.totalorder %v7605_v56, 0  ;;  %v4731_v54 = vand.u32 31, %v4729_v1  ;;  %v14060_v34 = vand.u32 2147483647, %v11826_v26  ;;  %v3965_v6 = vand.u32 2147483647, %v11797_v14 }
 0x7c5   :  { %v4357_v30 = vadd.s32 %v11756_v23, %v11767_v41  ;;  %v4372_v43 = vsel %vm7606_vm6, 0, %v7605_v56  ;;  %v4671_v47 = vadd.s32 1, %v11838_v50  ;;  %v11853_v10 = vshll.u32 %v4725_v59, 8 }
 0x7c6   :  { %v4373_v27 = vsub.s32 32, %v4372_v43  ;;  %v4377_v0 = vsub.s32 4294967266, %v4372_v43  ;;  %v4732_v4 = vsub.s32 32, %v4731_v54  ;;  %v4282_v17 = vsel %vm4199_vm15, %v4281_v52, %v4280_v63 }
 0x7c7   :  { %v4668_v8 = vmul.u32 %v11800_v37, %v4652_v40  ;;  %vm4670_vm11 = vc.u32 %v11845_v55, %v11837_v25  ;;  %v5032_v14 = vand.u32 2139095040, %v11826_v26  ;;  %v4730_v41 = vshrl.u32 %v4729_v1, 5 }
 0x7c8   :  { %v4378_v61 = vadd.s32 127, %v4377_v0  ;;  %v4672_v23 = vsel %vm4670_vm11, %v4671_v47, %v11838_v50  ;;  %v11864_v7 = vand.u32 8388607, %v14060_v34  ;;  %v4734_v46 = vshll.u32 %v14348_v2, %v4731_v54 }
 0x7c9   :  { %v4673_v39 = vadd.s32 %v4672_v23, %v4668_v8  ;;  %v4735_v63 = vshrl.u32 %v14349_v24, %v4732_v4  ;;  %v4738_v37 = vshrl.u32 %v14350_v60, %v4732_v4  ;;  %v4375_v45 = vshrl.u32 %v4357_v30, %v4373_v27 }
 0x7ca   :  { %v4737_v28 = vshll.u32 %v14349_v24, %v4731_v54  ;;  %v4740_v31 = vshll.u32 %v14350_v60, %v4731_v54  ;;  %v4741_v56 = vshrl.u32 %v14351_v42, %v4732_v4  ;;  %v14415_v50 = vand.u32 2147483647, %v11499_v13 }
 0x7cb   :  { %v4374_v59 = vshll.u32 %v11822_v32, %v4372_v43  ;;  %v4674_v52 = vadd.s32 536870912, %v4673_v39  ;;  %v4743_v48 = vshll.u32 %v14351_v42, %v4731_v54  ;;  %v4744_v1 = vshrl.u32 %v14352_v9, %v4732_v4 }
 0x7cc   :  { %vm11874_vm5 = vcmp.le.f32.partialorder %v14415_v50, 0.7853982  ;;  %v4379_v40 = vshll.u32 %v4378_v61, 23  ;;  %v4736_v30 = vor.u32 %v4735_v63, %v4734_v46  ;;  %v4739_v47 = vor.u32 %v4738_v37, %v4737_v28 }
 0x7cd   :  { %v4742_v27 = vor.u32 %v4741_v56, %v4740_v31  ;;  %v11881_v0 = vshrl.u32 %v4674_v52, 30  ;;  %v4745_v8 = vor.u32 %v4744_v1, %v4743_v48  ;;  %v4746_v23 = vshll.u32 %v14352_v9, %v4731_v54 }
 0x7ce   :  { %v4747_v50 = vshrl.u32 %v14353_v20, %v4732_v4  ;;  %v4376_v34 = vor.u32 %v4375_v45, %v4374_v59  ;;  %v4733_v22 = vshrl.u32 %v14348_v2, %v4732_v4  ;;  %v5033_v32 = vshrl.u32 %v5032_v14, 23 }
 0x7cf   :  { %v11888_v43 = vadd.f32 %v14414_v38, %v11793_v51  ;;  %v4676_v61 = vshll.u32 %v11881_v0, 30  ;;  %vm4749_vm8 = vcmp.lt.s32.totalorder %v4730_v41, 1  ;;  %vm4752_vm4 = vcmp.lt.s32.totalorder %v4730_v41, 4 }
 0x7d0   :  { %v4748_v46 = vor.u32 %v4747_v50, %v4746_v23  ;;  %vm4751_vm6 = vcmp.lt.s32.totalorder %v4730_v41, 3  ;;  %v4754_v63 = vsel %vm4752_vm4, %v4742_v27, 2102212464  ;;  %v4757_v37 = vsel %vm4749_vm8, %v4736_v30, %v4739_v47 }
 0x7d1   :  { %v4758_v28 = vsel %vm4752_vm4, %v4745_v8, 920167782  ;;  %v4380_v54 = vor.u32 4788187, %v4379_v40  ;;  %v11891_v31 = vsub.s32 %v4673_v39, %v4676_v61  ;;  %vm4750_vm11 = vcmp.lt.s32.totalorder %v4730_v41, 2 }
 0x7d2   :  { %v4759_v4 = vsel %vm4751_vm6, %v4742_v27, %v4758_v28  ;;  %v4753_v14 = vsel %vm4749_vm8, %v4733_v22, %v4736_v30  ;;  %v4755_v45 = vsel %vm4751_vm6, %v4739_v47, %v4754_v63  ;;  %v4761_v38 = vsel %vm4749_vm8, %v4739_v47, %v4742_v27 }
 0x7d3   :  { %v4760_v51 = vsel %vm4750_vm11, %v4757_v37, %v4759_v4  ;;  %v4679_v56 = vsub.s32 0, %v11891_v31  ;;  %v4762_v59 = vsel %vm4752_vm4, %v4748_v46, 1326507024  ;;  %v14418_v39 = vcvt.s32.f32 %v11780_v53 }
 0x7d4   :  { %v11898_v52 = vmul.u32.u64.low %v11853_v10, %v4760_v51  ;;  %v11899_v48 = vmul.u32.u64.high %v11853_v10, %v4760_v51, %v11898_v52  ;;  %v11909_v22 = vsel %vm11874_vm5, %v11499_v13, %v4282_v17  ;;  %v4763_v40 = vsel %vm4751_vm6, %v4745_v8, %v4762_v59 }
 0x7d5   :  { %v11904_v1 = vmul.f32 %v14418_v39, %v3965_v6  ;;  %v7631_v30 = vadd.s32 4294967169, %v5033_v32  ;;  %v4381_v47 = vand.u32 2147483647, %v4380_v54  ;;  %v4383_v27 = vcvt.s32.f32 %v4376_v34 }
 0x7d6   :  { %v7616_v23 = vmin.u32 %v4679_v56, %v11891_v31  ;;  %v4764_v50 = vsel %vm4750_vm11, %v4761_v38, %v4763_v40  ;;  %v4756_v61 = vsel %vm4750_vm11, %v4753_v14, %v4755_v45  ;;  %v4775_v17 = vadd.s32 1, %v11899_v48 }
 0x7d7   :  { %v11916_v53 = vmul.u32.u64.low %v11853_v10, %v4764_v50  ;;  %v11917_v6 = vmul.u32.u64.high %v11853_v10, %v4764_v50, %v11916_v53  ;;  %v5039_v46 = vadd.s32 1, %v7631_v30  ;;  %v5037_v37 = vor.u32 8388608, %v11864_v7 }
 0x7d8   :  { %v4681_v63 = vclz %v7616_v23  ;;  %v5136_v8 = vand.u32 2139095040, %v11888_v43  ;;  %8371 = vcosq.f32 %v11909_v22  ;;  %v4669_v41 = vadd.s32 %v11837_v25, %v11845_v55 }
 0x7d9   :  { %vm5040_vm8 = vcmp.gt.s32.totalorder %v5039_v46, 0  ;;  %v11926_v32 = vmul.f32 %v4383_v27, %v4381_v47  ;;  %v4772_v14 = vmul.u32 %v11853_v10, %v4756_v61  ;;  %vm4774_vm4 = vc.u32 %v11917_v6, %v11898_v52 }
 0x7da   :  { %v7617_v28 = vadd.s32 4294967294, %v4681_v63  ;;  %v5041_v4 = vsel %vm5040_vm8, %v5039_v46, 0  ;;  %v14063_v45 = vand.u32 2147483647, %v11888_v43  ;;  %v4776_v51 = vsel %vm4774_vm4, %v4775_v17, %v11899_v48 }
 0x7db   :  { %v5043_v7 = vand.u32 31, %v5041_v4  ;;  %v11934_v38 = vshll.u32 %v5037_v37, 8  ;;  %v5137_v25 = vshrl.u32 %v5136_v8, 23  ;;  %v4777_v56 = vadd.s32 %v4776_v51, %v4772_v14 }
 0x7dc   :  { %vm7618_vm6 = vcmp.lt.s32.totalorder %v7617_v28, 0  ;;  %v11936_v59 = vshrl.u32 %v5041_v4, 5  ;;  %vm14074_vm11 = vcmp.lt.s32.totalorder %v11444_v35, 0  ;;  %vm14072_vm3 = vcmp.lt.s32.totalorder %v11535_v12, 0 }
 0x7dd   :  { %v4684_v55 = vsel %vm7618_vm6, 0, %v7617_v28  ;;  %v5044_v39 = vsub.s32 32, %v5043_v7  ;;  %v5046_v47 = vshll.u32 %v14348_v2, %v5043_v7  ;;  %v4778_v27 = vadd.s32 536870912, %v4777_v56 }
 0x7de   :  { %v4685_v40 = vsub.s32 32, %v4684_v55  ;;  %v4686_v10 = vshll.u32 %v11891_v31, %v4684_v55  ;;  %v4689_v30 = vsub.s32 4294967266, %v4684_v55  ;;  %v5049_v50 = vshll.u32 %v14349_v24, %v5043_v7 }
 0x7df   :  { %v5047_v23 = vshrl.u32 %v14349_v24, %v5044_v39  ;;  %v5050_v48 = vshrl.u32 %v14350_v60, %v5044_v39  ;;  %v5052_v46 = vshll.u32 %v14350_v60, %v5043_v7  ;;  %v5053_v63 = vshrl.u32 %v14351_v42, %v5044_v39 }
 0x7e0   :  { %v4687_v61 = vshrl.u32 %v4669_v41, %v4685_v40  ;;  %v4690_v53 = vadd.s32 127, %v4689_v30  ;;  %v11945_v17 = vshrl.u32 %v4778_v27, 30  ;;  %v5055_v8 = vshll.u32 %v14351_v42, %v5043_v7 }
 0x7e1   :  { %v5048_v37 = vor.u32 %v5047_v23, %v5046_v47  ;;  %v5051_v31 = vor.u32 %v5050_v48, %v5049_v50  ;;  %v5054_v14 = vor.u32 %v5053_v63, %v5052_v46  ;;  %v5056_v51 = vshrl.u32 %v14352_v9, %v5044_v39 }
 0x7e2   :  { %v4688_v28 = vor.u32 %v4687_v61, %v4686_v10  ;;  %v4691_v4 = vshll.u32 %v4690_v53, 23  ;;  %v11949_v55 = vpop.eup %8371  ;;  %v4780_v41 = vshll.u32 %v11945_v17, 30  ;;  %v5058_v40 = vshll.u32 %v14352_v9, %v5043_v7 }
 0x7e3   :  { %14419 = vst [vmem:[#allocation18_spill] sm:$0xff] %v11949_v55  ;;  %v5059_v30 = vshrl.u32 %v14353_v20, %v5044_v39  ;;  %v5140_v47 = vand.u32 8388607, %v14063_v45  ;;  %v5045_v10 = vshrl.u32 %v14348_v2, %v5044_v39  ;;  %v5057_v23 = vor.u32 %v5056_v51, %v5055_v8 }
 0x7e4   :  { %v4692_v27 = vor.u32 4788187, %v4691_v4  ;;  %v7635_v50 = vadd.s32 4294967169, %v5137_v25  ;;  %v11958_v48 = vsub.s32 %v4777_v56, %v4780_v41  ;;  %vm5061_vm8 = vcmp.lt.s32.totalorder %v11936_v59, 1 }
 0x7e5   :  { %v5060_v61 = vor.u32 %v5059_v30, %v5058_v40  ;;  %vm5064_vm4 = vcmp.lt.s32.totalorder %v11936_v59, 4  ;;  %vm4615_vm6 = vcmp.lt.s32.totalorder %v11717_v11, 0  ;;  %v4695_v53 = vcvt.s32.f32 %v4688_v28 }
 0x7e6   :  { %v4693_v7 = vand.u32 2147483647, %v4692_v27  ;;  %v5066_v46 = vsel %vm5064_vm4, %v5054_v14, 2102212464  ;;  %v5069_v63 = vsel %vm5061_vm8, %v5048_v37, %v5051_v31  ;;  %v4783_v45 = vsub.s32 0, %v11958_v48 }
 0x7e7   :  { %vm5063_vm13 = vcmp.lt.s32.totalorder %v11936_v59, 3  ;;  %v5070_v39 = vsel %vm5064_vm4, %v5057_v23, 920167782  ;;  %v5073_v8 = vsel %vm5061_vm8, %v5051_v31, %v5054_v14  ;;  %vm5062_vm9 = vcmp.lt.s32.totalorder %v11936_v59, 2 }
 0x7e8   :  { %v5065_v25 = vsel %vm5061_vm8, %v5045_v10, %v5048_v37  ;;  %v5071_v56 = vsel %vm5063_vm13, %v5054_v14, %v5070_v39  ;;  %v5074_v4 = vsel %vm5064_vm4, %v5060_v61, 1326507024  ;;  %v7620_v51 = vmin.u32 %v4783_v45, %v11958_v48 }
 0x7e9   :  { %v5067_v41 = vsel %vm5063_vm13, %v5051_v31, %v5066_v46  ;;  %v5072_v28 = vsel %vm5062_vm9, %v5069_v63, %v5071_v56  ;;  %v5075_v40 = vsel %vm5063_vm13, %v5057_v23, %v5074_v4  ;;  %v4696_v30 = vmul.f32 %v4695_v53, %v4693_v7  ;;  %v14422_v46 = vld [vmem:[#allocation37_spill] sm:$0xff] }
 0x7ea   :  { %v5076_v27 = vsel %vm5062_vm9, %v5073_v8, %v5075_v40  ;;  %v11973_v54 = vmul.u32.u64.low %v11934_v38, %v5072_v28  ;;  %v11974_v34 = vmul.u32.u64.high %v11934_v38, %v5072_v28, %v11973_v54  ;;  %v4785_v55 = vclz %v7620_v51  ;;  %v14428_v28 = vld [vmem:[#allocation32_spill] sm:$0xff] }
 0x7eb   :  { %v11978_v37 = vmul.u32.u64.low %v11934_v38, %v5076_v27  ;;  %v11979_v14 = vmul.u32.u64.high %v11934_v38, %v5076_v27, %v11978_v37  ;;  %v5143_v45 = vadd.s32 1, %v7635_v50  ;;  %v14420_v31 = vxor.u32 2147483648, %v11904_v1 }
 0x7ec   :  { %v14421_v23 = vsub.s32 4, %v11723_v36  ;;  %8373 = vsinq.f32 %v11909_v22  ;;  %v5068_v7 = vsel %vm5062_vm9, %v5065_v25, %v5067_v41  ;;  %v4385_v50 = vxor.u32 2147483648, %v11926_v32  ;;  %v14432_v37 = vld [vmem:[#allocation39_spill] sm:$0xff] }
 0x7ed   :  { %v11986_v10 = vsel %vm14074_vm11, %v14420_v31, %v11904_v1  ;;  %v7621_v53 = vadd.s32 4294967294, %v4785_v55  ;;  %vm5144_vm13 = vcmp.gt.s32.totalorder %v5143_v45, 0  ;;  %v3763_v63 = vsub.s32 4, %v14422_v46 }
 0x7ee   :  { %v11993_v61 = vsel %vm4199_vm15, %v14421_v23, %v11723_v36  ;;  %v14423_v1 = vand.u32 2147483647, %v11717_v11  ;;  %v4697_v8 = vxor.u32 2147483648, %v4696_v30  ;;  %v5087_v36 = vadd.s32 1, %v11974_v34 }
 0x7ef   :  { %v5141_v56 = vor.u32 8388608, %v5140_v47  ;;  %v5145_v22 = vsel %vm5144_vm13, %v5143_v45, 0  ;;  %v14426_v59 = vsub.s32 4, %v11881_v0  ;;  %vm7622_vm9 = vcmp.lt.s32.totalorder %v7621_v53, 0 }
 0x7f0   :  { %vm12002_vm8 = vcmp.le.f32.partialorder %v14423_v1, 0.7853982  ;;  %v5084_v25 = vmul.u32 %v11934_v38, %v5068_v7  ;;  %vm5086_vm15 = vc.u32 %v11979_v14, %v11973_v54  ;;  %v4788_v4 = vsel %vm7622_vm9, 0, %v7621_v53 }
 0x7f1   :  { %v12012_v55 = vsel %vm4615_vm6, %v14426_v59, %v11881_v0  ;;  %v5088_v51 = vsel %vm5086_vm15, %v5087_v36, %v11974_v34  ;;  %v5147_v41 = vand.u32 31, %v5145_v22  ;;  %v14429_v47 = vand.u32 2147483647, %v14428_v28 }
 0x7f2   :  { %14427 = vst [vmem:[#allocation50_spill] sm:$0xff] %v12012_v55  ;;  %v12027_v0 = vsel %vm14072_vm3, %v4385_v50, %v11926_v32  ;;  %v4773_v38 = vadd.s32 %v11898_v52, %v11917_v6  ;;  %v5089_v27 = vadd.s32 %v5088_v51, %v5084_v25  ;;  %v4698_v45 = vsel %vm4615_vm6, %v4697_v8, %v4696_v30 }
 0x7f3   :  { %vm12020_vm4 = vcmp.le.f32.partialorder %v14429_v47, 0.7853982  ;;  %v5148_v31 = vsub.s32 32, %v5147_v41  ;;  %v12037_v23 = vshll.u32 %v5141_v56, 8  ;;  %v3764_v32 = vsel %vm3679_vm14, %v3763_v63, %v14422_v46 }
 0x7f4   :  { %v3765_v34 = vsel %vm12020_vm4, %v14428_v28, %v14432_v37  ;;  %v4789_v7 = vsub.s32 32, %v4788_v4  ;;  %v5090_v50 = vadd.s32 536870912, %v5089_v27  ;;  %v5146_v53 = vshrl.u32 %v5145_v22, 5 }
 0x7f5   :  { %v5150_v52 = vshll.u32 %v14348_v2, %v5147_v41  ;;  %v5151_v6 = vshrl.u32 %v14349_v24, %v5148_v31  ;;  %v5153_v1 = vshll.u32 %v14349_v24, %v5147_v41  ;;  %v5154_v36 = vshrl.u32 %v14350_v60, %v5148_v31 }
 0x7f6   :  { %v5157_v30 = vshrl.u32 %v14351_v42, %v5148_v31  ;;  %v4793_v8 = vsub.s32 4294967266, %v4788_v4  ;;  %v12047_v56 = vshrl.u32 %v5090_v50, 30  ;;  %v5156_v59 = vshll.u32 %v14350_v60, %v5147_v41  ;;  %v12051_v63 = vpop.eup %8373 }
 0x7f7   :  { %v5160_v46 = vshrl.u32 %v14352_v9, %v5148_v31  ;;  %v5152_v22 = vor.u32 %v5151_v6, %v5150_v52  ;;  %v5155_v25 = vor.u32 %v5154_v36, %v5153_v1  ;;  %v5159_v51 = vshll.u32 %v14351_v42, %v5147_v41 }
 0x7f8   :  { %8375 = vcosq.f32 %v3765_v34  ;;  %v12057_v47 = vsel %vm12002_vm8, %v11717_v11, %v4698_v45  ;;  %v5092_v37 = vshll.u32 %v12047_v56, 30  ;;  %v5158_v50 = vor.u32 %v5157_v30, %v5156_v59 }
 0x7f9   :  { %v3766_v60 = vsel %vm12020_vm4, 0, %v3764_v32  ;;  %v4790_v24 = vshll.u32 %v11958_v48, %v4788_v4  ;;  %v5161_v55 = vor.u32 %v5160_v46, %v5159_v51  ;;  %v5162_v52 = vshll.u32 %v14352_v9, %v5147_v41 }
 0x7fa   :  { %v5163_v6 = vshrl.u32 %v14353_v20, %v5148_v31  ;;  %v4791_v1 = vshrl.u32 %v4773_v38, %v4789_v7  ;;  %v4794_v36 = vadd.s32 127, %v4793_v8  ;;  %v12065_v42 = vsub.s32 %v5089_v27, %v5092_v37 }
 0x7fb   :  { %vm5165_vm14 = vcmp.lt.s32.totalorder %v5146_v53, 1  ;;  %v5149_v45 = vshrl.u32 %v14348_v2, %v5148_v31  ;;  %vm5168_vm6 = vcmp.lt.s32.totalorder %v5146_v53, 4  ;;  %vm5167_vm13 = vcmp.lt.s32.totalorder %v5146_v53, 3 }
 0x7fc   :  { %v5164_v11 = vor.u32 %v5163_v6, %v5162_v52  ;;  %v5173_v30 = vsel %vm5165_vm14, %v5152_v22, %v5155_v25  ;;  %v5095_v40 = vsub.s32 0, %v12065_v42  ;;  %v5170_v32 = vsel %vm5168_vm6, %v5158_v50, 2102212464 }
 0x7fd   :  { %v5174_v48 = vsel %vm5168_vm6, %v5161_v55, 920167782  ;;  %vm5166_vm9 = vcmp.lt.s32.totalorder %v5146_v53, 2  ;;  %v5177_v41 = vsel %vm5165_vm14, %v5155_v25, %v5158_v50  ;;  %v4795_v46 = vshll.u32 %v4794_v36, 23 }
 0x7fe   :  { %v5175_v4 = vsel %vm5167_vm13, %v5158_v50, %v5174_v48  ;;  %v5178_v59 = vsel %vm5168_vm6, %v5164_v11, 1326507024  ;;  %v7632_v38 = vmin.u32 %v5095_v40, %v12065_v42  ;;  %v5169_v27 = vsel %vm5165_vm14, %v5149_v45, %v5152_v22 }
 0x7ff   :  { %v5176_v7 = vsel %vm5166_vm9, %v5173_v30, %v5175_v4  ;;  %v5171_v8 = vsel %vm5167_vm13, %v5155_v25, %v5170_v32  ;;  %v5179_v31 = vsel %vm5167_vm13, %v5161_v55, %v5178_v59  ;;  %v12076_v52 = vor.u32 %v4791_v1, %v4790_v24  ;;  %v14436_v1 = vld [vmem:[#allocation24_spill] sm:$0xff] }
 0x800   :  { %v12072_v51 = vmul.u32.u64.low %v12037_v23, %v5176_v7  ;;  %v12073_v37 = vmul.u32.u64.high %v12037_v23, %v5176_v7, %v12072_v51  ;;  %v5097_v6 = vclz %v7632_v38  ;;  %v5180_v48 = vsel %vm5166_vm9, %v5177_v41, %v5179_v31 }
 0x801   :  { %8377 = vsinq.f32 %v3765_v34  ;;  %v12081_v22 = vmul.u32.u64.low %v12037_v23, %v5180_v48  ;;  %v12082_v50 = vmul.u32.u64.high %v12037_v23, %v5180_v48, %v12081_v22  ;;  %v3770_v25 = vadd.s32 3, %v3766_v60 }
 0x802   :  { %v8376_v11 = vpop.eup %8375  ;;  %8379 = vcosq.f32 %v12057_v47  ;;  %v7633_v55 = vadd.s32 4294967294, %v5097_v6  ;;  %v5172_v36 = vsel %vm5166_vm9, %v5169_v27, %v5171_v8  ;;  %v14433_v45 = vand.u32 2147483647, %v10925_v33 }
 0x803   :  { %v4179_v30 = vsub.s32 4, %v14436_v1  ;;  %v12092_v34 = vor.u32 4788187, %v4795_v46  ;;  %v5085_v40 = vadd.s32 %v11973_v54, %v11979_v14  ;;  %v5191_v32 = vadd.s32 1, %v12073_v37 }
 0x804   :  { %vm12087_vm15 = vcmp.le.f32.partialorder %v14433_v45, 0.7853982  ;;  %vm7634_vm4 = vcmp.lt.s32.totalorder %v7633_v55, 0  ;;  %v5188_v59 = vmul.u32 %v12037_v23, %v5172_v36  ;;  %vm5190_vm14 = vc.u32 %v12082_v50, %v12072_v51 }
 0x805   :  { %v4181_v60 = vsel %vm12087_vm15, %v10925_v33, %v11540_v62  ;;  %v4180_v4 = vsel %vm4095_vm2, %v4179_v30, %v14436_v1  ;;  %v5100_v41 = vsel %vm7634_vm4, 0, %v7633_v55  ;;  %v3771_v54 = vand.u32 3, %v3770_v25  ;;  %v14437_v62 = vld [vmem:[#allocation23_spill] sm:$0xff] }
 0x806   :  { %8381 = vcosq.f32 %v4181_v60  ;;  %v5101_v14 = vsub.s32 32, %v5100_v41  ;;  %v5105_v46 = vsub.s32 4294967266, %v5100_v41  ;;  %v5192_v38 = vsel %vm5190_vm14, %v5191_v32, %v12073_v37  ;;  %v14439_v32 = vld [vmem:[#allocation15_spill] sm:$0xff] }
 0x807   :  { %v3662_v7 = vsel %vm11157_vm7, 0, %v14437_v62  ;;  %v5102_v8 = vshll.u32 %v12065_v42, %v5100_v41  ;;  %v5193_v31 = vadd.s32 %v5192_v38, %v5188_v59  ;;  %v3777_v6 = vxor.u32 2147483648, %v8376_v11  ;;  %v14441_v38 = vld [vmem:[#allocation30_spill] sm:$0xff] }
 0x808   :  { %v4182_v48 = vsel %vm12087_vm15, 0, %v4180_v4  ;;  %v5103_v23 = vshrl.u32 %v5085_v40, %v5101_v14  ;;  %v5106_v22 = vadd.s32 127, %v5105_v46  ;;  %8383 = vsinq.f32 %v4181_v60  ;;  %v14440_v4 = vld [vmem:[#allocation34_spill] sm:$0xff] }
 0x809   :  { %v4186_v55 = vadd.s32 3, %v4182_v48  ;;  %v4797_v25 = vand.u32 2147483647, %v12092_v34  ;;  %v5194_v36 = vadd.s32 536870912, %v5193_v31  ;;  %vm3769_vm2 = vweird.f32 %v14428_v28  ;;  %v14442_v48 = vld [vmem:[#allocation14_spill] sm:$0xff] }
 0x80a   :  { %vm3776_vm6 = vcmp.eq.s32.totalorder %v3771_v54, 2  ;;  %v3666_v37 = vadd.s32 3, %v3662_v7  ;;  %v5104_v1 = vor.u32 %v5103_v23, %v5102_v8  ;;  %v5107_v30 = vshll.u32 %v5106_v22, 23 }
 0x80b   :  { %v8378_v45 = vpop.eup %8377  ;;  %v4187_v42 = vand.u32 3, %v4186_v55  ;;  %v3670_v41 = vxor.u32 2147483648, %v14439_v32  ;;  %v12120_v24 = vshrl.u32 %v5194_v36, 30  ;;  %vm3665_vm7 = vweird.f32 %v14440_v4 }
 0x80c   :  { %v12118_v59 = vpop.eup %8379  ;;  %v3774_v40 = vxor.u32 2147483648, %v8378_v45  ;;  %v3778_v60 = vsel %vm3776_vm6, %v3777_v6, %v8378_v45  ;;  %v3667_v14 = vand.u32 3, %v3666_v37  ;;  %v5108_v46 = vor.u32 4788187, %v5107_v30 }
 0x80d   :  { %vm3772_vm13 = vcmp.lt.s32.totalorder %v3771_v54, 2  ;;  %vm3773_vm9 = vcmp.eq.s32.totalorder %v3771_v54, 0  ;;  %v3673_v62 = vxor.u32 2147483648, %v14441_v38  ;;  %v5111_v27 = vcvt.s32.f32 %v5104_v1 }
 0x80e   :  { %v5196_v7 = vshll.u32 %v12120_v24, 30  ;;  %v3775_v8 = vsel %vm3773_vm9, %v8376_v11, %v3774_v40  ;;  %v4078_v22 = vsel %vm11229_vm10, 0, %v14442_v48  ;;  %v5109_v36 = vand.u32 2147483647, %v5108_v46  ;;  %v14445_v48 = vld [vmem:[#allocation44_spill] sm:$0xff] }
 0x80f   :  { %v3779_v53 = vsel %vm3772_vm13, %v3775_v8, %v3778_v60  ;;  %vm4185_vm15 = vweird.f32 %v10925_v33  ;;  %vm4188_vm4 = vcmp.lt.s32.totalorder %v4187_v42, 2  ;;  %vm3669_vm14 = vcmp.eq.s32.totalorder %v3667_v14, 0  ;;  %v14444_v60 = vld [vmem:[#allocation40_spill] sm:$0xff] }
 0x810   :  { %v8382_v55 = vpop.eup %8381  ;;  %v12129_v6 = vsub.s32 %v5193_v31, %v5196_v7  ;;  %v3671_v37 = vsel %vm3669_vm14, %v14441_v38, %v3670_v41  ;;  %vm3672_vm6 = vcmp.eq.s32.totalorder %v3667_v14, 2  ;;  %v5112_v45 = vmul.f32 %v5111_v27, %v5109_v36  ;;  %v14447_v36 = vld [vmem:[#allocation27_spill] sm:$0xff] }
 0x811   :  { %v4193_v54 = vxor.u32 2147483648, %v8382_v55  ;;  %vm3668_vm3 = vcmp.lt.s32.totalorder %v3667_v14, 2  ;;  %v3674_v11 = vsel %vm3672_vm6, %v3673_v62, %v14439_v32  ;;  %v4082_v1 = vadd.s32 3, %v4078_v22  ;;  %v14446_v62 = vld [vmem:[#allocation22_spill] sm:$0xff] }
 0x812   :  { %v5199_v30 = vsub.s32 0, %v12129_v6  ;;  %vm4189_vm10 = vcmp.eq.s32.totalorder %v4187_v42, 0  ;;  %v3675_v40 = vsel %vm3668_vm3, %v3671_v37, %v3674_v11  ;;  %v4086_v46 = vxor.u32 2147483648, %v14444_v60  ;;  %v8384_v8 = vpop.eup %8383 }
 0x813   :  { %v3780_v31 = vsel %vm3769_vm2, nan, %v3779_v53  ;;  %vm4192_vm13 = vcmp.eq.s32.totalorder %v4187_v42, 2  ;;  %v4083_v7 = vand.u32 3, %v4082_v1  ;;  %v4089_v41 = vxor.u32 2147483648, %v14445_v48 }
 0x814   :  { %vm14073_vm9 = vcmp.lt.s32.totalorder %v11826_v26, 0  ;;  %v7636_v14 = vmin.u32 %v5199_v30, %v12129_v6  ;;  %v4190_v32 = vxor.u32 2147483648, %v8384_v8  ;;  %v4194_v38 = vsel %vm4192_vm13, %v4193_v54, %v8384_v8 }
 0x815   :  { %v4595_v27 = vsub.s32 4, %v14446_v62  ;;  %v5113_v23 = vxor.u32 2147483648, %v5112_v45  ;;  %v3676_v22 = vsel %vm3665_vm7, nan, %v3675_v40  ;;  %vm4081_vm3 = vweird.f32 %v14447_v36 }
 0x816   :  { %vm4085_vm14 = vcmp.eq.s32.totalorder %v4083_v7, 0  ;;  %v5201_v28 = vclz %v7636_v14  ;;  %v4191_v53 = vsel %vm4189_vm10, %v8382_v55, %v4190_v32  ;;  %vm4088_vm2 = vcmp.eq.s32.totalorder %v4083_v7, 2 }
 0x817   :  { %v4087_v37 = vsel %vm4085_vm14, %v14445_v48, %v4086_v46  ;;  %v4195_v11 = vsel %vm4188_vm4, %v4191_v53, %v4194_v38  ;;  %vm4084_vm6 = vcmp.lt.s32.totalorder %v4083_v7, 2  ;;  %v4090_v54 = vsel %vm4088_vm2, %v4089_v41, %v14444_v60 }
 0x818   :  { %vm14448_vm13 = vcmp.lt.s32.totalorder %v11120_v58, 0  ;;  %v14449_v4 = vand.u32 2147483647, %v11826_v26  ;;  %v7637_v40 = vadd.s32 4294967294, %v5201_v28  ;;  %v4196_v55 = vsel %vm4185_vm15, nan, %v4195_v11 }
 0x819   :  { %v4596_v1 = vsel %vm14448_vm13, %v4595_v27, %v14446_v62  ;;  %v4091_v46 = vsel %vm4084_vm6, %v4087_v37, %v4090_v54  ;;  %v14452_v42 = vand.u32 2147483647, %v11120_v58  ;;  %v8017_v8 = vpack.c.bf16 %v4196_v55, %v3780_v31 }
 0x81a   :  { %vm12153_vm7 = vcmp.le.f32.partialorder %v14449_v4, 0.7853982  ;;  %v4092_v60 = vsel %vm4081_vm3, nan, %v4091_v46  ;;  %v14453_v41 = vcvt.s32.f32 %v12076_v52  ;;  %vm7638_vm10 = vcmp.lt.s32.totalorder %v7637_v40, 0 }
 0x81b   :  { %vm4510_vm4 = vcmp.le.f32.partialorder %v14452_v42, 0.7853982  ;;  %v8019_v33 = vpack.c.bf16 %v4092_v60, %v3676_v22  ;;  %v5189_v32 = vadd.s32 %v12072_v51, %v12082_v50  ;;  %v5204_v31 = vsel %vm7638_vm10, 0, %v7637_v40  ;;  %8018 = vmatprep.subr.bf16.mxu0 %v8017_v8 }
 0x81c   :  { %v4597_v7 = vsel %vm4510_vm4, %v11120_v58, %v11702_v18  ;;  %v4598_v48 = vsel %vm4510_vm4, 0, %v4596_v1  ;;  %v12169_v14 = vmul.f32 %v14453_v41, %v4797_v25  ;;  %v5205_v62 = vsub.s32 32, %v5204_v31  ;;  %v14458_v41 = vld [vmem:[#allocation31_spill] sm:$0xff] }
 0x81d   :  { %8385 = vcosq.f32 %v4597_v7  ;;  %v4602_v38 = vadd.s32 3, %v4598_v48  ;;  %v5209_v27 = vsub.s32 4294967266, %v5204_v31  ;;  %8020 = vmatpush1.bf16.msra.mxu0 %v8019_v33  ;;  %v14454_v18 = vand.u32 2147483647, %v11237_v29  ;;  %v14459_v33 = vld [vmem:[#allocation46_spill] sm:$0xff] }
 0x81e   :  { %8387 = vsinq.f32 %v4597_v7  ;;  %v5011_v52 = vsub.s32 4, %v11452_v5  ;;  %v5114_v25 = vsel %vm14073_vm9, %v5113_v23, %v5112_v45  ;;  %v5206_v51 = vshll.u32 %v12129_v6, %v5204_v31 }
 0x81f   :  { %vm12175_vm15 = vcmp.le.f32.partialorder %v14454_v18, 0.7853982  ;;  %v4494_v22 = vsel %vm11448_vm0, 0, %v11526_v57  ;;  %v5207_v36 = vshrl.u32 %v5189_v32, %v5205_v62  ;;  %v5210_v28 = vadd.s32 127, %v5209_v27  ;;  %v14460_v62 = vld [vmem:[#allocation35_spill] sm:$0xff]  ;;  %v14461_v18 = vld [vmem:[#allocation10_spill] sm:$0xff] }
 0x820   :  { %v5013_v50 = vsel %vm12175_vm15, %v11237_v29, %v11777_v3  ;;  %vm14457_vm3 = vcmp.lt.s32.totalorder %v11237_v29, 0  ;;  %v5115_v6 = vsub.s32 4, %v12047_v56  ;;  %v4603_v45 = vand.u32 3, %v4602_v38 }
 0x821   :  { %v5012_v53 = vsel %vm14457_vm3, %v5011_v52, %v11452_v5  ;;  %8389 = vcosq.f32 %v5013_v50  ;;  %v5208_v3 = vor.u32 %v5207_v36, %v5206_v51  ;;  %v5211_v37 = vshll.u32 %v5210_v28, 23  ;;  %v14462_v28 = vld [vmem:[#allocation21_spill] sm:$0xff] }
 0x822   :  { %8391 = vsinq.f32 %v12057_v47  ;;  %v5014_v23 = vsel %vm12175_vm15, 0, %v5012_v53  ;;  %v4801_v57 = vxor.u32 2147483648, %v12169_v14  ;;  %v12201_v11 = vsel %vm12153_vm7, %v11826_v26, %v5114_v25 }
 0x823   :  { %8393 = vsinq.f32 %v5013_v50  ;;  %v5018_v44 = vadd.s32 3, %v5014_v23  ;;  %v4498_v5 = vadd.s32 3, %v4494_v22  ;;  %v4502_v47 = vxor.u32 2147483648, %v11587_v21 }
 0x824   :  { %v5212_v54 = vor.u32 4788187, %v5211_v37  ;;  %v4505_v4 = vxor.u32 2147483648, %v11576_v19  ;;  %v4910_v40 = vsel %vm11506_vm1, 0, %v11668_v49  ;;  %vm4601_vm0 = vweird.f32 %v11120_v58 }
 0x825   :  { %v5019_v1 = vand.u32 3, %v5018_v44  ;;  %vm4604_vm14 = vcmp.lt.s32.totalorder %v4603_v45, 2  ;;  %v4499_v55 = vand.u32 3, %v4498_v5  ;;  %v4914_v46 = vadd.s32 3, %v4910_v40  ;;  %v14466_v5 = vld [vmem:[#allocation11_spill] sm:$0xff] }
 0x826   :  { %v5213_v8 = vand.u32 2147483647, %v5212_v54  ;;  %v5215_v60 = vcvt.s32.f32 %v5208_v3  ;;  %vm4605_vm2 = vcmp.eq.s32.totalorder %v4603_v45, 0  ;;  %vm4608_vm6 = vcmp.eq.s32.totalorder %v4603_v45, 2 }
 0x827   :  { %v8386_v42 = vpop.eup %8385  ;;  %vm4501_vm13 = vcmp.eq.s32.totalorder %v4499_v55, 0  ;;  %vm4504_vm4 = vcmp.eq.s32.totalorder %v4499_v55, 2  ;;  %v4918_v32 = vxor.u32 2147483648, %v14459_v33  ;;  %vm5020_vm15 = vcmp.lt.s32.totalorder %v5019_v1, 2 }
 0x828   :  { %v8388_v7 = vpop.eup %8387  ;;  %v4609_v48 = vxor.u32 2147483648, %v8386_v42  ;;  %v4503_v49 = vsel %vm4501_vm13, %v11576_v19, %v4502_v47  ;;  %v4506_v31 = vsel %vm4504_vm4, %v4505_v4, %v11587_v21  ;;  %vm5021_vm3 = vcmp.eq.s32.totalorder %v5019_v1, 0 }
 0x829   :  { %v4606_v15 = vxor.u32 2147483648, %v8388_v7  ;;  %v4915_v27 = vand.u32 3, %v4914_v46  ;;  %v4921_v34 = vxor.u32 2147483648, %v14461_v18  ;;  %v5216_v25 = vmul.f32 %v5215_v60, %v5213_v8 }
 0x82a   :  { %v4610_v38 = vsel %vm4608_vm6, %v4609_v48, %v8388_v7  ;;  %vm5024_vm10 = vcmp.eq.s32.totalorder %v5019_v1, 2  ;;  %vm4500_vm11 = vcmp.lt.s32.totalorder %v4499_v55, 2  ;;  %vm4719_vm6 = vcmp.lt.s32.totalorder %v14462_v28, 0 }
 0x82b   :  { %v8390_v52 = vpop.eup %8389  ;;  %v4607_v51 = vsel %vm4605_vm2, %v8386_v42, %v4606_v15  ;;  %v4507_v36 = vsel %vm4500_vm11, %v4503_v49, %v4506_v31  ;;  %vm4917_vm13 = vcmp.eq.s32.totalorder %v4915_v27, 0  ;;  %vm4916_vm4 = vcmp.lt.s32.totalorder %v4915_v27, 2  ;;  %v14475_v31 = vld [vmem:[#allocation45_spill] sm:$0xff] }
 0x82c   :  { %v12217_v50 = vpop.eup %8391  ;;  %v4611_v22 = vsel %vm4604_vm14, %v4607_v51, %v4610_v38  ;;  %v5025_v19 = vxor.u32 2147483648, %v8390_v52  ;;  %v4919_v53 = vsel %vm4917_vm13, %v14461_v18, %v4918_v32  ;;  %vm4920_vm9 = vcmp.eq.s32.totalorder %v4915_v27, 2  ;;  %v14473_v32 = vld [vmem:[#allocation25_spill] sm:$0xff] }
 0x82d   :  { %v8394_v21 = vpop.eup %8393  ;;  %v14463_v23 = vand.u32 2147483647, %v11444_v35  ;;  %vm14075_vm2 = vcmp.lt.s32.totalorder %v11888_v43, 0  ;;  %v4922_v44 = vsel %vm4920_vm9, %v4921_v34, %v14459_v33  ;;  %v3971_v47 = vsub.s32 4, %v14466_v5 }
 0x82e   :  { %v5022_v45 = vxor.u32 2147483648, %v8394_v21  ;;  %v5026_v37 = vsel %vm5024_vm10, %v5025_v19, %v8394_v21  ;;  %v5217_v54 = vxor.u32 2147483648, %v5216_v25  ;;  %v4612_v4 = vsel %vm4601_vm0, nan, %v4611_v22  ;;  %v14479_v22 = vld [vmem:[#allocation48_spill] sm:$0xff] }
 0x82f   :  { %vm12224_vm1 = vcmp.le.f32.partialorder %v14463_v23, 0.7853982  ;;  %v4923_v40 = vsel %vm4916_vm4, %v4919_v53, %v4922_v44  ;;  %vm14467_vm11 = vcmp.lt.s32.totalorder %v11444_v35, 0  ;;  %v14468_v8 = vand.u32 2147483647, %v11535_v12  ;;  %v14480_v53 = vld [vmem:[#allocation13_spill] sm:$0xff] }
 0x830   :  { %v3973_v55 = vsel %vm12224_vm1, %v11444_v35, %v11986_v10  ;;  %v5023_v46 = vsel %vm5021_vm3, %v8390_v52, %v5022_v45  ;;  %v3972_v42 = vsel %vm14467_vm11, %v3971_v47, %v14466_v5  ;;  %vm14471_vm0 = vweird.f32 %v14458_v41  ;;  %v14484_v5 = vld [vmem:[#allocation18_spill] sm:$0xff] }
 0x831   :  { %8395 = vcosq.f32 %v3973_v55  ;;  %vm12243_vm9 = vcmp.le.f32.partialorder %v14468_v8, 0.7853982  ;;  %v5027_v58 = vsel %vm5020_vm15, %v5023_v46, %v5026_v37  ;;  %v4924_v7 = vsel %vm14471_vm0, nan, %v4923_v40 }
 0x832   :  { %v3974_v10 = vsel %vm12224_vm1, 0, %v3972_v42  ;;  %8397 = vsinq.f32 %v3973_v55  ;;  %vm14472_vm14 = vweird.f32 %v11237_v29  ;;  %v4387_v15 = vsub.s32 4, %v14473_v32 }
 0x833   :  { %v5028_v48 = vsel %vm14472_vm14, nan, %v5027_v58  ;;  %v3978_v33 = vadd.s32 3, %v3974_v10  ;;  %v4389_v49 = vsel %vm12243_vm9, %v11535_v12, %v12027_v0  ;;  %vm14474_vm10 = vweird.f32 %v14460_v62 }
 0x834   :  { %v8021_v1 = vpack.c.bf16 %v5028_v48, %v4612_v4  ;;  %v4508_v41 = vsel %vm14474_vm10, nan, %v4507_v36  ;;  %8399 = vcosq.f32 %v4389_v49  ;;  %v3870_v27 = vsel %vm11684_vm12, 0, %v14475_v31 }
 0x835   :  { %v8023_v18 = vpack.c.bf16 %v4924_v7, %v4508_v41  ;;  %v12264_v29 = vand.u32 3, %v3978_v33  ;;  %vm14477_vm1 = vcmp.lt.s32.totalorder %v11535_v12, 0  ;;  %8401 = vsinq.f32 %v4389_v49 }
 0x836   :  { %v4388_v34 = vsel %vm14477_vm1, %v4387_v15, %v14473_v32  ;;  %vm14478_vm15 = vcmp.lt.s32.totalorder %v11826_v26, 0  ;;  %8403 = vcosq.f32 %v12201_v11  ;;  %8022 = vmatprep.subr.bf16.mxu0 %v8021_v1  ;;  %v3874_v52 = vadd.s32 3, %v3870_v27  ;;  %v12341_v1 = vld [vmem:[%s13912_s5 + $0x50] sm:$0xff] }
 0x837   :  { %v12274_v0 = vsel %vm14478_vm15, %v5115_v6, %v12047_v56  ;;  %v4390_v62 = vsel %vm12243_vm9, 0, %v4388_v34  ;;  %v4802_v51 = vsel %vm4719_vm6, %v4801_v57, %v12169_v14  ;;  %8405 = vsinq.f32 %v12201_v11  ;;  %8024 = vmatpush1.bf16.msra.mxu0 %v8023_v18  ;;  %v12288_v56 = vld [vmem:[%s13912_s5 + $0x40] sm:$0xff] }
 0x838   :  { %v4394_v6 = vadd.s32 3, %v4390_v62  ;;  %v3878_v19 = vxor.u32 2147483648, %v14479_v22  ;;  %v12293_v36 = vsel %vm14075_vm2, %v5217_v54, %v5216_v25  ;;  %v3875_v21 = vand.u32 3, %v3874_v52 }
 0x839   :  { %v3881_v23 = vxor.u32 2147483648, %v14480_v53  ;;  %v4286_v14 = vsel %vm11874_vm5, 0, %v11993_v61  ;;  %vm3980_vm12 = vcmp.lt.s32.totalorder %v12264_v29, 2  ;;  %vm3981_vm3 = vcmp.eq.s32.totalorder %v12264_v29, 0  ;;  %v14483_v61 = vld [vmem:[#allocation12_spill] sm:$0xff] }
 0x83a   :  { %v4395_v57 = vand.u32 3, %v4394_v6  ;;  %v4290_v11 = vadd.s32 3, %v4286_v14  ;;  %vm14481_vm13 = vcmask 261120   ;;  %vm3984_vm4 = vcmp.eq.s32.totalorder %v12264_v29, 2  ;;  %v12361_v29 = vld [vmem:[%s13912_s5 + $0x58] sm:$0xff] }
 0x83b   :  { %7643 = vmatmul.mubr.msk.f32.vlgmr.msra.gmra.mrb[32].mxu0 %vm14481_vm13, %v12288_v56  ;;  %vm3877_vm11 = vcmp.eq.s32.totalorder %v3875_v21, 0  ;;  %v4294_v25 = vxor.u32 2147483648, %v12051_v63  ;;  %v4803_v3 = vsub.s32 4, %v11945_v17  ;;  %v8396_v45 = vpop.eup %8395  ;;  %v14482_v37 = vmov 0.0  }
 0x83c   :  { %5324 = vmatprep.mubr.f32.mxu0 %v14482_v37  ;;  %vm3977_vm5 = vweird.f32 %v11444_v35  ;;  %vm4393_vm9 = vweird.f32 %v11535_v12  ;;  %vm3873_vm0 = vweird.f32 %v14483_v61  ;;  %v3879_v44 = vsel %vm3877_vm11, %v14480_v53, %v3878_v19  ;;  %v8398_v40 = vpop.eup %8397 }
 0x83d   :  { %vm3880_vm14 = vcmp.eq.s32.totalorder %v3875_v21, 2  ;;  %v4297_v47 = vxor.u32 2147483648, %v14484_v5  ;;  %v14485_v54 = vand.u32 2147483647, %v14462_v28  ;;  %v3985_v55 = vxor.u32 2147483648, %v8396_v45 }
 0x83e   :  { %vm3876_vm1 = vcmp.lt.s32.totalorder %v3875_v21, 2  ;;  %v3882_v46 = vsel %vm3880_vm14, %v3881_v23, %v14479_v22  ;;  %v4291_v42 = vand.u32 3, %v4290_v11  ;;  %v3982_v8 = vxor.u32 2147483648, %v8398_v40  ;;  %v8400_v58 = vpop.eup %8399  ;;  %v14494_v11 = vld [vmem:[#allocation50_spill] sm:$0xff] }
 0x83f   :  { %vm12319_vm10 = vcmp.le.f32.partialorder %v14485_v54, 0.7853982  ;;  %vm4397_vm15 = vcmp.eq.s32.totalorder %v4395_v57, 0  ;;  %vm4400_vm13 = vcmp.eq.s32.totalorder %v4395_v57, 2  ;;  %vm14488_vm11 = vcmask 261120   ;;  %v8402_v33 = vpop.eup %8401 }
 0x840   :  { %v4805_v60 = vsel %vm12319_vm10, %v14462_v28, %v4802_v51  ;;  %7644 = vmatmul.mubr.msk.f32.gmra.mrb[34].mxu0 %vm14488_vm11, %v12310_v16  ;;  %v3986_v7 = vsel %vm3984_vm4, %v3985_v55, %v8398_v40  ;;  %v3883_v10 = vsel %vm3876_vm1, %v3879_v44, %v3882_v46  ;;  %vm4293_vm2 = vcmp.eq.s32.totalorder %v4291_v42, 0  ;;  %v12343_v41 = vpop.eup %8403 }
 0x841   :  { %v4804_v48 = vsel %vm4719_vm6, %v4803_v3, %v11945_v17  ;;  %v3983_v32 = vsel %vm3981_vm3, %v8396_v45, %v3982_v8  ;;  %v4401_v15 = vxor.u32 2147483648, %v8400_v58  ;;  %v4295_v49 = vsel %vm4293_vm2, %v14484_v5, %v4294_v25  ;;  %5330 = vmatprep.mubr.f32.mxu0 %v14482_v37  ;;  %v12346_v38 = vpop.eup %8405  ;;  %vm14489_vm3 = vmmov %vm14488_vm11 }
 0x842   :  { %vm4296_vm14 = vcmp.eq.s32.totalorder %v4291_v42, 2  ;;  %v4398_v31 = vxor.u32 2147483648, %v8402_v33  ;;  %vm4292_vm4 = vcmp.lt.s32.totalorder %v4291_v42, 2  ;;  %8407 = vcosq.f32 %v4805_v60 }
 0x843   :  { %v4298_v17 = vsel %vm4296_vm14, %v4297_v47, %v12051_v63  ;;  %v3987_v27 = vsel %vm3980_vm12, %v3983_v32, %v3986_v7  ;;  %v4402_v18 = vsel %vm4400_vm13, %v4401_v15, %v8402_v33  ;;  %8409 = vsinq.f32 %v4805_v60 }
 0x844   :  { %v4299_v34 = vsel %vm4292_vm4, %v4295_v49, %v4298_v17  ;;  %vm4396_vm6 = vcmp.lt.s32.totalorder %v4395_v57, 2  ;;  %v4399_v62 = vsel %vm4397_vm15, %v8400_v58, %v4398_v31  ;;  %vm4289_vm2 = vweird.f32 %v11499_v13  ;;  %7645 = vmatmul.mubr.msk.f32.gmra.mrb[36].mxu0 %vm14489_vm3, %v12341_v1 }
 0x845   :  { %v4806_v63 = vsel %vm12319_vm10, 0, %v4804_v48  ;;  %v4403_v52 = vsel %vm4396_vm6, %v4399_v62, %v4402_v18  ;;  %v4300_v51 = vsel %vm4289_vm2, nan, %v4299_v34  ;;  %5336 = vmatprep.mubr.f32.mxu0 %v14482_v37  ;;  %v14490_v6 = vand.u32 2147483647, %v11888_v43  ;;  %v14496_v62 = vld [vmem:[#allocation43_spill] sm:$0xff] }
 0x846   :  { %v5219_v13 = vsub.s32 4, %v12120_v24  ;;  %v3988_v19 = vsel %vm3977_vm5, nan, %v3987_v27  ;;  %v4404_v21 = vsel %vm4393_vm9, nan, %v4403_v52  ;;  %v3884_v53 = vsel %vm3873_vm0, nan, %v3883_v10  ;;  %vm14495_vm5 = vmmov %vm14489_vm3 }
 0x847   :  { %vm12365_vm12 = vcmp.le.f32.partialorder %v14490_v6, 0.7853982  ;;  %v8025_v14 = vpack.c.bf16 %v4404_v21, %v3988_v19  ;;  %vm14493_vm10 = vcmp.lt.s32.totalorder %v11888_v43, 0  ;;  %v4702_v35 = vsel %vm12002_vm8, 0, %v14494_v11 }
 0x848   :  { %v5221_v23 = vsel %vm12365_vm12, %v11888_v43, %v12293_v36  ;;  %v5220_v57 = vsel %vm14493_vm10, %v5219_v13, %v12120_v24  ;;  %v8027_v12 = vpack.c.bf16 %v4300_v51, %v3884_v53  ;;  %7646 = vmatmul.mubr.msk.f32.gmra.mrb[38].mxu0 %vm14495_vm5, %v12361_v29  ;;  %v4810_v25 = vadd.s32 3, %v4806_v63 }
 0x849   :  { %8411 = vcosq.f32 %v5221_v23  ;;  %v5222_v3 = vsel %vm12365_vm12, 0, %v5220_v57  ;;  %8026 = vmatprep.subr.bf16.mxu1 %v8025_v14  ;;  %v4706_v45 = vadd.s32 3, %v4702_v35  ;;  %7339 = vmatprep.mubr.f32.mxu0 %v14482_v37  ;;  %v5118_v39 = vsel %vm12153_vm7, 0, %v12274_v0 }
 0x84a   :  { %8413 = vsinq.f32 %v5221_v23  ;;  %v5226_v36 = vadd.s32 3, %v5222_v3  ;;  %8028 = vmatpush1.bf16.msra.mxu1 %v8027_v12  ;;  %v5122_v24 = vadd.s32 3, %v5118_v39  ;;  %v4811_v44 = vand.u32 3, %v4810_v25 }
 0x84b   :  { %v4707_v4 = vand.u32 3, %v4706_v45  ;;  %v5126_v55 = vxor.u32 2147483648, %v12346_v38  ;;  %v4710_v46 = vxor.u32 2147483648, %v12217_v50  ;;  %v4713_v42 = vxor.u32 2147483648, %v12118_v59 }
 0x84c   :  { %v8408_v61 = vpop.eup %8407  ;;  %v5227_v5 = vand.u32 3, %v5226_v36  ;;  %v5123_v8 = vand.u32 3, %v5122_v24  ;;  %v5129_v60 = vxor.u32 2147483648, %v12343_v41  ;;  %vm4813_vm8 = vcmp.eq.s32.totalorder %v4811_v44, 0 }
 0x84d   :  { %v8410_v47 = vpop.eup %8409  ;;  %v4817_v54 = vxor.u32 2147483648, %v8408_v61  ;;  %vm4816_vm9 = vcmp.eq.s32.totalorder %v4811_v44, 2  ;;  %vm4709_vm0 = vcmp.eq.s32.totalorder %v4707_v4, 0  ;;  %vm4712_vm1 = vcmp.eq.s32.totalorder %v4707_v4, 2 }
 0x84e   :  { %v4814_v40 = vxor.u32 2147483648, %v8410_v47  ;;  %vm5232_vm7 = vcmp.eq.s32.totalorder %v5227_v5, 2  ;;  %vm5125_vm15 = vcmp.eq.s32.totalorder %v5123_v8, 0  ;;  %vm5128_vm13 = vcmp.eq.s32.totalorder %v5123_v8, 2 }
 0x84f   :  { %v4818_v0 = vsel %vm4816_vm9, %v4817_v54, %v8410_v47  ;;  %v5127_v10 = vsel %vm5125_vm15, %v12343_v41, %v5126_v55  ;;  %v4711_v33 = vsel %vm4709_vm0, %v12118_v59, %v4710_v46  ;;  %v4714_v32 = vsel %vm4712_vm1, %v4713_v42, %v12217_v50 }
 0x850   :  { %v4815_v58 = vsel %vm4813_vm8, %v8408_v61, %v4814_v40  ;;  %vm5124_vm11 = vcmp.lt.s32.totalorder %v5123_v8, 2  ;;  %v5130_v15 = vsel %vm5128_vm13, %v5129_v60, %v12346_v38  ;;  %vm4812_vm14 = vcmp.lt.s32.totalorder %v4811_v44, 2 }
 0x851   :  { %v5131_v17 = vsel %vm5124_vm11, %v5127_v10, %v5130_v15  ;;  %v4819_v27 = vsel %vm4812_vm14, %v4815_v58, %v4818_v0  ;;  %vm5229_vm4 = vcmp.eq.s32.totalorder %v5227_v5, 0  ;;  %vm4708_vm6 = vcmp.lt.s32.totalorder %v4707_v4, 2 }
 0x852   :  { %vm5228_vm2 = vcmp.lt.s32.totalorder %v5227_v5, 2  ;;  %v4715_v41 = vsel %vm4708_vm6, %v4711_v33, %v4714_v32  ;;  %vm5121_vm3 = vweird.f32 %v11826_v26  ;;  %vm4809_vm12 = vweird.f32 %v14462_v28  ;;  %v5468_v26 = vpop.permute.xlu1 %5467 }
 0x853   :  { %v8412_v30 = vpop.eup %8411  ;;  %vm5225_vm10 = vweird.f32 %v11888_v43  ;;  %v5132_v50 = vsel %vm5121_vm3, nan, %v5131_v17  ;;  %v4820_v38 = vsel %vm4809_vm12, nan, %v4819_v27  ;;  %vm4705_vm5 = vweird.f32 %v14496_v62 }
 0x854   :  { %v5233_v7 = vxor.u32 2147483648, %v8412_v30  ;;  %v8414_v48 = vpop.eup %8413  ;;  %v4716_v52 = vsel %vm4705_vm5, nan, %v4715_v41  ;;  %vm14497_vm8 = vcmask 261120  }
 0x855   :  { %v5230_v49 = vxor.u32 2147483648, %v8414_v48  ;;  %v8031_v51 = vpack.c.bf16 %v5132_v50, %v4716_v52  ;;  %vm14498_vm9 = vmmov %vm14497_vm8  ;;  %v14504_v50 = vmov 2475754826  }
 0x856   :  { %v5234_v31 = vsel %vm5232_vm7, %v5233_v7, %v8414_v48  ;;  %vm14499_vm7 = vmmov %vm14497_vm8  ;;  %v12419_v43 = vpop.permute.xlu1 %5486 }
 0x857   :  { %v5231_v18 = vsel %vm5229_vm4, %v8412_v30, %v5230_v49  ;;  %vm14500_vm0 = vmmov %vm14499_vm7 }
 0x858   :  { %v5235_v59 = vsel %vm5228_vm2, %v5231_v18, %v5234_v31 }
 0x859   :  { %v5236_v34 = vsel %vm5225_vm10, nan, %v5235_v59 }
 0x85a   :  { %v8029_v63 = vpack.c.bf16 %v5236_v34, %v4820_v38  ;;  %v12421_v28 = vpop.permute.xlu1 %5482  ;;  %v14505_v34 = vmov 2131351028  }
 0x85c   :  { %8030 = vmatprep.subr.bf16.mxu1 %v8029_v63  ;;  %v14506_v63 = vmov 2102212464  }
 0x85d   :  { %8032 = vmatpush1.bf16.msra.mxu1 %v8031_v51 }
 0x860   :  { %7647 = vmatmul.mubr.msk.f32.vlgmr.msra.gmra.mrb[32].mxu1 %vm14497_vm8, %v12288_v56  ;;  %v12423_v56 = vpop.permute.xlu1 %5494 }
 0x861   :  { %5413 = vmatprep.mubr.f32.mxu1 %v14482_v37 }
 0x864   :  { %7648 = vmatmul.mubr.msk.f32.gmra.mrb[34].mxu1 %vm14498_vm9, %v12310_v16  ;;  %v5541_v16 = vpop.permute.xlu1 %5540 }
 0x865   :  { %5419 = vmatprep.mubr.f32.mxu1 %v14482_v37 }
 0x868   :  { %7649 = vmatmul.mubr.msk.f32.gmra.mrb[36].mxu1 %vm14499_vm7, %v12341_v1  ;;  %v12425_v6 = vpop.permute.xlu1 %5558 }
 0x869   :  { %5425 = vmatprep.mubr.f32.mxu1 %v14482_v37 }
 0x86c   :  { %7650 = vmatmul.mubr.msk.f32.gmra.mrb[38].mxu1 %vm14500_vm0, %v12361_v29  ;;  %v5536_v19 = vpop.permute.xlu1 %5535  ;;  %v5473_v29 = vpop.permute.xlu0 %5472 }
 0x86d   :  { %7410 = vmatprep.mubr.f32.mxu1 %v14482_v37 }
 0x90e   :  { %v5320_v22 = vpop.f32.mrb[32].mxu0 }
 0x90f   :  { %v5517_v13 = vmul.f32 %v5468_v26, %v5320_v22  ;;  %v5322_v1 = vpop.f32.mrb[33].mxu0 }
 0x910   :  { %v5518_v21 = vmul.f32 %v5468_v26, %v5322_v1 }
 0x911   :  { %v12427_v53 = vadd.f32 %v5536_v19, %v5517_v13 }
 0x912   :  { %v12429_v23 = vadd.f32 %v5536_v19, %v5518_v21 }
 0x913   :  { %14501 = vst [vmem:[#allocation49_spill] sm:$0xff] %v12427_v53  ;;  %v5326_v37 = vpop.f32.mrb[34].mxu0  ;;  %v14079_v14 = vand.u32 2147483647, %v12427_v53  ;;  %v5604_v57 = vand.u32 2139095040, %v12427_v53 }
 0x914   :  { %14502 = vst [vmem:[#allocation16_spill] sm:$0xff] %v12429_v23  ;;  %v5521_v11 = vmul.f32 %v5473_v29, %v5326_v37  ;;  %v5328_v35 = vpop.f32.mrb[35].mxu0  ;;  %v14077_v12 = vand.u32 2147483647, %v12429_v23  ;;  %v5708_v25 = vand.u32 2139095040, %v12429_v23 }
 0x915   :  { %v5605_v3 = vshrl.u32 %v5604_v57, 23  ;;  %v5608_v36 = vand.u32 8388607, %v14079_v14  ;;  %v5522_v55 = vmul.f32 %v5473_v29, %v5328_v35 }
 0x916   :  { %v12437_v45 = vadd.f32 %v5541_v16, %v5521_v11  ;;  %v5709_v39 = vshrl.u32 %v5708_v25, 23  ;;  %v5712_v24 = vand.u32 8388607, %v14077_v12 }
 0x917   :  { %v12441_v61 = vpop.f32.mrb[36].mxu0  ;;  %v7655_v44 = vadd.s32 4294967169, %v5605_v3  ;;  %v5609_v4 = vor.u32 8388608, %v5608_v36  ;;  %v12451_v32 = vadd.f32 %v5541_v16, %v5522_v55 }
 0x918   :  { %14503 = vst [vmem:[#allocation47_spill] sm:$0xff] %v12437_v45  ;;  %v12443_v5 = vpop.f32.mrb[37].mxu0  ;;  %v7659_v47 = vadd.s32 4294967169, %v5709_v39  ;;  %v6020_v54 = vand.u32 2139095040, %v12437_v45  ;;  %v5713_v46 = vor.u32 8388608, %v5712_v24 }
 0x919   :  { %v5611_v40 = vadd.s32 1, %v7655_v44  ;;  %v14078_v8 = vand.u32 2147483647, %v12437_v45  ;;  %v12453_v15 = vshll.u32 %v5609_v4, 8 }
 0x91a   :  { %v5715_v42 = vadd.s32 1, %v7659_v47  ;;  %v6021_v60 = vshrl.u32 %v6020_v54, 23  ;;  %v12457_v31 = vshll.u32 %v5713_v46, 8 }
 0x91b   :  { %v12447_v30 = vpop.f32.mrb[38].mxu0  ;;  %vm5612_vm1 = vcmp.gt.s32.totalorder %v5611_v40, 0  ;;  %v12461_v17 = vand.u32 8388607, %v14078_v8 }
 0x91c   :  { %v12449_v0 = vpop.f32.mrb[39].mxu0  ;;  %v5613_v58 = vsel %vm5612_vm1, %v5611_v40, 0  ;;  %vm5716_vm15 = vcmp.gt.s32.totalorder %v5715_v42, 0  ;;  %v7671_v7 = vadd.s32 4294967169, %v6021_v60 }
 0x91d   :  { %v5614_v10 = vshrl.u32 %v5613_v58, 5  ;;  %v5615_v48 = vand.u32 31, %v5613_v58  ;;  %v5717_v33 = vsel %vm5716_vm15, %v5715_v42, 0 }
 0x91e   :  { %v12455_v49 = vshrl.u32 %v5717_v33, 5  ;;  %v5719_v41 = vand.u32 31, %v5717_v33  ;;  %v12464_v59 = vadd.s32 1, %v7671_v7 }
 0x91f   :  { %v5616_v27 = vsub.s32 32, %v5615_v48  ;;  %v5618_v18 = vshll.u32 %v14348_v2, %v5615_v48  ;;  %v5621_v38 = vshll.u32 %v14504_v50, %v5615_v48  ;;  %v5624_v62 = vshll.u32 %v14505_v34, %v5615_v48 }
 0x920   :  { %v5627_v52 = vshll.u32 %v14506_v63, %v5615_v48  ;;  %v5630_v51 = vshll.u32 %v14352_v9, %v5615_v48  ;;  %vm5633_vm13 = vcmp.lt.s32.totalorder %v5614_v10, 1  ;;  %vm5634_vm11 = vcmp.lt.s32.totalorder %v5614_v10, 2 }
 0x921   :  { %v5619_v26 = vshrl.u32 %v14504_v50, %v5616_v27  ;;  %v5622_v16 = vshrl.u32 %v14505_v34, %v5616_v27  ;;  %v5625_v22 = vshrl.u32 %v14506_v63, %v5616_v27  ;;  %v5617_v13 = vshrl.u32 %v14348_v2, %v5616_v27 }
 0x922   :  { %v5628_v1 = vshrl.u32 %v14352_v9, %v5616_v27  ;;  %v5631_v19 = vshrl.u32 %v14353_v20, %v5616_v27  ;;  %v5720_v57 = vsub.s32 32, %v5719_v41  ;;  %vm5635_vm14 = vcmp.lt.s32.totalorder %v5614_v10, 3 }
 0x923   :  { %v5620_v21 = vor.u32 %v5619_v26, %v5618_v18  ;;  %v5623_v29 = vor.u32 %v5622_v16, %v5621_v38  ;;  %v5626_v37 = vor.u32 %v5625_v22, %v5624_v62  ;;  %vm5636_vm4 = vcmp.lt.s32.totalorder %v5614_v10, 4 }
 0x924   :  { %v5629_v11 = vor.u32 %v5628_v1, %v5627_v52  ;;  %v5632_v35 = vor.u32 %v5631_v19, %v5630_v51  ;;  %v5722_v54 = vshll.u32 %v14348_v2, %v5719_v41  ;;  %v5723_v55 = vshrl.u32 %v14504_v50, %v5720_v57 }
 0x925   :  { %v5637_v25 = vsel %vm5633_vm13, %v5617_v13, %v5620_v21  ;;  %v5638_v3 = vsel %vm5636_vm4, %v5626_v37, 2102212464  ;;  %v5641_v36 = vsel %vm5633_vm13, %v5620_v21, %v5623_v29  ;;  %v5645_v39 = vsel %vm5633_vm13, %v5623_v29, %v5626_v37 }
 0x926   :  { %v5639_v24 = vsel %vm5635_vm14, %v5623_v29, %v5638_v3  ;;  %v5642_v44 = vsel %vm5636_vm4, %v5629_v11, 920167782  ;;  %v5646_v47 = vsel %vm5636_vm4, %v5632_v35, 1326507024  ;;  %v5725_v46 = vshll.u32 %v14504_v50, %v5719_v41 }
 0x927   :  { %v5643_v4 = vsel %vm5635_vm14, %v5626_v37, %v5642_v44  ;;  %v5647_v40 = vsel %vm5635_vm14, %v5629_v11, %v5646_v47  ;;  %v5640_v42 = vsel %vm5634_vm11, %v5637_v25, %v5639_v24  ;;  %v5726_v7 = vshrl.u32 %v14505_v34, %v5720_v57 }
 0x928   :  { %v5644_v60 = vsel %vm5634_vm11, %v5641_v36, %v5643_v4  ;;  %v5648_v58 = vsel %vm5634_vm11, %v5645_v39, %v5647_v40  ;;  %v5724_v38 = vor.u32 %v5723_v55, %v5722_v54  ;;  %v5728_v52 = vshll.u32 %v14505_v34, %v5719_v41 }
 0x929   :  { %v12487_v48 = vmul.u32.u64.low %v12453_v15, %v5648_v58  ;;  %v12488_v33 = vmul.u32.u64.high %v12453_v15, %v5648_v58, %v12487_v48  ;;  %v12491_v27 = vmul.u32.u64.low %v12453_v15, %v5644_v60  ;;  %v12492_v18 = vmul.u32.u64.high %v12453_v15, %v5644_v60, %v12491_v27 }
 0x92a   :  { %v5727_v62 = vor.u32 %v5726_v7, %v5725_v46  ;;  %v5729_v51 = vshrl.u32 %v14506_v63, %v5720_v57  ;;  %v5721_v10 = vshrl.u32 %v14348_v2, %v5720_v57  ;;  %v5731_v26 = vshll.u32 %v14506_v63, %v5719_v41 }
 0x92b   :  { %v5732_v16 = vshrl.u32 %v14352_v9, %v5720_v57  ;;  %v5735_v22 = vshrl.u32 %v14353_v20, %v5720_v57  ;;  %v5656_v13 = vmul.u32 %v12453_v15, %v5640_v42  ;;  %v5734_v19 = vshll.u32 %v14352_v9, %v5719_v41 }
 0x92c   :  { %v5730_v1 = vor.u32 %v5729_v51, %v5728_v52  ;;  %vm5737_vm6 = vcmp.lt.s32.totalorder %v12455_v49, 1  ;;  %vm5658_vm2 = vc.u32 %v12488_v33, %v12491_v27  ;;  %v5659_v21 = vadd.s32 1, %v12492_v18 }
 0x92d   :  { %v5733_v29 = vor.u32 %v5732_v16, %v5731_v26  ;;  %vm5738_vm3 = vcmp.lt.s32.totalorder %v12455_v49, 2  ;;  %v5736_v37 = vor.u32 %v5735_v22, %v5734_v19  ;;  %vm5739_vm12 = vcmp.lt.s32.totalorder %v12455_v49, 3 }
 0x92e   :  { %vm5740_vm10 = vcmp.lt.s32.totalorder %v12455_v49, 4  ;;  %v5745_v57 = vsel %vm5737_vm6, %v5724_v38, %v5727_v62  ;;  %v5660_v15 = vsel %vm5658_vm2, %v5659_v21, %v12492_v18  ;;  %v5749_v35 = vsel %vm5737_vm6, %v5727_v62, %v5730_v1 }
 0x92f   :  { %v5742_v11 = vsel %vm5740_vm10, %v5730_v1, 2102212464  ;;  %v5746_v41 = vsel %vm5740_vm10, %v5733_v29, 920167782  ;;  %v5661_v25 = vadd.s32 %v5660_v15, %v5656_v13  ;;  %v5741_v3 = vsel %vm5737_vm6, %v5721_v10, %v5724_v38 }
 0x930   :  { %v5747_v36 = vsel %vm5739_vm12, %v5730_v1, %v5746_v41  ;;  %v5750_v39 = vsel %vm5740_vm10, %v5736_v37, 1326507024  ;;  %v5743_v24 = vsel %vm5739_vm12, %v5727_v62, %v5742_v11  ;;  %vm6028_vm5 = vcmp.gt.s32.totalorder %v12464_v59, 0 }
 0x931   :  { %v5748_v44 = vsel %vm5738_vm3, %v5745_v57, %v5747_v36  ;;  %v5751_v47 = vsel %vm5739_vm12, %v5733_v29, %v5750_v39  ;;  %v5662_v4 = vadd.s32 536870912, %v5661_v25  ;;  %v6029_v7 = vsel %vm6028_vm5, %v12464_v59, 0 }
 0x932   :  { %v5752_v40 = vsel %vm5738_vm3, %v5749_v35, %v5751_v47  ;;  %v12519_v55 = vmul.u32.u64.low %v12457_v31, %v5748_v44  ;;  %v12520_v46 = vmul.u32.u64.high %v12457_v31, %v5748_v44, %v12519_v55  ;;  %v6124_v48 = vand.u32 2139095040, %v12451_v32 }
 0x933   :  { %v12514_v54 = vpop.f32.mrb[32].mxu1  ;;  %v12526_v60 = vmul.u32.u64.low %v12457_v31, %v5752_v40  ;;  %v12527_v58 = vmul.u32.u64.high %v12457_v31, %v5752_v40, %v12526_v60  ;;  %v12531_v18 = vshrl.u32 %v5662_v4, 30  ;;  %v5744_v38 = vsel %vm5738_vm3, %v5741_v3, %v5743_v24 }
 0x934   :  { %v12523_v42 = vpop.f32.mrb[33].mxu1  ;;  %v6031_v62 = vand.u32 31, %v6029_v7  ;;  %v5763_v51 = vadd.s32 1, %v12520_v46  ;;  %v6025_v10 = vor.u32 8388608, %v12461_v17  ;;  %v5760_v16 = vmul.u32 %v12457_v31, %v5744_v38 }
 0x935   :  { %v5664_v52 = vshll.u32 %v12531_v18, 30  ;;  %vm5762_vm8 = vc.u32 %v12527_v58, %v12519_v55  ;;  %v6030_v59 = vshrl.u32 %v6029_v7, 5  ;;  %v6125_v22 = vshrl.u32 %v6124_v48, 23 }
 0x936   :  { %v6032_v26 = vsub.s32 32, %v6031_v62  ;;  %v5764_v49 = vsel %vm5762_vm8, %v5763_v51, %v12520_v46  ;;  %v6034_v1 = vshll.u32 %v14348_v2, %v6031_v62  ;;  %v6037_v19 = vshll.u32 %v14504_v50, %v6031_v62 }
 0x937   :  { %v12541_v13 = vsub.s32 %v5661_v25, %v5664_v52  ;;  %v5765_v21 = vadd.s32 %v5764_v49, %v5760_v16  ;;  %v6040_v31 = vshll.u32 %v14505_v34, %v6031_v62  ;;  %v6043_v15 = vshll.u32 %v14506_v63, %v6031_v62 }
 0x938   :  { %v6035_v29 = vshrl.u32 %v14504_v50, %v6032_v26  ;;  %v6038_v17 = vshrl.u32 %v14505_v34, %v6032_v26  ;;  %v6041_v57 = vshrl.u32 %v14506_v63, %v6032_v26  ;;  %v6044_v11 = vshrl.u32 %v14352_v9, %v6032_v26 }
 0x939   :  { %v5667_v37 = vsub.s32 0, %v12541_v13  ;;  %v5766_v41 = vadd.s32 536870912, %v5765_v21  ;;  %v6046_v3 = vshll.u32 %v14352_v9, %v6031_v62  ;;  %v6047_v44 = vshrl.u32 %v14353_v20, %v6032_v26 }
 0x93a   :  { %v6036_v35 = vor.u32 %v6035_v29, %v6034_v1  ;;  %v6039_v25 = vor.u32 %v6038_v17, %v6037_v19  ;;  %v6042_v39 = vor.u32 %v6041_v57, %v6040_v31  ;;  %v6045_v24 = vor.u32 %v6044_v11, %v6043_v15 }
 0x93b   :  { %v7656_v36 = vmin.u32 %v5667_v37, %v12541_v13  ;;  %v12556_v47 = vshrl.u32 %v5766_v41, 30  ;;  %vm6049_vm9 = vcmp.lt.s32.totalorder %v6030_v59, 1  ;;  %v6065_v4 = vshll.u32 %v6025_v10, 8 }
 0x93c   :  { %v7675_v40 = vadd.s32 4294967169, %v6125_v22  ;;  %v6048_v60 = vor.u32 %v6047_v44, %v6046_v3  ;;  %vm6050_vm7 = vcmp.lt.s32.totalorder %v6030_v59, 2  ;;  %vm6052_vm0 = vcmp.lt.s32.totalorder %v6030_v59, 4 }
 0x93d   :  { %14507 = vst [vmem:[#allocation3_spill] sm:$0xff] %v12556_v47  ;;  %v5669_v46 = vclz %v7656_v36  ;;  %v5768_v7 = vshll.u32 %v12556_v47, 30  ;;  %vm6051_vm1 = vcmp.lt.s32.totalorder %v6030_v59, 3  ;;  %v6057_v48 = vsel %vm6049_vm9, %v6036_v35, %v6039_v25 }
 0x93e   :  { %v6058_v38 = vsel %vm6052_vm0, %v6045_v24, 920167782  ;;  %v6054_v52 = vsel %vm6052_vm0, %v6042_v39, 2102212464  ;;  %v6061_v16 = vsel %vm6049_vm9, %v6039_v25, %v6042_v39  ;;  %v6033_v10 = vshrl.u32 %v14348_v2, %v6032_v26 }
 0x93f   :  { %v7657_v62 = vadd.s32 4294967294, %v5669_v46  ;;  %v6059_v51 = vsel %vm6051_vm1, %v6042_v39, %v6058_v38  ;;  %v12562_v49 = vsub.s32 %v5765_v21, %v5768_v7  ;;  %v6062_v1 = vsel %vm6052_vm0, %v6048_v60, 1326507024  ;;  %v12582_v60 = vpop.permute.xlu1 %5550 }
 0x940   :  { %v6060_v22 = vsel %vm6050_vm7, %v6057_v48, %v6059_v51  ;;  %v6063_v19 = vsel %vm6051_vm1, %v6045_v24, %v6062_v1  ;;  %v6053_v37 = vsel %vm6049_vm9, %v6033_v10, %v6036_v35  ;;  %v6055_v57 = vsel %vm6051_vm1, %v6039_v25, %v6054_v52  ;;  %v5478_v52 = vpop.permute.xlu0 %5477 }
 0x941   :  { %vm7658_vm15 = vcmp.lt.s32.totalorder %v7657_v62, 0  ;;  %v12567_v29 = vmul.u32.u64.low %v6065_v4, %v6060_v22  ;;  %v12568_v17 = vmul.u32.u64.high %v6065_v4, %v6060_v22, %v12567_v29  ;;  %v6064_v21 = vsel %vm6050_vm7, %v6061_v16, %v6063_v19 }
 0x942   :  { %v5672_v31 = vsel %vm7658_vm15, 0, %v7657_v62  ;;  %v5771_v15 = vsub.s32 0, %v12562_v49  ;;  %v6131_v26 = vadd.s32 1, %v7675_v40  ;;  %v14076_v3 = vand.u32 2147483647, %v12451_v32  ;;  %v12586_v40 = vpop.f32.mrb[34].mxu1 }
 0x943   :  { %v12575_v11 = vmul.u32.u64.low %v6065_v4, %v6064_v21  ;;  %v12576_v41 = vmul.u32.u64.high %v6065_v4, %v6064_v21, %v12575_v11  ;;  %v5677_v36 = vsub.s32 4294967266, %v5672_v31  ;;  %v6056_v39 = vsel %vm6050_vm7, %v6053_v37, %v6055_v57  ;;  %v12595_v21 = vpop.permute.xlu1 %5545 }
 0x944   :  { %v6075_v24 = vadd.s32 1, %v12568_v17  ;;  %vm6132_vm13 = vcmp.gt.s32.totalorder %v6131_v26, 0  ;;  %v5673_v35 = vsub.s32 32, %v5672_v31  ;;  %v7660_v25 = vmin.u32 %v5771_v15, %v12562_v49 }
 0x945   :  { %v6133_v44 = vsel %vm6132_vm13, %v6131_v26, 0  ;;  %v6072_v7 = vmul.u32 %v6065_v4, %v6056_v39  ;;  %vm6074_vm11 = vc.u32 %v12576_v41, %v12567_v29  ;;  %v5657_v59 = vadd.s32 %v12491_v27, %v12488_v33 }
 0x946   :  { %v6135_v46 = vand.u32 31, %v6133_v44  ;;  %v5678_v48 = vadd.s32 127, %v5677_v36  ;;  %v6076_v38 = vsel %vm6074_vm11, %v6075_v24, %v12568_v17  ;;  %v6128_v62 = vand.u32 8388607, %v14076_v3 }
 0x947   :  { %v6077_v51 = vadd.s32 %v6076_v38, %v6072_v7  ;;  %v5675_v10 = vshrl.u32 %v5657_v59, %v5673_v35  ;;  %v5773_v22 = vclz %v7660_v25  ;;  %v5525_v4 = vmul.f32 %v5478_v52, %v12441_v61 }
 0x948   :  { %v6136_v16 = vsub.s32 32, %v6135_v46  ;;  %v5674_v19 = vshll.u32 %v12541_v13, %v5672_v31  ;;  %v5679_v37 = vshll.u32 %v5678_v48, 23  ;;  %v6129_v57 = vor.u32 8388608, %v6128_v62 }
 0x949   :  { %v6078_v1 = vadd.s32 536870912, %v6077_v51  ;;  %v7661_v11 = vadd.s32 4294967294, %v5773_v22  ;;  %v12604_v61 = vadd.f32 %v12595_v21, %v5525_v4  ;;  %v6138_v31 = vshll.u32 %v14348_v2, %v6135_v46 }
 0x94a   :  { %v6139_v27 = vshrl.u32 %v14504_v50, %v6136_v16  ;;  %v6142_v17 = vshrl.u32 %v14505_v34, %v6136_v16  ;;  %v6145_v15 = vshrl.u32 %v14506_v63, %v6136_v16  ;;  %v5676_v26 = vor.u32 %v5675_v10, %v5674_v19 }
 0x94b   :  { %v12597_v33 = vshrl.u32 %v6078_v1, 30  ;;  %v6148_v36 = vshrl.u32 %v14352_v9, %v6136_v16  ;;  %14508 = vst [vmem:[#allocation19_spill] sm:$0xff] %v12604_v61  ;;  %v6141_v39 = vshll.u32 %v14504_v50, %v6135_v46  ;;  %v6144_v24 = vshll.u32 %v14505_v34, %v6135_v46 }
 0x94c   :  { %v5680_v35 = vor.u32 4788187, %v5679_v37  ;;  %v6134_v25 = vshrl.u32 %v6133_v44, 5  ;;  %v6147_v7 = vshll.u32 %v14506_v63, %v6135_v46  ;;  %v5526_v59 = vmul.f32 %v5478_v52, %v12443_v5 }
 0x94d   :  { %v6080_v13 = vshll.u32 %v12597_v33, 30  ;;  %v6140_v38 = vor.u32 %v6139_v27, %v6138_v31  ;;  %v6143_v62 = vor.u32 %v6142_v17, %v6141_v39  ;;  %v6146_v10 = vor.u32 %v6145_v15, %v6144_v24 }
 0x94e   :  { %vm7662_vm14 = vcmp.lt.s32.totalorder %v7661_v11, 0  ;;  %v6149_v22 = vor.u32 %v6148_v36, %v6147_v7  ;;  %v6150_v4 = vshll.u32 %v14352_v9, %v6135_v46  ;;  %v6151_v1 = vshrl.u32 %v14353_v20, %v6136_v16 }
 0x94f   :  { %v12612_v48 = vsub.s32 %v6077_v51, %v6080_v13  ;;  %v5683_v19 = vcvt.s32.f32 %v5676_v26  ;;  %v6169_v37 = vshll.u32 %v6129_v57, 8  ;;  %v14080_v44 = vand.u32 2147483647, %v12604_v61  ;;  %v12621_v26 = vpop.f32.mrb[35].mxu1 }
 0x950   :  { %v5681_v12 = vand.u32 2147483647, %v5680_v35  ;;  %v6152_v8 = vor.u32 %v6151_v1, %v6150_v4  ;;  %vm6153_vm4 = vcmp.lt.s32.totalorder %v6134_v25, 1  ;;  %vm6156_vm6 = vcmp.lt.s32.totalorder %v6134_v25, 4 }
 0x951   :  { %v6083_v3 = vsub.s32 0, %v12612_v48  ;;  %v5776_v5 = vsel %vm7662_vm14, 0, %v7661_v11  ;;  %v6158_v51 = vsel %vm6156_vm6, %v6146_v10, 2102212464  ;;  %v6161_v27 = vsel %vm6153_vm4, %v6140_v38, %v6143_v62 }
 0x952   :  { %vm6155_vm2 = vcmp.lt.s32.totalorder %v6134_v25, 3  ;;  %v6162_v46 = vsel %vm6156_vm6, %v6149_v22, 920167782  ;;  %v6165_v17 = vsel %vm6153_vm4, %v6143_v62, %v6146_v10  ;;  %v6166_v15 = vsel %vm6156_vm6, %v6152_v8, 1326507024 }
 0x953   :  { %v7672_v52 = vmin.u32 %v6083_v3, %v12612_v48  ;;  %v6137_v36 = vshrl.u32 %v14348_v2, %v6136_v16  ;;  %vm6154_vm3 = vcmp.lt.s32.totalorder %v6134_v25, 2  ;;  %v6163_v13 = vsel %vm6155_vm2, %v6146_v10, %v6162_v46 }
 0x954   :  { %v5781_v31 = vsub.s32 4294967266, %v5776_v5  ;;  %v6164_v11 = vsel %vm6154_vm3, %v6161_v27, %v6163_v13  ;;  %v6167_v39 = vsel %vm6155_vm2, %v6149_v22, %v6166_v15  ;;  %v6436_v3 = vand.u32 2139095040, %v12604_v61 }
 0x955   :  { %v6085_v57 = vclz %v7672_v52  ;;  %v6157_v35 = vsel %vm6153_vm4, %v6137_v36, %v6140_v38  ;;  %v6159_v7 = vsel %vm6155_vm2, %v6143_v62, %v6158_v51  ;;  %v6168_v4 = vsel %vm6154_vm3, %v6165_v17, %v6167_v39 }
 0x956   :  { %v12628_v8 = vmul.u32.u64.low %v6169_v37, %v6168_v4  ;;  %v12629_v1 = vmul.u32.u64.high %v6169_v37, %v6168_v4, %v12628_v8  ;;  %v12631_v52 = vmul.u32.u64.low %v6169_v37, %v6164_v11  ;;  %v12632_v14 = vmul.u32.u64.high %v6169_v37, %v6164_v11, %v12631_v52 }
 0x957   :  { %v7673_v24 = vadd.s32 4294967294, %v6085_v57  ;;  %v5777_v16 = vsub.s32 32, %v5776_v5  ;;  %v6437_v10 = vshrl.u32 %v6436_v3, 23  ;;  %v5684_v27 = vmul.f32 %v5683_v19, %v5681_v12 }
 0x958   :  { %v5782_v22 = vadd.s32 127, %v5781_v31  ;;  %v6160_v15 = vsel %vm6154_vm3, %v6157_v35, %v6159_v7  ;;  %vm5603_vm10 = vcmp.lt.s32.totalorder %v12427_v53, 0  ;;  %v5761_v38 = vadd.s32 %v12519_v55, %v12527_v58 }
 0x959   :  { %vm7674_vm12 = vcmp.lt.s32.totalorder %v7673_v24, 0  ;;  %v7687_v62 = vadd.s32 4294967169, %v6437_v10  ;;  %v6440_v51 = vand.u32 8388607, %v14080_v44  ;;  %vm6178_vm5 = vc.u32 %v12629_v1, %v12631_v52 }
 0x95a   :  { %v12635_v46 = vsel %vm7674_vm12, 0, %v7673_v24  ;;  %v6179_v12 = vadd.s32 1, %v12632_v14  ;;  %v12648_v19 = vadd.f32 %v12595_v21, %v5526_v59  ;;  %v5687_v25 = vsub.s32 4, %v12531_v18 }
 0x95b   :  { %v6093_v17 = vsub.s32 4294967266, %v12635_v46  ;;  %v5779_v57 = vshrl.u32 %v5761_v38, %v5777_v16  ;;  %v6176_v36 = vmul.u32 %v6169_v37, %v6160_v15  ;;  %v6443_v13 = vadd.s32 1, %v7687_v62 }
 0x95c   :  { %v5685_v55 = vxor.u32 2147483648, %v5684_v27  ;;  %v5778_v58 = vshll.u32 %v12562_v49, %v5776_v5  ;;  %v5783_v31 = vshll.u32 %v5782_v22, 23  ;;  %v6180_v11 = vsel %vm6178_vm5, %v6179_v12, %v12632_v14 }
 0x95d   :  { %v6089_v39 = vsub.s32 32, %v12635_v46  ;;  %v6181_v3 = vadd.s32 %v6180_v11, %v6176_v36  ;;  %v6441_v24 = vor.u32 8388608, %v6440_v51  ;;  %vm6444_vm8 = vcmp.gt.s32.totalorder %v6443_v13, 0 }
 0x95e   :  { %v6094_v35 = vadd.s32 127, %v6093_v17  ;;  %v6445_v7 = vsel %vm6444_vm8, %v6443_v13, 0  ;;  %v6540_v21 = vand.u32 2139095040, %v12648_v19  ;;  %v12657_v59 = vmul.f32 %v12421_v28, %v12447_v30 }
 0x95f   :  { %v12662_v49 = vsel %vm5603_vm10, %v5687_v25, %v12531_v18  ;;  %v12664_v37 = vor.u32 %v5779_v57, %v5778_v58  ;;  %v6073_v14 = vadd.s32 %v12567_v29, %v12576_v41  ;;  %v6182_v5 = vadd.s32 536870912, %v6181_v3 }
 0x960   :  { %14509 = vst [vmem:[#allocation51_spill] sm:$0xff] %v12662_v49  ;;  %v5686_v4 = vsel %vm5603_vm10, %v5685_v55, %v5684_v27  ;;  %v12670_v8 = vor.u32 4788187, %v5783_v31  ;;  %v6090_v30 = vshll.u32 %v12612_v48, %v12635_v46  ;;  %v6447_v16 = vand.u32 31, %v6445_v7 }
 0x961   :  { %v6091_v10 = vshrl.u32 %v6073_v14, %v6089_v39  ;;  %v12674_v22 = vshrl.u32 %v6182_v5, 30  ;;  %v12676_v18 = vshll.u32 %v6441_v24, 8  ;;  %v6095_v38 = vshll.u32 %v6094_v35, 23 }
 0x962   :  { %v6446_v62 = vshrl.u32 %v6445_v7, 5  ;;  %v6448_v29 = vsub.s32 32, %v6447_v16  ;;  %v6541_v41 = vshrl.u32 %v6540_v21, 23  ;;  %v6450_v27 = vshll.u32 %v14348_v2, %v6447_v16 }
 0x963   :  { %14510 = vst [vmem:[#allocation20_spill] sm:$0xff] %v12674_v22  ;;  %v6184_v51 = vshll.u32 %v12674_v22, 30  ;;  %v6453_v17 = vshll.u32 %v14504_v50, %v6447_v16  ;;  %v6456_v48 = vshll.u32 %v14505_v34, %v6447_v16  ;;  %v14511_v46 = vand.u32 2147483647, %v12427_v53 }
 0x964   :  { %v14512_v12 = vmov 0  ;;  %v6451_v25 = vshrl.u32 %v14504_v50, %v6448_v29  ;;  %v6454_v57 = vshrl.u32 %v14505_v34, %v6448_v29  ;;  %v6457_v36 = vshrl.u32 %v14506_v63, %v6448_v29 }
 0x965   :  { %vm12685_vm9 = vcmp.le.f32.partialorder %v14511_v46, 0.7853982  ;;  %v6459_v13 = vshll.u32 %v14506_v63, %v6447_v16  ;;  %v12693_v55 = vsub.s32 %v6181_v3, %v6184_v51  ;;  %v6460_v58 = vshrl.u32 %v14352_v9, %v6448_v29 }
 0x966   :  { %v14513_v12 = vsel %vm12685_vm9, 4294967295, %v14512_v12  ;;  %v6462_v31 = vshll.u32 %v14352_v9, %v6447_v16  ;;  %v6463_v11 = vshrl.u32 %v14353_v20, %v6448_v29  ;;  %v6096_v39 = vor.u32 4788187, %v6095_v38 }
 0x967   :  { %14514 = vst [vmem:[#allocation53_spill] sm:$0xff] %v14513_v12  ;;  %v6452_v24 = vor.u32 %v6451_v25, %v6450_v27  ;;  %v6455_v35 = vor.u32 %v6454_v57, %v6453_v17  ;;  %v6458_v7 = vor.u32 %v6457_v36, %v6456_v48  ;;  %v6187_v21 = vsub.s32 0, %v12693_v55  ;;  %v12701_v17 = vpop.f32.mrb[36].mxu1 }
 0x968   :  { %v6461_v14 = vor.u32 %v6460_v58, %v6459_v13  ;;  %v6464_v5 = vor.u32 %v6463_v11, %v6462_v31  ;;  %vm6465_vm7 = vcmp.lt.s32.totalorder %v6446_v62, 1  ;;  %v6449_v46 = vshrl.u32 %v14348_v2, %v6448_v29 }
 0x969   :  { %vm6468_vm0 = vcmp.lt.s32.totalorder %v6446_v62, 4  ;;  %v6473_v3 = vsel %vm6465_vm7, %v6452_v24, %v6455_v35  ;;  %v7691_v51 = vadd.s32 4294967169, %v6541_v41  ;;  %v7676_v44 = vmin.u32 %v6187_v21, %v12693_v55 }
 0x96a   :  { %vm6467_vm1 = vcmp.lt.s32.totalorder %v6446_v62, 3  ;;  %v6470_v16 = vsel %vm6468_vm0, %v6458_v7, 2102212464  ;;  %v6474_v15 = vsel %vm6468_vm0, %v6461_v14, 920167782  ;;  %v6092_v49 = vor.u32 %v6091_v10, %v6090_v30 }
 0x96b   :  { %vm6466_vm15 = vcmp.lt.s32.totalorder %v6446_v62, 2  ;;  %v6475_v38 = vsel %vm6467_vm1, %v6458_v7, %v6474_v15  ;;  %v6477_v27 = vsel %vm6465_vm7, %v6455_v35, %v6458_v7  ;;  %v6189_v48 = vclz %v7676_v44 }
 0x96c   :  { %v6469_v25 = vsel %vm6465_vm7, %v6449_v46, %v6452_v24  ;;  %v6476_v57 = vsel %vm6466_vm15, %v6473_v3, %v6475_v38  ;;  %v6478_v36 = vsel %vm6468_vm0, %v6464_v5, 1326507024  ;;  %v6471_v29 = vsel %vm6467_vm1, %v6455_v35, %v6470_v16 }
 0x96d   :  { %v6479_v13 = vsel %vm6467_vm1, %v6461_v14, %v6478_v36  ;;  %v12705_v41 = vmul.u32.u64.low %v12676_v18, %v6476_v57  ;;  %v12706_v58 = vmul.u32.u64.high %v12676_v18, %v6476_v57, %v12705_v41  ;;  %v5689_v30 = vsel %vm12685_vm9, %v12427_v53, %v5686_v4 }
 0x96e   :  { %v6097_v10 = vand.u32 2147483647, %v6096_v39  ;;  %v6480_v15 = vsel %vm6466_vm15, %v6477_v27, %v6479_v13  ;;  %v6547_v31 = vadd.s32 1, %v7691_v51  ;;  %v5785_v44 = vand.u32 2147483647, %v12670_v8 }
 0x96f   :  { %v7677_v11 = vadd.s32 4294967294, %v6189_v48  ;;  %v12715_v24 = vmul.u32.u64.low %v12676_v18, %v6480_v15  ;;  %v12716_v35 = vmul.u32.u64.high %v12676_v18, %v6480_v15, %v12715_v24  ;;  %v6099_v7 = vcvt.s32.f32 %v6092_v49 }
 0x970   :  { %v6472_v21 = vsel %vm6466_vm15, %v6469_v25, %v6471_v29  ;;  %vm6548_vm13 = vcmp.gt.s32.totalorder %v6547_v31, 0  ;;  %v12721_v14 = vadd.f32 %v12582_v60, %v12657_v59  ;;  %8415 = vcosq.f32 %v5689_v30 }
 0x971   :  { %v6491_v4 = vadd.s32 1, %v12706_v58  ;;  %v14516_v39 = vand.u32 2147483647, %v12648_v19  ;;  %v6549_v8 = vsel %vm6548_vm13, %v6547_v31, 0  ;;  %8417 = vsinq.f32 %v5689_v30 }
 0x972   :  { %14515 = vst [vmem:[#allocation2_spill] sm:$0xff] %v12721_v14  ;;  %v5787_v46 = vcvt.s32.f32 %v12664_v37  ;;  %vm6019_vm11 = vcmp.lt.s32.totalorder %v12437_v45, 0  ;;  %v6100_v49 = vmul.f32 %v6099_v7, %v6097_v10  ;;  %vm7678_vm14 = vcmp.lt.s32.totalorder %v7677_v11, 0 }
 0x973   :  { %v6544_v5 = vand.u32 8388607, %v14516_v39  ;;  %v6488_v3 = vmul.u32 %v12676_v18, %v6472_v21  ;;  %vm6490_vm4 = vc.u32 %v12716_v35, %v12705_v41  ;;  %v6551_v59 = vand.u32 31, %v6549_v8 }
 0x974   :  { %v12732_v51 = vmul.f32 %v5787_v46, %v5785_v44  ;;  %v6492_v16 = vsel %vm6490_vm4, %v6491_v4, %v12706_v58  ;;  %v5530_v37 = vmul.f32 %v12421_v28, %v12449_v0  ;;  %v6852_v57 = vand.u32 2139095040, %v12721_v14 }
 0x975   :  { %v6493_v27 = vadd.s32 %v6492_v16, %v6488_v3  ;;  %v6545_v48 = vor.u32 8388608, %v6544_v5  ;;  %v6552_v25 = vsub.s32 32, %v6551_v59  ;;  %v6101_v36 = vxor.u32 2147483648, %v6100_v49 }
 0x976   :  { %v12739_v18 = vsel %vm7678_vm14, 0, %v7677_v11  ;;  %v6550_v29 = vshrl.u32 %v6549_v8, 5  ;;  %v6554_v13 = vshll.u32 %v14348_v2, %v6551_v59  ;;  %v6557_v58 = vshll.u32 %v14504_v50, %v6551_v59  ;;  %v12749_v11 = vpop.permute.xlu0 %5490 }
 0x977   :  { %v6494_v30 = vadd.s32 536870912, %v6493_v27  ;;  %v6555_v10 = vshrl.u32 %v14504_v50, %v6552_v25  ;;  %v6558_v15 = vshrl.u32 %v14505_v34, %v6552_v25  ;;  %v6560_v28 = vshll.u32 %v14505_v34, %v6551_v59 }
 0x978   :  { %v6561_v0 = vshrl.u32 %v14506_v63, %v6552_v25  ;;  %v6563_v31 = vshll.u32 %v14506_v63, %v6551_v59  ;;  %v6564_v44 = vshrl.u32 %v14352_v9, %v6552_v25  ;;  %v6853_v4 = vshrl.u32 %v6852_v57, 23 }
 0x979   :  { %v12751_v24 = vshrl.u32 %v6494_v30, 30  ;;  %v6556_v7 = vor.u32 %v6555_v10, %v6554_v13  ;;  %v6559_v21 = vor.u32 %v6558_v15, %v6557_v58  ;;  %v6566_v8 = vshll.u32 %v14352_v9, %v6551_v59 }
 0x97a   :  { %v6562_v39 = vor.u32 %v6561_v0, %v6560_v28  ;;  %v6565_v5 = vor.u32 %v6564_v44, %v6563_v31  ;;  %v6567_v46 = vshrl.u32 %v14353_v20, %v6552_v25  ;;  %v12755_v3 = vpop.eup %8415  ;;  %v14518_v16 = vand.u32 2147483647, %v12437_v45 }
 0x97b   :  { %14517 = vst [vmem:[#allocation52_spill] sm:$0xff] %v12755_v3  ;;  %v14519_v62 = vmov 0  ;;  %v6102_v30 = vsel %vm6019_vm11, %v6101_v36, %v6100_v49  ;;  %v6496_v13 = vshll.u32 %v12751_v24, 30  ;;  %v6585_v57 = vshll.u32 %v6545_v48, 8  ;;  %v12769_v59 = vpop.eup %8417  ;;  %v12779_v3 = vpop.f32.mrb[37].mxu1 }
 0x97c   :  { %vm12759_vm6 = vcmp.le.f32.partialorder %v14518_v16, 0.7853982  ;;  %v12767_v10 = vadd.f32 %v12582_v60, %v5530_v37  ;;  %14522 = vst [vmem:[#allocation42_spill] sm:$0xff] %v12769_v59  ;;  %v6197_v58 = vsub.s32 4294967266, %v12739_v18  ;;  %v6568_v15 = vor.u32 %v6567_v46, %v6566_v8  ;;  %v12775_v16 = vpop.permute.xlu0 %5498  ;;  %14524 = vst [vmem:[#allocation7_spill] sm:$0xff] %v12779_v3 }
 0x97d   :  { %v14520_v62 = vsel %vm12759_vm6, 4294967295, %v14519_v62  ;;  %vm6569_vm2 = vcmp.lt.s32.totalorder %v6550_v29, 1  ;;  %vm6572_vm3 = vcmp.lt.s32.totalorder %v6550_v29, 4  ;;  %v12772_v28 = vsub.s32 %v6493_v27, %v6496_v13  ;;  %14523 = vst [vmem:[#allocation54_spill] sm:$0xff] %v12775_v16 }
 0x97e   :  { %14521 = vst [vmem:[#allocation33_spill] sm:$0xff] %v14520_v62  ;;  %v6574_v0 = vsel %vm6572_vm3, %v6562_v39, 2102212464  ;;  %v6577_v31 = vsel %vm6569_vm2, %v6556_v7, %v6559_v21  ;;  %v7703_v44 = vadd.s32 4294967169, %v6853_v4  ;;  %v6553_v49 = vshrl.u32 %v14348_v2, %v6552_v25 }
 0x97f   :  { %vm6571_vm12 = vcmp.lt.s32.totalorder %v6550_v29, 3  ;;  %v6578_v36 = vsel %vm6572_vm3, %v6565_v5, 920167782  ;;  %v6581_v48 = vsel %vm6569_vm2, %v6559_v21, %v6562_v39  ;;  %v6499_v60 = vsub.s32 0, %v12772_v28 }
 0x980   :  { %vm6570_vm10 = vcmp.lt.s32.totalorder %v6550_v29, 2  ;;  %v6579_v37 = vsel %vm6571_vm12, %v6562_v39, %v6578_v36  ;;  %v6582_v38 = vsel %vm6572_vm3, %v6568_v15, 1326507024  ;;  %v6573_v8 = vsel %vm6569_vm2, %v6553_v49, %v6556_v7 }
 0x981   :  { %v6575_v46 = vsel %vm6571_vm12, %v6559_v21, %v6574_v0  ;;  %v6580_v27 = vsel %vm6570_vm10, %v6577_v31, %v6579_v37  ;;  %v6583_v13 = vsel %vm6571_vm12, %v6565_v5, %v6582_v38  ;;  %v7688_v4 = vmin.u32 %v6499_v60, %v12772_v28 }
 0x982   :  { %v6584_v25 = vsel %vm6570_vm10, %v6581_v48, %v6583_v13  ;;  %v12783_v53 = vmul.u32.u64.low %v6585_v57, %v6580_v27  ;;  %v12784_v59 = vmul.u32.u64.high %v6585_v57, %v6580_v27, %v12783_v53  ;;  %v6859_v39 = vadd.s32 1, %v7703_v44 }
 0x983   :  { %v12787_v12 = vmul.u32.u64.low %v6585_v57, %v6584_v25  ;;  %v12788_v22 = vmul.u32.u64.high %v6585_v57, %v6584_v25, %v12787_v12  ;;  %v5519_v7 = vmul.f32 %v12419_v43, %v12514_v54  ;;  %v6177_v38 = vadd.s32 %v12631_v52, %v12629_v1  ;;  %v12805_v54 = vpop.permute.xlu0 %5554 }
 0x984   :  { %v6193_v21 = vsub.s32 32, %v12739_v18  ;;  %v6501_v5 = vclz %v7688_v4  ;;  %v6576_v15 = vsel %vm6570_vm10, %v6573_v8, %v6575_v46  ;;  %v12799_v0 = vsel %vm12759_vm6, %v12437_v45, %v6102_v30 }
 0x985   :  { %v12801_v31 = vadd.s32 127, %v6197_v58  ;;  %v14525_v12 = vand.u32 2147483647, %v12721_v14  ;;  %vm6860_vm5 = vcmp.gt.s32.totalorder %v6859_v39, 0  ;;  %v6595_v1 = vadd.s32 1, %v12784_v59 }
 0x986   :  { %v7689_v49 = vadd.s32 4294967294, %v6501_v5  ;;  %v6861_v52 = vsel %vm6860_vm5, %v6859_v39, 0  ;;  %v6956_v29 = vand.u32 2139095040, %v12767_v10  ;;  %v6592_v36 = vmul.u32 %v6585_v57, %v6576_v15 }
 0x987   :  { %v6856_v44 = vand.u32 8388607, %v14525_v12  ;;  %vm6594_vm8 = vc.u32 %v12788_v22, %v12783_v53  ;;  %v6863_v30 = vand.u32 31, %v6861_v52  ;;  %v12812_v58 = vadd.f32 %v12805_v54, %v5519_v7 }
 0x988   :  { %v12814_v48 = vshrl.u32 %v6177_v38, %v6193_v21  ;;  %v6489_v60 = vadd.s32 %v12705_v41, %v12716_v35  ;;  %vm7690_vm7 = vcmp.lt.s32.totalorder %v7689_v49, 0  ;;  %v6596_v37 = vsel %vm6594_vm8, %v6595_v1, %v12784_v59 }
 0x989   :  { %14526 = vst [vmem:[#allocation8_spill] sm:$0xff] %v12812_v58  ;;  %v6504_v46 = vsel %vm7690_vm7, 0, %v7689_v49  ;;  %v6597_v27 = vadd.s32 %v6596_v37, %v6592_v36  ;;  %v6864_v57 = vsub.s32 32, %v6863_v30  ;;  %v6857_v4 = vor.u32 8388608, %v6856_v44 }
 0x98a   :  { %v6509_v13 = vsub.s32 4294967266, %v6504_v46  ;;  %v6866_v25 = vshll.u32 %v14348_v2, %v6863_v30  ;;  %v6957_v39 = vshrl.u32 %v6956_v29, 23  ;;  %v6869_v21 = vshll.u32 %v14504_v50, %v6863_v30 }
 0x98b   :  { %v6598_v7 = vadd.s32 536870912, %v6597_v27  ;;  %v6867_v38 = vshrl.u32 %v14504_v50, %v6864_v57  ;;  %v6870_v41 = vshrl.u32 %v14505_v34, %v6864_v57  ;;  %v6862_v5 = vshrl.u32 %v6861_v52, 5 }
 0x98c   :  { %v6510_v35 = vadd.s32 127, %v6509_v13  ;;  %v6872_v59 = vshll.u32 %v14505_v34, %v6863_v30  ;;  %v6873_v15 = vshrl.u32 %v14506_v63, %v6864_v57  ;;  %v6505_v12 = vsub.s32 32, %v6504_v46 }
 0x98d   :  { %v12826_v49 = vshrl.u32 %v6598_v7, 30  ;;  %v6868_v44 = vor.u32 %v6867_v38, %v6866_v25  ;;  %v6871_v1 = vor.u32 %v6870_v41, %v6869_v21  ;;  %v6875_v37 = vshll.u32 %v14506_v63, %v6863_v30 }
 0x98e   :  { %v6511_v36 = vshll.u32 %v6510_v35, 23  ;;  %v6874_v29 = vor.u32 %v6873_v15, %v6872_v59  ;;  %v6876_v8 = vshrl.u32 %v14352_v9, %v6864_v57  ;;  %v6878_v13 = vshll.u32 %v14352_v9, %v6863_v30 }
 0x98f   :  { %14527 = vst [vmem:[#allocation6_spill] sm:$0xff] %v12826_v49  ;;  %v6600_v62 = vshll.u32 %v12826_v49, 30  ;;  %v6879_v52 = vshrl.u32 %v14353_v20, %v6864_v57  ;;  %v6897_v47 = vshll.u32 %v6857_v4, 8  ;;  %v6506_v16 = vshll.u32 %v12772_v28, %v6504_v46 }
 0x990   :  { %v6865_v7 = vshrl.u32 %v14348_v2, %v6864_v57  ;;  %v6877_v3 = vor.u32 %v6876_v8, %v6875_v37  ;;  %v7707_v25 = vadd.s32 4294967169, %v6957_v39  ;;  %vm6881_vm0 = vcmp.lt.s32.totalorder %v6862_v5, 1  ;;  %v12841_v39 = vpop.f32.mrb[38].mxu1 }
 0x991   :  { %v12835_v38 = vsub.s32 %v6597_v27, %v6600_v62  ;;  %v6880_v21 = vor.u32 %v6879_v52, %v6878_v13  ;;  %vm6884_vm1 = vcmp.lt.s32.totalorder %v6862_v5, 4  ;;  %v6507_v41 = vshrl.u32 %v6489_v60, %v6505_v12  ;;  %14528 = vst [vmem:[#allocation9_spill] sm:$0xff] %v12841_v39 }
 0x992   :  { %v6512_v35 = vor.u32 4788187, %v6511_v36  ;;  %v6886_v59 = vsel %vm6884_vm1, %v6874_v29, 2102212464  ;;  %v6889_v15 = vsel %vm6881_vm0, %v6868_v44, %v6871_v1  ;;  %vm6883_vm15 = vcmp.lt.s32.totalorder %v6862_v5, 3 }
 0x993   :  { %v6603_v30 = vsub.s32 0, %v12835_v38  ;;  %v6890_v49 = vsel %vm6884_vm1, %v6877_v3, 920167782  ;;  %v6893_v4 = vsel %vm6881_vm0, %v6871_v1, %v6874_v29  ;;  %vm5707_vm13 = vcmp.lt.s32.totalorder %v12429_v23, 0 }
 0x994   :  { %vm6882_vm14 = vcmp.lt.s32.totalorder %v6862_v5, 2  ;;  %v6885_v28 = vsel %vm6881_vm0, %v6865_v7, %v6868_v44  ;;  %v6891_v8 = vsel %vm6883_vm15, %v6874_v29, %v6890_v49  ;;  %v6894_v46 = vsel %vm6884_vm1, %v6880_v21, 1326507024 }
 0x995   :  { %v7692_v62 = vmin.u32 %v6603_v30, %v12835_v38  ;;  %v6887_v27 = vsel %vm6883_vm15, %v6871_v1, %v6886_v59  ;;  %v6892_v57 = vsel %vm6882_vm14, %v6889_v15, %v6891_v8  ;;  %v6895_v60 = vsel %vm6883_vm15, %v6877_v3, %v6894_v46 }
 0x996   :  { %v6508_v12 = vor.u32 %v6507_v41, %v6506_v16  ;;  %v6896_v36 = vsel %vm6882_vm14, %v6893_v4, %v6895_v60  ;;  %v12844_v37 = vmul.u32.u64.low %v6897_v47, %v6892_v57  ;;  %v12845_v13 = vmul.u32.u64.high %v6897_v47, %v6892_v57, %v12844_v37 }
 0x997   :  { %v6194_v44 = vshll.u32 %v12693_v55, %v12739_v18  ;;  %v6605_v49 = vclz %v7692_v62  ;;  %v12850_v29 = vmul.u32.u64.low %v6897_v47, %v6896_v36  ;;  %v12851_v52 = vmul.u32.u64.high %v6897_v47, %v6896_v36, %v12850_v29 }
 0x998   :  { %v6513_v1 = vand.u32 2147483647, %v6512_v35  ;;  %v6888_v7 = vsel %vm6882_vm14, %v6885_v28, %v6887_v27  ;;  %v14094_v3 = vand.u32 2147483647, %v12767_v10  ;;  %v6963_v21 = vadd.s32 1, %v7707_v25 }
 0x999   :  { %v5789_v16 = vxor.u32 2147483648, %v12732_v51  ;;  %8419 = vcosq.f32 %v12799_v0  ;;  %v12858_v41 = vor.u32 %v12814_v48, %v6194_v44  ;;  %v14529_v59 = vshll.u32 %v12801_v31, 23 }
 0x99a   :  { %v6515_v18 = vcvt.s32.f32 %v6508_v12  ;;  %v7693_v15 = vadd.s32 4294967294, %v6605_v49  ;;  %v6907_v35 = vadd.s32 1, %v12845_v13  ;;  %vm6964_vm4 = vcmp.gt.s32.totalorder %v6963_v21, 0 }
 0x99b   :  { %v12862_v55 = vor.u32 4788187, %v14529_v59  ;;  %v6904_v5 = vmul.u32 %v6897_v47, %v6888_v7  ;;  %vm6906_vm2 = vc.u32 %v12851_v52, %v12844_v37  ;;  %v14095_v25 = vand.u32 2147483647, %v12812_v58 }
 0x99c   :  { %v5812_v30 = vand.u32 2139095040, %v12812_v58  ;;  %v12869_v4 = vmul.f32 %v6515_v18, %v6513_v1  ;;  %v6908_v48 = vsel %vm6906_vm2, %v6907_v35, %v12845_v13  ;;  %v6960_v31 = vand.u32 8388607, %v14094_v3 }
 0x99d   :  { %v6965_v28 = vsel %vm6964_vm4, %v6963_v21, 0  ;;  %v12877_v8 = vsel %vm5707_vm13, %v5789_v16, %v12732_v51  ;;  %v14531_v47 = vsub.s32 4, %v12597_v33  ;;  %8421 = vsinq.f32 %v12799_v0 }
 0x99e   :  { %14530 = vst [vmem:[#allocation5_spill] sm:$0xff] %v12877_v8  ;;  %v6909_v62 = vadd.s32 %v6908_v48, %v6904_v5  ;;  %vm7694_vm3 = vcmp.lt.s32.totalorder %v7693_v15, 0  ;;  %v6967_v60 = vand.u32 31, %v6965_v28  ;;  %v12892_v51 = vadd.s32 %v12783_v53, %v12788_v22 }
 0x99f   :  { %v12884_v46 = vsel %vm6019_vm11, %v14531_v47, %v12597_v33  ;;  %v5813_v13 = vshrl.u32 %v5812_v30, 23  ;;  %v6517_v33 = vxor.u32 2147483648, %v12869_v4  ;;  %v6961_v44 = vor.u32 8388608, %v6960_v31 }
 0x9a0   :  { %14532 = vst [vmem:[#allocation38_spill] sm:$0xff] %v12884_v46  ;;  %v6910_v36 = vadd.s32 536870912, %v6909_v62  ;;  %v6968_v49 = vsub.s32 32, %v6967_v60  ;;  %v12897_v0 = vand.u32 8388607, %v14095_v25  ;;  %v12899_v29 = vsel %vm7694_vm3, 0, %v7693_v15 }
 0x9a1   :  { %v6970_v7 = vshll.u32 %v14348_v2, %v6967_v60  ;;  %v6973_v21 = vshll.u32 %v14504_v50, %v6967_v60  ;;  %v6976_v16 = vshll.u32 %v14505_v34, %v6967_v60  ;;  %v6966_v15 = vshrl.u32 %v6965_v28, 5 }
 0x9a2   :  { %v12901_v1 = vshrl.u32 %v6910_v36, 30  ;;  %v6971_v53 = vshrl.u32 %v14504_v50, %v6968_v49  ;;  %v6974_v22 = vshrl.u32 %v14505_v34, %v6968_v49  ;;  %v6977_v59 = vshrl.u32 %v14506_v63, %v6968_v49 }
 0x9a3   :  { %v12909_v18 = vpop.eup %8419  ;;  %v6979_v5 = vshll.u32 %v14506_v63, %v6967_v60  ;;  %v7663_v30 = vadd.s32 4294967169, %v5813_v13  ;;  %v6980_v36 = vshrl.u32 %v14352_v9, %v6968_v49  ;;  %vm6435_vm11 = vcmp.lt.s32.totalorder %v12604_v61, 0 }
 0x9a4   :  { %14533 = vst [vmem:[#allocation28_spill] sm:$0xff] %v12909_v18  ;;  %v6912_v35 = vshll.u32 %v12901_v1, 30  ;;  %v6972_v48 = vor.u32 %v6971_v53, %v6970_v7  ;;  %v6975_v31 = vor.u32 %v6974_v22, %v6973_v21  ;;  %v6978_v47 = vor.u32 %v6977_v59, %v6976_v16 }
 0x9a5   :  { %v6609_v3 = vsub.s32 32, %v12899_v29  ;;  %v6613_v25 = vsub.s32 4294967266, %v12899_v29  ;;  %v7001_v57 = vshll.u32 %v6961_v44, 8  ;;  %v6981_v27 = vor.u32 %v6980_v36, %v6979_v5 }
 0x9a6   :  { %v12917_v12 = vsub.s32 %v6909_v62, %v6912_v35  ;;  %v6982_v28 = vshll.u32 %v14352_v9, %v6967_v60  ;;  %v6983_v45 = vshrl.u32 %v14353_v20, %v6968_v49  ;;  %v5817_v13 = vor.u32 8388608, %v12897_v0  ;;  %v12927_v35 = vpop.f32.mrb[39].mxu1 }
 0x9a7   :  { %v12922_v7 = vpop.eup %8421  ;;  %vm6985_vm12 = vcmp.lt.s32.totalorder %v6966_v15, 1  ;;  %vm6988_vm10 = vcmp.lt.s32.totalorder %v6966_v15, 4  ;;  %v5819_v53 = vadd.s32 1, %v7663_v30  ;;  %v6969_v22 = vshrl.u32 %v14348_v2, %v6968_v49  ;;  %14535 = vst [vmem:[#allocation36_spill] sm:$0xff] %v12927_v35 }
 0x9a8   :  { %14534 = vst [vmem:[#allocation4_spill] sm:$0xff] %v12922_v7  ;;  %v6915_v21 = vsub.s32 0, %v12917_v12  ;;  %v6984_v16 = vor.u32 %v6983_v45, %v6982_v28  ;;  %v6990_v62 = vsel %vm6988_vm10, %v6978_v47, 2102212464  ;;  %v6993_v59 = vsel %vm6985_vm12, %v6972_v48, %v6975_v31 }
 0x9a9   :  { %vm6986_vm5 = vcmp.lt.s32.totalorder %v6966_v15, 2  ;;  %vm6987_vm8 = vcmp.lt.s32.totalorder %v6966_v15, 3  ;;  %v6994_v60 = vsel %vm6988_vm10, %v6981_v27, 920167782  ;;  %v6989_v0 = vsel %vm6985_vm12, %v6969_v22, %v6972_v48 }
 0x9aa   :  { %v7704_v44 = vmin.u32 %v6915_v21, %v12917_v12  ;;  %v6995_v5 = vsel %vm6987_vm8, %v6978_v47, %v6994_v60  ;;  %v6997_v36 = vsel %vm6985_vm12, %v6975_v31, %v6978_v47  ;;  %v6998_v18 = vsel %vm6988_vm10, %v6984_v16, 1326507024 }
 0x9ab   :  { %v6991_v46 = vsel %vm6987_vm8, %v6975_v31, %v6990_v62  ;;  %v6996_v30 = vsel %vm6986_vm5, %v6993_v59, %v6995_v5  ;;  %v6999_v8 = vsel %vm6987_vm8, %v6981_v27, %v6998_v18  ;;  %v12930_v49 = vadd.s32 127, %v6613_v25 }
 0x9ac   :  { %v6917_v7 = vclz %v7704_v44  ;;  %v7000_v45 = vsel %vm6986_vm5, %v6997_v36, %v6999_v8  ;;  %v12933_v28 = vmul.u32.u64.low %v7001_v57, %v6996_v30  ;;  %v12934_v21 = vmul.u32.u64.high %v7001_v57, %v6996_v30, %v12933_v28 }
 0x9ad   :  { %v12937_v39 = vmul.u32.u64.low %v7001_v57, %v7000_v45  ;;  %v12938_v35 = vmul.u32.u64.high %v7001_v57, %v7000_v45, %v12937_v39  ;;  %vm5820_vm7 = vcmp.gt.s32.totalorder %v5819_v53, 0  ;;  %v14536_v48 = vand.u32 2147483647, %v12862_v55 }
 0x9ae   :  { %v7705_v23 = vadd.s32 4294967294, %v6917_v7  ;;  %v14537_v31 = vcvt.s32.f32 %v12858_v41  ;;  %v12949_v25 = vsel %vm6435_vm11, %v6517_v33, %v12869_v4  ;;  %v6992_v8 = vsel %vm6986_vm5, %v6989_v0, %v6991_v46 }
 0x9af   :  { %v5821_v27 = vsel %vm5820_vm7, %v5819_v53, 0  ;;  %v12953_v18 = vshrl.u32 %v12892_v51, %v6609_v3  ;;  %v6905_v39 = vadd.s32 %v12844_v37, %v12851_v52  ;;  %v6615_v41 = vshll.u32 %v12930_v49, 23 }
 0x9b0   :  { %v12944_v47 = vmul.f32 %v14537_v31, %v14536_v48  ;;  %vm7706_vm0 = vcmp.lt.s32.totalorder %v7705_v23, 0  ;;  %v5823_v55 = vand.u32 31, %v5821_v27  ;;  %v7011_v22 = vadd.s32 1, %v12934_v21 }
 0x9b1   :  { %v6920_v7 = vsel %vm7706_vm0, 0, %v7705_v23  ;;  %v5520_v4 = vmul.f32 %v12419_v43, %v12523_v42  ;;  %v7008_v46 = vmul.u32 %v7001_v57, %v6992_v8  ;;  %v12961_v53 = vshll.u32 %v5817_v13, 8 }
 0x9b2   :  { %v6921_v33 = vsub.s32 32, %v6920_v7  ;;  %v6925_v15 = vsub.s32 4294967266, %v6920_v7  ;;  %v6922_v3 = vshll.u32 %v12917_v12, %v6920_v7  ;;  %vm7010_vm1 = vc.u32 %v12938_v35, %v12933_v28 }
 0x9b3   :  { %v12966_v37 = vshrl.u32 %v5821_v27, 5  ;;  %v5824_v52 = vsub.s32 32, %v5823_v55  ;;  %v7012_v16 = vsel %vm7010_vm1, %v7011_v22, %v12934_v21  ;;  %v5826_v62 = vshll.u32 %v14348_v2, %v5823_v55 }
 0x9b4   :  { %v6923_v51 = vshrl.u32 %v6905_v39, %v6921_v33  ;;  %v6926_v23 = vadd.s32 127, %v6925_v15  ;;  %v7013_v43 = vadd.s32 %v7012_v16, %v7008_v46  ;;  %v5829_v57 = vshll.u32 %v14504_v50, %v5823_v55 }
 0x9b5   :  { %v5827_v42 = vshrl.u32 %v14504_v50, %v5824_v52  ;;  %v5830_v13 = vshrl.u32 %v14505_v34, %v5824_v52  ;;  %v5832_v44 = vshll.u32 %v14505_v34, %v5823_v55  ;;  %v5833_v60 = vshrl.u32 %v14506_v63, %v5824_v52 }
 0x9b6   :  { %v6924_v12 = vor.u32 %v6923_v51, %v6922_v3  ;;  %v6927_v59 = vshll.u32 %v6926_v23, 23  ;;  %v7014_v0 = vadd.s32 536870912, %v7013_v43  ;;  %v5835_v5 = vshll.u32 %v14506_v63, %v5823_v55 }
 0x9b7   :  { %v5836_v36 = vshrl.u32 %v14352_v9, %v5824_v52  ;;  %v12978_v30 = vadd.f32 %v12805_v54, %v5520_v4  ;;  %v5828_v21 = vor.u32 %v5827_v42, %v5826_v62  ;;  %v5831_v48 = vor.u32 %v5830_v13, %v5829_v57 }
 0x9b8   :  { %v6928_v45 = vor.u32 4788187, %v6927_v59  ;;  %v5834_v31 = vor.u32 %v5833_v60, %v5832_v44  ;;  %v14538_v8 = vand.u32 2147483647, %v12604_v61  ;;  %v12986_v39 = vshrl.u32 %v7014_v0, 30 }
 0x9b9   :  { %v5837_v7 = vor.u32 %v5836_v36, %v5835_v5  ;;  %v5838_v22 = vshll.u32 %v14352_v9, %v5823_v55  ;;  %v5839_v33 = vshrl.u32 %v14353_v20, %v5824_v52  ;;  %v6931_v15 = vcvt.s32.f32 %v6924_v12 }
 0x9ba   :  { %vm12982_vm15 = vcmp.le.f32.partialorder %v14538_v8, 0.7853982  ;;  %v5825_v54 = vshrl.u32 %v14348_v2, %v5824_v52  ;;  %vm5844_vm14 = vcmp.lt.s32.totalorder %v12966_v37, 4  ;;  %v5523_v4 = vmul.f32 %v12749_v11, %v12586_v40 }
 0x9bb   :  { %v7016_v46 = vshll.u32 %v12986_v39, 30  ;;  %v5840_v3 = vor.u32 %v5839_v33, %v5838_v22  ;;  %vm5841_vm4 = vcmp.lt.s32.totalorder %v12966_v37, 1  ;;  %v5846_v51 = vsel %vm5844_vm14, %v5834_v31, 2102212464 }
 0x9bc   :  { %v6929_v23 = vand.u32 2147483647, %v6928_v45  ;;  %vm5843_vm2 = vcmp.lt.s32.totalorder %v12966_v37, 3  ;;  %v5849_v55 = vsel %vm5841_vm4, %v5828_v21, %v5831_v48  ;;  %v5850_v52 = vsel %vm5844_vm14, %v5837_v7, 920167782 }
 0x9bd   :  { %v13001_v16 = vsub.s32 %v7013_v43, %v7016_v46  ;;  %vm5842_vm3 = vcmp.lt.s32.totalorder %v12966_v37, 2  ;;  %v5851_v40 = vsel %vm5843_vm2, %v5834_v31, %v5850_v52  ;;  %v5853_v62 = vsel %vm5841_vm4, %v5831_v48, %v5834_v31 }
 0x9be   :  { %v5845_v42 = vsel %vm5841_vm4, %v5825_v54, %v5828_v21  ;;  %v5847_v57 = vsel %vm5843_vm2, %v5831_v48, %v5846_v51  ;;  %v5852_v13 = vsel %vm5842_vm3, %v5849_v55, %v5851_v40  ;;  %v5854_v12 = vsel %vm5844_vm14, %v5840_v3, 1326507024 }
 0x9bf   :  { %v7019_v59 = vsub.s32 0, %v13001_v16  ;;  %v5855_v44 = vsel %vm5843_vm2, %v5837_v7, %v5854_v12  ;;  %v13010_v60 = vmul.u32.u64.low %v12961_v53, %v5852_v13  ;;  %v13011_v0 = vmul.u32.u64.high %v12961_v53, %v5852_v13, %v13010_v60 }
 0x9c0   :  { %vm6851_vm12 = vcmp.lt.s32.totalorder %v12721_v14, 0  ;;  %v6932_v43 = vmul.f32 %v6931_v15, %v6929_v23  ;;  %v5856_v5 = vsel %vm5842_vm3, %v5853_v62, %v5855_v44  ;;  %v14102_v36 = vand.u32 2147483647, %v12978_v30 }
 0x9c1   :  { %v5916_v45 = vand.u32 2139095040, %v12978_v30  ;;  %vm6123_vm10 = vcmp.lt.s32.totalorder %v12451_v32, 0  ;;  %v6610_v21 = vshll.u32 %v12835_v38, %v12899_v29  ;;  %v7708_v48 = vmin.u32 %v7019_v59, %v13001_v16 }
 0x9c2   :  { %v13023_v31 = vmul.u32.u64.low %v12961_v53, %v5856_v5  ;;  %v13024_v8 = vmul.u32.u64.high %v12961_v53, %v5856_v5, %v13023_v31  ;;  %v6521_v7 = vsel %vm12982_vm15, %v12604_v61, %v12949_v25  ;;  %v5848_v22 = vsel %vm5842_vm3, %v5845_v42, %v5847_v57 }
 0x9c3   :  { %v5917_v33 = vshrl.u32 %v5916_v45, 23  ;;  %v13033_v15 = vadd.f32 %v12425_v6, %v5523_v4  ;;  %v6612_v38 = vor.u32 %v12953_v18, %v6610_v21  ;;  %v6616_v29 = vor.u32 4788187, %v6615_v41 }
 0x9c4   :  { %v14541_v54 = vand.u32 2147483647, %v12721_v14  ;;  %v7021_v3 = vclz %v7708_v48  ;;  %v5867_v25 = vadd.s32 1, %v13011_v0  ;;  %v6933_v37 = vxor.u32 2147483648, %v6932_v43 }
 0x9c5   :  { %v7667_v51 = vadd.s32 4294967169, %v5917_v33  ;;  %v5920_v4 = vand.u32 8388607, %v14102_v36  ;;  %v5524_v18 = vmul.f32 %v12749_v11, %v12621_v26  ;;  %v5864_v49 = vmul.u32 %v12961_v53, %v5848_v22 }
 0x9c6   :  { %vm13040_vm5 = vcmp.le.f32.partialorder %v14541_v54, 0.7853982  ;;  %v7709_v23 = vadd.s32 4294967294, %v7021_v3  ;;  %vm5866_vm8 = vc.u32 %v13024_v8, %v13010_v60  ;;  %v14103_v41 = vand.u32 2147483647, %v13033_v15 }
 0x9c7   :  { %v6205_v55 = vxor.u32 2147483648, %v12944_v47  ;;  %v5868_v52 = vsel %vm5866_vm8, %v5867_v25, %v13011_v0  ;;  %v5923_v40 = vadd.s32 1, %v7667_v51  ;;  %v6228_v62 = vand.u32 2139095040, %v13033_v15 }
 0x9c8   :  { %v14544_v42 = vsub.s32 4, %v12751_v24  ;;  %8423 = vcosq.f32 %v6521_v7  ;;  %v6617_v11 = vand.u32 2147483647, %v6616_v29  ;;  %v5869_v53 = vadd.s32 %v5868_v52, %v5864_v49 }
 0x9c9   :  { %v6619_v57 = vcvt.s32.f32 %v6612_v38  ;;  %vm7710_vm7 = vcmp.lt.s32.totalorder %v7709_v23, 0  ;;  %v5921_v13 = vor.u32 8388608, %v5920_v4  ;;  %vm5924_vm0 = vcmp.gt.s32.totalorder %v5923_v40, 0 }
 0x9ca   :  { %v13060_v26 = vsel %vm6435_vm11, %v14544_v42, %v12751_v24  ;;  %v6934_v12 = vsel %vm6851_vm12, %v6933_v37, %v6932_v43  ;;  %v5870_v59 = vadd.s32 536870912, %v5869_v53  ;;  %v13066_v44 = vand.u32 8388607, %v14103_v41 }
 0x9cb   :  { %v13069_v0 = vadd.f32 %v12425_v6, %v5524_v18  ;;  %v13074_v24 = vsel %vm6123_vm10, %v6205_v55, %v12944_v47  ;;  %8425 = vsinq.f32 %v6521_v7  ;;  %v5925_v5 = vsel %vm5924_vm0, %v5923_v40, 0 }
 0x9cc   :  { %v6229_v45 = vshrl.u32 %v6228_v62, 23  ;;  %v13076_v21 = vmul.f32 %v6619_v57, %v6617_v11  ;;  %v13079_v48 = vsel %vm7710_vm7, 0, %v7709_v23  ;;  %v13081_v31 = vshrl.u32 %v5870_v59, 30 }
 0x9cd   :  { %v13086_v6 = vsel %vm13040_vm5, %v12721_v14, %v6934_v12  ;;  %v13090_v47 = vadd.s32 %v12933_v28, %v12938_v35  ;;  %v5927_v7 = vand.u32 31, %v5925_v5  ;;  %v13092_v22 = vshll.u32 %v5921_v13, 8 }
 0x9ce   :  { %v13095_v33 = vadd.s32 %v13010_v60, %v13024_v8  ;;  %v5872_v38 = vshll.u32 %v13081_v31, 30  ;;  %v6233_v29 = vor.u32 8388608, %v13066_v44  ;;  %v7025_v3 = vsub.s32 32, %v13079_v48 }
 0x9cf   :  { %v7029_v25 = vsub.s32 4294967266, %v13079_v48  ;;  %v5928_v37 = vsub.s32 32, %v5927_v7  ;;  %v7679_v51 = vadd.s32 4294967169, %v6229_v45  ;;  %v5926_v28 = vshrl.u32 %v5925_v5, 5 }
 0x9d0   :  { %v13102_v35 = vsub.s32 %v5869_v53, %v5872_v38  ;;  %v5930_v4 = vshll.u32 %v14348_v2, %v5927_v7  ;;  %v5933_v60 = vshll.u32 %v14504_v50, %v5927_v7  ;;  %v5936_v23 = vshll.u32 %v14505_v34, %v5927_v7 }
 0x9d1   :  { %v5931_v8 = vshrl.u32 %v14504_v50, %v5928_v37  ;;  %v5934_v18 = vshrl.u32 %v14505_v34, %v5928_v37  ;;  %v5937_v49 = vshrl.u32 %v14506_v63, %v5928_v37  ;;  %v5939_v62 = vshll.u32 %v14506_v63, %v5927_v7 }
 0x9d2   :  { %v13110_v55 = vpop.eup %8423  ;;  %v5875_v40 = vsub.s32 0, %v13102_v35  ;;  %v5940_v42 = vshrl.u32 %v14352_v9, %v5928_v37  ;;  %v6332_v13 = vand.u32 2139095040, %v13069_v0  ;;  %v5942_v44 = vshll.u32 %v14352_v9, %v5927_v7 }
 0x9d3   :  { %v5932_v11 = vor.u32 %v5931_v8, %v5930_v4  ;;  %v5935_v53 = vor.u32 %v5934_v18, %v5933_v60  ;;  %v5938_v57 = vor.u32 %v5937_v49, %v5936_v23  ;;  %v5943_v5 = vshrl.u32 %v14353_v20, %v5928_v37 }
 0x9d4   :  { %v7664_v12 = vmin.u32 %v5875_v40, %v13102_v35  ;;  %v5941_v59 = vor.u32 %v5940_v42, %v5939_v62  ;;  %v13123_v38 = vadd.s32 127, %v7029_v25  ;;  %v5929_v36 = vshrl.u32 %v14348_v2, %v5928_v37 }
 0x9d5   :  { %v13121_v45 = vpop.eup %8425  ;;  %vm5945_vm11 = vcmp.lt.s32.totalorder %v5926_v28, 1  ;;  %v6235_v41 = vadd.s32 1, %v7679_v51  ;;  %v5944_v60 = vor.u32 %v5943_v5, %v5942_v44  ;;  %vm5946_vm1 = vcmp.lt.s32.totalorder %v5926_v28, 2 }
 0x9d6   :  { %v5877_v4 = vclz %v7664_v12  ;;  %vm5948_vm14 = vcmp.lt.s32.totalorder %v5926_v28, 4  ;;  %vm5947_vm4 = vcmp.lt.s32.totalorder %v5926_v28, 3  ;;  %v5953_v18 = vsel %vm5945_vm11, %v5932_v11, %v5935_v53 }
 0x9d7   :  { %v5950_v8 = vsel %vm5948_vm14, %v5938_v57, 2102212464  ;;  %v5954_v23 = vsel %vm5948_vm14, %v5941_v59, 920167782  ;;  %v5949_v7 = vsel %vm5945_vm11, %v5929_v36, %v5932_v11  ;;  %v5957_v62 = vsel %vm5945_vm11, %v5935_v53, %v5938_v57 }
 0x9d8   :  { %v7665_v49 = vadd.s32 4294967294, %v5877_v4  ;;  %v5955_v40 = vsel %vm5947_vm4, %v5938_v57, %v5954_v23  ;;  %v5951_v42 = vsel %vm5947_vm4, %v5935_v53, %v5950_v8  ;;  %v5958_v54 = vsel %vm5948_vm14, %v5944_v60, 1326507024 }
 0x9d9   :  { %v5956_v25 = vsel %vm5946_vm1, %v5953_v18, %v5955_v40  ;;  %vm6236_vm2 = vcmp.gt.s32.totalorder %v6235_v41, 0  ;;  %v5959_v37 = vsel %vm5947_vm4, %v5941_v59, %v5958_v54  ;;  %v6333_v4 = vshrl.u32 %v6332_v13, 23 }
 0x9da   :  { %vm7666_vm3 = vcmp.lt.s32.totalorder %v7665_v49, 0  ;;  %v13128_v51 = vmul.u32.u64.low %v13092_v22, %v5956_v25  ;;  %v13129_v12 = vmul.u32.u64.high %v13092_v22, %v5956_v25, %v13128_v51  ;;  %v5960_v5 = vsel %vm5946_vm1, %v5957_v62, %v5959_v37 }
 0x9db   :  { %v5880_v44 = vsel %vm7666_vm3, 0, %v7665_v49  ;;  %v6237_v52 = vsel %vm6236_vm2, %v6235_v41, 0  ;;  %v5952_v53 = vsel %vm5946_vm1, %v5949_v7, %v5951_v42  ;;  %v13140_v59 = vshll.u32 %v6233_v29, 8 }
 0x9dc   :  { %v5881_v36 = vsub.s32 32, %v5880_v44  ;;  %v5885_v11 = vsub.s32 4294967266, %v5880_v44  ;;  %v13134_v57 = vshrl.u32 %v6237_v52, 5  ;;  %v6239_v54 = vand.u32 31, %v6237_v52 }
 0x9dd   :  { %v13137_v60 = vmul.u32.u64.low %v13092_v22, %v5960_v5  ;;  %v13138_v8 = vmul.u32.u64.high %v13092_v22, %v5960_v5, %v13137_v60  ;;  %v13143_v18 = vshrl.u32 %v13090_v47, %v7025_v3  ;;  %v7031_v23 = vshll.u32 %v13123_v38, 23 }
 0x9de   :  { %v5886_v41 = vadd.s32 127, %v5885_v11  ;;  %v5971_v13 = vadd.s32 1, %v13129_v12  ;;  %v5882_v28 = vshll.u32 %v13102_v35, %v5880_v44  ;;  %v5968_v49 = vmul.u32 %v13092_v22, %v5952_v53 }
 0x9df   :  { %v6240_v7 = vsub.s32 32, %v6239_v54  ;;  %v7683_v40 = vadd.s32 4294967169, %v6333_v4  ;;  %v5883_v62 = vshrl.u32 %v13095_v33, %v5881_v36  ;;  %v6242_v29 = vshll.u32 %v14348_v2, %v6239_v54 }
 0x9e0   :  { %v5887_v42 = vshll.u32 %v5886_v41, 23  ;;  %vm6257_vm8 = vcmp.lt.s32.totalorder %v13134_v57, 1  ;;  %vm5970_vm7 = vc.u32 %v13138_v8, %v13128_v51  ;;  %v6245_v3 = vshll.u32 %v14504_v50, %v6239_v54 }
 0x9e1   :  { %v6243_v47 = vshrl.u32 %v14504_v50, %v6240_v7  ;;  %v6248_v35 = vshll.u32 %v14505_v34, %v6239_v54  ;;  %v5972_v22 = vsel %vm5970_vm7, %v5971_v13, %v13129_v12  ;;  %v6246_v38 = vshrl.u32 %v14505_v34, %v6240_v7 }
 0x9e2   :  { %v5888_v52 = vor.u32 4788187, %v5887_v42  ;;  %v6251_v33 = vshll.u32 %v14506_v63, %v6239_v54  ;;  %v5973_v25 = vadd.s32 %v5972_v22, %v5968_v49  ;;  %v6249_v44 = vshrl.u32 %v14506_v63, %v6240_v7 }
 0x9e3   :  { %v6244_v37 = vor.u32 %v6243_v47, %v6242_v29  ;;  %v6252_v5 = vshrl.u32 %v14352_v9, %v6240_v7  ;;  %v5884_v4 = vor.u32 %v5883_v62, %v5882_v28  ;;  %v6247_v36 = vor.u32 %v6246_v38, %v6245_v3 }
 0x9e4   :  { %v6254_v11 = vshll.u32 %v14352_v9, %v6239_v54  ;;  %v6255_v53 = vshrl.u32 %v14353_v20, %v6240_v7  ;;  %v5974_v60 = vadd.s32 536870912, %v5973_v25  ;;  %v6241_v41 = vshrl.u32 %v14348_v2, %v6240_v7 }
 0x9e5   :  { %v6250_v12 = vor.u32 %v6249_v44, %v6248_v35  ;;  %v6253_v13 = vor.u32 %v6252_v5, %v6251_v33  ;;  %v5889_v42 = vand.u32 2147483647, %v5888_v52  ;;  %vm6259_vm0 = vcmp.lt.s32.totalorder %v13134_v57, 3 }
 0x9e6   :  { %v6256_v43 = vor.u32 %v6255_v53, %v6254_v11  ;;  %vm6260_vm11 = vcmp.lt.s32.totalorder %v13134_v57, 4  ;;  %v13167_v49 = vshrl.u32 %v5974_v60, 30  ;;  %v6265_v28 = vsel %vm6257_vm8, %v6244_v37, %v6247_v36 }
 0x9e7   :  { %v6262_v29 = vsel %vm6260_vm11, %v6250_v12, 2102212464  ;;  %v6266_v54 = vsel %vm6260_vm11, %v6253_v13, 920167782  ;;  %v5891_v62 = vcvt.s32.f32 %v5884_v4  ;;  %vm6258_vm1 = vcmp.lt.s32.totalorder %v13134_v57, 2 }
 0x9e8   :  { %14545 = vst [vmem:[#allocation26_spill] sm:$0xff] %v13167_v49  ;;  %v6267_v7 = vsel %vm6259_vm0, %v6250_v12, %v6266_v54  ;;  %v6269_v47 = vsel %vm6257_vm8, %v6247_v36, %v6250_v12  ;;  %vm14125_vm14 = vcmp.lt.s32.totalorder %v12648_v19, 0  ;;  %vm5811_vm4 = vcmp.lt.s32.totalorder %v12812_v58, 0 }
 0x9e9   :  { %v5976_v3 = vshll.u32 %v13167_v49, 30  ;;  %v6261_v35 = vsel %vm6257_vm8, %v6241_v41, %v6244_v37  ;;  %v6268_v52 = vsel %vm6258_vm1, %v6265_v28, %v6267_v7  ;;  %v6270_v22 = vsel %vm6260_vm11, %v6256_v43, 1326507024 }
 0x9ea   :  { %v6263_v38 = vsel %vm6259_vm0, %v6247_v36, %v6262_v29  ;;  %v6271_v33 = vsel %vm6259_vm0, %v6253_v13, %v6270_v22  ;;  %v13188_v44 = vmul.u32.u64.low %v13140_v59, %v6268_v52  ;;  %v13189_v5 = vmul.u32.u64.high %v13140_v59, %v6268_v52, %v13188_v44 }
 0x9eb   :  { %v7032_v4 = vor.u32 4788187, %v7031_v23  ;;  %v5892_v11 = vmul.f32 %v5891_v62, %v5889_v42  ;;  %v13192_v53 = vsub.s32 %v5973_v25, %v5976_v3  ;;  %v6272_v37 = vsel %vm6258_vm1, %v6269_v47, %v6271_v33 }
 0x9ec   :  { %v6621_v43 = vxor.u32 2147483648, %v13076_v21  ;;  %v14546_v36 = vsub.s32 4, %v12901_v1  ;;  %v13205_v41 = vmul.u32.u64.low %v13140_v59, %v6272_v37  ;;  %v13206_v12 = vmul.u32.u64.high %v13140_v59, %v6272_v37, %v13205_v41  ;;  %v13244_v37 = vpop.permute.xlu0 %5562 }
 0x9ed   :  { %v14547_v23 = vshll.u32 %v13001_v16, %v13079_v48  ;;  %v5979_v13 = vsub.s32 0, %v13192_v53  ;;  %v6264_v42 = vsel %vm6258_vm1, %v6261_v35, %v6263_v38  ;;  %v6339_v29 = vadd.s32 1, %v7683_v40 }
 0x9ee   :  { %v13202_v60 = vsel %vm6851_vm12, %v14546_v36, %v12901_v1  ;;  %8427 = vcosq.f32 %v13086_v6  ;;  %v14548_v1 = vand.u32 2147483647, %v12812_v58  ;;  %v14549_v28 = vmov 0 }
 0x9ef   :  { %v7028_v25 = vor.u32 %v13143_v18, %v14547_v23  ;;  %v5895_v54 = vsub.s32 4, %v13081_v31  ;;  %v6283_v16 = vadd.s32 1, %v13189_v5  ;;  %v14552_v48 = vand.u32 2147483647, %v13069_v0 }
 0x9f0   :  { %vm13218_vm12 = vcmp.le.f32.partialorder %v14548_v1, 0.7853982  ;;  %v7033_v62 = vand.u32 2147483647, %v7032_v4  ;;  %v5893_v7 = vxor.u32 2147483648, %v5892_v11  ;;  %v7668_v57 = vmin.u32 %v5979_v13, %v13192_v53 }
 0x9f1   :  { %v14550_v28 = vsel %vm13218_vm12, 4294967295, %v14549_v28  ;;  %v6336_v18 = vand.u32 8388607, %v14552_v48  ;;  %vm6340_vm2 = vcmp.gt.s32.totalorder %v6339_v29, 0  ;;  %v6280_v40 = vmul.u32 %v13140_v59, %v6264_v42 }
 0x9f2   :  { %14551 = vst [vmem:[#allocation37_spill] sm:$0xff] %v14550_v28  ;;  %vm6282_vm3 = vc.u32 %v13206_v12, %v13188_v44  ;;  %v6341_v47 = vsel %vm6340_vm2, %v6339_v29, 0  ;;  %v5527_v3 = vmul.f32 %v12423_v56, %v12701_v17  ;;  %v7035_v35 = vcvt.s32.f32 %v7028_v25 }
 0x9f3   :  { %v5981_v52 = vclz %v7668_v57  ;;  %v6284_v22 = vsel %vm6282_vm3, %v6283_v16, %v13189_v5  ;;  %v6343_v38 = vand.u32 31, %v6341_v47  ;;  %v13236_v33 = vsel %vm14125_vm14, %v6621_v43, %v13076_v21 }
 0x9f4   :  { %8429 = vsinq.f32 %v13086_v6  ;;  %v13242_v59 = vsel %vm5811_vm4, %v5895_v54, %v13081_v31  ;;  %v6285_v4 = vadd.s32 %v6284_v22, %v6280_v40  ;;  %v13246_v17 = vmul.f32 %v7035_v35, %v7033_v62 }
 0x9f5   :  { %14553 = vst [vmem:[#allocation32_spill] sm:$0xff] %v13242_v59  ;;  %v5969_v5 = vadd.s32 %v13128_v51, %v13138_v8  ;;  %v7669_v36 = vadd.s32 4294967294, %v5981_v52  ;;  %v6344_v41 = vsub.s32 32, %v6343_v38  ;;  %v5894_v21 = vsel %vm5811_vm4, %v5893_v7, %v5892_v11 }
 0x9f6   :  { %v6286_v43 = vadd.s32 536870912, %v6285_v4  ;;  %v6337_v6 = vor.u32 8388608, %v6336_v18  ;;  %v13253_v23 = vadd.f32 %v13244_v37, %v5527_v3  ;;  %v6346_v31 = vshll.u32 %v14348_v2, %v6343_v38 }
 0x9f7   :  { %v6347_v25 = vshrl.u32 %v14504_v50, %v6344_v41  ;;  %v6349_v13 = vshll.u32 %v14504_v50, %v6343_v38  ;;  %v6350_v42 = vshrl.u32 %v14505_v34, %v6344_v41  ;;  %vm7670_vm8 = vcmp.lt.s32.totalorder %v7669_v36, 0 }
 0x9f8   :  { %14554 = vst [vmem:[#allocation39_spill] sm:$0xff] %v13253_v23  ;;  %v13259_v51 = vshrl.u32 %v6286_v43, 30  ;;  %v6353_v8 = vshrl.u32 %v14506_v63, %v6344_v41  ;;  %v6356_v11 = vshrl.u32 %v14352_v9, %v6344_v41  ;;  %v5897_v29 = vsel %vm13218_vm12, %v12812_v58, %v5894_v21  ;;  %v13268_v48 = vpop.eup %8427  ;;  %v14556_v43 = vld [vmem:[#allocation7_spill] sm:$0xff] }
 0x9f9   :  { %v6342_v1 = vshrl.u32 %v6341_v47, 5  ;;  %v6352_v54 = vshll.u32 %v14505_v34, %v6343_v38  ;;  %v6355_v16 = vshll.u32 %v14506_v63, %v6343_v38  ;;  %14555 = vst [vmem:[#allocation24_spill] sm:$0xff] %v13268_v48  ;;  %v6348_v62 = vor.u32 %v6347_v25, %v6346_v31 }
 0x9fa   :  { %v6288_v18 = vshll.u32 %v13259_v51, 30  ;;  %v6351_v7 = vor.u32 %v6350_v42, %v6349_v13  ;;  %v6358_v57 = vshll.u32 %v14352_v9, %v6343_v38  ;;  %v5984_v40 = vsel %vm7670_vm8, 0, %v7669_v36 }
 0x9fb   :  { %v6354_v3 = vor.u32 %v6353_v8, %v6352_v54  ;;  %v6357_v35 = vor.u32 %v6356_v11, %v6355_v16  ;;  %v6359_v52 = vshrl.u32 %v14353_v20, %v6344_v41  ;;  %v13275_v47 = vshll.u32 %v6337_v6, 8 }
 0x9fc   :  { %v13273_v22 = vsub.s32 %v6285_v4, %v6288_v18  ;;  %v5528_v58 = vmul.f32 %v12423_v56, %v14556_v43  ;;  %v6345_v28 = vshrl.u32 %v14348_v2, %v6344_v41  ;;  %vm6361_vm7 = vcmp.lt.s32.totalorder %v6342_v1, 1 }
 0x9fd   :  { %v6360_v31 = vor.u32 %v6359_v52, %v6358_v57  ;;  %v6644_v38 = vand.u32 2139095040, %v13253_v23  ;;  %vm14124_vm0 = vcmp.lt.s32.totalorder %v12767_v10, 0  ;;  %v5985_v25 = vsub.s32 32, %v5984_v40 }
 0x9fe   :  { %v13282_v36 = vpop.eup %8429  ;;  %v6291_v4 = vsub.s32 0, %v13273_v22  ;;  %vm6364_vm11 = vcmp.lt.s32.totalorder %v6342_v1, 4  ;;  %v6369_v6 = vsel %vm6361_vm7, %v6348_v62, %v6351_v7  ;;  %v5989_v13 = vsub.s32 4294967266, %v5984_v40 }
 0x9ff   :  { %14557 = vst [vmem:[#allocation23_spill] sm:$0xff] %v13282_v36  ;;  %vm6363_vm1 = vcmp.lt.s32.totalorder %v6342_v1, 3  ;;  %v6366_v42 = vsel %vm6364_vm11, %v6354_v3, 2102212464  ;;  %v6370_v56 = vsel %vm6364_vm11, %v6357_v35, 920167782  ;;  %v6373_v11 = vsel %vm6361_vm7, %v6351_v7, %v6354_v3 }
 0xa00   :  { %v7680_v41 = vmin.u32 %v6291_v4, %v13273_v22  ;;  %vm6362_vm4 = vcmp.lt.s32.totalorder %v6342_v1, 2  ;;  %v6371_v8 = vsel %vm6363_vm1, %v6354_v3, %v6370_v56  ;;  %v6365_v54 = vsel %vm6361_vm7, %v6345_v28, %v6348_v62 }
 0xa01   :  { %v6367_v16 = vsel %vm6363_vm1, %v6351_v7, %v6366_v42  ;;  %v6372_v18 = vsel %vm6362_vm4, %v6369_v6, %v6371_v8  ;;  %v6374_v57 = vsel %vm6364_vm11, %v6360_v31, 1326507024  ;;  %v7037_v49 = vxor.u32 2147483648, %v13246_v17 }
 0xa02   :  { %v6293_v52 = vclz %v7680_v41  ;;  %v6375_v43 = vsel %vm6363_vm1, %v6357_v35, %v6374_v57  ;;  %v13292_v21 = vmul.u32.u64.low %v13275_v47, %v6372_v18  ;;  %v13293_v59 = vmul.u32.u64.high %v13275_v47, %v6372_v18, %v13292_v21 }
 0xa03   :  { %v5987_v4 = vshrl.u32 %v5969_v5, %v5985_v25  ;;  %v6376_v56 = vsel %vm6362_vm4, %v6373_v11, %v6375_v43  ;;  %v13299_v3 = vadd.f32 %v13244_v37, %v5528_v58  ;;  %v6645_v31 = vshrl.u32 %v6644_v38, 23 }
 0xa04   :  { %v7681_v28 = vadd.s32 4294967294, %v6293_v52  ;;  %v13302_v62 = vmul.u32.u64.low %v13275_v47, %v6376_v56  ;;  %v13303_v7 = vmul.u32.u64.high %v13275_v47, %v6376_v56, %v13302_v62  ;;  %8431 = vcosq.f32 %v5897_v29  ;;  %v14561_v56 = vld [vmem:[#allocation54_spill] sm:$0xff] }
 0xa05   :  { %14558 = vst [vmem:[#allocation17_spill] sm:$0xff] %v13299_v3  ;;  %v5986_v35 = vshll.u32 %v13192_v53, %v5984_v40  ;;  %v5990_v6 = vadd.s32 127, %v5989_v13  ;;  %v6368_v42 = vsel %vm6362_vm4, %v6365_v54, %v6367_v16  ;;  %v6387_v5 = vadd.s32 1, %v13293_v59 }
 0xa06   :  { %vm7682_vm2 = vcmp.lt.s32.totalorder %v7681_v28, 0  ;;  %v7695_v25 = vadd.s32 4294967169, %v6645_v31  ;;  %v14559_v41 = vand.u32 2147483647, %v13253_v23  ;;  %v13313_v37 = vsel %vm14124_vm0, %v7037_v49, %v13246_v17 }
 0xa07   :  { %8433 = vsinq.f32 %v5897_v29  ;;  %v6296_v38 = vsel %vm7682_vm2, 0, %v7681_v28  ;;  %v6748_v8 = vand.u32 2139095040, %v13299_v3  ;;  %v13316_v53 = vor.u32 %v5987_v4, %v5986_v35  ;;  %v14560_v4 = vld [vmem:[#allocation9_spill] sm:$0xff] }
 0xa08   :  { %v6648_v58 = vand.u32 8388607, %v14559_v41  ;;  %v6281_v1 = vadd.s32 %v13188_v44, %v13206_v12  ;;  %v6297_v40 = vsub.s32 32, %v6296_v38  ;;  %v6301_v13 = vsub.s32 4294967266, %v6296_v38 }
 0xa09   :  { %v5991_v11 = vshll.u32 %v5990_v6, 23  ;;  %v6384_v54 = vmul.u32 %v13275_v47, %v6368_v42  ;;  %vm6386_vm3 = vc.u32 %v13303_v7, %v13292_v21  ;;  %v6651_v16 = vadd.s32 1, %v7695_v25  ;;  %v14562_v47 = vld [vmem:[#allocation36_spill] sm:$0xff] }
 0xa0a   :  { %v6302_v49 = vadd.s32 127, %v6301_v13  ;;  %v6388_v17 = vsel %vm6386_vm3, %v6387_v5, %v13293_v59  ;;  %v6649_v29 = vor.u32 8388608, %v6648_v58  ;;  %v14109_v18 = vand.u32 2147483647, %v13299_v3 }
 0xa0b   :  { %v6299_v57 = vshrl.u32 %v6281_v1, %v6297_v40  ;;  %v6389_v52 = vadd.s32 %v6388_v17, %v6384_v54  ;;  %vm6652_vm8 = vcmp.gt.s32.totalorder %v6651_v16, 0  ;;  %v6749_v43 = vshrl.u32 %v6748_v8, 23 }
 0xa0c   :  { %v6303_v44 = vshll.u32 %v6302_v49, 23  ;;  %v6653_v12 = vsel %vm6652_vm8, %v6651_v16, 0  ;;  %v5531_v28 = vmul.f32 %v14561_v56, %v14560_v4  ;;  %v13329_v62 = vmul.f32 %v14561_v56, %v14562_v47  ;;  %v13358_v56 = vpop.permute.xlu1 %5566 }
 0xa0d   :  { %v6298_v31 = vshll.u32 %v13273_v22, %v6296_v38  ;;  %v6390_v35 = vadd.s32 536870912, %v6389_v52  ;;  %v6655_v6 = vand.u32 31, %v6653_v12  ;;  %v13333_v42 = vor.u32 4788187, %v5991_v11 }
 0xa0e   :  { %v13336_v25 = vshll.u32 %v6649_v29, 8  ;;  %v13340_v41 = vand.u32 8388607, %v14109_v18  ;;  %v13342_v58 = vpop.eup %8431  ;;  %v7699_v38 = vadd.s32 4294967169, %v6749_v43  ;;  %v6304_v40 = vor.u32 4788187, %v6303_v44 }
 0xa0f   :  { %14563 = vst [vmem:[#allocation15_spill] sm:$0xff] %v13342_v58  ;;  %v6300_v8 = vor.u32 %v6299_v57, %v6298_v31  ;;  %v13344_v1 = vshrl.u32 %v6390_v35, 30  ;;  %v6656_v22 = vsub.s32 32, %v6655_v6  ;;  %v6654_v13 = vshrl.u32 %v6653_v12, 5 }
 0xa10   :  { %v6658_v11 = vshll.u32 %v14348_v2, %v6655_v6  ;;  %v6661_v54 = vshll.u32 %v14504_v50, %v6655_v6  ;;  %v6664_v57 = vshll.u32 %v14505_v34, %v6655_v6  ;;  %v6667_v43 = vshll.u32 %v14506_v63, %v6655_v6 }
 0xa11   :  { %14564 = vst [vmem:[#allocation34_spill] sm:$0xff] %v13344_v1  ;;  %v13348_v16 = vpop.eup %8433  ;;  %v6392_v49 = vshll.u32 %v13344_v1, 30  ;;  %v6659_v17 = vshrl.u32 %v14504_v50, %v6656_v22  ;;  %v6662_v29 = vshrl.u32 %v14505_v34, %v6656_v22  ;;  %v6665_v4 = vshrl.u32 %v14506_v63, %v6656_v22 }
 0xa12   :  { %14565 = vst [vmem:[#allocation30_spill] sm:$0xff] %v13348_v16  ;;  %v6668_v44 = vshrl.u32 %v14352_v9, %v6656_v22  ;;  %v6671_v12 = vshrl.u32 %v14353_v20, %v6656_v22  ;;  %v6670_v18 = vshll.u32 %v14352_v9, %v6655_v6  ;;  %v6305_v59 = vand.u32 2147483647, %v6304_v40 }
 0xa13   :  { %v13360_v47 = vsub.s32 %v6389_v52, %v6392_v49  ;;  %v6660_v31 = vor.u32 %v6659_v17, %v6658_v11  ;;  %v6663_v35 = vor.u32 %v6662_v29, %v6661_v54  ;;  %v6666_v5 = vor.u32 %v6665_v4, %v6664_v57 }
 0xa14   :  { %v6669_v58 = vor.u32 %v6668_v44, %v6667_v43  ;;  %v13364_v16 = vadd.f32 %v13358_v56, %v5531_v28  ;;  %v6672_v3 = vor.u32 %v6671_v12, %v6670_v18  ;;  %vm6673_vm7 = vcmp.lt.s32.totalorder %v6654_v13, 1 }
 0xa15   :  { %v6395_v1 = vsub.s32 0, %v13360_v47  ;;  %v6755_v48 = vadd.s32 1, %v7699_v38  ;;  %v6307_v61 = vcvt.s32.f32 %v6300_v8  ;;  %v6657_v36 = vshrl.u32 %v14348_v2, %v6656_v22 }
 0xa16   :  { %vm6676_vm11 = vcmp.lt.s32.totalorder %v6654_v13, 4  ;;  %v6681_v52 = vsel %vm6673_vm7, %v6660_v31, %v6663_v35  ;;  %vm6227_vm1 = vcmp.lt.s32.totalorder %v13033_v15, 0  ;;  %vm6675_vm4 = vcmp.lt.s32.totalorder %v6654_v13, 3 }
 0xa17   :  { %v7684_v6 = vmin.u32 %v6395_v1, %v13360_v47  ;;  %v6678_v40 = vsel %vm6676_vm11, %v6666_v5, 2102212464  ;;  %v6682_v11 = vsel %vm6676_vm11, %v6669_v58, 920167782  ;;  %v6308_v28 = vmul.f32 %v6307_v61, %v6305_v59 }
 0xa18   :  { %vm6674_vm2 = vcmp.lt.s32.totalorder %v6654_v13, 2  ;;  %v6683_v54 = vsel %vm6675_vm4, %v6666_v5, %v6682_v11  ;;  %v6685_v18 = vsel %vm6673_vm7, %v6663_v35, %v6666_v5  ;;  %v6677_v8 = vsel %vm6673_vm7, %v6657_v36, %v6660_v31 }
 0xa19   :  { %v6397_v49 = vclz %v7684_v6  ;;  %v6684_v22 = vsel %vm6674_vm2, %v6681_v52, %v6683_v54  ;;  %v6686_v38 = vsel %vm6676_vm11, %v6672_v3, 1326507024  ;;  %v6679_v17 = vsel %vm6675_vm4, %v6663_v35, %v6678_v40 }
 0xa1a   :  { %v6687_v29 = vsel %vm6675_vm4, %v6669_v58, %v6686_v38  ;;  %v13375_v57 = vmul.u32.u64.low %v13336_v25, %v6684_v22  ;;  %v13376_v4 = vmul.u32.u64.high %v13336_v25, %v6684_v22, %v13375_v57  ;;  %v6753_v59 = vor.u32 8388608, %v13340_v41 }
 0xa1b   :  { %v7685_v1 = vadd.s32 4294967294, %v6397_v49  ;;  %v6688_v61 = vsel %vm6674_vm2, %v6685_v18, %v6687_v29  ;;  %vm6756_vm3 = vcmp.gt.s32.totalorder %v6755_v48, 0  ;;  %v6309_v5 = vxor.u32 2147483648, %v6308_v28 }
 0xa1c   :  { %v13382_v43 = vmul.u32.u64.low %v13336_v25, %v6688_v61  ;;  %v13383_v36 = vmul.u32.u64.high %v13336_v25, %v6688_v61, %v13382_v43  ;;  %v6757_v44 = vsel %vm6756_vm3, %v6755_v48, 0  ;;  %v6680_v3 = vsel %vm6674_vm2, %v6677_v8, %v6679_v17  ;;  %v14632_v61 = vld [vmem:[#allocation8_spill] sm:$0xff] }
 0xa1d   :  { %vm7686_vm8 = vcmp.lt.s32.totalorder %v7685_v1, 0  ;;  %v6759_v58 = vand.u32 31, %v6757_v44  ;;  %v14120_v12 = vand.u32 2147483647, %v13364_v16  ;;  %v5993_v31 = vand.u32 2147483647, %v13333_v42 }
 0xa1e   :  { %v6385_v35 = vadd.s32 %v13292_v21, %v13303_v7  ;;  %v6400_v52 = vsel %vm7686_vm8, 0, %v7685_v1  ;;  %v6699_v41 = vadd.s32 1, %v13376_v4  ;;  %v13391_v54 = vshll.u32 %v6753_v59, 8 }
 0xa1f   :  { %v6401_v6 = vsub.s32 32, %v6400_v52  ;;  %v6405_v40 = vsub.s32 4294967266, %v6400_v52  ;;  %v6760_v11 = vsub.s32 32, %v6759_v58  ;;  %v6310_v48 = vsel %vm6227_vm1, %v6309_v5, %v6308_v28 }
 0xa20   :  { %v6696_v13 = vmul.u32 %v13336_v25, %v6680_v3  ;;  %vm6698_vm7 = vc.u32 %v13383_v36, %v13375_v57  ;;  %v7060_v42 = vand.u32 2139095040, %v13364_v16  ;;  %v6758_v7 = vshrl.u32 %v6757_v44, 5 }
 0xa21   :  { %v6406_v18 = vadd.s32 127, %v6405_v40  ;;  %v6700_v21 = vsel %vm6698_vm7, %v6699_v41, %v13376_v4  ;;  %v13402_v49 = vand.u32 8388607, %v14120_v12  ;;  %v6762_v22 = vshll.u32 %v14348_v2, %v6759_v58 }
 0xa22   :  { %v6701_v8 = vadd.s32 %v6700_v21, %v6696_v13  ;;  %v6763_v28 = vshrl.u32 %v14504_v50, %v6760_v11  ;;  %v6766_v25 = vshrl.u32 %v14505_v34, %v6760_v11  ;;  %v6403_v38 = vshrl.u32 %v6385_v35, %v6401_v6 }
 0xa23   :  { %v6765_v17 = vshll.u32 %v14504_v50, %v6759_v58  ;;  %v6768_v29 = vshll.u32 %v14505_v34, %v6759_v58  ;;  %v6769_v1 = vshrl.u32 %v14506_v63, %v6760_v11  ;;  %v14566_v4 = vand.u32 2147483647, %v13033_v15 }
 0xa24   :  { %v6402_v59 = vshll.u32 %v13360_v47, %v6400_v52  ;;  %v6702_v5 = vadd.s32 536870912, %v6701_v8  ;;  %v6771_v43 = vshll.u32 %v14506_v63, %v6759_v58  ;;  %v6772_v44 = vshrl.u32 %v14352_v9, %v6760_v11 }
 0xa25   :  { %vm13412_vm11 = vcmp.le.f32.partialorder %v14566_v4, 0.7853982  ;;  %v6407_v3 = vshll.u32 %v6406_v18, 23  ;;  %v6764_v35 = vor.u32 %v6763_v28, %v6762_v22  ;;  %v6767_v41 = vor.u32 %v6766_v25, %v6765_v17 }
 0xa26   :  { %v6770_v6 = vor.u32 %v6769_v1, %v6768_v29  ;;  %v13419_v40 = vshrl.u32 %v6702_v5, 30  ;;  %v6773_v13 = vor.u32 %v6772_v44, %v6771_v43  ;;  %v6774_v21 = vshll.u32 %v14352_v9, %v6759_v58 }
 0xa27   :  { %v6775_v4 = vshrl.u32 %v14353_v20, %v6760_v11  ;;  %v6404_v12 = vor.u32 %v6403_v38, %v6402_v59  ;;  %v6761_v14 = vshrl.u32 %v14348_v2, %v6760_v11  ;;  %v7061_v47 = vshrl.u32 %v7060_v42, 23 }
 0xa28   :  { %v13426_v52 = vadd.f32 %v13358_v56, %v13329_v62  ;;  %v6704_v18 = vshll.u32 %v13419_v40, 30  ;;  %vm6777_vm4 = vcmp.lt.s32.totalorder %v6758_v7, 1  ;;  %vm6780_vm2 = vcmp.lt.s32.totalorder %v6758_v7, 4 }
 0xa29   :  { %v6776_v22 = vor.u32 %v6775_v4, %v6774_v21  ;;  %vm6779_vm3 = vcmp.lt.s32.totalorder %v6758_v7, 3  ;;  %v6782_v28 = vsel %vm6780_vm2, %v6770_v6, 2102212464  ;;  %v6785_v25 = vsel %vm6777_vm4, %v6764_v35, %v6767_v41 }
 0xa2a   :  { %v6786_v17 = vsel %vm6780_vm2, %v6773_v13, 920167782  ;;  %v6408_v58 = vor.u32 4788187, %v6407_v3  ;;  %v13429_v29 = vsub.s32 %v6701_v8, %v6704_v18  ;;  %vm6778_vm8 = vcmp.lt.s32.totalorder %v6758_v7, 2 }
 0xa2b   :  { %v6787_v11 = vsel %vm6779_vm3, %v6770_v6, %v6786_v17  ;;  %v6781_v42 = vsel %vm6777_vm4, %v6761_v14, %v6764_v35  ;;  %v6783_v38 = vsel %vm6779_vm3, %v6767_v41, %v6782_v28  ;;  %v6789_v56 = vsel %vm6777_vm4, %v6767_v41, %v6770_v6 }
 0xa2c   :  { %v6788_v62 = vsel %vm6778_vm8, %v6785_v25, %v6787_v11  ;;  %v6707_v1 = vsub.s32 0, %v13429_v29  ;;  %v6790_v59 = vsel %vm6780_vm2, %v6776_v22, 1326507024  ;;  %v14569_v8 = vcvt.s32.f32 %v13316_v53 }
 0xa2d   :  { %v13436_v5 = vmul.u32.u64.low %v13391_v54, %v6788_v62  ;;  %v13437_v43 = vmul.u32.u64.high %v13391_v54, %v6788_v62, %v13436_v5  ;;  %v13447_v14 = vsel %vm13412_vm11, %v13033_v15, %v6310_v48  ;;  %v6791_v3 = vsel %vm6779_vm3, %v6773_v13, %v6790_v59 }
 0xa2e   :  { %v13442_v44 = vmul.f32 %v14569_v8, %v5993_v31  ;;  %v7711_v35 = vadd.s32 4294967169, %v7061_v47  ;;  %v6409_v41 = vand.u32 2147483647, %v6408_v58  ;;  %v6411_v6 = vcvt.s32.f32 %v6404_v12  ;;  %v7266_v12 = vld [vmem:[%s13915_s8] sm:$0xf] }
 0xa2f   :  { %v7696_v21 = vmin.u32 %v6707_v1, %v13429_v29  ;;  %v6792_v4 = vsel %vm6778_vm8, %v6789_v56, %v6791_v3  ;;  %v6784_v18 = vsel %vm6778_vm8, %v6781_v42, %v6783_v38  ;;  %v6803_v48 = vadd.s32 1, %v13437_v43  ;;  %7269 = vperm.xlu0 %8286, %v7266_v12  }
 0xa30   :  { %v13454_v53 = vmul.u32.u64.low %v13391_v54, %v6792_v4  ;;  %v13455_v31 = vmul.u32.u64.high %v13391_v54, %v6792_v4, %v13454_v53  ;;  %v7067_v22 = vadd.s32 1, %v7711_v35  ;;  %v7065_v25 = vor.u32 8388608, %v13402_v49 }
 0xa31   :  { %v6709_v28 = vclz %v7696_v21  ;;  %v7164_v13 = vand.u32 2139095040, %v13426_v52  ;;  %8435 = vcosq.f32 %v13447_v14  ;;  %v6697_v7 = vadd.s32 %v13375_v57, %v13383_v36 }
 0xa32   :  { %vm7068_vm7 = vcmp.gt.s32.totalorder %v7067_v22, 0  ;;  %v13467_v17 = vmul.f32 %v6411_v6, %v6409_v41  ;;  %v6800_v42 = vmul.u32 %v13391_v54, %v6784_v18  ;;  %vm6802_vm4 = vc.u32 %v13455_v31, %v13436_v5 }
 0xa33   :  { %v7697_v58 = vadd.s32 4294967294, %v6709_v28  ;;  %v7069_v11 = vsel %vm7068_vm7, %v7067_v22, 0  ;;  %v14123_v62 = vand.u32 2147483647, %v13426_v52  ;;  %v6804_v56 = vsel %vm6802_vm4, %v6803_v48, %v13437_v43 }
 0xa34   :  { %v7071_v38 = vand.u32 31, %v7069_v11  ;;  %v13475_v57 = vshll.u32 %v7065_v25, 8  ;;  %v7165_v36 = vshrl.u32 %v7164_v13, 23  ;;  %v6805_v59 = vadd.s32 %v6804_v56, %v6800_v42 }
 0xa35   :  { %vm7698_vm2 = vcmp.lt.s32.totalorder %v7697_v58, 0  ;;  %v13477_v8 = vshrl.u32 %v7069_v11, 5  ;;  %vm14130_vm3 = vcmp.lt.s32.totalorder %v12978_v30, 0  ;;  %vm6643_vm4 = vcmp.lt.s32.totalorder %v13253_v23, 0 }
 0xa36   :  { %v6712_v1 = vsel %vm7698_vm2, 0, %v7697_v58  ;;  %v7072_v3 = vsub.s32 32, %v7071_v38  ;;  %v7074_v6 = vshll.u32 %v14348_v2, %v7071_v38  ;;  %v6806_v21 = vadd.s32 536870912, %v6805_v59 }
 0xa37   :  { %v6713_v35 = vsub.s32 32, %v6712_v1  ;;  %v6714_v54 = vshll.u32 %v13429_v29, %v6712_v1  ;;  %v6717_v41 = vsub.s32 4294967266, %v6712_v1  ;;  %v7077_v18 = vshll.u32 %v14504_v50, %v7071_v38 }
 0xa38   :  { %v7075_v4 = vshrl.u32 %v14504_v50, %v7072_v3  ;;  %v7078_v43 = vshrl.u32 %v14505_v34, %v7072_v3  ;;  %v7080_v28 = vshll.u32 %v14505_v34, %v7071_v38  ;;  %v7081_v48 = vshrl.u32 %v14506_v63, %v7072_v3 }
 0xa39   :  { %v6715_v53 = vshrl.u32 %v6697_v7, %v6713_v35  ;;  %v6718_v22 = vadd.s32 127, %v6717_v41  ;;  %v13486_v25 = vshrl.u32 %v6806_v21, 30  ;;  %v7083_v12 = vshll.u32 %v14506_v63, %v7071_v38 }
 0xa3a   :  { %v7076_v13 = vor.u32 %v7075_v4, %v7074_v6  ;;  %v7079_v29 = vor.u32 %v7078_v43, %v7077_v18  ;;  %v7082_v42 = vor.u32 %v7081_v48, %v7080_v28  ;;  %v7084_v56 = vshrl.u32 %v14352_v9, %v7072_v3 }
 0xa3b   :  { %v6716_v58 = vor.u32 %v6715_v53, %v6714_v54  ;;  %v6719_v11 = vshll.u32 %v6718_v22, 23  ;;  %v13490_v1 = vpop.eup %8435  ;;  %v6808_v7 = vshll.u32 %v13486_v25, 30  ;;  %v7086_v35 = vshll.u32 %v14352_v9, %v7071_v38 }
 0xa3c   :  { %14570 = vst [vmem:[#allocation14_spill] sm:$0xff] %v13490_v1  ;;  %v7087_v41 = vshrl.u32 %v14353_v20, %v7072_v3  ;;  %v7168_v6 = vand.u32 8388607, %v14123_v62  ;;  %v7073_v54 = vshrl.u32 %v14348_v2, %v7072_v3  ;;  %v7085_v4 = vor.u32 %v7084_v56, %v7083_v12 }
 0xa3d   :  { %v6720_v21 = vor.u32 4788187, %v6719_v11  ;;  %v7715_v18 = vadd.s32 4294967169, %v7165_v36  ;;  %v13499_v43 = vsub.s32 %v6805_v59, %v6808_v7  ;;  %vm7089_vm8 = vcmp.lt.s32.totalorder %v13477_v8, 1 }
 0xa3e   :  { %v7088_v53 = vor.u32 %v7087_v41, %v7086_v35  ;;  %vm7092_vm7 = vcmp.lt.s32.totalorder %v13477_v8, 4  ;;  %v6723_v22 = vcvt.s32.f32 %v6716_v58  ;;  %v7097_v48 = vsel %vm7089_vm8, %v7076_v13, %v7079_v29 }
 0xa3f   :  { %v6721_v38 = vand.u32 2147483647, %v6720_v21  ;;  %v7094_v28 = vsel %vm7092_vm7, %v7082_v42, 2102212464  ;;  %v6811_v62 = vsub.s32 0, %v13499_v43  ;;  %vm7091_vm2 = vcmp.lt.s32.totalorder %v13477_v8, 3 }
 0xa40   :  { %v7098_v3 = vsel %vm7092_vm7, %v7085_v4, 920167782  ;;  %v7101_v12 = vsel %vm7089_vm8, %v7079_v29, %v7082_v42  ;;  %vm14128_vm0 = vcmp.lt.s32.totalorder %v13069_v0, 0  ;;  %vm7090_vm14 = vcmp.lt.s32.totalorder %v13477_v8, 2 }
 0xa41   :  { %v7093_v36 = vsel %vm7089_vm8, %v7073_v54, %v7076_v13  ;;  %v7099_v59 = vsel %vm7091_vm2, %v7082_v42, %v7098_v3  ;;  %v7102_v11 = vsel %vm7092_vm7, %v7088_v53, 1326507024  ;;  %v7700_v56 = vmin.u32 %v6811_v62, %v13499_v43 }
 0xa42   :  { %v7095_v7 = vsel %vm7091_vm2, %v7079_v29, %v7094_v28  ;;  %v7100_v58 = vsel %vm7090_vm14, %v7097_v48, %v7099_v59  ;;  %v7103_v35 = vsel %vm7091_vm2, %v7085_v4, %v7102_v11  ;;  %v6724_v41 = vmul.f32 %v6723_v22, %v6721_v38  ;;  %v14573_v28 = vld [vmem:[#allocation3_spill] sm:$0xff] }
 0xa43   :  { %v7104_v21 = vsel %vm7090_vm14, %v7101_v12, %v7103_v35  ;;  %v13514_v49 = vmul.u32.u64.low %v13475_v57, %v7100_v58  ;;  %v13515_v47 = vmul.u32.u64.high %v13475_v57, %v7100_v58, %v13514_v49  ;;  %v6813_v1 = vclz %v7700_v56  ;;  %v14579_v58 = vld [vmem:[#allocation16_spill] sm:$0xff] }
 0xa44   :  { %v13519_v13 = vmul.u32.u64.low %v13475_v57, %v7104_v21  ;;  %v13520_v42 = vmul.u32.u64.high %v13475_v57, %v7104_v21, %v13519_v13  ;;  %v7171_v62 = vadd.s32 1, %v7715_v18  ;;  %v14571_v29 = vxor.u32 2147483648, %v13442_v44 }
 0xa45   :  { %v14572_v4 = vsub.s32 4, %v13259_v51  ;;  %8437 = vsinq.f32 %v13447_v14  ;;  %v7096_v38 = vsel %vm7090_vm14, %v7093_v36, %v7095_v7  ;;  %v6413_v18 = vxor.u32 2147483648, %v13467_v17  ;;  %v14583_v13 = vld [vmem:[#allocation5_spill] sm:$0xff] }
 0xa46   :  { %v13527_v54 = vsel %vm14130_vm3, %v14571_v29, %v13442_v44  ;;  %v7701_v22 = vadd.s32 4294967294, %v6813_v1  ;;  %vm7172_vm8 = vcmp.gt.s32.totalorder %v7171_v62, 0  ;;  %v5791_v48 = vsub.s32 4, %v14573_v28 }
 0xa47   :  { %v13534_v53 = vsel %vm6227_vm1, %v14572_v4, %v13259_v51  ;;  %v14574_v44 = vand.u32 2147483647, %v13253_v23  ;;  %v6725_v12 = vxor.u32 2147483648, %v6724_v41  ;;  %v7115_v51 = vadd.s32 1, %v13515_v47 }
 0xa48   :  { %v7169_v59 = vor.u32 8388608, %v7168_v6  ;;  %v7173_v14 = vsel %vm7172_vm8, %v7171_v62, 0  ;;  %v14577_v8 = vsub.s32 4, %v13419_v40  ;;  %vm7702_vm14 = vcmp.lt.s32.totalorder %v7701_v22, 0 }
 0xa49   :  { %vm13543_vm7 = vcmp.le.f32.partialorder %v14574_v44, 0.7853982  ;;  %v7112_v36 = vmul.u32 %v13475_v57, %v7096_v38  ;;  %vm7114_vm1 = vc.u32 %v13520_v42, %v13514_v49  ;;  %v6816_v11 = vsel %vm7702_vm14, 0, %v7701_v22 }
 0xa4a   :  { %v13553_v1 = vsel %vm6643_vm4, %v14577_v8, %v13419_v40  ;;  %v7116_v56 = vsel %vm7114_vm1, %v7115_v51, %v13515_v47  ;;  %v7175_v7 = vand.u32 31, %v7173_v14  ;;  %v14580_v6 = vand.u32 2147483647, %v14579_v58 }
 0xa4b   :  { %14578 = vst [vmem:[#allocation29_spill] sm:$0xff] %v13553_v1  ;;  %v13568_v40 = vsel %vm14128_vm0, %v6413_v18, %v13467_v17  ;;  %v6801_v57 = vadd.s32 %v13436_v5, %v13455_v31  ;;  %v7117_v21 = vadd.s32 %v7116_v56, %v7112_v36  ;;  %v6726_v62 = vsel %vm6643_vm4, %v6725_v12, %v6724_v41 }
 0xa4c   :  { %vm13561_vm2 = vcmp.le.f32.partialorder %v14580_v6, 0.7853982  ;;  %v7176_v29 = vsub.s32 32, %v7175_v7  ;;  %v13578_v4 = vshll.u32 %v7169_v59, 8  ;;  %v5792_v17 = vsel %vm5707_vm13, %v5791_v48, %v14573_v28 }
 0xa4d   :  { %v5793_v47 = vsel %vm13561_vm2, %v14579_v58, %v14583_v13  ;;  %v6817_v38 = vsub.s32 32, %v6816_v11  ;;  %v7118_v18 = vadd.s32 536870912, %v7117_v21  ;;  %v7174_v22 = vshrl.u32 %v7173_v14, 5 }
 0xa4e   :  { %v7178_v5 = vshll.u32 %v14348_v2, %v7175_v7  ;;  %v7179_v31 = vshrl.u32 %v14504_v50, %v7176_v29  ;;  %v7181_v44 = vshll.u32 %v14504_v50, %v7175_v7  ;;  %v7182_v51 = vshrl.u32 %v14505_v34, %v7176_v29 }
 0xa4f   :  { %v7185_v41 = vshrl.u32 %v14506_v63, %v7176_v29  ;;  %v6821_v12 = vsub.s32 4294967266, %v6816_v11  ;;  %v13588_v59 = vshrl.u32 %v7118_v18, 30  ;;  %v7184_v8 = vshll.u32 %v14505_v34, %v7175_v7  ;;  %v13592_v48 = vpop.eup %8437 }
 0xa50   :  { %v7188_v28 = vshrl.u32 %v14352_v9, %v7176_v29  ;;  %v7180_v14 = vor.u32 %v7179_v31, %v7178_v5  ;;  %v7183_v36 = vor.u32 %v7182_v51, %v7181_v44  ;;  %v7187_v56 = vshll.u32 %v14506_v63, %v7175_v7 }
 0xa51   :  { %8439 = vcosq.f32 %v5793_v47  ;;  %v13598_v50 = vsel %vm13543_vm7, %v13253_v23, %v6726_v62  ;;  %v7120_v6 = vshll.u32 %v13588_v59, 30  ;;  %v7186_v13 = vor.u32 %v7185_v41, %v7184_v8 }
 0xa52   :  { %v5794_v34 = vsel %vm13561_vm2, 0, %v5792_v17  ;;  %v6818_v18 = vshll.u32 %v13499_v43, %v6816_v11  ;;  %v7189_v1 = vor.u32 %v7188_v28, %v7187_v56  ;;  %v7190_v5 = vshll.u32 %v14352_v9, %v7175_v7 }
 0xa53   :  { %v7191_v31 = vshrl.u32 %v14353_v20, %v7176_v29  ;;  %v6819_v63 = vshrl.u32 %v6801_v57, %v6817_v38  ;;  %v6822_v44 = vadd.s32 127, %v6821_v12  ;;  %v13606_v51 = vsub.s32 %v7117_v21, %v7120_v6 }
 0xa54   :  { %vm7193_vm13 = vcmp.lt.s32.totalorder %v7174_v22, 1  ;;  %v7177_v62 = vshrl.u32 %v14348_v2, %v7176_v29  ;;  %vm7196_vm4 = vcmp.lt.s32.totalorder %v7174_v22, 4  ;;  %vm7195_vm8 = vcmp.lt.s32.totalorder %v7174_v22, 3 }
 0xa55   :  { %v7192_v23 = vor.u32 %v7191_v31, %v7190_v5  ;;  %v7201_v41 = vsel %vm7193_vm13, %v7180_v14, %v7183_v36  ;;  %v7123_v35 = vsub.s32 0, %v13606_v51  ;;  %v7198_v17 = vsel %vm7196_vm4, %v7186_v13, 2102212464 }
 0xa56   :  { %v7202_v43 = vsel %vm7196_vm4, %v7189_v1, 920167782  ;;  %vm7194_vm14 = vcmp.lt.s32.totalorder %v7174_v22, 2  ;;  %v7205_v9 = vsel %vm7193_vm13, %v7183_v36, %v7186_v13  ;;  %v6823_v20 = vshll.u32 %v6822_v44, 23 }
 0xa57   :  { %v7203_v11 = vsel %vm7195_vm8, %v7186_v13, %v7202_v43  ;;  %v7206_v7 = vsel %vm7196_vm4, %v7192_v23, 1326507024  ;;  %v7712_v57 = vmin.u32 %v7123_v35, %v13606_v51  ;;  %v7197_v21 = vsel %vm7193_vm13, %v7177_v62, %v7180_v14 }
 0xa58   :  { %v7204_v38 = vsel %vm7194_vm14, %v7201_v41, %v7203_v11  ;;  %v7199_v12 = vsel %vm7195_vm8, %v7183_v36, %v7198_v17  ;;  %v7207_v2 = vsel %vm7195_vm8, %v7189_v1, %v7206_v7  ;;  %v13617_v28 = vor.u32 %v6819_v63, %v6818_v18  ;;  %v14587_v63 = vld [vmem:[#allocation20_spill] sm:$0xff]  ;;  %v14593_v7 = vld [vmem:[#allocation38_spill] sm:$0xff] }
 0xa59   :  { %v13613_v29 = vmul.u32.u64.low %v13578_v4, %v7204_v38  ;;  %v13614_v8 = vmul.u32.u64.high %v13578_v4, %v7204_v38, %v13613_v29  ;;  %v7125_v56 = vclz %v7712_v57  ;;  %v7208_v6 = vsel %vm7194_vm14, %v7205_v9, %v7207_v2 }
 0xa5a   :  { %8441 = vsinq.f32 %v5793_v47  ;;  %v13622_v14 = vmul.u32.u64.low %v13578_v4, %v7208_v6  ;;  %v13623_v13 = vmul.u32.u64.high %v13578_v4, %v7208_v6, %v13622_v14  ;;  %v5798_v36 = vadd.s32 3, %v5794_v34 }
 0xa5b   :  { %v8440_v23 = vpop.eup %8439  ;;  %8443 = vcosq.f32 %v13598_v50  ;;  %v7713_v1 = vadd.s32 4294967294, %v7125_v56  ;;  %v7200_v5 = vsel %vm7194_vm14, %v7197_v21, %v7199_v12  ;;  %v14584_v31 = vand.u32 2147483647, %v12451_v32 }
 0xa5c   :  { %v6207_v44 = vsub.s32 4, %v14587_v63  ;;  %v13633_v47 = vor.u32 4788187, %v6823_v20  ;;  %v7113_v62 = vadd.s32 %v13514_v49, %v13520_v42  ;;  %v7219_v41 = vadd.s32 1, %v13614_v8 }
 0xa5d   :  { %vm13628_vm1 = vcmp.le.f32.partialorder %v14584_v31, 0.7853982  ;;  %v6827_v34 = vcvt.s32.f32 %v13617_v28  ;;  %vm7714_vm2 = vcmp.lt.s32.totalorder %v7713_v1, 0  ;;  %v7216_v43 = vmul.u32 %v13578_v4, %v7200_v5  ;;  %v14590_v31 = vld [vmem:[#allocation42_spill] sm:$0xff] }
 0xa5e   :  { %v6209_v22 = vsel %vm13628_vm1, %v12451_v32, %v13074_v24  ;;  %v6208_v35 = vsel %vm6123_vm10, %v6207_v44, %v14587_v63  ;;  %v7128_v17 = vsel %vm7714_vm2, 0, %v7713_v1  ;;  %vm7218_vm13 = vc.u32 %v13623_v13, %v13613_v29  ;;  %v14588_v24 = vld [vmem:[#allocation51_spill] sm:$0xff] }
 0xa5f   :  { %8445 = vcosq.f32 %v6209_v22  ;;  %v5799_v49 = vand.u32 3, %v5798_v36  ;;  %v7129_v42 = vsub.s32 32, %v7128_v17  ;;  %v7133_v11 = vsub.s32 4294967266, %v7128_v17 }
 0xa60   :  { %v7220_v9 = vsel %vm7218_vm13, %v7219_v41, %v13614_v8  ;;  %v5690_v20 = vsel %vm12685_vm9, 0, %v14588_v24  ;;  %v7130_v57 = vshll.u32 %v13606_v51, %v7128_v17  ;;  %v5805_v38 = vxor.u32 2147483648, %v8440_v23 }
 0xa61   :  { %v7221_v21 = vadd.s32 %v7220_v9, %v7216_v43  ;;  %v6210_v12 = vsel %vm13628_vm1, 0, %v6208_v35  ;;  %v7131_v4 = vshrl.u32 %v7113_v62, %v7129_v42  ;;  %v7134_v2 = vadd.s32 127, %v7133_v11  ;;  %v14592_v43 = vld [vmem:[#allocation52_spill] sm:$0xff] }
 0xa62   :  { %8447 = vsinq.f32 %v6209_v22  ;;  %v6214_v56 = vadd.s32 3, %v6210_v12  ;;  %v6825_v6 = vand.u32 2147483647, %v13633_v47  ;;  %vm5797_vm10 = vweird.f32 %v14579_v58  ;;  %v14591_v22 = vld [vmem:[#allocation49_spill] sm:$0xff] }
 0xa63   :  { %v7222_v14 = vadd.s32 536870912, %v7221_v21  ;;  %vm5804_vm4 = vcmp.eq.s32.totalorder %v5799_v49, 2  ;;  %v5694_v8 = vadd.s32 3, %v5690_v20  ;;  %v7132_v1 = vor.u32 %v7131_v4, %v7130_v57  ;;  %v14598_v20 = vld [vmem:[#allocation47_spill] sm:$0xff] }
 0xa64   :  { %v8442_v36 = vpop.eup %8441  ;;  %v7135_v5 = vshll.u32 %v7134_v2, 23  ;;  %v6215_v51 = vand.u32 3, %v6214_v56  ;;  %v5698_v63 = vxor.u32 2147483648, %v14590_v31  ;;  %vm5693_vm9 = vweird.f32 %v14591_v22 }
 0xa65   :  { %v13659_v44 = vpop.eup %8443  ;;  %v13661_v18 = vshrl.u32 %v7222_v14, 30  ;;  %v5802_v62 = vxor.u32 2147483648, %v8442_v36  ;;  %v5806_v41 = vsel %vm5804_vm4, %v5805_v38, %v8442_v36  ;;  %v5695_v35 = vand.u32 3, %v5694_v8 }
 0xa66   :  { %v7136_v17 = vor.u32 4788187, %v7135_v5  ;;  %vm5800_vm8 = vcmp.lt.s32.totalorder %v5799_v49, 2  ;;  %vm5801_vm14 = vcmp.eq.s32.totalorder %v5799_v49, 0  ;;  %v5701_v42 = vxor.u32 2147483648, %v14592_v43  ;;  %v14595_v5 = vld [vmem:[#allocation4_spill] sm:$0xff] }
 0xa67   :  { %v7139_v11 = vcvt.s32.f32 %v7132_v1  ;;  %v7224_v9 = vshll.u32 %v13661_v18, 30  ;;  %v5803_v24 = vsel %vm5801_vm14, %v8440_v23, %v5802_v62  ;;  %v6106_v57 = vsel %vm12759_vm6, 0, %v14593_v7 }
 0xa68   :  { %v7137_v4 = vand.u32 2147483647, %v7136_v17  ;;  %v5807_v2 = vsel %vm5800_vm8, %v5803_v24, %v5806_v41  ;;  %vm6213_vm1 = vweird.f32 %v12451_v32  ;;  %vm6216_vm2 = vcmp.lt.s32.totalorder %v6215_v51, 2 }
 0xa69   :  { %v8446_v12 = vpop.eup %8445  ;;  %vm5697_vm13 = vcmp.eq.s32.totalorder %v5695_v35, 0  ;;  %v13670_v38 = vsub.s32 %v7221_v21, %v7224_v9  ;;  %vm5700_vm4 = vcmp.eq.s32.totalorder %v5695_v35, 2  ;;  %vm5696_vm0 = vcmp.lt.s32.totalorder %v5695_v35, 2  ;;  %v14596_v9 = vld [vmem:[#allocation28_spill] sm:$0xff] }
 0xa6a   :  { %v6221_v49 = vxor.u32 2147483648, %v8446_v12  ;;  %v5699_v56 = vsel %vm5697_vm13, %v14592_v43, %v5698_v63  ;;  %v7140_v14 = vmul.f32 %v7139_v11, %v7137_v4  ;;  %v5702_v23 = vsel %vm5700_vm4, %v5701_v42, %v14590_v31  ;;  %v14597_v42 = vld [vmem:[#allocation6_spill] sm:$0xff] }
 0xa6b   :  { %v6110_v8 = vadd.s32 3, %v6106_v57  ;;  %v7227_v36 = vsub.s32 0, %v13670_v38  ;;  %vm6217_vm6 = vcmp.eq.s32.totalorder %v6215_v51, 0  ;;  %v5703_v1 = vsel %vm5696_vm0, %v5699_v56, %v5702_v23 }
 0xa6c   :  { %v6114_v62 = vxor.u32 2147483648, %v14595_v5  ;;  %v8448_v41 = vpop.eup %8447  ;;  %v5808_v21 = vsel %vm5797_vm10, nan, %v5807_v2  ;;  %vm6220_vm8 = vcmp.eq.s32.totalorder %v6215_v51, 2  ;;  %v6117_v63 = vxor.u32 2147483648, %v14596_v9 }
 0xa6d   :  { %v6111_v17 = vand.u32 3, %v6110_v8  ;;  %vm14129_vm14 = vcmp.lt.s32.totalorder %v13364_v16, 0  ;;  %v7716_v35 = vmin.u32 %v7227_v36, %v13670_v38  ;;  %v6218_v31 = vxor.u32 2147483648, %v8448_v41 }
 0xa6e   :  { %v6222_v43 = vsel %vm6220_vm8, %v6221_v49, %v8448_v41  ;;  %v6623_v11 = vsub.s32 4, %v14597_v42  ;;  %v7141_v24 = vxor.u32 2147483648, %v7140_v14  ;;  %v5704_v7 = vsel %vm5693_vm9, nan, %v5703_v1 }
 0xa6f   :  { %vm6109_vm0 = vweird.f32 %v14598_v20  ;;  %vm6113_vm13 = vcmp.eq.s32.totalorder %v6111_v17, 0  ;;  %v7229_v58 = vclz %v7716_v35  ;;  %v6219_v57 = vsel %vm6217_vm6, %v8446_v12, %v6218_v31 }
 0xa70   :  { %v6115_v4 = vsel %vm6113_vm13, %v14596_v9, %v6114_v62  ;;  %vm6116_vm10 = vcmp.eq.s32.totalorder %v6111_v17, 2  ;;  %v6223_v2 = vsel %vm6216_vm2, %v6219_v57, %v6222_v43  ;;  %vm6112_vm4 = vcmp.lt.s32.totalorder %v6111_v17, 2 }
 0xa71   :  { %v6118_v49 = vsel %vm6116_vm10, %v6117_v63, %v14595_v5  ;;  %vm14599_vm8 = vcmp.lt.s32.totalorder %v12648_v19, 0  ;;  %v14600_v22 = vand.u32 2147483647, %v13364_v16  ;;  %v7717_v8 = vadd.s32 4294967294, %v7229_v58 }
 0xa72   :  { %v6624_v56 = vsel %vm14599_vm8, %v6623_v11, %v14597_v42  ;;  %v6224_v12 = vsel %vm6213_vm1, nan, %v6223_v2  ;;  %v6119_v36 = vsel %vm6112_vm4, %v6115_v4, %v6118_v49  ;;  %v14603_v51 = vand.u32 2147483647, %v12648_v19 }
 0xa73   :  { %vm13694_vm9 = vcmp.le.f32.partialorder %v14600_v22, 0.7853982  ;;  %v8033_v1 = vpack.c.bf16 %v6224_v12, %v5808_v21  ;;  %v6120_v5 = vsel %vm6109_vm0, nan, %v6119_v36  ;;  %v13710_v17 = vmul.f32 %v6827_v34, %v6825_v6 }
 0xa74   :  { %vm6538_vm2 = vcmp.le.f32.partialorder %v14603_v51, 0.7853982  ;;  %vm7718_vm6 = vcmp.lt.s32.totalorder %v7717_v8, 0  ;;  %v8035_v32 = vpack.c.bf16 %v6120_v5, %v5704_v7  ;;  %v7217_v9 = vadd.s32 %v13613_v29, %v13623_v13  ;;  %v14609_v5 = vld [vmem:[#allocation23_spill] sm:$0xff] }
 0xa75   :  { %v6625_v62 = vsel %vm6538_vm2, %v12648_v19, %v13236_v33  ;;  %v6626_v41 = vsel %vm6538_vm2, 0, %v6624_v56  ;;  %v7232_v21 = vsel %vm7718_vm6, 0, %v7717_v8  ;;  %8034 = vmatprep.subr.bf16.mxu0 %v8033_v1  ;;  %v14604_v33 = vand.u32 2147483647, %v12767_v10  ;;  %v14608_v1 = vld [vmem:[#allocation2_spill] sm:$0xff] }
 0xa76   :  { %8449 = vcosq.f32 %v6625_v62  ;;  %v6630_v63 = vadd.s32 3, %v6626_v41  ;;  %v7233_v35 = vsub.s32 32, %v7232_v21  ;;  %v7237_v31 = vsub.s32 4294967266, %v7232_v21  ;;  %8036 = vmatpush1.bf16.msra.mxu0 %v8035_v32 }
 0xa77   :  { %8451 = vsinq.f32 %v6625_v62  ;;  %vm13716_vm1 = vcmp.le.f32.partialorder %v14604_v33, 0.7853982  ;;  %v7039_v28 = vsub.s32 4, %v12986_v39  ;;  %v7142_v34 = vsel %vm14129_vm14, %v7141_v24, %v7140_v14 }
 0xa78   :  { %v7234_v29 = vshll.u32 %v13670_v38, %v7232_v21  ;;  %v7041_v13 = vsel %vm13716_vm1, %v12767_v10, %v13313_v37  ;;  %v6522_v6 = vsel %vm12982_vm15, 0, %v13060_v26  ;;  %v7235_v43 = vshrl.u32 %v7217_v9, %v7233_v35  ;;  %v14610_v9 = vld [vmem:[#allocation19_spill] sm:$0xff] }
 0xa79   :  { %v7238_v42 = vadd.s32 127, %v7237_v31  ;;  %vm14607_vm0 = vcmp.lt.s32.totalorder %v12767_v10, 0  ;;  %8453 = vcosq.f32 %v7041_v13  ;;  %v7143_v38 = vsub.s32 4, %v13588_v59 }
 0xa7a   :  { %v7040_v11 = vsel %vm14607_vm0, %v7039_v28, %v12986_v39  ;;  %8455 = vsinq.f32 %v13598_v50  ;;  %v6631_v14 = vand.u32 3, %v6630_v63  ;;  %v7236_v37 = vor.u32 %v7235_v43, %v7234_v29  ;;  %v14611_v63 = vld [vmem:[#allocation24_spill] sm:$0xff] }
 0xa7b   :  { %v7042_v24 = vsel %vm13716_vm1, 0, %v7040_v11  ;;  %v7239_v7 = vshll.u32 %v7238_v42, 23  ;;  %8457 = vsinq.f32 %v7041_v13  ;;  %v6829_v26 = vxor.u32 2147483648, %v13710_v17  ;;  %v14612_v13 = vld [vmem:[#allocation17_spill] sm:$0xff] }
 0xa7c   :  { %v7046_v27 = vadd.s32 3, %v7042_v24  ;;  %v13742_v20 = vsel %vm13694_vm9, %v13364_v16, %v7142_v34  ;;  %v6526_v39 = vadd.s32 3, %v6522_v6  ;;  %v6530_v50 = vxor.u32 2147483648, %v13121_v45 }
 0xa7d   :  { %v7240_v58 = vor.u32 4788187, %v7239_v7  ;;  %v6533_v4 = vxor.u32 2147483648, %v13110_v55  ;;  %v6938_v2 = vsel %vm13040_vm5, 0, %v13202_v60  ;;  %vm6629_vm15 = vweird.f32 %v12648_v19 }
 0xa7e   :  { %v7047_v57 = vand.u32 3, %v7046_v27  ;;  %vm6632_vm13 = vcmp.lt.s32.totalorder %v6631_v14, 2  ;;  %v6527_v49 = vand.u32 3, %v6526_v39  ;;  %v6942_v56 = vadd.s32 3, %v6938_v2 }
 0xa7f   :  { %v7241_v8 = vand.u32 2147483647, %v7240_v58  ;;  %v7243_v12 = vcvt.s32.f32 %v7236_v37  ;;  %vm6633_vm10 = vcmp.eq.s32.totalorder %v6631_v14, 0  ;;  %vm6636_vm4 = vcmp.eq.s32.totalorder %v6631_v14, 2  ;;  %v14616_v37 = vld [vmem:[#allocation26_spill] sm:$0xff] }
 0xa80   :  { %v8450_v22 = vpop.eup %8449  ;;  %vm6529_vm8 = vcmp.eq.s32.totalorder %v6527_v49, 0  ;;  %vm6532_vm2 = vcmp.eq.s32.totalorder %v6527_v49, 2  ;;  %v6946_v62 = vxor.u32 2147483648, %v14609_v5  ;;  %vm7048_vm1 = vcmp.lt.s32.totalorder %v7047_v57, 2 }
 0xa81   :  { %v8452_v36 = vpop.eup %8451  ;;  %v6637_v51 = vxor.u32 2147483648, %v8450_v22  ;;  %v6531_v60 = vsel %vm6529_vm8, %v13110_v55, %v6530_v50  ;;  %v6534_v41 = vsel %vm6532_vm2, %v6533_v4, %v13121_v45  ;;  %vm7049_vm0 = vcmp.eq.s32.totalorder %v7047_v57, 0 }
 0xa82   :  { %v6634_v46 = vxor.u32 2147483648, %v8452_v36  ;;  %v6943_v21 = vand.u32 3, %v6942_v56  ;;  %v6949_v35 = vxor.u32 2147483648, %v14611_v63  ;;  %v7244_v33 = vmul.f32 %v7243_v12, %v7241_v8 }
 0xa83   :  { %v6638_v32 = vsel %vm6636_vm4, %v6637_v51, %v8452_v36  ;;  %v8454_v31 = vpop.eup %8453  ;;  %vm7052_vm6 = vcmp.eq.s32.totalorder %v7047_v57, 2  ;;  %vm6528_vm3 = vcmp.lt.s32.totalorder %v6527_v49, 2  ;;  %vm6747_vm4 = vcmp.lt.s32.totalorder %v14612_v13, 0  ;;  %v14623_v36 = vld [vmem:[#allocation34_spill] sm:$0xff] }
 0xa84   :  { %v6635_v47 = vsel %vm6633_vm10, %v8450_v22, %v6634_v46  ;;  %v13758_v28 = vpop.eup %8455  ;;  %v7053_v55 = vxor.u32 2147483648, %v8454_v31  ;;  %v6535_v29 = vsel %vm6528_vm3, %v6531_v60, %v6534_v41  ;;  %vm6945_vm8 = vcmp.eq.s32.totalorder %v6943_v21, 0 }
 0xa85   :  { %v6639_v34 = vsel %vm6632_vm13, %v6635_v47, %v6638_v32  ;;  %v8458_v45 = vpop.eup %8457  ;;  %vm6944_vm2 = vcmp.lt.s32.totalorder %v6943_v21, 2  ;;  %v6947_v6 = vsel %vm6945_vm8, %v14611_v63, %v6946_v62  ;;  %vm6948_vm14 = vcmp.eq.s32.totalorder %v6943_v21, 2  ;;  %v14625_v62 = vld [vmem:[#allocation32_spill] sm:$0xff] }
 0xa86   :  { %v14613_v43 = vand.u32 2147483647, %v12978_v30  ;;  %vm14131_vm10 = vcmp.lt.s32.totalorder %v13426_v52, 0  ;;  %v7050_v11 = vxor.u32 2147483648, %v8458_v45  ;;  %v7054_v14 = vsel %vm7052_vm6, %v7053_v55, %v8458_v45  ;;  %v14630_v55 = vld [vmem:[#allocation15_spill] sm:$0xff] }
 0xa87   :  { %v6950_v24 = vsel %vm6948_vm14, %v6949_v35, %v14609_v5  ;;  %v5999_v7 = vsub.s32 4, %v14616_v37  ;;  %v7245_v27 = vxor.u32 2147483648, %v7244_v33  ;;  %v6640_v39 = vsel %vm6629_vm15, nan, %v6639_v34 }
 0xa88   :  { %vm13765_vm5 = vcmp.le.f32.partialorder %v14613_v43, 0.7853982  ;;  %v6951_v50 = vsel %vm6944_vm2, %v6947_v6, %v6950_v24  ;;  %v7051_v4 = vsel %vm7049_vm0, %v8454_v31, %v7050_v11  ;;  %vm14617_vm3 = vcmp.lt.s32.totalorder %v12978_v30, 0  ;;  %v14629_v31 = vld [vmem:[#allocation30_spill] sm:$0xff] }
 0xa89   :  { %v6001_v58 = vsel %vm13765_vm5, %v12978_v30, %v13527_v54  ;;  %v6000_v2 = vsel %vm14617_vm3, %v5999_v7, %v14616_v37  ;;  %v14618_v49 = vand.u32 2147483647, %v13069_v0  ;;  %v7055_v19 = vsel %vm7048_vm1, %v7051_v4, %v7054_v14  ;;  %v14633_v43 = vld [vmem:[#allocation14_spill] sm:$0xff] }
 0xa8a   :  { %8459 = vcosq.f32 %v6001_v58  ;;  %vm14621_vm15 = vweird.f32 %v14608_v1  ;;  %v6002_v54 = vsel %vm13765_vm5, 0, %v6000_v2  ;;  %vm14622_vm13 = vweird.f32 %v12767_v10 }
 0xa8b   :  { %vm13784_vm14 = vcmp.le.f32.partialorder %v14618_v49, 0.7853982  ;;  %v6952_v22 = vsel %vm14621_vm15, nan, %v6951_v50  ;;  %8461 = vsinq.f32 %v6001_v58  ;;  %v7056_v8 = vsel %vm14622_vm13, nan, %v7055_v19 }
 0xa8c   :  { %v6006_v12 = vadd.s32 3, %v6002_v54  ;;  %v6415_v51 = vsub.s32 4, %v14623_v36  ;;  %v6417_v5 = vsel %vm13784_vm14, %v13069_v0, %v13568_v40  ;;  %v8037_v57 = vpack.c.bf16 %v7056_v8, %v6640_v39 }
 0xa8d   :  { %vm14624_vm6 = vweird.f32 %v14610_v9  ;;  %8463 = vcosq.f32 %v6417_v5  ;;  %v5898_v60 = vsel %vm13218_vm12, 0, %v14625_v62  ;;  %vm14627_vm5 = vcmp.lt.s32.totalorder %v13069_v0, 0 }
 0xa8e   :  { %v6536_v1 = vsel %vm14624_vm6, nan, %v6535_v29  ;;  %v6007_v10 = vand.u32 3, %v6006_v12  ;;  %v6416_v32 = vsel %vm14627_vm5, %v6415_v51, %v14623_v36  ;;  %8465 = vsinq.f32 %v6417_v5  ;;  %8038 = vmatprep.subr.bf16.mxu0 %v8037_v57 }
 0xa8f   :  { %v8039_v41 = vpack.c.bf16 %v6952_v22, %v6536_v1  ;;  %vm14628_vm1 = vcmp.lt.s32.totalorder %v13364_v16, 0  ;;  %8467 = vcosq.f32 %v13742_v20  ;;  %v6418_v9 = vsel %vm13784_vm14, 0, %v6416_v32 }
 0xa90   :  { %v13813_v40 = vsel %vm14628_vm1, %v7143_v38, %v13588_v59  ;;  %v5902_v21 = vadd.s32 3, %v5898_v60  ;;  %v6830_v63 = vsel %vm6747_vm4, %v6829_v26, %v13710_v17  ;;  %8469 = vsinq.f32 %v13742_v20  ;;  %v13828_v38 = vld [vmem:[%s13916_s7] sm:$0xf] }
 0xa91   :  { %8040 = vmatpush1.bf16.msra.mxu0 %v8039_v41  ;;  %v6422_v35 = vadd.s32 3, %v6418_v9  ;;  %v5906_v59 = vxor.u32 2147483648, %v14629_v31  ;;  %v7246_v47 = vsel %vm14131_vm10, %v7245_v27, %v7244_v33  ;;  %v5909_v29 = vxor.u32 2147483648, %v14630_v55 }
 0xa92   :  { %v5903_v34 = vand.u32 3, %v5902_v21  ;;  %v6314_v17 = vsel %vm13412_vm11, 0, %v13534_v53  ;;  %vm6008_vm12 = vcmp.lt.s32.totalorder %v6007_v10, 2  ;;  %vm6009_vm0 = vcmp.eq.s32.totalorder %v6007_v10, 0 }
 0xa93   :  { %v6423_v26 = vand.u32 3, %v6422_v35  ;;  %v6318_v20 = vadd.s32 3, %v6314_v17  ;;  %vm6012_vm8 = vcmp.eq.s32.totalorder %v6007_v10, 2  ;;  %v6322_v45 = vxor.u32 2147483648, %v13592_v48  ;;  %v14639_v35 = vld [vmem:[#allocation29_spill] sm:$0xff] }
 0xa94   :  { %vm5905_vm2 = vcmp.eq.s32.totalorder %v5903_v34, 0  ;;  %v6831_v6 = vsub.s32 4, %v13486_v25  ;;  %vm14631_vm3 = vcmask 261120   ;;  %v8460_v33 = vpop.eup %8459  ;;  %vm6005_vm14 = vweird.f32 %v12978_v30 }
 0xa95   :  { %7719 = vmatmul.mubr.msk.f32.vlgmr.msra.gmra.mrb[40].mxu0 %vm14631_vm3, %v13828_v38  ;;  %vm6421_vm15 = vweird.f32 %v13069_v0  ;;  %vm5901_vm11 = vweird.f32 %v14632_v61  ;;  %v5907_v53 = vsel %vm5905_vm2, %v14630_v55, %v5906_v59  ;;  %vm5908_vm13 = vcmp.eq.s32.totalorder %v5903_v34, 2  ;;  %v8462_v24 = vpop.eup %8461 }
 0xa96   :  { %v6325_v42 = vxor.u32 2147483648, %v14633_v43  ;;  %v14634_v11 = vand.u32 2147483647, %v14612_v13  ;;  %v6013_v37 = vxor.u32 2147483648, %v8460_v33  ;;  %vm5904_vm5 = vcmp.lt.s32.totalorder %v5903_v34, 2 }
 0xa97   :  { %v5910_v7 = vsel %vm5908_vm13, %v5909_v29, %v14629_v31  ;;  %v6319_v27 = vand.u32 3, %v6318_v20  ;;  %v6010_v39 = vxor.u32 2147483648, %v8462_v24  ;;  %vm6425_vm1 = vcmp.eq.s32.totalorder %v6423_v26, 0  ;;  %v8464_v58 = vpop.eup %8463 }
 0xa98   :  { %vm13847_vm6 = vcmp.le.f32.partialorder %v14634_v11, 0.7853982  ;;  %vm6428_vm3 = vcmp.eq.s32.totalorder %v6423_v26, 2  ;;  %v6014_v4 = vsel %vm6012_vm8, %v6013_v37, %v8462_v24  ;;  %v5911_v2 = vsel %vm5904_vm5, %v5907_v53, %v5910_v7  ;;  %v8466_v56 = vpop.eup %8465 }
 0xa99   :  { %v6833_v50 = vsel %vm13847_vm6, %v14612_v13, %v6830_v63  ;;  %vm6321_vm2 = vcmp.eq.s32.totalorder %v6319_v27, 0  ;;  %v6832_v49 = vsel %vm6747_vm4, %v6831_v6, %v13486_v25  ;;  %v6011_v19 = vsel %vm6009_vm0, %v8460_v33, %v6010_v39  ;;  %v13861_v8 = vpop.eup %8467 }
 0xa9a   :  { %v6429_v22 = vxor.u32 2147483648, %v8464_v58  ;;  %v6323_v54 = vsel %vm6321_vm2, %v14633_v43, %v6322_v45  ;;  %vm6324_vm13 = vcmp.eq.s32.totalorder %v6319_v27, 2  ;;  %v6426_v12 = vxor.u32 2147483648, %v8466_v56  ;;  %v8470_v51 = vpop.eup %8469 }
 0xa9b   :  { %vm6320_vm10 = vcmp.lt.s32.totalorder %v6319_v27, 2  ;;  %v6326_v36 = vsel %vm6324_vm13, %v6325_v42, %v13592_v48  ;;  %8471 = vcosq.f32 %v6833_v50  ;;  %v6015_v5 = vsel %vm6008_vm12, %v6011_v19, %v6014_v4 }
 0xa9c   :  { %v6430_v57 = vsel %vm6428_vm3, %v6429_v22, %v8466_v56  ;;  %v6327_v25 = vsel %vm6320_vm10, %v6323_v54, %v6326_v36  ;;  %8473 = vsinq.f32 %v6833_v50  ;;  %vm6424_vm4 = vcmp.lt.s32.totalorder %v6423_v26, 2  ;;  %v14640_v54 = vld [vmem:[#allocation39_spill] sm:$0xff] }
 0xa9d   :  { %v6427_v1 = vsel %vm6425_vm1, %v8464_v58, %v6426_v12  ;;  %vm6317_vm0 = vweird.f32 %v13033_v15  ;;  %v6834_v62 = vsel %vm13847_vm6, 0, %v6832_v49  ;;  %v14637_v48 = vand.u32 2147483647, %v13426_v52 }
 0xa9e   :  { %v6431_v46 = vsel %vm6424_vm4, %v6427_v1, %v6430_v57  ;;  %v6328_v60 = vsel %vm6317_vm0, nan, %v6327_v25  ;;  %v7247_v41 = vsub.s32 4, %v13661_v18  ;;  %v6016_v10 = vsel %vm6005_vm14, nan, %v6015_v5 }
 0xa9f   :  { %vm7162_vm8 = vcmp.le.f32.partialorder %v14637_v48, 0.7853982  ;;  %v6432_v32 = vsel %vm6421_vm15, nan, %v6431_v46  ;;  %v5912_v9 = vsel %vm5901_vm11, nan, %v5911_v2  ;;  %vm14638_vm10 = vcmp.lt.s32.totalorder %v13426_v52, 0 }
 0xaa0   :  { %v7249_v15 = vsel %vm7162_vm8, %v13426_v52, %v7246_v47  ;;  %v8041_v21 = vpack.c.bf16 %v6432_v32, %v6016_v10  ;;  %v7248_v63 = vsel %vm14638_vm10, %v7247_v41, %v13661_v18  ;;  %v6730_v31 = vsel %vm13543_vm7, 0, %v14639_v35 }
 0xaa1   :  { %8475 = vcosq.f32 %v7249_v15  ;;  %v8043_v30 = vpack.c.bf16 %v6328_v60, %v5912_v9  ;;  %v6838_v59 = vadd.s32 3, %v6834_v62  ;;  %v7250_v34 = vsel %vm7162_vm8, 0, %v7248_v63 }
 0xaa2   :  { %8042 = vmatprep.subr.bf16.mxu1 %v8041_v21  ;;  %8477 = vsinq.f32 %v7249_v15  ;;  %v7254_v0 = vadd.s32 3, %v7250_v34  ;;  %v6734_v55 = vadd.s32 3, %v6730_v31  ;;  %v7146_v47 = vsel %vm13694_vm9, 0, %v13813_v40 }
 0xaa3   :  { %8044 = vmatpush1.bf16.msra.mxu1 %v8043_v30  ;;  %v7150_v29 = vadd.s32 3, %v7146_v47  ;;  %v6839_v18 = vand.u32 3, %v6838_v59  ;;  %v7154_v33 = vxor.u32 2147483648, %v8470_v51  ;;  %v6738_v61 = vxor.u32 2147483648, %v13758_v28 }
 0xaa4   :  { %v7255_v26 = vand.u32 3, %v7254_v0  ;;  %v6735_v3 = vand.u32 3, %v6734_v55  ;;  %v6741_v53 = vxor.u32 2147483648, %v13659_v44  ;;  %v7157_v42 = vxor.u32 2147483648, %v13861_v8 }
 0xaa5   :  { %v8472_v17 = vpop.eup %8471  ;;  %v7151_v43 = vand.u32 3, %v7150_v29  ;;  %vm6841_vm7 = vcmp.eq.s32.totalorder %v6839_v18, 0  ;;  %vm6844_vm12 = vcmp.eq.s32.totalorder %v6839_v18, 2  ;;  %vm6840_vm1 = vcmp.lt.s32.totalorder %v6839_v18, 2 }
 0xaa6   :  { %v8474_v20 = vpop.eup %8473  ;;  %v6845_v45 = vxor.u32 2147483648, %v8472_v17  ;;  %vm7260_vm14 = vcmp.eq.s32.totalorder %v7255_v26, 2  ;;  %vm6737_vm9 = vcmp.eq.s32.totalorder %v6735_v3, 0  ;;  %vm6740_vm15 = vcmp.eq.s32.totalorder %v6735_v3, 2 }
 0xaa7   :  { %v6842_v6 = vxor.u32 2147483648, %v8474_v20  ;;  %vm7153_vm11 = vcmp.eq.s32.totalorder %v7151_v43, 0  ;;  %vm7156_vm6 = vcmp.eq.s32.totalorder %v7151_v43, 2  ;;  %v6739_v7 = vsel %vm6737_vm9, %v13659_v44, %v6738_v61 }
 0xaa8   :  { %v6846_v40 = vsel %vm6844_vm12, %v6845_v45, %v8474_v20  ;;  %v7155_v24 = vsel %vm7153_vm11, %v13861_v8, %v7154_v33  ;;  %v6742_v27 = vsel %vm6740_vm15, %v6741_v53, %v13758_v28  ;;  %vm7152_vm5 = vcmp.lt.s32.totalorder %v7151_v43, 2 }
 0xaa9   :  { %v6843_v11 = vsel %vm6841_vm7, %v8472_v17, %v6842_v6  ;;  %v7158_v39 = vsel %vm7156_vm6, %v7157_v42, %v8470_v51  ;;  %vm7257_vm3 = vcmp.eq.s32.totalorder %v7255_v26, 0  ;;  %vm6736_vm2 = vcmp.lt.s32.totalorder %v6735_v3, 2 }
 0xaaa   :  { %v7159_v4 = vsel %vm7152_vm5, %v7155_v24, %v7158_v39  ;;  %v6847_v2 = vsel %vm6840_vm1, %v6843_v11, %v6846_v40  ;;  %vm7256_vm13 = vcmp.lt.s32.totalorder %v7255_v26, 2  ;;  %v6743_v56 = vsel %vm6736_vm2, %v6739_v7, %v6742_v27 }
 0xaab   :  { %v8476_v23 = vpop.eup %8475  ;;  %vm7149_vm4 = vweird.f32 %v13364_v16  ;;  %vm6837_vm0 = vweird.f32 %v14612_v13  ;;  %vm7253_vm8 = vweird.f32 %v13426_v52  ;;  %vm6733_vm10 = vweird.f32 %v14640_v54 }
 0xaac   :  { %v7261_v14 = vxor.u32 2147483648, %v8476_v23  ;;  %v8478_v37 = vpop.eup %8477  ;;  %v7160_v28 = vsel %vm7149_vm4, nan, %v7159_v4  ;;  %v6848_v19 = vsel %vm6837_vm0, nan, %v6847_v2  ;;  %v6744_v12 = vsel %vm6733_vm10, nan, %v6743_v56 }
 0xaad   :  { %v7258_v50 = vxor.u32 2147483648, %v8478_v37  ;;  %v8047_v36 = vpack.c.bf16 %v7160_v28, %v6744_v12  ;;  %vm14641_vm7 = vcmask 261120  }
 0xaae   :  { %v7262_v58 = vsel %vm7260_vm14, %v7261_v14, %v8478_v37  ;;  %v7270_v51 = vpop.permute.xlu0 %7269 }
 0xaaf   :  { %v7259_v49 = vsel %vm7257_vm3, %v8476_v23, %v7258_v50 }
 0xab0   :  { %v7263_v44 = vsel %vm7256_vm13, %v7259_v49, %v7262_v58 }
 0xab1   :  { %v7264_v22 = vsel %vm7253_vm8, nan, %v7263_v44 }
 0xab2   :  { %v8045_v8 = vpack.c.bf16 %v7264_v22, %v6848_v19 }
 0xab4   :  { %8046 = vmatprep.subr.bf16.mxu1 %v8045_v8 }
 0xab5   :  { %8048 = vmatpush1.bf16.msra.mxu1 %v8047_v36 }
 0xab8   :  { %7720 = vmatmul.mubr.msk.f32.vlgmr.msra.gmra.mrb[40].mxu1 %vm14641_vm7, %v13828_v38 }
 0xb68   :  { %v7341_v16 = vpop.f32.mrb[40].mxu0 }
 0xb69   :  { %v7343_v5 = vpop.f32.mrb[41].mxu0  ;;  %v7342_v13 = vadd.f32 %v7341_v16, %v7270_v51 }
 0xb6a   :  { %v7344_v57 = vadd.f32 %v7343_v5, %v7270_v51 }
 0xb6c   :  { %v7421_v52 = vcombine.low %v7342_v13, %v7344_v57 }
 0xb6e   :  { %7425 = vst [vmem:[%s13917_s9] sm:$0xff] %v7421_v52 }
 0xb8b   :  { %v7412_v25 = vpop.f32.mrb[40].mxu1 }
 0xb8c   :  { %v7414_v1 = vpop.f32.mrb[41].mxu1  ;;  %v7413_v62 = vadd.f32 %v7412_v25, %v7270_v51 }
 0xb8d   :  { %v7415_v46 = vadd.f32 %v7414_v1, %v7270_v51 }
 0xb8f   :  { %v7422_v60 = vcombine.low %v7413_v62, %v7415_v46 }
 0xb91   :  { %7426 = vst [vmem:[%s13917_s9 + $0x8] sm:$0xff] %v7422_v60 }

</bundles_post_ra>
